<compile_context>
chip_gen: v5e
topology: v5e:2x2
jax: 0.10.0
libtpu: 0.0.40
codegen_flags: <defaults>
</compile_context>

<pallas_src>
import functools

import jax
import jax.numpy as jnp
from jax.experimental import pallas as pl
from jax.experimental.pallas import tpu as pltpu

BN_EPS = 1e-5


# ---------------------------------------------------------------------------
# Fused Pallas kernel: branches [1x1, dil...] + broadcast of the (precomputed)
# image-pool branch, for one (batch, row-tile) block.
# ---------------------------------------------------------------------------
def _aspp_fused_kernel(pf_ref, xb_ref, w1_ref, w3_ref, scale_ref, bias_ref,
                       o_ref, *, TH, W, Cin, ad, dilations, dmax):
    # pf_ref:    (1, ad)  f32   -- image-pool branch, already conv+BN+ReLU'd
    # xb_ref:    (TH+2*dmax, W+2*dmax, Cin) bf16 -- padded row band (halo)
    # w1_ref:    (Cin, ad) bf16                  -- 1x1 conv weight
    # w3_ref:    (ndil*9, Cin, ad) bf16          -- 3x3 taps, (ky,kx)-major
    # scale_ref: (1+ndil, ad) f32                -- folded BN scale [1x1, dil..]
    # bias_ref:  (1+ndil, ad) f32
    # o_ref:     (TH, W, NB*ad)                  -- lane-dense concat output
    scale = scale_ref[...]
    bias = bias_ref[...]

    def mm(a2d, w2d):
        # bf16 operands, f32 accumulation on the MXU.
        return jnp.dot(a2d, w2d, preferred_element_type=jnp.float32)

    def bn_relu(y, j):
        return jnp.maximum(y * scale[j][None, :] + bias[j][None, :], 0.0)

    # ---- branch 0: image pooling (precomputed) -> broadcast over the tile.
    o_ref[:, :, 0:ad] = jnp.broadcast_to(
        pf_ref[...].reshape(1, 1, ad), (TH, W, ad)).astype(o_ref.dtype)

    # Center full-width band: the ky=1 row offset is dilation-independent, so
    # this single load is shared by the 1x1 branch and every dilation.
    center = xb_ref[dmax:dmax + TH, :, :]                      # (TH, Wp, Cin)
    xc = center[:, dmax:dmax + W, :].reshape(TH * W, Cin)      # center window

    # ---- branch 1: 1x1 conv + BN + ReLU.
    o_ref[:, :, ad:2 * ad] = bn_relu(mm(xc, w1_ref[...]), 0).reshape(
        TH, W, ad).astype(o_ref.dtype)

    # ---- branches 2..: dilated 3x3 convs as 9-tap matmul reductions.
    # Per (dilation, ky): one full-width band load; kx taps are static
    # in-register column slices of it (XLU shifts, not 9 unaligned loads).
    for di, d in enumerate(dilations):
        acc = jnp.zeros((TH * W, ad), jnp.float32)
        for ky in range(3):
            if ky == 1:
                band = center
            else:
                r0 = dmax + (ky - 1) * d
                band = xb_ref[r0:r0 + TH, :, :]                # (TH, Wp, Cin)
            for kx in range(3):
                if ky == 1 and kx == 1:
                    win = xc                                   # exact reuse
                else:
                    off = dmax + (kx - 1) * d
                    win = band[:, off:off + W, :].reshape(TH * W, Cin)
                acc += mm(win, w3_ref[di * 9 + ky * 3 + kx])
        lo = (2 + di) * ad
        o_ref[:, :, lo:lo + ad] = bn_relu(acc, 1 + di).reshape(
            TH, W, ad).astype(o_ref.dtype)


# ---------------------------------------------------------------------------
# Glue: BN folding, VMEM-aware tile picking, parameter init
# ---------------------------------------------------------------------------
def fold_bn(gamma, beta, running_mean, running_var, eps=BN_EPS):
    scale = gamma / jnp.sqrt(running_var + eps)
    bias = beta - running_mean * scale
    return scale, bias


def _vmem_capacity_bytes():
    try:
        info = pltpu.get_tpu_info()
        cap = getattr(info, "vmem_capacity_bytes", None)
        if cap:
            return int(cap)
    except Exception:
        pass
    return 64 * 1024 * 1024  # conservative default (v7x per-TensorCore VMEM)


def _vmem_footprint_bytes(TH, W, Cin, ad, NB, ndil, dmax, out_bytes):
    band = 2 * (TH + 2 * dmax) * (W + 2 * dmax) * Cin * 2  # 2x-buffered bf16 band
    outb = 2 * TH * W * NB * ad * out_bytes                # 2x-buffered out tile
    wts = (1 + 9 * ndil) * Cin * ad * 2                    # single-copy weights
    misc = (2 * (1 + ndil) + 2) * max(ad, 128) * 4 * 2     # scale/bias/pf (tiny)
    return band + outb + wts + misc


def _pick_tile_h(H, W, Cin, ad, NB, ndil, dmax, out_bytes, budget, target=None):
    """Largest row tile <= target whose per-step VMEM footprint fits budget."""
    target = 32 if target is None else int(target)
    th = min(max(target, 8), H) if H >= 8 else max(H, 1)
    while th > 8 and _vmem_footprint_bytes(
            th, W, Cin, ad, NB, ndil, dmax, out_bytes) > budget:
        th -= 8
    return th


def init_aspp_params(key, dim_in, aspp_dim, dilations):
    """Deterministic synthetic parameters matching the PyTorch module shapes."""
    def bn_params(k):
        k1, k2, k3, k4 = jax.random.split(k, 4)
        gamma = 1.0 + 0.1 * jax.random.normal(k1, (aspp_dim,), jnp.float32)
        beta = 0.1 * jax.random.normal(k2, (aspp_dim,), jnp.float32)
        rmean = 0.1 * jax.random.normal(k3, (aspp_dim,), jnp.float32)
        rvar = 1.0 + 0.1 * jax.random.uniform(k4, (aspp_dim,), jnp.float32)
        return gamma, beta, rmean, rvar

    keys = jax.random.split(key, 2 + 2 * (len(dilations) + 2))
    ki = iter(keys)
    params = {}
    params["pool_w"] = 0.1 * jax.random.normal(next(ki), (aspp_dim, dim_in, 1, 1), jnp.float32)
    params["pool_bn"] = bn_params(next(ki))
    params["conv1x1_w"] = 0.1 * jax.random.normal(next(ki), (aspp_dim, dim_in, 1, 1), jnp.float32)
    params["conv1x1_bn"] = bn_params(next(ki))
    for i, _ in enumerate(dilations):
        params[f"dil{i}_w"] = 0.1 * jax.random.normal(
            next(ki), (aspp_dim, dim_in, 3, 3), jnp.float32)
        params[f"dil{i}_bn"] = bn_params(next(ki))
    return params


# ---------------------------------------------------------------------------
# ASPP forward (public API: NCHW in, NCHW out, like the PyTorch module)
# ---------------------------------------------------------------------------
def aspp_forward(x_nchw, params, dilations, *, tile_h=None,
                 out_dtype=jnp.float32, nchw_output=True):
    N, Cin, H, W = x_nchw.shape
    ad = params["conv1x1_w"].shape[0]
    ndil = len(dilations)
    NB = 2 + ndil                       # pool + 1x1 + dilated branches
    dmax = max(dilations)

    # NCHW -> NHWC once (channels lane-dense for the kernel).
    x = jnp.transpose(x_nchw, (0, 2, 3, 1)).astype(jnp.float32)

    # ---- image-pool branch hoisted out of the per-tile kernel ---------------
    # (the M=1 matmul was re-run identically for every row tile).  Pool + 1x1
    # conv + folded BN + ReLU in f32; bilinear upsample of a 1x1 map is a
    # broadcast, done by the kernel's branch-0 store.
    s0, b0 = fold_bn(*params["pool_bn"])
    w_pool = params["pool_w"].reshape(ad, Cin).T               # (Cin, ad) f32
    pooled = jnp.mean(x, axis=(1, 2))                          # (N, Cin) f32
    pf = jnp.maximum(pooled @ w_pool * s0[None, :] + b0[None, :], 0.0)
    pf = pf.reshape(N, 1, ad).astype(jnp.float32)

    # ---- VMEM-budget-aware row tiling; cdiv grid + pad (no divisor fallback)
    out_bytes = jnp.dtype(out_dtype).itemsize
    cap = _vmem_capacity_bytes()
    TH = _pick_tile_h(H, W, Cin, ad, NB, ndil, dmax, out_bytes,
                      budget=int(0.75 * cap), target=tile_h)
    n_rt = pl.cdiv(H, TH)
    Hpad = n_rt * TH
    BAND = TH + 2 * dmax
    Wp = W + 2 * dmax

    # Pad once (height also padded up to the tile multiple), then gather
    # overlapping row bands so a plain Blocked BlockSpec can pipeline them:
    # band r holds padded rows [r*TH, r*TH + BAND).
    x_pad = jnp.pad(x.astype(jnp.bfloat16),
                    ((0, 0), (dmax, dmax + Hpad - H), (dmax, dmax), (0, 0)))
    row_idx = jnp.arange(n_rt)[:, None] * TH + jnp.arange(BAND)[None, :]
    x_bands = x_pad[:, row_idx]                     # (N, n_rt, BAND, Wp, Cin)

    # Fold the remaining BatchNorms -> lane-dense (1+ndil, ad) scale/bias.
    folded = [fold_bn(*params["conv1x1_bn"])]
    folded += [fold_bn(*params[f"dil{i}_bn"]) for i in range(ndil)]
    scale_all = jnp.stack([f[0] for f in folded]).astype(jnp.float32)
    bias_all = jnp.stack([f[1] for f in folded]).astype(jnp.float32)

    # Weights in conv-as-matmul layout, bf16 for the MXU.
    w_1x1 = params["conv1x1_w"].reshape(ad, Cin).T.astype(jnp.bfloat16)
    w3_all = jnp.concatenate(
        [jnp.transpose(params[f"dil{i}_w"], (2, 3, 1, 0)).reshape(9, Cin, ad)
         for i in range(ndil)], axis=0).astype(jnp.bfloat16)  # (ndil*9, Cin, ad)

    kernel = functools.partial(_aspp_fused_kernel, TH=TH, W=W, Cin=Cin, ad=ad,
                               dilations=tuple(dilations), dmax=dmax)

    footprint = _vmem_footprint_bytes(TH, W, Cin, ad, NB, ndil, dmax, out_bytes)
    vmem_limit = int(max(32 << 20, min(footprint + (8 << 20), int(0.92 * cap))))

    # Grid-invariant operands live wholly in VMEM (single copy, no per-step
    # double buffering); per-(batch, row-tile) operands use pipelined specs.
    resident = pl.BlockSpec(memory_space=pltpu.MemorySpace.VMEM)

    out = pl.pallas_call(
        kernel,
        out_shape=jax.ShapeDtypeStruct((N, Hpad, W, NB * ad), out_dtype),
        grid=(N, n_rt),
        in_specs=[
            pl.BlockSpec((None, 1, ad), lambda n, r: (n, 0, 0)),          # pf
            pl.BlockSpec((None, None, BAND, Wp, Cin),
                         lambda n, r: (n, r, 0, 0, 0)),                   # x band
            resident,                                                     # w_1x1
            resident,                                                     # w3
            resident,                                                     # scale
            resident,                                                     # bias
        ],
        out_specs=pl.BlockSpec((None, TH, W, NB * ad),
                               lambda n, r: (n, r, 0, 0)),
        compiler_params=pltpu.CompilerParams(
            # Both axes independent -> v7x's two TensorCores shard (N, row tiles).
            dimension_semantics=("parallel", "parallel"),
            vmem_limit_bytes=vmem_limit),
    )(pf, x_bands, w_1x1, w3_all, scale_all, bias_all)

    if Hpad != H:
        out = out[:, :H]
    # (N, H, W, NB*ad) already has torch.cat's branch-major channel ordering.
    if nchw_output:
        out = jnp.transpose(out, (0, 3, 1, 2))      # match PyTorch NCHW output
    return out


# ---------------------------------------------------------------------------
if __name__ == "__main__":
    N, dim_in, H, W = 2, 4, 16, 16
    aspp_dim = 8
    dilations = (6, 12, 18)

    key = jax.random.PRNGKey(0)
    kx, kp = jax.random.split(key)
    x = jax.random.normal(kx, (N, dim_in, H, W), jnp.float32)
    params = init_aspp_params(kp, dim_in, aspp_dim, dilations)

    out = jax.block_until_ready(aspp_forward(x, params, dilations))

    expected_channels = (len(dilations) + 2) * aspp_dim
    assert out.shape == (N, expected_channels, H, W), out.shape
    assert out.dtype == jnp.float32
    assert bool(jnp.all(jnp.isfinite(out)))
    print("KERNEL_OK")
</pallas_src>

<mosaic_0001>
module attributes {stable_mosaic.version = 11 : i64} {
  func.func @_aspp_fused_kernel(%arg0: i32, %arg1: i32, %arg2: memref<1x1x8xf32, #tpu.memory_space<vmem>>, %arg3: memref<1x1x52x52x4xbf16, #tpu.memory_space<vmem>>, %arg4: memref<4x8xbf16, #tpu.memory_space<vmem>>, %arg5: memref<27x4x8xbf16, #tpu.memory_space<vmem>>, %arg6: memref<4x8xf32, #tpu.memory_space<vmem>>, %arg7: memref<4x8xf32, #tpu.memory_space<vmem>>, %arg8: memref<1x16x16x40xf32, #tpu.memory_space<vmem>>) attributes {dimension_semantics = [#tpu.dimension_semantics<parallel>, #tpu.dimension_semantics<parallel>], iteration_bounds = array<i64: 2, 1>, scalar_prefetch = 0 : i64, scratch_operands = 0 : i64, tpu.core_type = #tpu.core_type<tc>, window_params = [{transform_indices = @transform_0, window_bounds = array<i64: 1, 1, 8>}, {transform_indices = @transform_1, window_bounds = array<i64: 1, 1, 52, 52, 4>}, {pipeline_mode = #tpu.pipeline_mode<synchronous>, transform_indices = @transform_2, window_bounds = array<i64: 4, 8>}, {pipeline_mode = #tpu.pipeline_mode<synchronous>, transform_indices = @transform_3, window_bounds = array<i64: 27, 4, 8>}, {pipeline_mode = #tpu.pipeline_mode<synchronous>, transform_indices = @transform_4, window_bounds = array<i64: 4, 8>}, {pipeline_mode = #tpu.pipeline_mode<synchronous>, transform_indices = @transform_5, window_bounds = array<i64: 4, 8>}, {transform_indices = @transform_6, window_bounds = array<i64: 1, 16, 16, 40>}]} {
    %c0 = arith.constant 0 : index
    %c0_0 = arith.constant 0 : index
    %0 = vector.load %arg6[%c0, %c0_0] : memref<4x8xf32, #tpu.memory_space<vmem>>, vector<4x8xf32>
    %c0_1 = arith.constant 0 : index
    %c0_2 = arith.constant 0 : index
    %1 = vector.load %arg7[%c0_1, %c0_2] : memref<4x8xf32, #tpu.memory_space<vmem>>, vector<4x8xf32>
    %c0_3 = arith.constant 0 : index
    %c0_4 = arith.constant 0 : index
    %c0_5 = arith.constant 0 : index
    %2 = vector.load %arg2[%c0_3, %c0_4, %c0_5] : memref<1x1x8xf32, #tpu.memory_space<vmem>>, vector<1x1x8xf32>
    %3 = vector.shape_cast %2 : vector<1x1x8xf32> to vector<1x8xf32>
    %4 = vector.shape_cast %3 : vector<1x8xf32> to vector<1x1x8xf32>
    %5 = vector.shape_cast %4 : vector<1x1x8xf32> to vector<1x1x8xf32>
    %6 = vector.broadcast %5 : vector<1x1x8xf32> to vector<16x16x8xf32>
    %c0_6 = arith.constant 0 : index
    %c0_7 = arith.constant 0 : index
    %c0_8 = arith.constant 0 : index
    %c0_9 = arith.constant 0 : index
    %7 = vector.load %arg8[%c0_6, %c0_7, %c0_8, %c0_9] : memref<1x16x16x40xf32, #tpu.memory_space<vmem>>, vector<1x16x16x8xf32>
    %8 = vector.shape_cast %7 : vector<1x16x16x8xf32> to vector<16x16x8xf32>
    %9 = vector.shape_cast %6 : vector<16x16x8xf32> to vector<1x16x16x8xf32>
    tpu.vector_store %arg8[%c0_6, %c0_7, %c0_8, %c0_9], %9 {strides = array<i32>} : memref<1x16x16x40xf32, #tpu.memory_space<vmem>>, vector<1x16x16x8xf32>,
    %c0_10 = arith.constant 0 : index
    %c0_11 = arith.constant 0 : index
    %c18 = arith.constant 18 : index
    %c0_12 = arith.constant 0 : index
    %c0_13 = arith.constant 0 : index
    %10 = vector.load %arg3[%c0_10, %c0_11, %c18, %c0_12, %c0_13] : memref<1x1x52x52x4xbf16, #tpu.memory_space<vmem>>, vector<1x1x16x52x4xbf16>
    %11 = vector.shape_cast %10 : vector<1x1x16x52x4xbf16> to vector<16x52x4xbf16>
    %12 = vector.extract_strided_slice %11 {offsets = [0, 18, 0], sizes = [16, 16, 4], strides = [1, 1, 1]} : vector<16x52x4xbf16> to vector<16x16x4xbf16>
    %13 = vector.shape_cast %12 : vector<16x16x4xbf16> to vector<256x4xbf16>
    %c0_14 = arith.constant 0 : index
    %c0_15 = arith.constant 0 : index
    %14 = vector.load %arg4[%c0_14, %c0_15] : memref<4x8xbf16, #tpu.memory_space<vmem>>, vector<4x8xbf16>
    %cst = arith.constant dense<0.000000e+00> : vector<256x8xf32>
    %15 = tpu.matmul %13, %14, %cst {dimension_numbers = #tpu.dot_dimension_numbers<[1], [0], [0], [1], [0, 0, 1, 1], [], []>} : vector<256x4xbf16>, vector<4x8xbf16>, vector<256x8xf32> -> vector<256x8xf32>
    %16 = vector.extract_strided_slice %0 {offsets = [0, 0], sizes = [1, 8], strides = [1, 1]} : vector<4x8xf32> to vector<1x8xf32>
    %17 = vector.shape_cast %16 : vector<1x8xf32> to vector<8xf32>
    %18 = vector.shape_cast %17 : vector<8xf32> to vector<1x8xf32>
    %19 = vector.broadcast %18 : vector<1x8xf32> to vector<256x8xf32>
    %20 = arith.mulf %15, %19 : vector<256x8xf32>
    %21 = vector.extract_strided_slice %1 {offsets = [0, 0], sizes = [1, 8], strides = [1, 1]} : vector<4x8xf32> to vector<1x8xf32>
    %22 = vector.shape_cast %21 : vector<1x8xf32> to vector<8xf32>
    %23 = vector.shape_cast %22 : vector<8xf32> to vector<1x8xf32>
    %24 = vector.broadcast %23 : vector<1x8xf32> to vector<256x8xf32>
    %25 = arith.addf %20, %24 : vector<256x8xf32>
    %cst_16 = arith.constant 0.000000e+00 : f32
    %26 = vector.broadcast %cst_16 : f32 to vector<256x8xf32>
    %27 = arith.maximumf %25, %26 : vector<256x8xf32>
    %28 = vector.shape_cast %27 : vector<256x8xf32> to vector<16x16x8xf32>
    %c0_17 = arith.constant 0 : index
    %c0_18 = arith.constant 0 : index
    %c0_19 = arith.constant 0 : index
    %c8 = arith.constant 8 : index
    %29 = vector.load %arg8[%c0_17, %c0_18, %c0_19, %c8] : memref<1x16x16x40xf32, #tpu.memory_space<vmem>>, vector<1x16x16x8xf32>
    %30 = vector.shape_cast %29 : vector<1x16x16x8xf32> to vector<16x16x8xf32>
    %31 = vector.shape_cast %28 : vector<16x16x8xf32> to vector<1x16x16x8xf32>
    tpu.vector_store %arg8[%c0_17, %c0_18, %c0_19, %c8], %31 {strides = array<i32>} : memref<1x16x16x40xf32, #tpu.memory_space<vmem>>, vector<1x16x16x8xf32>,
    %cst_20 = arith.constant 0.000000e+00 : f32
    %32 = vector.broadcast %cst_20 : f32 to vector<256x8xf32>
    %c0_21 = arith.constant 0 : index
    %c0_22 = arith.constant 0 : index
    %c12 = arith.constant 12 : index
    %c0_23 = arith.constant 0 : index
    %c0_24 = arith.constant 0 : index
    %33 = vector.load %arg3[%c0_21, %c0_22, %c12, %c0_23, %c0_24] : memref<1x1x52x52x4xbf16, #tpu.memory_space<vmem>>, vector<1x1x16x52x4xbf16>
    %34 = vector.shape_cast %33 : vector<1x1x16x52x4xbf16> to vector<16x52x4xbf16>
    %35 = vector.extract_strided_slice %34 {offsets = [0, 12, 0], sizes = [16, 16, 4], strides = [1, 1, 1]} : vector<16x52x4xbf16> to vector<16x16x4xbf16>
    %36 = vector.shape_cast %35 : vector<16x16x4xbf16> to vector<256x4xbf16>
    %c0_25 = arith.constant 0 : index
    %c0_26 = arith.constant 0 : index
    %c0_27 = arith.constant 0 : index
    %37 = vector.load %arg5[%c0_25, %c0_26, %c0_27] : memref<27x4x8xbf16, #tpu.memory_space<vmem>>, vector<1x4x8xbf16>
    %38 = vector.shape_cast %37 : vector<1x4x8xbf16> to vector<4x8xbf16>
    %cst_28 = arith.constant dense<0.000000e+00> : vector<256x8xf32>
    %39 = tpu.matmul %36, %38, %cst_28 {dimension_numbers = #tpu.dot_dimension_numbers<[1], [0], [0], [1], [0, 0, 1, 1], [], []>} : vector<256x4xbf16>, vector<4x8xbf16>, vector<256x8xf32> -> vector<256x8xf32>
    %40 = arith.addf %32, %39 : vector<256x8xf32>
    %41 = vector.extract_strided_slice %34 {offsets = [0, 18, 0], sizes = [16, 16, 4], strides = [1, 1, 1]} : vector<16x52x4xbf16> to vector<16x16x4xbf16>
    %42 = vector.shape_cast %41 : vector<16x16x4xbf16> to vector<256x4xbf16>
    %c1 = arith.constant 1 : index
    %c0_29 = arith.constant 0 : index
    %c0_30 = arith.constant 0 : index
    %43 = vector.load %arg5[%c1, %c0_29, %c0_30] : memref<27x4x8xbf16, #tpu.memory_space<vmem>>, vector<1x4x8xbf16>
    %44 = vector.shape_cast %43 : vector<1x4x8xbf16> to vector<4x8xbf16>
    %cst_31 = arith.constant dense<0.000000e+00> : vector<256x8xf32>
    %45 = tpu.matmul %42, %44, %cst_31 {dimension_numbers = #tpu.dot_dimension_numbers<[1], [0], [0], [1], [0, 0, 1, 1], [], []>} : vector<256x4xbf16>, vector<4x8xbf16>, vector<256x8xf32> -> vector<256x8xf32>
    %46 = arith.addf %40, %45 : vector<256x8xf32>
    %47 = vector.extract_strided_slice %34 {offsets = [0, 24, 0], sizes = [16, 16, 4], strides = [1, 1, 1]} : vector<16x52x4xbf16> to vector<16x16x4xbf16>
    %48 = vector.shape_cast %47 : vector<16x16x4xbf16> to vector<256x4xbf16>
    %c2 = arith.constant 2 : index
    %c0_32 = arith.constant 0 : index
    %c0_33 = arith.constant 0 : index
    %49 = vector.load %arg5[%c2, %c0_32, %c0_33] : memref<27x4x8xbf16, #tpu.memory_space<vmem>>, vector<1x4x8xbf16>
    %50 = vector.shape_cast %49 : vector<1x4x8xbf16> to vector<4x8xbf16>
    %cst_34 = arith.constant dense<0.000000e+00> : vector<256x8xf32>
    %51 = tpu.matmul %48, %50, %cst_34 {dimension_numbers = #tpu.dot_dimension_numbers<[1], [0], [0], [1], [0, 0, 1, 1], [], []>} : vector<256x4xbf16>, vector<4x8xbf16>, vector<256x8xf32> -> vector<256x8xf32>
    %52 = arith.addf %46, %51 : vector<256x8xf32>
    %53 = vector.extract_strided_slice %11 {offsets = [0, 12, 0], sizes = [16, 16, 4], strides = [1, 1, 1]} : vector<16x52x4xbf16> to vector<16x16x4xbf16>
    %54 = vector.shape_cast %53 : vector<16x16x4xbf16> to vector<256x4xbf16>
    %c3 = arith.constant 3 : index
    %c0_35 = arith.constant 0 : index
    %c0_36 = arith.constant 0 : index
    %55 = vector.load %arg5[%c3, %c0_35, %c0_36] : memref<27x4x8xbf16, #tpu.memory_space<vmem>>, vector<1x4x8xbf16>
    %56 = vector.shape_cast %55 : vector<1x4x8xbf16> to vector<4x8xbf16>
    %cst_37 = arith.constant dense<0.000000e+00> : vector<256x8xf32>
    %57 = tpu.matmul %54, %56, %cst_37 {dimension_numbers = #tpu.dot_dimension_numbers<[1], [0], [0], [1], [0, 0, 1, 1], [], []>} : vector<256x4xbf16>, vector<4x8xbf16>, vector<256x8xf32> -> vector<256x8xf32>
    %58 = arith.addf %52, %57 : vector<256x8xf32>
    %c4 = arith.constant 4 : index
    %c0_38 = arith.constant 0 : index
    %c0_39 = arith.constant 0 : index
    %59 = vector.load %arg5[%c4, %c0_38, %c0_39] : memref<27x4x8xbf16, #tpu.memory_space<vmem>>, vector<1x4x8xbf16>
    %60 = vector.shape_cast %59 : vector<1x4x8xbf16> to vector<4x8xbf16>
    %cst_40 = arith.constant dense<0.000000e+00> : vector<256x8xf32>
    %61 = tpu.matmul %13, %60, %cst_40 {dimension_numbers = #tpu.dot_dimension_numbers<[1], [0], [0], [1], [0, 0, 1, 1], [], []>} : vector<256x4xbf16>, vector<4x8xbf16>, vector<256x8xf32> -> vector<256x8xf32>
    %62 = arith.addf %58, %61 : vector<256x8xf32>
    %63 = vector.extract_strided_slice %11 {offsets = [0, 24, 0], sizes = [16, 16, 4], strides = [1, 1, 1]} : vector<16x52x4xbf16> to vector<16x16x4xbf16>
    %64 = vector.shape_cast %63 : vector<16x16x4xbf16> to vector<256x4xbf16>
    %c5 = arith.constant 5 : index
    %c0_41 = arith.constant 0 : index
    %c0_42 = arith.constant 0 : index
    %65 = vector.load %arg5[%c5, %c0_41, %c0_42] : memref<27x4x8xbf16, #tpu.memory_space<vmem>>, vector<1x4x8xbf16>
    %66 = vector.shape_cast %65 : vector<1x4x8xbf16> to vector<4x8xbf16>
    %cst_43 = arith.constant dense<0.000000e+00> : vector<256x8xf32>
    %67 = tpu.matmul %64, %66, %cst_43 {dimension_numbers = #tpu.dot_dimension_numbers<[1], [0], [0], [1], [0, 0, 1, 1], [], []>} : vector<256x4xbf16>, vector<4x8xbf16>, vector<256x8xf32> -> vector<256x8xf32>
    %68 = arith.addf %62, %67 : vector<256x8xf32>
    %c0_44 = arith.constant 0 : index
    %c0_45 = arith.constant 0 : index
    %c24 = arith.constant 24 : index
    %c0_46 = arith.constant 0 : index
    %c0_47 = arith.constant 0 : index
    %69 = vector.load %arg3[%c0_44, %c0_45, %c24, %c0_46, %c0_47] : memref<1x1x52x52x4xbf16, #tpu.memory_space<vmem>>, vector<1x1x16x52x4xbf16>
    %70 = vector.shape_cast %69 : vector<1x1x16x52x4xbf16> to vector<16x52x4xbf16>
    %71 = vector.extract_strided_slice %70 {offsets = [0, 12, 0], sizes = [16, 16, 4], strides = [1, 1, 1]} : vector<16x52x4xbf16> to vector<16x16x4xbf16>
    %72 = vector.shape_cast %71 : vector<16x16x4xbf16> to vector<256x4xbf16>
    %c6 = arith.constant 6 : index
    %c0_48 = arith.constant 0 : index
    %c0_49 = arith.constant 0 : index
    %73 = vector.load %arg5[%c6, %c0_48, %c0_49] : memref<27x4x8xbf16, #tpu.memory_space<vmem>>, vector<1x4x8xbf16>
    %74 = vector.shape_cast %73 : vector<1x4x8xbf16> to vector<4x8xbf16>
    %cst_50 = arith.constant dense<0.000000e+00> : vector<256x8xf32>
    %75 = tpu.matmul %72, %74, %cst_50 {dimension_numbers = #tpu.dot_dimension_numbers<[1], [0], [0], [1], [0, 0, 1, 1], [], []>} : vector<256x4xbf16>, vector<4x8xbf16>, vector<256x8xf32> -> vector<256x8xf32>
    %76 = arith.addf %68, %75 : vector<256x8xf32>
    %77 = vector.extract_strided_slice %70 {offsets = [0, 18, 0], sizes = [16, 16, 4], strides = [1, 1, 1]} : vector<16x52x4xbf16> to vector<16x16x4xbf16>
    %78 = vector.shape_cast %77 : vector<16x16x4xbf16> to vector<256x4xbf16>
    %c7 = arith.constant 7 : index
    %c0_51 = arith.constant 0 : index
    %c0_52 = arith.constant 0 : index
    %79 = vector.load %arg5[%c7, %c0_51, %c0_52] : memref<27x4x8xbf16, #tpu.memory_space<vmem>>, vector<1x4x8xbf16>
    %80 = vector.shape_cast %79 : vector<1x4x8xbf16> to vector<4x8xbf16>
    %cst_53 = arith.constant dense<0.000000e+00> : vector<256x8xf32>
    %81 = tpu.matmul %78, %80, %cst_53 {dimension_numbers = #tpu.dot_dimension_numbers<[1], [0], [0], [1], [0, 0, 1, 1], [], []>} : vector<256x4xbf16>, vector<4x8xbf16>, vector<256x8xf32> -> vector<256x8xf32>
    %82 = arith.addf %76, %81 : vector<256x8xf32>
    %83 = vector.extract_strided_slice %70 {offsets = [0, 24, 0], sizes = [16, 16, 4], strides = [1, 1, 1]} : vector<16x52x4xbf16> to vector<16x16x4xbf16>
    %84 = vector.shape_cast %83 : vector<16x16x4xbf16> to vector<256x4xbf16>
    %c8_54 = arith.constant 8 : index
    %c0_55 = arith.constant 0 : index
    %c0_56 = arith.constant 0 : index
    %85 = vector.load %arg5[%c8_54, %c0_55, %c0_56] : memref<27x4x8xbf16, #tpu.memory_space<vmem>>, vector<1x4x8xbf16>
    %86 = vector.shape_cast %85 : vector<1x4x8xbf16> to vector<4x8xbf16>
    %cst_57 = arith.constant dense<0.000000e+00> : vector<256x8xf32>
    %87 = tpu.matmul %84, %86, %cst_57 {dimension_numbers = #tpu.dot_dimension_numbers<[1], [0], [0], [1], [0, 0, 1, 1], [], []>} : vector<256x4xbf16>, vector<4x8xbf16>, vector<256x8xf32> -> vector<256x8xf32>
    %88 = arith.addf %82, %87 : vector<256x8xf32>
    %89 = vector.extract_strided_slice %0 {offsets = [1, 0], sizes = [1, 8], strides = [1, 1]} : vector<4x8xf32> to vector<1x8xf32>
    %90 = vector.shape_cast %89 : vector<1x8xf32> to vector<8xf32>
    %91 = vector.shape_cast %90 : vector<8xf32> to vector<1x8xf32>
    %92 = vector.broadcast %91 : vector<1x8xf32> to vector<256x8xf32>
    %93 = arith.mulf %88, %92 : vector<256x8xf32>
    %94 = vector.extract_strided_slice %1 {offsets = [1, 0], sizes = [1, 8], strides = [1, 1]} : vector<4x8xf32> to vector<1x8xf32>
    %95 = vector.shape_cast %94 : vector<1x8xf32> to vector<8xf32>
    %96 = vector.shape_cast %95 : vector<8xf32> to vector<1x8xf32>
    %97 = vector.broadcast %96 : vector<1x8xf32> to vector<256x8xf32>
    %98 = arith.addf %93, %97 : vector<256x8xf32>
    %cst_58 = arith.constant 0.000000e+00 : f32
    %99 = vector.broadcast %cst_58 : f32 to vector<256x8xf32>
    %100 = arith.maximumf %98, %99 : vector<256x8xf32>
    %101 = vector.shape_cast %100 : vector<256x8xf32> to vector<16x16x8xf32>
    %c0_59 = arith.constant 0 : index
    %c0_60 = arith.constant 0 : index
    %c0_61 = arith.constant 0 : index
    %c16 = arith.constant 16 : index
    %102 = vector.load %arg8[%c0_59, %c0_60, %c0_61, %c16] : memref<1x16x16x40xf32, #tpu.memory_space<vmem>>, vector<1x16x16x8xf32>
    %103 = vector.shape_cast %102 : vector<1x16x16x8xf32> to vector<16x16x8xf32>
    %104 = vector.shape_cast %101 : vector<16x16x8xf32> to vector<1x16x16x8xf32>
    tpu.vector_store %arg8[%c0_59, %c0_60, %c0_61, %c16], %104 {strides = array<i32>} : memref<1x16x16x40xf32, #tpu.memory_space<vmem>>, vector<1x16x16x8xf32>,
    %cst_62 = arith.constant 0.000000e+00 : f32
    %105 = vector.broadcast %cst_62 : f32 to vector<256x8xf32>
    %c0_63 = arith.constant 0 : index
    %c0_64 = arith.constant 0 : index
    %c6_65 = arith.constant 6 : index
    %c0_66 = arith.constant 0 : index
    %c0_67 = arith.constant 0 : index
    %106 = vector.load %arg3[%c0_63, %c0_64, %c6_65, %c0_66, %c0_67] : memref<1x1x52x52x4xbf16, #tpu.memory_space<vmem>>, vector<1x1x16x52x4xbf16>
    %107 = vector.shape_cast %106 : vector<1x1x16x52x4xbf16> to vector<16x52x4xbf16>
    %108 = vector.extract_strided_slice %107 {offsets = [0, 6, 0], sizes = [16, 16, 4], strides = [1, 1, 1]} : vector<16x52x4xbf16> to vector<16x16x4xbf16>
    %109 = vector.shape_cast %108 : vector<16x16x4xbf16> to vector<256x4xbf16>
    %c9 = arith.constant 9 : index
    %c0_68 = arith.constant 0 : index
    %c0_69 = arith.constant 0 : index
    %110 = vector.load %arg5[%c9, %c0_68, %c0_69] : memref<27x4x8xbf16, #tpu.memory_space<vmem>>, vector<1x4x8xbf16>
    %111 = vector.shape_cast %110 : vector<1x4x8xbf16> to vector<4x8xbf16>
    %cst_70 = arith.constant dense<0.000000e+00> : vector<256x8xf32>
    %112 = tpu.matmul %109, %111, %cst_70 {dimension_numbers = #tpu.dot_dimension_numbers<[1], [0], [0], [1], [0, 0, 1, 1], [], []>} : vector<256x4xbf16>, vector<4x8xbf16>, vector<256x8xf32> -> vector<256x8xf32>
    %113 = arith.addf %105, %112 : vector<256x8xf32>
    %114 = vector.extract_strided_slice %107 {offsets = [0, 18, 0], sizes = [16, 16, 4], strides = [1, 1, 1]} : vector<16x52x4xbf16> to vector<16x16x4xbf16>
    %115 = vector.shape_cast %114 : vector<16x16x4xbf16> to vector<256x4xbf16>
    %c10 = arith.constant 10 : index
    %c0_71 = arith.constant 0 : index
    %c0_72 = arith.constant 0 : index
    %116 = vector.load %arg5[%c10, %c0_71, %c0_72] : memref<27x4x8xbf16, #tpu.memory_space<vmem>>, vector<1x4x8xbf16>
    %117 = vector.shape_cast %116 : vector<1x4x8xbf16> to vector<4x8xbf16>
    %cst_73 = arith.constant dense<0.000000e+00> : vector<256x8xf32>
    %118 = tpu.matmul %115, %117, %cst_73 {dimension_numbers = #tpu.dot_dimension_numbers<[1], [0], [0], [1], [0, 0, 1, 1], [], []>} : vector<256x4xbf16>, vector<4x8xbf16>, vector<256x8xf32> -> vector<256x8xf32>
    %119 = arith.addf %113, %118 : vector<256x8xf32>
    %120 = vector.extract_strided_slice %107 {offsets = [0, 30, 0], sizes = [16, 16, 4], strides = [1, 1, 1]} : vector<16x52x4xbf16> to vector<16x16x4xbf16>
    %121 = vector.shape_cast %120 : vector<16x16x4xbf16> to vector<256x4xbf16>
    %c11 = arith.constant 11 : index
    %c0_74 = arith.constant 0 : index
    %c0_75 = arith.constant 0 : index
    %122 = vector.load %arg5[%c11, %c0_74, %c0_75] : memref<27x4x8xbf16, #tpu.memory_space<vmem>>, vector<1x4x8xbf16>
    %123 = vector.shape_cast %122 : vector<1x4x8xbf16> to vector<4x8xbf16>
    %cst_76 = arith.constant dense<0.000000e+00> : vector<256x8xf32>
    %124 = tpu.matmul %121, %123, %cst_76 {dimension_numbers = #tpu.dot_dimension_numbers<[1], [0], [0], [1], [0, 0, 1, 1], [], []>} : vector<256x4xbf16>, vector<4x8xbf16>, vector<256x8xf32> -> vector<256x8xf32>
    %125 = arith.addf %119, %124 : vector<256x8xf32>
    %126 = vector.extract_strided_slice %11 {offsets = [0, 6, 0], sizes = [16, 16, 4], strides = [1, 1, 1]} : vector<16x52x4xbf16> to vector<16x16x4xbf16>
    %127 = vector.shape_cast %126 : vector<16x16x4xbf16> to vector<256x4xbf16>
    %c12_77 = arith.constant 12 : index
    %c0_78 = arith.constant 0 : index
    %c0_79 = arith.constant 0 : index
    %128 = vector.load %arg5[%c12_77, %c0_78, %c0_79] : memref<27x4x8xbf16, #tpu.memory_space<vmem>>, vector<1x4x8xbf16>
    %129 = vector.shape_cast %128 : vector<1x4x8xbf16> to vector<4x8xbf16>
    %cst_80 = arith.constant dense<0.000000e+00> : vector<256x8xf32>
    %130 = tpu.matmul %127, %129, %cst_80 {dimension_numbers = #tpu.dot_dimension_numbers<[1], [0], [0], [1], [0, 0, 1, 1], [], []>} : vector<256x4xbf16>, vector<4x8xbf16>, vector<256x8xf32> -> vector<256x8xf32>
    %131 = arith.addf %125, %130 : vector<256x8xf32>
    %c13 = arith.constant 13 : index
    %c0_81 = arith.constant 0 : index
    %c0_82 = arith.constant 0 : index
    %132 = vector.load %arg5[%c13, %c0_81, %c0_82] : memref<27x4x8xbf16, #tpu.memory_space<vmem>>, vector<1x4x8xbf16>
    %133 = vector.shape_cast %132 : vector<1x4x8xbf16> to vector<4x8xbf16>
    %cst_83 = arith.constant dense<0.000000e+00> : vector<256x8xf32>
    %134 = tpu.matmul %13, %133, %cst_83 {dimension_numbers = #tpu.dot_dimension_numbers<[1], [0], [0], [1], [0, 0, 1, 1], [], []>} : vector<256x4xbf16>, vector<4x8xbf16>, vector<256x8xf32> -> vector<256x8xf32>
    %135 = arith.addf %131, %134 : vector<256x8xf32>
    %136 = vector.extract_strided_slice %11 {offsets = [0, 30, 0], sizes = [16, 16, 4], strides = [1, 1, 1]} : vector<16x52x4xbf16> to vector<16x16x4xbf16>
    %137 = vector.shape_cast %136 : vector<16x16x4xbf16> to vector<256x4xbf16>
    %c14 = arith.constant 14 : index
    %c0_84 = arith.constant 0 : index
    %c0_85 = arith.constant 0 : index
    %138 = vector.load %arg5[%c14, %c0_84, %c0_85] : memref<27x4x8xbf16, #tpu.memory_space<vmem>>, vector<1x4x8xbf16>
    %139 = vector.shape_cast %138 : vector<1x4x8xbf16> to vector<4x8xbf16>
    %cst_86 = arith.constant dense<0.000000e+00> : vector<256x8xf32>
    %140 = tpu.matmul %137, %139, %cst_86 {dimension_numbers = #tpu.dot_dimension_numbers<[1], [0], [0], [1], [0, 0, 1, 1], [], []>} : vector<256x4xbf16>, vector<4x8xbf16>, vector<256x8xf32> -> vector<256x8xf32>
    %141 = arith.addf %135, %140 : vector<256x8xf32>
    %c0_87 = arith.constant 0 : index
    %c0_88 = arith.constant 0 : index
    %c30 = arith.constant 30 : index
    %c0_89 = arith.constant 0 : index
    %c0_90 = arith.constant 0 : index
    %142 = vector.load %arg3[%c0_87, %c0_88, %c30, %c0_89, %c0_90] : memref<1x1x52x52x4xbf16, #tpu.memory_space<vmem>>, vector<1x1x16x52x4xbf16>
    %143 = vector.shape_cast %142 : vector<1x1x16x52x4xbf16> to vector<16x52x4xbf16>
    %144 = vector.extract_strided_slice %143 {offsets = [0, 6, 0], sizes = [16, 16, 4], strides = [1, 1, 1]} : vector<16x52x4xbf16> to vector<16x16x4xbf16>
    %145 = vector.shape_cast %144 : vector<16x16x4xbf16> to vector<256x4xbf16>
    %c15 = arith.constant 15 : index
    %c0_91 = arith.constant 0 : index
    %c0_92 = arith.constant 0 : index
    %146 = vector.load %arg5[%c15, %c0_91, %c0_92] : memref<27x4x8xbf16, #tpu.memory_space<vmem>>, vector<1x4x8xbf16>
    %147 = vector.shape_cast %146 : vector<1x4x8xbf16> to vector<4x8xbf16>
    %cst_93 = arith.constant dense<0.000000e+00> : vector<256x8xf32>
    %148 = tpu.matmul %145, %147, %cst_93 {dimension_numbers = #tpu.dot_dimension_numbers<[1], [0], [0], [1], [0, 0, 1, 1], [], []>} : vector<256x4xbf16>, vector<4x8xbf16>, vector<256x8xf32> -> vector<256x8xf32>
    %149 = arith.addf %141, %148 : vector<256x8xf32>
    %150 = vector.extract_strided_slice %143 {offsets = [0, 18, 0], sizes = [16, 16, 4], strides = [1, 1, 1]} : vector<16x52x4xbf16> to vector<16x16x4xbf16>
    %151 = vector.shape_cast %150 : vector<16x16x4xbf16> to vector<256x4xbf16>
    %c16_94 = arith.constant 16 : index
    %c0_95 = arith.constant 0 : index
    %c0_96 = arith.constant 0 : index
    %152 = vector.load %arg5[%c16_94, %c0_95, %c0_96] : memref<27x4x8xbf16, #tpu.memory_space<vmem>>, vector<1x4x8xbf16>
    %153 = vector.shape_cast %152 : vector<1x4x8xbf16> to vector<4x8xbf16>
    %cst_97 = arith.constant dense<0.000000e+00> : vector<256x8xf32>
    %154 = tpu.matmul %151, %153, %cst_97 {dimension_numbers = #tpu.dot_dimension_numbers<[1], [0], [0], [1], [0, 0, 1, 1], [], []>} : vector<256x4xbf16>, vector<4x8xbf16>, vector<256x8xf32> -> vector<256x8xf32>
    %155 = arith.addf %149, %154 : vector<256x8xf32>
    %156 = vector.extract_strided_slice %143 {offsets = [0, 30, 0], sizes = [16, 16, 4], strides = [1, 1, 1]} : vector<16x52x4xbf16> to vector<16x16x4xbf16>
    %157 = vector.shape_cast %156 : vector<16x16x4xbf16> to vector<256x4xbf16>
    %c17 = arith.constant 17 : index
    %c0_98 = arith.constant 0 : index
    %c0_99 = arith.constant 0 : index
    %158 = vector.load %arg5[%c17, %c0_98, %c0_99] : memref<27x4x8xbf16, #tpu.memory_space<vmem>>, vector<1x4x8xbf16>
    %159 = vector.shape_cast %158 : vector<1x4x8xbf16> to vector<4x8xbf16>
    %cst_100 = arith.constant dense<0.000000e+00> : vector<256x8xf32>
    %160 = tpu.matmul %157, %159, %cst_100 {dimension_numbers = #tpu.dot_dimension_numbers<[1], [0], [0], [1], [0, 0, 1, 1], [], []>} : vector<256x4xbf16>, vector<4x8xbf16>, vector<256x8xf32> -> vector<256x8xf32>
    %161 = arith.addf %155, %160 : vector<256x8xf32>
    %162 = vector.extract_strided_slice %0 {offsets = [2, 0], sizes = [1, 8], strides = [1, 1]} : vector<4x8xf32> to vector<1x8xf32>
    %163 = vector.shape_cast %162 : vector<1x8xf32> to vector<8xf32>
    %164 = vector.shape_cast %163 : vector<8xf32> to vector<1x8xf32>
    %165 = vector.broadcast %164 : vector<1x8xf32> to vector<256x8xf32>
    %166 = arith.mulf %161, %165 : vector<256x8xf32>
    %167 = vector.extract_strided_slice %1 {offsets = [2, 0], sizes = [1, 8], strides = [1, 1]} : vector<4x8xf32> to vector<1x8xf32>
    %168 = vector.shape_cast %167 : vector<1x8xf32> to vector<8xf32>
    %169 = vector.shape_cast %168 : vector<8xf32> to vector<1x8xf32>
    %170 = vector.broadcast %169 : vector<1x8xf32> to vector<256x8xf32>
    %171 = arith.addf %166, %170 : vector<256x8xf32>
    %cst_101 = arith.constant 0.000000e+00 : f32
    %172 = vector.broadcast %cst_101 : f32 to vector<256x8xf32>
    %173 = arith.maximumf %171, %172 : vector<256x8xf32>
    %174 = vector.shape_cast %173 : vector<256x8xf32> to vector<16x16x8xf32>
    %c0_102 = arith.constant 0 : index
    %c0_103 = arith.constant 0 : index
    %c0_104 = arith.constant 0 : index
    %c24_105 = arith.constant 24 : index
    %175 = vector.load %arg8[%c0_102, %c0_103, %c0_104, %c24_105] : memref<1x16x16x40xf32, #tpu.memory_space<vmem>>, vector<1x16x16x8xf32>
    %176 = vector.shape_cast %175 : vector<1x16x16x8xf32> to vector<16x16x8xf32>
    %177 = vector.shape_cast %174 : vector<16x16x8xf32> to vector<1x16x16x8xf32>
    tpu.vector_store %arg8[%c0_102, %c0_103, %c0_104, %c24_105], %177 {strides = array<i32>} : memref<1x16x16x40xf32, #tpu.memory_space<vmem>>, vector<1x16x16x8xf32>,
    %cst_106 = arith.constant 0.000000e+00 : f32
    %178 = vector.broadcast %cst_106 : f32 to vector<256x8xf32>
    %c0_107 = arith.constant 0 : index
    %c0_108 = arith.constant 0 : index
    %c0_109 = arith.constant 0 : index
    %c0_110 = arith.constant 0 : index
    %c0_111 = arith.constant 0 : index
    %179 = vector.load %arg3[%c0_107, %c0_108, %c0_109, %c0_110, %c0_111] : memref<1x1x52x52x4xbf16, #tpu.memory_space<vmem>>, vector<1x1x16x52x4xbf16>
    %180 = vector.shape_cast %179 : vector<1x1x16x52x4xbf16> to vector<16x52x4xbf16>
    %181 = vector.extract_strided_slice %180 {offsets = [0, 0, 0], sizes = [16, 16, 4], strides = [1, 1, 1]} : vector<16x52x4xbf16> to vector<16x16x4xbf16>
    %182 = vector.shape_cast %181 : vector<16x16x4xbf16> to vector<256x4xbf16>
    %c18_112 = arith.constant 18 : index
    %c0_113 = arith.constant 0 : index
    %c0_114 = arith.constant 0 : index
    %183 = vector.load %arg5[%c18_112, %c0_113, %c0_114] : memref<27x4x8xbf16, #tpu.memory_space<vmem>>, vector<1x4x8xbf16>
    %184 = vector.shape_cast %183 : vector<1x4x8xbf16> to vector<4x8xbf16>
    %cst_115 = arith.constant dense<0.000000e+00> : vector<256x8xf32>
    %185 = tpu.matmul %182, %184, %cst_115 {dimension_numbers = #tpu.dot_dimension_numbers<[1], [0], [0], [1], [0, 0, 1, 1], [], []>} : vector<256x4xbf16>, vector<4x8xbf16>, vector<256x8xf32> -> vector<256x8xf32>
    %186 = arith.addf %178, %185 : vector<256x8xf32>
    %187 = vector.extract_strided_slice %180 {offsets = [0, 18, 0], sizes = [16, 16, 4], strides = [1, 1, 1]} : vector<16x52x4xbf16> to vector<16x16x4xbf16>
    %188 = vector.shape_cast %187 : vector<16x16x4xbf16> to vector<256x4xbf16>
    %c19 = arith.constant 19 : index
    %c0_116 = arith.constant 0 : index
    %c0_117 = arith.constant 0 : index
    %189 = vector.load %arg5[%c19, %c0_116, %c0_117] : memref<27x4x8xbf16, #tpu.memory_space<vmem>>, vector<1x4x8xbf16>
    %190 = vector.shape_cast %189 : vector<1x4x8xbf16> to vector<4x8xbf16>
    %cst_118 = arith.constant dense<0.000000e+00> : vector<256x8xf32>
    %191 = tpu.matmul %188, %190, %cst_118 {dimension_numbers = #tpu.dot_dimension_numbers<[1], [0], [0], [1], [0, 0, 1, 1], [], []>} : vector<256x4xbf16>, vector<4x8xbf16>, vector<256x8xf32> -> vector<256x8xf32>
    %192 = arith.addf %186, %191 : vector<256x8xf32>
    %193 = vector.extract_strided_slice %180 {offsets = [0, 36, 0], sizes = [16, 16, 4], strides = [1, 1, 1]} : vector<16x52x4xbf16> to vector<16x16x4xbf16>
    %194 = vector.shape_cast %193 : vector<16x16x4xbf16> to vector<256x4xbf16>
    %c20 = arith.constant 20 : index
    %c0_119 = arith.constant 0 : index
    %c0_120 = arith.constant 0 : index
    %195 = vector.load %arg5[%c20, %c0_119, %c0_120] : memref<27x4x8xbf16, #tpu.memory_space<vmem>>, vector<1x4x8xbf16>
    %196 = vector.shape_cast %195 : vector<1x4x8xbf16> to vector<4x8xbf16>
    %cst_121 = arith.constant dense<0.000000e+00> : vector<256x8xf32>
    %197 = tpu.matmul %194, %196, %cst_121 {dimension_numbers = #tpu.dot_dimension_numbers<[1], [0], [0], [1], [0, 0, 1, 1], [], []>} : vector<256x4xbf16>, vector<4x8xbf16>, vector<256x8xf32> -> vector<256x8xf32>
    %198 = arith.addf %192, %197 : vector<256x8xf32>
    %199 = vector.extract_strided_slice %11 {offsets = [0, 0, 0], sizes = [16, 16, 4], strides = [1, 1, 1]} : vector<16x52x4xbf16> to vector<16x16x4xbf16>
    %200 = vector.shape_cast %199 : vector<16x16x4xbf16> to vector<256x4xbf16>
    %c21 = arith.constant 21 : index
    %c0_122 = arith.constant 0 : index
    %c0_123 = arith.constant 0 : index
    %201 = vector.load %arg5[%c21, %c0_122, %c0_123] : memref<27x4x8xbf16, #tpu.memory_space<vmem>>, vector<1x4x8xbf16>
    %202 = vector.shape_cast %201 : vector<1x4x8xbf16> to vector<4x8xbf16>
    %cst_124 = arith.constant dense<0.000000e+00> : vector<256x8xf32>
    %203 = tpu.matmul %200, %202, %cst_124 {dimension_numbers = #tpu.dot_dimension_numbers<[1], [0], [0], [1], [0, 0, 1, 1], [], []>} : vector<256x4xbf16>, vector<4x8xbf16>, vector<256x8xf32> -> vector<256x8xf32>
    %204 = arith.addf %198, %203 : vector<256x8xf32>
    %c22 = arith.constant 22 : index
    %c0_125 = arith.constant 0 : index
    %c0_126 = arith.constant 0 : index
    %205 = vector.load %arg5[%c22, %c0_125, %c0_126] : memref<27x4x8xbf16, #tpu.memory_space<vmem>>, vector<1x4x8xbf16>
    %206 = vector.shape_cast %205 : vector<1x4x8xbf16> to vector<4x8xbf16>
    %cst_127 = arith.constant dense<0.000000e+00> : vector<256x8xf32>
    %207 = tpu.matmul %13, %206, %cst_127 {dimension_numbers = #tpu.dot_dimension_numbers<[1], [0], [0], [1], [0, 0, 1, 1], [], []>} : vector<256x4xbf16>, vector<4x8xbf16>, vector<256x8xf32> -> vector<256x8xf32>
    %208 = arith.addf %204, %207 : vector<256x8xf32>
    %209 = vector.extract_strided_slice %11 {offsets = [0, 36, 0], sizes = [16, 16, 4], strides = [1, 1, 1]} : vector<16x52x4xbf16> to vector<16x16x4xbf16>
    %210 = vector.shape_cast %209 : vector<16x16x4xbf16> to vector<256x4xbf16>
    %c23 = arith.constant 23 : index
    %c0_128 = arith.constant 0 : index
    %c0_129 = arith.constant 0 : index
    %211 = vector.load %arg5[%c23, %c0_128, %c0_129] : memref<27x4x8xbf16, #tpu.memory_space<vmem>>, vector<1x4x8xbf16>
    %212 = vector.shape_cast %211 : vector<1x4x8xbf16> to vector<4x8xbf16>
    %cst_130 = arith.constant dense<0.000000e+00> : vector<256x8xf32>
    %213 = tpu.matmul %210, %212, %cst_130 {dimension_numbers = #tpu.dot_dimension_numbers<[1], [0], [0], [1], [0, 0, 1, 1], [], []>} : vector<256x4xbf16>, vector<4x8xbf16>, vector<256x8xf32> -> vector<256x8xf32>
    %214 = arith.addf %208, %213 : vector<256x8xf32>
    %c0_131 = arith.constant 0 : index
    %c0_132 = arith.constant 0 : index
    %c36 = arith.constant 36 : index
    %c0_133 = arith.constant 0 : index
    %c0_134 = arith.constant 0 : index
    %215 = vector.load %arg3[%c0_131, %c0_132, %c36, %c0_133, %c0_134] : memref<1x1x52x52x4xbf16, #tpu.memory_space<vmem>>, vector<1x1x16x52x4xbf16>
    %216 = vector.shape_cast %215 : vector<1x1x16x52x4xbf16> to vector<16x52x4xbf16>
    %217 = vector.extract_strided_slice %216 {offsets = [0, 0, 0], sizes = [16, 16, 4], strides = [1, 1, 1]} : vector<16x52x4xbf16> to vector<16x16x4xbf16>
    %218 = vector.shape_cast %217 : vector<16x16x4xbf16> to vector<256x4xbf16>
    %c24_135 = arith.constant 24 : index
    %c0_136 = arith.constant 0 : index
    %c0_137 = arith.constant 0 : index
    %219 = vector.load %arg5[%c24_135, %c0_136, %c0_137] : memref<27x4x8xbf16, #tpu.memory_space<vmem>>, vector<1x4x8xbf16>
    %220 = vector.shape_cast %219 : vector<1x4x8xbf16> to vector<4x8xbf16>
    %cst_138 = arith.constant dense<0.000000e+00> : vector<256x8xf32>
    %221 = tpu.matmul %218, %220, %cst_138 {dimension_numbers = #tpu.dot_dimension_numbers<[1], [0], [0], [1], [0, 0, 1, 1], [], []>} : vector<256x4xbf16>, vector<4x8xbf16>, vector<256x8xf32> -> vector<256x8xf32>
    %222 = arith.addf %214, %221 : vector<256x8xf32>
    %223 = vector.extract_strided_slice %216 {offsets = [0, 18, 0], sizes = [16, 16, 4], strides = [1, 1, 1]} : vector<16x52x4xbf16> to vector<16x16x4xbf16>
    %224 = vector.shape_cast %223 : vector<16x16x4xbf16> to vector<256x4xbf16>
    %c25 = arith.constant 25 : index
    %c0_139 = arith.constant 0 : index
    %c0_140 = arith.constant 0 : index
    %225 = vector.load %arg5[%c25, %c0_139, %c0_140] : memref<27x4x8xbf16, #tpu.memory_space<vmem>>, vector<1x4x8xbf16>
    %226 = vector.shape_cast %225 : vector<1x4x8xbf16> to vector<4x8xbf16>
    %cst_141 = arith.constant dense<0.000000e+00> : vector<256x8xf32>
    %227 = tpu.matmul %224, %226, %cst_141 {dimension_numbers = #tpu.dot_dimension_numbers<[1], [0], [0], [1], [0, 0, 1, 1], [], []>} : vector<256x4xbf16>, vector<4x8xbf16>, vector<256x8xf32> -> vector<256x8xf32>
    %228 = arith.addf %222, %227 : vector<256x8xf32>
    %229 = vector.extract_strided_slice %216 {offsets = [0, 36, 0], sizes = [16, 16, 4], strides = [1, 1, 1]} : vector<16x52x4xbf16> to vector<16x16x4xbf16>
    %230 = vector.shape_cast %229 : vector<16x16x4xbf16> to vector<256x4xbf16>
    %c26 = arith.constant 26 : index
    %c0_142 = arith.constant 0 : index
    %c0_143 = arith.constant 0 : index
    %231 = vector.load %arg5[%c26, %c0_142, %c0_143] : memref<27x4x8xbf16, #tpu.memory_space<vmem>>, vector<1x4x8xbf16>
    %232 = vector.shape_cast %231 : vector<1x4x8xbf16> to vector<4x8xbf16>
    %cst_144 = arith.constant dense<0.000000e+00> : vector<256x8xf32>
    %233 = tpu.matmul %230, %232, %cst_144 {dimension_numbers = #tpu.dot_dimension_numbers<[1], [0], [0], [1], [0, 0, 1, 1], [], []>} : vector<256x4xbf16>, vector<4x8xbf16>, vector<256x8xf32> -> vector<256x8xf32>
    %234 = arith.addf %228, %233 : vector<256x8xf32>
    %235 = vector.extract_strided_slice %0 {offsets = [3, 0], sizes = [1, 8], strides = [1, 1]} : vector<4x8xf32> to vector<1x8xf32>
    %236 = vector.shape_cast %235 : vector<1x8xf32> to vector<8xf32>
    %237 = vector.shape_cast %236 : vector<8xf32> to vector<1x8xf32>
    %238 = vector.broadcast %237 : vector<1x8xf32> to vector<256x8xf32>
    %239 = arith.mulf %234, %238 : vector<256x8xf32>
    %240 = vector.extract_strided_slice %1 {offsets = [3, 0], sizes = [1, 8], strides = [1, 1]} : vector<4x8xf32> to vector<1x8xf32>
    %241 = vector.shape_cast %240 : vector<1x8xf32> to vector<8xf32>
    %242 = vector.shape_cast %241 : vector<8xf32> to vector<1x8xf32>
    %243 = vector.broadcast %242 : vector<1x8xf32> to vector<256x8xf32>
    %244 = arith.addf %239, %243 : vector<256x8xf32>
    %cst_145 = arith.constant 0.000000e+00 : f32
    %245 = vector.broadcast %cst_145 : f32 to vector<256x8xf32>
    %246 = arith.maximumf %244, %245 : vector<256x8xf32>
    %247 = vector.shape_cast %246 : vector<256x8xf32> to vector<16x16x8xf32>
    %c0_146 = arith.constant 0 : index
    %c0_147 = arith.constant 0 : index
    %c0_148 = arith.constant 0 : index
    %c32 = arith.constant 32 : index
    %248 = vector.load %arg8[%c0_146, %c0_147, %c0_148, %c32] : memref<1x16x16x40xf32, #tpu.memory_space<vmem>>, vector<1x16x16x8xf32>
    %249 = vector.shape_cast %248 : vector<1x16x16x8xf32> to vector<16x16x8xf32>
    %250 = vector.shape_cast %247 : vector<16x16x8xf32> to vector<1x16x16x8xf32>
    tpu.vector_store %arg8[%c0_146, %c0_147, %c0_148, %c32], %250 {strides = array<i32>} : memref<1x16x16x40xf32, #tpu.memory_space<vmem>>, vector<1x16x16x8xf32>,
    return
  }
  func.func @transform_0(%arg0: i32, %arg1: i32) -> (i32, i32, i32) {
    %c0_i32 = arith.constant 0 : i32
    %c0_i32_0 = arith.constant 0 : i32
    %c0_i32_1 = arith.constant 0 : i32
    return %arg0, %c0_i32, %c0_i32_0 : i32, i32, i32
  }
  func.func @transform_1(%arg0: i32, %arg1: i32) -> (i32, i32, i32, i32, i32) {
    %c0_i32 = arith.constant 0 : i32
    %c0_i32_0 = arith.constant 0 : i32
    %c0_i32_1 = arith.constant 0 : i32
    %c0_i32_2 = arith.constant 0 : i32
    return %arg0, %arg1, %c0_i32, %c0_i32_0, %c0_i32_1 : i32, i32, i32, i32, i32
  }
  func.func @transform_2(%arg0: i32, %arg1: i32) -> (i32, i32) {
    %c0_i32 = arith.constant 0 : i32
    %c0_i32_0 = arith.constant 0 : i32
    %c0_i32_1 = arith.constant 0 : i32
    return %c0_i32, %c0_i32_0 : i32, i32
  }
  func.func @transform_3(%arg0: i32, %arg1: i32) -> (i32, i32, i32) {
    %c0_i32 = arith.constant 0 : i32
    %c0_i32_0 = arith.constant 0 : i32
    %c0_i32_1 = arith.constant 0 : i32
    %c0_i32_2 = arith.constant 0 : i32
    return %c0_i32, %c0_i32_0, %c0_i32_1 : i32, i32, i32
  }
  func.func @transform_4(%arg0: i32, %arg1: i32) -> (i32, i32) {
    %c0_i32 = arith.constant 0 : i32
    %c0_i32_0 = arith.constant 0 : i32
    %c0_i32_1 = arith.constant 0 : i32
    return %c0_i32, %c0_i32_0 : i32, i32
  }
  func.func @transform_5(%arg0: i32, %arg1: i32) -> (i32, i32) {
    %c0_i32 = arith.constant 0 : i32
    %c0_i32_0 = arith.constant 0 : i32
    %c0_i32_1 = arith.constant 0 : i32
    return %c0_i32, %c0_i32_0 : i32, i32
  }
  func.func @transform_6(%arg0: i32, %arg1: i32) -> (i32, i32, i32, i32) {
    %c0_i32 = arith.constant 0 : i32
    %c0_i32_0 = arith.constant 0 : i32
    %c0_i32_1 = arith.constant 0 : i32
    return %arg0, %arg1, %c0_i32, %c0_i32_0 : i32, i32, i32, i32
  }
}

</mosaic_0001>

<bundles_post_ra>
// kernel: tpu_custom_call.1
= control target key start
LH: loop header
LB: loop body
LE: loop exit
PB: predicated region body
PF: predicated region fallthrough
CT: control target
= control target key end

     0   :  { %11 = vsyncpa [#allocation3], 0  ;;  %s17332_s0 = inlined_call_operand.vmem [shape: f32[2,1,8], index: 0, kind: input, shape index: {}]   ;;  %s17333_s1 = inlined_call_operand.vmem [shape: bf16[2,1,52,52,4], index: 1, kind: input, shape index: {}]   ;;  %s17334_s2 = inlined_call_operand.vmem [shape: bf16[4,8], index: 2, kind: input, shape index: {}]   ;;  %s17335_s3 = inlined_call_operand.vmem [shape: bf16[27,4,8], index: 3, kind: input, shape index: {}]   ;;  %s17336_s4 = inlined_call_operand.vmem [shape: f32[4,8], index: 4, kind: input, shape index: {}]   ;;  %s17337_s5 = inlined_call_operand.vmem [shape: f32[4,8], index: 5, kind: input, shape index: {}]   ;;  %s17338_s6 = inlined_call_operand.hbm [shape: f32[2,16,16,40], index: 6, kind: output, shape index: {}]  }
   0x1   :  { %13 = vsyncpa [#allocation3 + $0x1], 0  ;;  %s12849_s21 = smov 0   ;;  %s12851_s22 = smov 0  }
   0x2   :  { %s12853_s23 = smov 0   ;;  %s12855_s24 = smov 0  }
   0x3   :  { %s12857_s25 = smov 0   ;;  %s12859_s26 = smov 0  }
   0x4 LB: > { %s10638_s27 = sadd.s32 4294967295, %s12807_s26   ;;  %s10639_s28 = sadd.s32 4294967294, %s12807_s26   ;;  %s12807_s26 = sphi %s12859_s26, %s19_s26   ;;  %s12803_s25 = sphi %s12857_s25, %s17451_s25   ;;  %s12799_s24 = sphi %s12855_s24, %s17450_s24   ;;  %s12795_s23 = sphi %s12853_s23, %s17449_s23   ;;  %s12791_s22 = sphi %s12851_s22, %s17448_s22   ;;  %s12787_s21 = sphi %s12849_s21, %s17447_s21  }
   0x5   : > { %s31_s29 = sadd.s32 1, %s12803_s25  ;;  %s178_s30 = sadd.s32 1, %s12795_s23 }
   0x6   : > { %p33_p0 = scmp.ge.s32.totalorder %s31_s29, 2  ;;  %p188_p1 = scmp.ne.s32.totalorder %s12795_s23, %s12791_s22 }
   0x7   : > { %p189_p2 = scmp.eq.s32.totalorder %s10638_s27, 1  ;;  %p194_p3 = scmp.ne.s32.totalorder %s12791_s22, %s12787_s21 }
   0x8   : > { %s17453_s29 = smov (%p33_p0, %s31_s29), 0  ;;  %p195_p5 = scmp.eq.s32.totalorder %s10639_s28, 1 }
   0x9   : > { %p12889_p4 = por %p189_p2, %p188_p1  ;;  %s173_s8 = ssub.s32 %s12803_s25, %s17453_s29 }
   0xa   : > { %p10642_p6 = scmp.ge.s32.totalorder %s12807_s26, 1  ;;  %p176_p7 = scmp.eq.s32.totalorder %s173_s8, 0 }
   0xb   : > { %p12896_p8 = por %p195_p5, %p194_p3  ;;  %p243_p9 = scmp.lt.s32.totalorder %s12807_s26, 3 }
   0xc   : > { %s12902_s10 = scalar_select %p176_p7, %s12795_s23, %s178_s30  }
   0xd   : > { %p244_p10 = pnand %p10642_p6, %p243_p9 }
   0xf   : > { %247 = sbr.rel (%p244_p10) target bundleno = 2086 (0x826), region = 44 }
  0x14   : > { %vm707_vm0 = vcmask 1041408   ;;  %v10918_v0 = vld [vmem:[%s17335_s3 + $0x4] sm:$0x3]  ;;  %p280_p11 = scmp.lt.s32.totalorder %s12799_s24, 1  ;;  %v609_v2 = vld [vmem:[%s17334_s2] sm:$0x3] }
  0x15   : > { %v1893_v1 = vsel %vm707_vm0, %v10918_v0, 0  ;;  %v10885_v3 = vld [vmem:[%s17335_s3 + $0x2] sm:$0x3]  ;;  %v709_v4 = vsel %vm707_vm0, %v609_v2, 0  ;;  %v1287_v6 = vld [vmem:[%s17335_s3] sm:$0x3] }
  0x16   : > { %1902 = vmatpush.bf16.msra.mxu3 %v1893_v1  ;;  %s12916_s17 = scalar_select %p280_p11, %s12799_s24, 1  ;;  %v1515_v5 = vsel %vm707_vm0, %v10885_v3, 0  ;;  %vm494_vm1 = vcmask 1042432   ;;  %718 = vmatpush.bf16.msra.mxu0 %v709_v4  ;;  %v1703_v7 = vsel %vm707_vm0, %v1287_v6, 0  ;;  %vm495_vm2 = vcmask 1046532  }
  0x17   : > { %1524 = vmatpush.bf16.msra.mxu1 %v1515_v5  ;;  %v11049_v8 = vld [vmem:[%s17335_s3 + $0xa] sm:$0x3]  ;;  %v11015_v9 = vld [vmem:[%s17335_s3 + $0x6] sm:$0x3]  ;;  %1712 = vmatpush.bf16.msra.mxu2 %v1703_v7  ;;  %v11210_v12 = vld [vmem:[%s17335_s3 + $0xc] sm:$0x3] }
  0x18   : > { %s12453_s8 = smul.u32 1456, %s12916_s17  ;;  %v2591_v10 = vsel %vm707_vm0, %v11049_v8, 0  ;;  %v2243_v11 = vsel %vm707_vm0, %v11015_v9, 0  ;;  %v3038_v13 = vsel %vm707_vm0, %v11210_v12, 0  ;;  %v11032_v14 = vld [vmem:[%s17335_s3 + $0x8] sm:$0x3]  ;;  %vm12946_vm4 = vmor %vm494_vm1, %vm495_vm2  ;;  %s282_s30 = scalar_lea.vmem %s17332_s0, %s12916_s17 }
  0x19   : > { %vm658_vm3 = vcmask 31744   ;;  %v2369_v16 = vsel %vm707_vm0, %v11032_v14, 0  ;;  %vm1173_vm5 = vcmask 1045508   ;;  %v17376_v30 = vmov 0  ;;  %s12809_s12 = smov 8   ;;  %s277_s13 = sand.u32 1, %s12791_s22  }
  0x1a   : > { %2252 = vmatpush.bf16.msrb.mxu0 %v2243_v11  ;;  %s12943_s18 = scalar_lea.vmem %s17333_s1, %s12453_s8  ;;  %3047 = vmatpush.bf16.msrb.mxu3 %v3038_v13  ;;  %vm12962_vm6 = vmor %vm707_vm0, %vm1173_vm5  ;;  %s10643_s14 = sshll.u32 %s277_s13, 8  ;;  %vm300_vm7 = vcmask 64512   ;;  %vm1026_vm8 = vcmask 130112   ;;  %vm4137_vm9 = vcmask 1040384   ;;  %vm4138_vm10 = vcmask 1044484  }
  0x1b   : > { %2600 = vmatpush.bf16.msrb.mxu2 %v2591_v10  ;;  %v12388_v17 = vld [vmem:[%s12943_s18 + $0x15c] sm:$0xff]  ;;  %v10648_v19 = vld [vmem:[%s12943_s18 + $0x204] sm:$0xf]  ;;  %2378 = vmatpush.bf16.msrb.mxu1 %v2369_v16  ;;  %v10649_v20 = vld [vmem:[%s12943_s18 + $0x208] sm:$0xf]  ;;  %v17377_v30 = vsel %vm12962_vm6, 4294967295, %v17376_v30 }
  0x1c   : > { %v10647_v18 = vld [vmem:[%s12943_s18 + $0x200] sm:$0xf]  ;;  %v499_v22 = vrot.slane %v10648_v19, 5  ;;  %10983 = vmatmul.msk.bf16.vlgmr.msra.gmra.mxu3 %vm658_vm3, %v12388_v17  ;;  %v502_v23 = vrot.slane %v10649_v20, 5  ;;  %v10790_v24 = vld [vmem:[%s12943_s18 + $0x158] sm:$0xf]  ;;  %vm14172_vm11 = vmor %vm4137_vm9, %vm4138_vm10 }
  0x1d   : > { %v10757_v21 = vrot.slane %v10647_v18, 9  ;;  %v10791_v27 = vld [vmem:[%s12943_s18 + $0x15c] sm:$0xf]  ;;  %v10792_v28 = vld [vmem:[%s12943_s18 + $0x160] sm:$0xf]  ;;  %v10869_v29 = vrot.slane %v10790_v24, 9 }
  0x1e   : > { %v501_v26 = vrot.slane %v499_v22, 4  ;;  %17378 = vst [vmem:[#allocation5_spill] sm:$0xff] %v17377_v30  ;;  %v1306_v32 = vrot.slane %v10791_v27, 5  ;;  %v1309_v33 = vrot.slane %v10792_v28, 5  ;;  %v10789_v34 = vld [vmem:[%s12943_s18 + $0x154] sm:$0xf] }
  0x1f   : > { %v500_v25 = vsel %vm12946_vm4, %v10757_v21, %v499_v22  ;;  %v10853_v36 = vrot.slane %v10789_v34, 10  ;;  %v1177_v37 = vrot.slane %v10790_v24, 6  ;;  %v1180_v38 = vrot.slane %v10791_v27, 6  ;;  %v10655_v42 = vld [vmem:[%s12943_s18 + $0x220] sm:$0xf]  ;;  %v12389_v2 = vld [vmem:[%s12943_s18 + $0x178] sm:$0xff] }
  0x20   : > { %v610_v31 = vunpack.c.l.b16 %v500_v25  ;;  %v503_v35 = vsel %vm12946_vm4, %v501_v26, %v502_v23  ;;  %v1307_v40 = vsel %vm12946_vm4, %v10869_v29, %v1306_v32  ;;  %v1308_v41 = vrot.slane %v1306_v32, 4  ;;  %v10654_v46 = vld [vmem:[%s12943_s18 + $0x21c] sm:$0xf]  ;;  %v10795_v48 = vld [vmem:[%s12943_s18 + $0x178] sm:$0xf]  ;;  %s13452_s19 = scalar_lea.vmem [#allocation2], %s10643_s14 }
  0x21   : > { %v611_v39 = vunpack.c.l.b16 %v503_v35  ;;  %v1418_v43 = vunpack.c.l.b16 %v1307_v40  ;;  %v1178_v44 = vsel %vm12962_vm6, %v10853_v36, %v1177_v37  ;;  %v1179_v45 = vrot.slane %v1177_v37, 4  ;;  %v10656_v52 = vld [vmem:[%s12943_s18 + $0x224] sm:$0xf]  ;;  %v10794_v57 = vld [vmem:[%s12943_s18 + $0x174] sm:$0xf]  ;;  %s12810_s17 = smov 16  }
  0x22   : > { %v506_v47 = vrot.slane %v10655_v42, 5  ;;  %v1310_v50 = vsel %vm12946_vm4, %v1308_v41, %v1309_v33  ;;  %v1606_v51 = vunpack.c.l.b16 %v1178_v44  ;;  %v10758_v56 = vrot.slane %v10654_v46, 9  ;;  %v10796_v62 = vld [vmem:[%s12943_s18 + $0x17c] sm:$0xf]  ;;  %v10793_v0 = vld [vmem:[%s12943_s18 + $0x170] sm:$0xf] }
  0x23   : > { %v12976_v49 = vpack.c.b16 %v611_v39, %v610_v31  ;;  %v1419_v53 = vunpack.c.l.b16 %v1310_v50  ;;  %v1181_v54 = vsel %vm12962_vm6, %v1179_v45, %v1180_v38  ;;  %v1313_v58 = vrot.slane %v10795_v48, 5  ;;  %v10662_v18 = vld [vmem:[%s12943_s18 + $0x23c] sm:$0xf]  ;;  %v10661_v24 = vld [vmem:[%s12943_s18 + $0x238] sm:$0xf]  ;;  %s12811_s20 = smov 24  }
  0x24   : > { %v1607_v55 = vunpack.c.l.b16 %v1181_v54  ;;  %v508_v60 = vrot.slane %v506_v47, 4  ;;  %v509_v61 = vrot.slane %v10656_v52, 5  ;;  %v1184_v1 = vrot.slane %v10794_v57, 6  ;;  %v10799_v26 = vld [vmem:[%s12943_s18 + $0x194] sm:$0xf]  ;;  %s10544_s15 = sshll.u32 %s13452_s19, 4  ;;  %s10545_s15 = int_to_ptr.vmem [resolvable:$true] %s10544_s15 }
  0x25   : > { %17379 = vst [vmem:[#allocation6_spill] sm:$0xff] %v12976_v49  ;;  %10773 = vmatmul.msk.bf16.vlgmr.msra.gmra.mxu0 %vm658_vm3, %v12976_v49  ;;  %v1450_v59 = vpack.c.b16 %v1419_v53, %v1418_v43  ;;  %v507_v3 = vsel %vm12946_vm4, %v10758_v56, %v506_v47  ;;  %v10870_v4 = vrot.slane %v10794_v57, 9  ;;  %v1315_v5 = vrot.slane %v1313_v58, 4  ;;  %v10663_v27 = vld [vmem:[%s12943_s18 + $0x240] sm:$0xf]  ;;  %v12390_v39 = vld [vmem:[%s12943_s18 + $0x194] sm:$0xff] }
  0x26   : > { %v1638_v63 = vpack.c.b16 %v1607_v55, %v1606_v51  ;;  %v1316_v6 = vrot.slane %v10796_v62, 5  ;;  %v510_v7 = vsel %vm12946_vm4, %v508_v60, %v509_v61  ;;  %v10854_v8 = vrot.slane %v10793_v0, 10  ;;  %v10798_v28 = vld [vmem:[%s12943_s18 + $0x190] sm:$0xf]  ;;  %v10800_v36 = vld [vmem:[%s12943_s18 + $0x198] sm:$0xf] }
  0x27   : > { %10886 = vmatmul.msk.bf16.vlgmr.msra.gmra.mxu1 %vm658_vm3, %v1450_v59  ;;  %v1186_v9 = vrot.slane %v1184_v1, 4  ;;  %v1187_v10 = vrot.slane %v10795_v48, 6  ;;  %v612_v11 = vunpack.c.l.b16 %v507_v3  ;;  %v613_v12 = vunpack.c.l.b16 %v510_v7  ;;  %v10797_v38 = vld [vmem:[%s12943_s18 + $0x18c] sm:$0xf]  ;;  %v10669_v55 = vld [vmem:[%s12943_s18 + $0x258] sm:$0xf] }
  0x28   : > { %10902 = vmatmul.msk.bf16.vlgmr.msra.gmra.mxu2 %vm658_vm3, %v1638_v63  ;;  %v1314_v13 = vsel %vm12946_vm4, %v10870_v4, %v1313_v58  ;;  %v1317_v14 = vsel %vm12946_vm4, %v1315_v5, %v1316_v6  ;;  %v1185_v16 = vsel %vm12962_vm6, %v10854_v8, %v1184_v1  ;;  %v513_v25 = vrot.slane %v10662_v18, 5  ;;  %v10668_v61 = vld [vmem:[%s12943_s18 + $0x254] sm:$0xf]  ;;  %v10803_v63 = vld [vmem:[%s12943_s18 + $0x1b0] sm:$0xf] }
  0x29   : > { %v1188_v17 = vsel %vm12962_vm6, %v1186_v9, %v1187_v10  ;;  %v1420_v19 = vunpack.c.l.b16 %v1314_v13  ;;  %v1421_v20 = vunpack.c.l.b16 %v1317_v14  ;;  %v13005_v21 = vpack.c.b16 %v613_v12, %v612_v11  ;;  %v10670_v0 = vld [vmem:[%s12943_s18 + $0x25c] sm:$0xf]  ;;  %v10802_v1 = vld [vmem:[%s12943_s18 + $0x1ac] sm:$0xf]  ;;  %v10804_v8 = vld [vmem:[%s12943_s18 + $0x1b4] sm:$0xf] }
  0x2a   : > { %v1608_v22 = vunpack.c.l.b16 %v1185_v16  ;;  %v1609_v23 = vunpack.c.l.b16 %v1188_v17  ;;  %v10759_v32 = vrot.slane %v10661_v24, 9  ;;  %v1320_v33 = vrot.slane %v10799_v26, 5  ;;  %v10801_v10 = vld [vmem:[%s12943_s18 + $0x1a8] sm:$0xf]  ;;  %v12391_v11 = vld [vmem:[%s12943_s18 + $0x1b0] sm:$0xff] }
  0x2b   : > { %17380 = vst [vmem:[#allocation7_spill] sm:$0xff] %v13005_v21  ;;  %v1451_v29 = vpack.c.b16 %v1421_v20, %v1420_v19  ;;  %v515_v34 = vrot.slane %v513_v25, 4  ;;  %v516_v35 = vrot.slane %v10663_v27, 5  ;;  %v1191_v37 = vrot.slane %v10798_v28, 6  ;;  %v11351_v30 = vld [vmem:[%s12943_s18 + $0xd4] sm:$0xf] }
  0x2c   : > { %10984 = vmatmul.msk.bf16.gmra.mxu3 %vm658_vm3, %v12389_v2  ;;  %v1639_v31 = vpack.c.b16 %v1609_v23, %v1608_v22  ;;  %v514_v40 = vsel %vm12946_vm4, %v10759_v32, %v513_v25  ;;  %v10871_v41 = vrot.slane %v10798_v28, 9  ;;  %v1322_v42 = vrot.slane %v1320_v33, 4  ;;  %v10676_v28 = vld [vmem:[%s12943_s18 + $0x274] sm:$0xf] }
  0x2d   : > { %v1323_v43 = vrot.slane %v10800_v36, 5  ;;  %v517_v44 = vsel %vm12946_vm4, %v515_v34, %v516_v35  ;;  %v10855_v45 = vrot.slane %v10797_v38, 10  ;;  %v1193_v46 = vrot.slane %v1191_v37, 4  ;;  %v10675_v35 = vld [vmem:[%s12943_s18 + $0x270] sm:$0xf] }
  0x2e   : > { %v1194_v47 = vrot.slane %v10799_v26, 6  ;;  %v614_v48 = vunpack.c.l.b16 %v514_v40  ;;  %v615_v50 = vunpack.c.l.b16 %v517_v44  ;;  %v1321_v51 = vsel %vm12946_vm4, %v10871_v41, %v1320_v33  ;;  %v10677_v38 = vld [vmem:[%s12943_s18 + $0x278] sm:$0xf] }
  0x2f   : > { %v1324_v52 = vsel %vm12946_vm4, %v1322_v42, %v1323_v43  ;;  %v1192_v53 = vsel %vm12962_vm6, %v10855_v45, %v1191_v37  ;;  %v1422_v56 = vunpack.c.l.b16 %v1321_v51  ;;  %v520_v62 = vrot.slane %v10669_v55, 5  ;;  %v10807_v37 = vld [vmem:[%s12943_s18 + $0x1cc] sm:$0xf] }
  0x30   : > { %v1195_v54 = vsel %vm12962_vm6, %v1193_v46, %v1194_v47  ;;  %v1423_v57 = vunpack.c.l.b16 %v1324_v52  ;;  %v13032_v58 = vpack.c.b16 %v615_v50, %v614_v48  ;;  %v1610_v59 = vunpack.c.l.b16 %v1192_v53  ;;  %v10808_v46 = vld [vmem:[%s12943_s18 + $0x1d0] sm:$0xf]  ;;  %v10805_v48 = vld [vmem:[%s12943_s18 + $0x1c4] sm:$0xf] }
  0x31   : > { %v1611_v60 = vunpack.c.l.b16 %v1195_v54  ;;  %v10760_v4 = vrot.slane %v10668_v61, 9  ;;  %v1327_v5 = vrot.slane %v10803_v63, 5  ;;  %v522_v6 = vrot.slane %v520_v62, 4  ;;  %v12392_v50 = vld [vmem:[%s12943_s18 + $0x1cc] sm:$0xff] }
  0x32   : > { %17381 = vst [vmem:[#allocation8_spill] sm:$0xff] %v13032_v58  ;;  %v1452_v2 = vpack.c.b16 %v1423_v57, %v1422_v56  ;;  %v523_v7 = vrot.slane %v10670_v0, 5  ;;  %v1198_v9 = vrot.slane %v10802_v1, 6  ;;  %v10872_v13 = vrot.slane %v10802_v1, 9 }
  0x33   : > { %v1640_v3 = vpack.c.b16 %v1611_v60, %v1610_v59  ;;  %v521_v12 = vsel %vm12946_vm4, %v10760_v4, %v520_v62  ;;  %v1329_v14 = vrot.slane %v1327_v5, 4  ;;  %v1330_v16 = vrot.slane %v10804_v8, 5  ;;  %v10682_v8 = vld [vmem:[%s12943_s18 + $0x28c] sm:$0xf] }
  0x34   : > { %v524_v17 = vsel %vm12946_vm4, %v522_v6, %v523_v7  ;;  %v10856_v18 = vrot.slane %v10801_v10, 10  ;;  %v1200_v19 = vrot.slane %v1198_v9, 4  ;;  %v1201_v20 = vrot.slane %v10803_v63, 6  ;;  %v10811_v10 = vld [vmem:[%s12943_s18 + $0x1e8] sm:$0xf] }
  0x35   : > { %10774 = vmatmul.msk.bf16.gmra.mxu0 %vm658_vm3, %v13005_v21  ;;  %v616_v22 = vunpack.c.l.b16 %v521_v12  ;;  %v617_v23 = vunpack.c.l.b16 %v524_v17  ;;  %v1328_v24 = vsel %vm12946_vm4, %v10872_v13, %v1327_v5  ;;  %v1331_v25 = vsel %vm12946_vm4, %v1329_v14, %v1330_v16  ;;  %v10810_v12 = vld [vmem:[%s12943_s18 + $0x1e4] sm:$0xf] }
  0x36   : > { %v1199_v26 = vsel %vm12962_vm6, %v10856_v18, %v1198_v9  ;;  %v1202_v27 = vsel %vm12962_vm6, %v1200_v19, %v1201_v20  ;;  %v527_v36 = vrot.slane %v10676_v28, 5  ;;  %v10761_v42 = vrot.slane %v10675_v35, 9  ;;  %v10812_v20 = vld [vmem:[%s12943_s18 + $0x1ec] sm:$0xf] }
  0x37   : > { %10887 = vmatmul.msk.bf16.gmra.mxu1 %vm658_vm3, %v1451_v29  ;;  %v1424_v29 = vunpack.c.l.b16 %v1328_v24  ;;  %v13059_v32 = vpack.c.b16 %v617_v23, %v616_v22  ;;  %v1612_v33 = vunpack.c.l.b16 %v1199_v26  ;;  %v1613_v34 = vunpack.c.l.b16 %v1202_v27  ;;  %v10809_v23 = vld [vmem:[%s12943_s18 + $0x1e0] sm:$0xf]  ;;  %v12393_v24 = vld [vmem:[%s12943_s18 + $0x1e8] sm:$0xff] }
  0x38   : > { %10903 = vmatmul.msk.bf16.gmra.mxu2 %vm658_vm3, %v1639_v31  ;;  %v1425_v31 = vunpack.c.l.b16 %v1331_v25  ;;  %v1334_v43 = vrot.slane %v10807_v37, 5  ;;  %v529_v44 = vrot.slane %v527_v36, 4  ;;  %v530_v45 = vrot.slane %v10677_v38, 5 }
  0x39   : > { %17382 = vst [vmem:[#allocation9_spill] sm:$0xff] %v13059_v32  ;;  %v1641_v41 = vpack.c.b16 %v1613_v34, %v1612_v33  ;;  %v528_v51 = vsel %vm12946_vm4, %v10761_v42, %v527_v36  ;;  %v1337_v54 = vrot.slane %v10808_v46, 5  ;;  %v10857_v56 = vrot.slane %v10805_v48, 10  ;;  %v10689_v48 = vld [vmem:[%s12943_s18 + $0x2a8] sm:$0xf] }
  0x3a   : > { %v1453_v40 = vpack.c.b16 %v1425_v31, %v1424_v29  ;;  %v1336_v53 = vrot.slane %v1334_v43, 4  ;;  %v531_v55 = vsel %vm12946_vm4, %v529_v44, %v530_v45  ;;  %v1208_v59 = vrot.slane %v10807_v37, 6 }
  0x3b   : > { %v618_v60 = vunpack.c.l.b16 %v528_v51  ;;  %v619_v61 = vunpack.c.l.b16 %v531_v55  ;;  %v10762_v16 = vrot.slane %v10682_v8, 9  ;;  %v1341_v17 = vrot.slane %v10811_v10, 5  ;;  %v10691_v51 = vld [vmem:[%s12943_s18 + $0x2b0] sm:$0xf] }
  0x3c   : > { %10985 = vmatmul.msk.bf16.gmra.mxu3 %vm658_vm3, %v12390_v39  ;;  %v10806_v39 = vld [vmem:[%s12943_s18 + $0x1c8] sm:$0xf]  ;;  %v1338_v63 = vsel %vm12946_vm4, %v1336_v53, %v1337_v54  ;;  %v1212_v22 = vrot.slane %v10810_v12, 6  ;;  %v10874_v26 = vrot.slane %v10810_v12, 9  ;;  %v1344_v28 = vrot.slane %v10812_v20, 5 }
  0x3d   : > { %v1205_v47 = vrot.slane %v10806_v39, 6  ;;  %v10873_v52 = vrot.slane %v10806_v39, 9  ;;  %v1427_v4 = vunpack.c.l.b16 %v1338_v63  ;;  %v13086_v5 = vpack.c.b16 %v619_v61, %v618_v60 }
  0x3e   : > { %v1343_v27 = vrot.slane %v1341_v17, 4  ;;  %v10858_v31 = vrot.slane %v10809_v23, 10  ;;  %v1214_v33 = vrot.slane %v1212_v22, 4  ;;  %v1215_v34 = vrot.slane %v10811_v10, 6 }
  0x3f   : > { %v1207_v57 = vrot.slane %v1205_v47, 4  ;;  %v1335_v62 = vsel %vm12946_vm4, %v10873_v52, %v1334_v43  ;;  %v1206_v0 = vsel %vm12962_vm6, %v10857_v56, %v1205_v47  ;;  %17383 = vst [vmem:[#allocation10_spill] sm:$0xff] %v13086_v5  ;;  %v1342_v37 = vsel %vm12946_vm4, %v10874_v26, %v1341_v17  ;;  %v10815_v47 = vld [vmem:[%s12943_s18 + $0x204] sm:$0xf]  ;;  %v10814_v52 = vld [vmem:[%s12943_s18 + $0x200] sm:$0xf] }
  0x40   : > { %v1614_v6 = vunpack.c.l.b16 %v1206_v0  ;;  %v1345_v38 = vsel %vm12946_vm4, %v1343_v27, %v1344_v28  ;;  %v1213_v39 = vsel %vm12962_vm6, %v10858_v31, %v1212_v22  ;;  %v1428_v42 = vunpack.c.l.b16 %v1342_v37  ;;  %v10819_v26 = vld [vmem:[%s12943_s18 + $0x220] sm:$0xf]  ;;  %v10818_v27 = vld [vmem:[%s12943_s18 + $0x21c] sm:$0xf]  ;;  %v10820_v37 = vld [vmem:[%s12943_s18 + $0x224] sm:$0xf] }
  0x41   : > { %v1209_v1 = vsel %vm12962_vm6, %v1207_v57, %v1208_v59  ;;  %v1429_v43 = vunpack.c.l.b16 %v1345_v38  ;;  %v1616_v45 = vunpack.c.l.b16 %v1213_v39  ;;  %v1348_v54 = vrot.slane %v10815_v47, 5  ;;  %v10816_v57 = vld [vmem:[%s12943_s18 + $0x208] sm:$0xf]  ;;  %v10817_v38 = vld [vmem:[%s12943_s18 + $0x218] sm:$0xf] }
  0x42   : > { %v1615_v7 = vunpack.c.l.b16 %v1209_v1  ;;  %v10763_v56 = vrot.slane %v10689_v48, 9  ;;  %v544_v60 = vrot.slane %v10691_v51, 5  ;;  %v1219_v61 = vrot.slane %v10814_v52, 6 }
  0x43   : > { %v1455_v53 = vpack.c.b16 %v1429_v43, %v1428_v42  ;;  %v10875_v63 = vrot.slane %v10814_v52, 9  ;;  %v1350_v0 = vrot.slane %v1348_v54, 4  ;;  %v1351_v1 = vrot.slane %v10816_v57, 5  ;;  %v12395_v43 = vld [vmem:[%s12943_s18 + $0x220] sm:$0xff] }
  0x44   : > { %v1642_v14 = vpack.c.b16 %v1615_v7, %v1614_v6  ;;  %v1221_v7 = vrot.slane %v1219_v61, 4  ;;  %v1222_v8 = vrot.slane %v10815_v47, 6  ;;  %v1229_v48 = vrot.slane %v10819_v26, 6 }
  0x45   : > { %10775 = vmatmul.msk.bf16.gmra.mxu0 %vm658_vm3, %v13032_v58  ;;  %v1352_v10 = vsel %vm12946_vm4, %v1350_v0, %v1351_v1  ;;  %v10823_v0 = vld [vmem:[%s12943_s18 + $0x23c] sm:$0xf]  ;;  %v10703_v1 = vld [vmem:[%s12943_s18 + $0x2e0] sm:$0xf]  ;;  %vm3959_vm12 = vcmask 195712   ;;  %vm7373_vm13 = vcmask 261312  }
  0x46   : > { %vm10495_vm14 = vcmask 326912  }
  0x47   : > { %10888 = vmatmul.msk.bf16.gmra.mxu1 %vm658_vm3, %v1452_v2  ;;  %v10683_v2 = vld [vmem:[%s12943_s18 + $0x290] sm:$0xf] }
  0x48   : > { %10904 = vmatmul.msk.bf16.gmra.mxu2 %vm658_vm3, %v1640_v3  ;;  %v1426_v3 = vunpack.c.l.b16 %v1335_v62  ;;  %v534_v9 = vrot.slane %v10683_v2, 5  ;;  %v10813_v62 = vld [vmem:[%s12943_s18 + $0x1fc] sm:$0xf]  ;;  %v12394_v2 = vld [vmem:[%s12943_s18 + $0x204] sm:$0xff] }
  0x49   : > { %v10859_v6 = vrot.slane %v10813_v62, 10 }
  0x4a   : > { %v1454_v13 = vpack.c.b16 %v1427_v4, %v1426_v3  ;;  %v536_v18 = vrot.slane %v534_v9, 4  ;;  %v535_v25 = vsel %vm12946_vm4, %v10762_v16, %v534_v9  ;;  %v1349_v9 = vsel %vm12946_vm4, %v10875_v63, %v1348_v54 }
  0x4b   : > { %v620_v35 = vunpack.c.l.b16 %v535_v25  ;;  %v1223_v16 = vsel %vm12962_vm6, %v1221_v7, %v1222_v8  ;;  %v1430_v17 = vunpack.c.l.b16 %v1349_v9  ;;  %v10698_v25 = vld [vmem:[%s12943_s18 + $0x2cc] sm:$0xf]  ;;  %v10824_v7 = vld [vmem:[%s12943_s18 + $0x240] sm:$0xf]  ;;  %v1362_v8 = vrot.slane %v10823_v0, 5 }
  0x4c   : > { %10986 = vmatmul.msk.bf16.gmra.mxu3 %vm658_vm3, %v12391_v11  ;;  %v10684_v11 = vld [vmem:[%s12943_s18 + $0x294] sm:$0xf]  ;;  %v1619_v23 = vunpack.c.l.b16 %v1223_v16  ;;  %v10765_v9 = vrot.slane %v10703_v1, 9 }
  0x4d   : > { %v537_v19 = vrot.slane %v10684_v11, 5  ;;  %v1364_v16 = vrot.slane %v1362_v8, 4 }
  0x4f   : > { %v538_v29 = vsel %vm12946_vm4, %v536_v18, %v537_v19  ;;  %v1431_v18 = vunpack.c.l.b16 %v1352_v10 }
  0x50   : > { %v621_v36 = vunpack.c.l.b16 %v538_v29 }
  0x51   : > { %v1456_v28 = vpack.c.b16 %v1431_v18, %v1430_v17  ;;  %v1365_v17 = vrot.slane %v10824_v7, 5 }
  0x52   : > { %v13113_v44 = vpack.c.b16 %v621_v36, %v620_v35  ;;  %v1226_v36 = vrot.slane %v10818_v27, 6 }
  0x54   : > { %17384 = vst [vmem:[#allocation11_spill] sm:$0xff] %v13113_v44  ;;  %v1228_v47 = vrot.slane %v1226_v36, 4 }
  0x55   : > { %10776 = vmatmul.msk.bf16.gmra.mxu0 %vm658_vm3, %v13059_v32 }
  0x57   : > { %10889 = vmatmul.msk.bf16.gmra.mxu1 %vm658_vm3, %v1453_v40  ;;  %v1216_v40 = vsel %vm12962_vm6, %v1214_v33, %v1215_v34  ;;  %v551_v33 = vrot.slane %v10698_v25, 5  ;;  %v1355_v34 = vrot.slane %v10819_v26, 5  ;;  %v1236_v25 = vrot.slane %v10823_v0, 6  ;;  %v294_v26 = vld [vmem:[%s17336_s4] sm:$0xf] }
  0x58   : > { %10905 = vmatmul.msk.bf16.gmra.mxu2 %vm658_vm3, %v1641_v41  ;;  %v10690_v41 = vld [vmem:[%s12943_s18 + $0x2ac] sm:$0xf]  ;;  %v1617_v46 = vunpack.c.l.b16 %v1216_v40 }
  0x59   : > { %v1357_v42 = vrot.slane %v1355_v34, 4 }
  0x5a   : > { %v1643_v55 = vpack.c.b16 %v1617_v46, %v1616_v45  ;;  %v1358_v45 = vrot.slane %v10820_v37, 5  ;;  %v10860_v46 = vrot.slane %v10817_v38, 10  ;;  %v13204_v37 = vperm.slane %v294_v26, 0 }
  0x5c   : > { %10987 = vmatmul.msk.bf16.gmra.mxu3 %vm658_vm3, %v12392_v50  ;;  %v541_v50 = vrot.slane %v10690_v41, 5  ;;  %v10876_v41 = vrot.slane %v10818_v27, 9  ;;  %v1227_v54 = vsel %vm12962_vm6, %v10860_v46, %v1226_v36  ;;  %v10711_v36 = vld [vmem:[%s12943_s18 + $0x300] sm:$0xf] }
  0x5d   : > { %v562_v46 = vrot.slane %v10711_v36, 5 }
  0x5e   : > { %v543_v59 = vrot.slane %v541_v50, 4  ;;  %v542_v3 = vsel %vm12946_vm4, %v10763_v56, %v541_v50  ;;  %v1356_v52 = vsel %vm12946_vm4, %v10876_v41, %v1355_v34  ;;  %v10704_v56 = vld [vmem:[%s12943_s18 + $0x2e4] sm:$0xf] }
  0x5f   : > { %v622_v11 = vunpack.c.l.b16 %v542_v3  ;;  %v1432_v57 = vunpack.c.l.b16 %v1356_v52  ;;  %v555_v63 = vrot.slane %v10704_v56, 5  ;;  %v10822_v3 = vld [vmem:[%s12943_s18 + $0x238] sm:$0xf]  ;;  %v10712_v52 = vld [vmem:[%s12943_s18 + $0x304] sm:$0xf]  ;;  %v564_v0 = vrot.slane %v562_v46, 4 }
  0x60   : > { %v545_v4 = vsel %vm12946_vm4, %v543_v59, %v544_v60  ;;  %v1620_v60 = vunpack.c.l.b16 %v1227_v54  ;;  %v10828_v56 = vld [vmem:[%s12943_s18 + $0x25c] sm:$0xf]  ;;  %v565_v1 = vrot.slane %v10712_v52, 5  ;;  %v10719_v52 = vld [vmem:[%s12943_s18 + $0x320] sm:$0xf] }
  0x61   : > { %v623_v12 = vunpack.c.l.b16 %v545_v4  ;;  %v557_v10 = vrot.slane %v555_v63, 4 }
  0x63   : > { %v13140_v20 = vpack.c.b16 %v623_v12, %v622_v11  ;;  %v10821_v12 = vld [vmem:[%s12943_s18 + $0x234] sm:$0xf] }
  0x64   : > { %v10861_v18 = vrot.slane %v10821_v12, 10  ;;  %v566_v12 = vsel %vm12946_vm4, %v564_v0, %v565_v1  ;;  %v572_v1 = vrot.slane %v10719_v52, 5 }
  0x65   : > { %10777 = vmatmul.msk.bf16.gmra.mxu0 %vm658_vm3, %v13086_v5  ;;  %17385 = vst [vmem:[#allocation12_spill] sm:$0xff] %v13140_v20 }
  0x67   : > { %10890 = vmatmul.msk.bf16.gmra.mxu1 %vm658_vm3, %v1454_v13  ;;  %v10697_v13 = vld [vmem:[%s12943_s18 + $0x2c8] sm:$0xf] }
  0x68   : > { %10906 = vmatmul.msk.bf16.gmra.mxu2 %vm658_vm3, %v1642_v14  ;;  %v1220_v14 = vsel %vm12962_vm6, %v10859_v6, %v1219_v61  ;;  %v548_v19 = vrot.slane %v10697_v13, 5  ;;  %v1233_v13 = vrot.slane %v10822_v3, 6 }
  0x69   : > { %v1618_v22 = vunpack.c.l.b16 %v1220_v14  ;;  %v10877_v14 = vrot.slane %v10822_v3, 9 }
  0x6a   : > { %v550_v31 = vrot.slane %v548_v19, 4 }
  0x6b   : > { %v1644_v35 = vpack.c.b16 %v1619_v23, %v1618_v22  ;;  %v556_v22 = vsel %vm12946_vm4, %v10765_v9, %v555_v63 }
  0x6c   : > { %10988 = vmatmul.msk.bf16.gmra.mxu3 %vm658_vm3, %v12393_v24  ;;  %v10696_v24 = vld [vmem:[%s12943_s18 + $0x2c4] sm:$0xf]  ;;  %v552_v40 = vsel %vm12946_vm4, %v550_v31, %v551_v33  ;;  %v626_v27 = vunpack.c.l.b16 %v556_v22  ;;  %v1366_v31 = vsel %vm12946_vm4, %v1364_v16, %v1365_v17  ;;  %v1234_v33 = vsel %vm12962_vm6, %v10861_v18, %v1233_v13 }
  0x6d   : > { %v10764_v29 = vrot.slane %v10696_v24, 9  ;;  %v625_v51 = vunpack.c.l.b16 %v552_v40  ;;  %v1235_v24 = vrot.slane %v1233_v13, 4  ;;  %v1435_v40 = vunpack.c.l.b16 %v1366_v31  ;;  %v10718_v31 = vld [vmem:[%s12943_s18 + $0x31c] sm:$0xf] }
  0x6e   : > { %v1622_v41 = vunpack.c.l.b16 %v1234_v33  ;;  %v629_v22 = vunpack.c.l.b16 %v566_v12 }
  0x6f   : > { %v549_v39 = vsel %vm12946_vm4, %v10764_v29, %v548_v19  ;;  %v12396_v19 = vld [vmem:[%s12943_s18 + $0x23c] sm:$0xff]  ;;  %v1363_v29 = vsel %vm12946_vm4, %v10877_v14, %v1362_v8  ;;  %v1237_v34 = vsel %vm12962_vm6, %v1235_v24, %v1236_v25  ;;  %v1372_v8 = vrot.slane %v10828_v56, 5 }
  0x70   : > { %v624_v50 = vunpack.c.l.b16 %v549_v39  ;;  %v1434_v39 = vunpack.c.l.b16 %v1363_v29 }
  0x72   : > { %v13167_v62 = vpack.c.b16 %v625_v51, %v624_v50  ;;  %v10710_v51 = vld [vmem:[%s12943_s18 + $0x2fc] sm:$0xf]  ;;  %v1458_v54 = vpack.c.b16 %v1435_v40, %v1434_v39 }
  0x73   : > { %v10766_v63 = vrot.slane %v10710_v51, 9 }
  0x74   : > { %17386 = vst [vmem:[#allocation13_spill] sm:$0xff] %v13167_v62 }
  0x75   : > { %10778 = vmatmul.msk.bf16.gmra.mxu0 %vm658_vm3, %v13113_v44 }
  0x77   : > { %10891 = vmatmul.msk.bf16.gmra.mxu1 %vm658_vm3, %v1455_v53  ;;  %v1359_v53 = vsel %vm12946_vm4, %v1357_v42, %v1358_v45  ;;  %v1623_v42 = vunpack.c.l.b16 %v1237_v34 }
  0x78   : > { %10907 = vmatmul.msk.bf16.gmra.mxu2 %vm658_vm3, %v1643_v55  ;;  %v1230_v55 = vsel %vm12962_vm6, %v1228_v47, %v1229_v48  ;;  %v1433_v59 = vunpack.c.l.b16 %v1359_v53  ;;  %v10826_v47 = vld [vmem:[%s12943_s18 + $0x254] sm:$0xf]  ;;  %v10827_v48 = vld [vmem:[%s12943_s18 + $0x258] sm:$0xf] }
  0x79   : > { %v1621_v61 = vunpack.c.l.b16 %v1230_v55  ;;  %v1646_v55 = vpack.c.b16 %v1623_v42, %v1622_v41  ;;  %v1243_v14 = vrot.slane %v10827_v48, 6  ;;  %v10830_v42 = vld [vmem:[%s12943_s18 + $0x270] sm:$0xf] }
  0x7a   : > { %v1457_v4 = vpack.c.b16 %v1433_v59, %v1432_v57  ;;  %v1369_v57 = vrot.slane %v10827_v48, 5  ;;  %v1240_v59 = vrot.slane %v10826_v47, 6  ;;  %v569_v48 = vrot.slane %v10718_v31, 5 }
  0x7b   : > { %v1645_v6 = vpack.c.b16 %v1621_v61, %v1620_v60 }
  0x7c   : > { %10989 = vmatmul.msk.bf16.gmra.mxu3 %vm658_vm3, %v12394_v2  ;;  %v10705_v2 = vld [vmem:[%s12943_s18 + $0x2e8] sm:$0xf]  ;;  %v1371_v7 = vrot.slane %v1369_v57, 4  ;;  %v1242_v13 = vrot.slane %v1240_v59, 4  ;;  %v571_v0 = vrot.slane %v569_v48, 4 }
  0x7d   : > { %v558_v11 = vrot.slane %v10705_v2, 5  ;;  %v10825_v2 = vld [vmem:[%s12943_s18 + $0x250] sm:$0xf] }
  0x7e   : > { %v10862_v9 = vrot.slane %v10825_v2, 10  ;;  %v1373_v24 = vsel %vm12946_vm4, %v1371_v7, %v1372_v8  ;;  %v1244_v29 = vsel %vm12962_vm6, %v1242_v13, %v1243_v14  ;;  %v10832_v2 = vld [vmem:[%s12943_s18 + $0x278] sm:$0xf]  ;;  %v10879_v7 = vrot.slane %v10830_v42, 9 }
  0x7f   : > { %v559_v23 = vsel %vm12946_vm4, %v557_v10, %v558_v11  ;;  %v12397_v10 = vld [vmem:[%s12943_s18 + $0x258] sm:$0xff]  ;;  %v563_v11 = vsel %vm12946_vm4, %v10766_v63, %v562_v46  ;;  %v1625_v41 = vunpack.c.l.b16 %v1244_v29 }
  0x80   : > { %v12398_v13 = vld [vmem:[%s12943_s18 + $0x274] sm:$0xff] }
  0x85   : > { %10779 = vmatmul.msk.bf16.gmra.mxu0 %vm658_vm3, %v13140_v20 }
  0x87   : > { %10892 = vmatmul.msk.bf16.gmra.mxu1 %vm658_vm3, %v1456_v28  ;;  %v627_v28 = vunpack.c.l.b16 %v559_v23 }
  0x88   : > { %10908 = vmatmul.msk.bf16.gmra.mxu2 %vm658_vm3, %v1644_v35  ;;  %v295_v35 = vld [vmem:[%s17337_s5] sm:$0xf] }
  0x89   : > { %v13208_v45 = vperm.slane %v295_v35, 0  ;;  %v1437_v35 = vunpack.c.l.b16 %v1373_v24 }
  0x8c   : > { %10990 = vmatmul.msk.bf16.gmra.mxu3 %vm658_vm3, %v12395_v43  ;;  %v13206_v43 = vpack.c.b16 %v627_v28, %v626_v27  ;;  %v1241_v28 = vsel %vm12962_vm6, %v10862_v9, %v1240_v59  ;;  %v1247_v59 = vrot.slane %v10830_v42, 6 }
  0x8d   : > { %v1624_v40 = vunpack.c.l.b16 %v1241_v28 }
  0x8e   : > { %17387 = vst [vmem:[#allocation14_spill] sm:$0xff] %v13206_v43 }
  0x95   : > { %10780 = vmatmul.msk.bf16.gmra.mxu0 %vm658_vm3, %v13167_v62 }
  0x97   : > { %10893 = vmatmul.msk.bf16.gmra.mxu1 %vm658_vm3, %v1457_v4 }
  0x98   : > { %10909 = vmatmul.msk.bf16.gmra.mxu2 %vm658_vm3, %v1645_v6  ;;  %v10878_v6 = vrot.slane %v10826_v47, 9  ;;  %v10717_v47 = vld [vmem:[%s12943_s18 + $0x318] sm:$0xf] }
  0x99   : > { %v10767_v56 = vrot.slane %v10717_v47, 9 }
  0x9a   : > { %v1370_v23 = vsel %vm12946_vm4, %v10878_v6, %v1369_v57 }
  0x9b   : > { %v1436_v34 = vunpack.c.l.b16 %v1370_v23  ;;  %v570_v14 = vsel %vm12946_vm4, %v10767_v56, %v569_v48  ;;  %v10835_v56 = vld [vmem:[%s12943_s18 + $0x290] sm:$0xf] }
  0x9c   : > { %10991 = vmatmul.msk.bf16.gmra.mxu3 %vm658_vm3, %v12396_v19  ;;  %v628_v19 = vunpack.c.l.b16 %v563_v11 }
  0x9e   : > { %v13246_v46 = vpack.c.b16 %v629_v22, %v628_v19 }
  0x9f   : > { %v1904_v38 = vpop.f32.mrf.mxu3 }
  0xa0   : > { %17388 = vst [vmem:[#allocation15_spill] sm:$0xff] %v13246_v46 }
  0xa2   : > { %v720_v50 = vpop.f32.mrf.mxu0 }
  0xa3   : > { %v801_v53 = vmul.f32 %v13204_v37, %v720_v50  ;;  %v10831_v50 = vld [vmem:[%s12943_s18 + $0x274] sm:$0xf] }
  0xa4   : > { %v1526_v60 = vpop.f32.mrf.mxu1  ;;  %v1376_v57 = vrot.slane %v10831_v50, 5 }
  0xa5   : > { %10781 = vmatmul.msk.bf16.gmra.mxu0 %vm658_vm3, %v13206_v43  ;;  %v834_v61 = vadd.f32 %v13208_v45, %v801_v53 }
  0xa6   : > { %v1378_v9 = vrot.slane %v1376_v57, 4 }
  0xa7   : > { %v866_v3 = vmax.f32 %v834_v61, 0.0  ;;  %10894 = vmatmul.msk.bf16.gmra.mxu1 %vm658_vm3, %v1458_v54  ;;  %v13221_v4 = vpop.f32.mrf.mxu3  ;;  %v1459_v54 = vpack.c.b16 %v1437_v35, %v1436_v34  ;;  %v10725_v34 = vld [vmem:[%s12943_s18 + $0x338] sm:$0xf] }
  0xa8   : > { %10910 = vmatmul.msk.bf16.gmra.mxu2 %vm658_vm3, %v1646_v55  ;;  %v1647_v55 = vpack.c.b16 %v1625_v41, %v1624_v40 }
  0xa9   : > { %930 = vrot.lane.b32.xlu0 %v866_v3, %s12809_s12  ;;  %v10829_v3 = vld [vmem:[%s12943_s18 + $0x26c] sm:$0xf] }
  0xaa   : > { %v722_v16 = vpop.f32.mrf.mxu0  ;;  %v10863_v11 = vrot.slane %v10829_v3, 10 }
  0xab   : > { %v802_v17 = vmul.f32 %v13204_v37, %v722_v16  ;;  %v1714_v18 = vpop.f32.mrf.mxu2  ;;  %v573_v16 = vsel %vm12946_vm4, %v571_v0, %v572_v1 }
  0xac   : > { %v1715_v25 = vadd.f32 %v1714_v18, %v1526_v60  ;;  %v1528_v27 = vpop.f32.mrf.mxu1  ;;  %10992 = vmatmul.msk.bf16.gmra.mxu3 %vm658_vm3, %v12397_v10  ;;  %v1379_v10 = vrot.slane %v10832_v2, 5  ;;  %v1250_v18 = vrot.slane %v10831_v50, 6  ;;  %v631_v24 = vunpack.c.l.b16 %v573_v16 }
  0xad   : > { %v835_v26 = vadd.f32 %v13208_v45, %v802_v17  ;;  %v1249_v17 = vrot.slane %v1247_v59, 4  ;;  %v1248_v31 = vsel %vm12962_vm6, %v10863_v11, %v1247_v59 }
  0xae   : > { %v13242_v36 = vadd.f32 %v1904_v38, %v1715_v25  ;;  %v1377_v25 = vsel %vm12946_vm4, %v10879_v7, %v1376_v57  ;;  %v1626_v48 = vunpack.c.l.b16 %v1248_v31  ;;  %v1383_v7 = vrot.slane %v10835_v56, 5 }
  0xaf   : > { %v867_v33 = vmax.f32 %v835_v26, 0.0  ;;  %v1909_v39 = vpop.f32.mrf.mxu3  ;;  %v1380_v26 = vsel %vm12946_vm4, %v1378_v9, %v1379_v10  ;;  %v1438_v40 = vunpack.c.l.b16 %v1377_v25  ;;  %v10833_v9 = vld [vmem:[%s12943_s18 + $0x288] sm:$0xf]  ;;  %v10836_v10 = vld [vmem:[%s12943_s18 + $0x294] sm:$0xf] }
  0xb0   : > { %v1439_v41 = vunpack.c.l.b16 %v1380_v26  ;;  %v10864_v16 = vrot.slane %v10833_v9, 10  ;;  %v1386_v25 = vrot.slane %v10836_v10, 5 }
  0xb1   : > { %932 = vrot.lane.b32.xlu0 %v867_v33, %s12809_s12  ;;  %v1251_v33 = vsel %vm12962_vm6, %v1249_v17, %v1250_v18  ;;  %v1257_v18 = vrot.slane %v10835_v56, 6 }
  0xb2   : > { %v725_v51 = vpop.f32.mrf.mxu0  ;;  %v1627_v50 = vunpack.c.l.b16 %v1251_v33  ;;  %v1460_v59 = vpack.c.b16 %v1439_v41, %v1438_v40 }
  0xb3   : > { %v803_v53 = vmul.f32 %v13204_v37, %v725_v51  ;;  %v1716_v38 = vpop.f32.mrf.mxu2  ;;  %v576_v51 = vrot.slane %v10725_v34, 5 }
  0xb4   : > { %v1717_v60 = vadd.f32 %v1716_v38, %v1528_v27  ;;  %v1531_v61 = vpop.f32.mrf.mxu1 }
  0xb5   : > { %10782 = vmatmul.msk.bf16.gmra.mxu0 %vm658_vm3, %v13246_v46  ;;  %v836_v63 = vadd.f32 %v13208_v45, %v803_v53  ;;  %v10724_v53 = vld [vmem:[%s12943_s18 + $0x334] sm:$0xf] }
  0xb6   : > { %v13261_v12 = vadd.f32 %v13221_v4, %v1717_v60  ;;  %v630_v4 = vunpack.c.l.b16 %v570_v14  ;;  %v1648_v60 = vpack.c.b16 %v1627_v50, %v1626_v48  ;;  %v10732_v50 = vld [vmem:[%s12943_s18 + $0x354] sm:$0xf] }
  0xb7   : > { %v868_v6 = vmax.f32 %v836_v63, 0.0  ;;  %10895 = vmatmul.msk.bf16.gmra.mxu1 %vm658_vm3, %v1459_v54  ;;  %v13258_v8 = vpop.f32.mrf.mxu3  ;;  %v10834_v54 = vld [vmem:[%s12943_s18 + $0x28c] sm:$0xf]  ;;  %v578_v63 = vrot.slane %v576_v51, 4 }
  0xb8   : > { %10911 = vmatmul.msk.bf16.gmra.mxu2 %vm658_vm3, %v1647_v55  ;;  %v13285_v52 = vpack.c.b16 %v631_v24, %v630_v4  ;;  %v10726_v55 = vld [vmem:[%s12943_s18 + $0x33c] sm:$0xf]  ;;  %v1254_v0 = vrot.slane %v10834_v54, 6  ;;  %v1385_v24 = vrot.slane %v1383_v7, 4 }
  0xb9   : > { %934 = vrot.lane.b32.xlu1 %v868_v6, %s12809_s12  ;;  %v579_v6 = vrot.slane %v10726_v55, 5 }
  0xba   : > { %v727_v19 = vpop.f32.mrf.mxu0  ;;  %17389 = vst [vmem:[#allocation16_spill] sm:$0xff] %v13285_v52  ;;  %v1256_v17 = vrot.slane %v1254_v0, 4  ;;  %v1255_v31 = vsel %vm12962_vm6, %v10864_v16, %v1254_v0  ;;  %v1387_v48 = vsel %vm12946_vm4, %v1385_v24, %v1386_v25  ;;  %v10733_v0 = vld [vmem:[%s12943_s18 + $0x358] sm:$0xf] }
  0xbb   : > { %v804_v22 = vmul.f32 %v13204_v37, %v727_v19  ;;  %v1719_v23 = vpop.f32.mrf.mxu2  ;;  %v580_v4 = vsel %vm12946_vm4, %v578_v63, %v579_v6 }
  0xbc   : > { %v1720_v27 = vadd.f32 %v1719_v23, %v1531_v61  ;;  %v1533_v29 = vpop.f32.mrf.mxu1  ;;  %10993 = vmatmul.msk.bf16.gmra.mxu3 %vm658_vm3, %v12398_v13  ;;  %v10768_v61 = vrot.slane %v10724_v53, 9  ;;  %v10880_v13 = vrot.slane %v10834_v54, 9  ;;  %v1258_v33 = vsel %vm12962_vm6, %v1256_v17, %v1257_v18 }
  0xbd   : > { %v837_v28 = vadd.f32 %v13208_v45, %v804_v22  ;;  %v12399_v22 = vld [vmem:[%s12943_s18 + $0x290] sm:$0xff]  ;;  %v1628_v53 = vunpack.c.l.b16 %v1255_v31  ;;  %v1629_v54 = vunpack.c.l.b16 %v1258_v33  ;;  %v586_v17 = vrot.slane %v10733_v0, 5 }
  0xbe   : > { %v13282_v42 = vadd.f32 %v1909_v39, %v1720_v27  ;;  %v577_v23 = vsel %vm12946_vm4, %v10768_v61, %v576_v51  ;;  %v1384_v41 = vsel %vm12946_vm4, %v10880_v13, %v1383_v7  ;;  %v10838_v61 = vld [vmem:[%s12943_s18 + $0x2a8] sm:$0xf] }
  0xbf   : > { %v869_v35 = vmax.f32 %v837_v28, 0.0  ;;  %v1914_v47 = vpop.f32.mrf.mxu3  ;;  %v1440_v56 = vunpack.c.l.b16 %v1384_v41  ;;  %v1261_v10 = vrot.slane %v10838_v61, 6  ;;  %v10881_v24 = vrot.slane %v10838_v61, 9  ;;  %v10739_v61 = vld [vmem:[%s12943_s18 + $0x370] sm:$0xf] }
  0xc1   : > { %936 = vrot.lane.b32.xlu1 %v869_v35, %s12809_s12 }
  0xc2   : > { %v730_v38 = vpop.f32.mrf.mxu0 }
  0xc3   : > { %v805_v57 = vmul.f32 %v13204_v37, %v730_v38  ;;  %v1721_v39 = vpop.f32.mrf.mxu2 }
  0xc4   : > { %v1722_v1 = vadd.f32 %v1721_v39, %v1533_v29  ;;  %v1536_v2 = vpop.f32.mrf.mxu1  ;;  %v633_v29 = vunpack.c.l.b16 %v580_v4 }
  0xc5   : > { %10783 = vmatmul.msk.bf16.gmra.mxu0 %vm658_vm3, %v13285_v52  ;;  %v838_v3 = vadd.f32 %v13208_v45, %v805_v57  ;;  %v1441_v57 = vunpack.c.l.b16 %v1387_v48 }
  0xc6   : > { %v13301_v19 = vadd.f32 %v13258_v8, %v1722_v1  ;;  %v632_v8 = vunpack.c.l.b16 %v577_v23  ;;  %v10839_v1 = vld [vmem:[%s12943_s18 + $0x2ac] sm:$0xf]  ;;  %v10840_v23 = vld [vmem:[%s12943_s18 + $0x2b0] sm:$0xf] }
  0xc7   : > { %v870_v11 = vmax.f32 %v838_v3, 0.0  ;;  %10896 = vmatmul.msk.bf16.gmra.mxu1 %vm658_vm3, %v1460_v59  ;;  %v13298_v14 = vpop.f32.mrf.mxu3  ;;  %v583_v59 = vrot.slane %v10732_v50, 5  ;;  %v1649_v3 = vpack.c.b16 %v1629_v54, %v1628_v53  ;;  %v1461_v6 = vpack.c.b16 %v1441_v57, %v1440_v56 }
  0xc8   : > { %10912 = vmatmul.msk.bf16.gmra.mxu2 %vm658_vm3, %v1648_v60  ;;  %v13325_v39 = vpack.c.b16 %v633_v29, %v632_v8  ;;  %v10731_v60 = vld [vmem:[%s12943_s18 + $0x350] sm:$0xf]  ;;  %v1390_v18 = vrot.slane %v10839_v1, 5 }
  0xc9   : > { %938 = vrot.lane.b32.xlu2 %v870_v11, %s12809_s12  ;;  %v10769_v7 = vrot.slane %v10731_v60, 9  ;;  %v585_v9 = vrot.slane %v583_v59, 4  ;;  %v12400_v29 = vld [vmem:[%s12943_s18 + $0x2ac] sm:$0xff] }
  0xca   : > { %v732_v26 = vpop.f32.mrf.mxu0  ;;  %17390 = vst [vmem:[#allocation17_spill] sm:$0xff] %v13325_v39 }
  0xcb   : > { %v806_v27 = vmul.f32 %v13204_v37, %v732_v26  ;;  %v1724_v28 = vpop.f32.mrf.mxu2  ;;  %v584_v31 = vsel %vm12946_vm4, %v10769_v7, %v583_v59  ;;  %v587_v33 = vsel %vm12946_vm4, %v585_v9, %v586_v17  ;;  %v1391_v59 = vsel %vm12946_vm4, %v10881_v24, %v1390_v18  ;;  %v10843_v17 = vld [vmem:[%s12943_s18 + $0x2c8] sm:$0xf] }
  0xcc   : > { %v1725_v34 = vadd.f32 %v1724_v28, %v1536_v2  ;;  %v1538_v40 = vpop.f32.mrf.mxu1  ;;  %10994 = vmatmul.msk.bf16.gmra.mxu3 %vm658_vm3, %v12399_v22  ;;  %v10837_v22 = vld [vmem:[%s12943_s18 + $0x2a4] sm:$0xf]  ;;  %v1264_v28 = vrot.slane %v10839_v1, 6  ;;  %v635_v50 = vunpack.c.l.b16 %v587_v33  ;;  %v590_v7 = vrot.slane %v10739_v61, 5  ;;  %v10844_v33 = vld [vmem:[%s12943_s18 + $0x2cc] sm:$0xf] }
  0xcd   : > { %v839_v35 = vadd.f32 %v13208_v45, %v806_v27  ;;  %v10865_v26 = vrot.slane %v10837_v22, 10  ;;  %v1263_v27 = vrot.slane %v1261_v10, 4 }
  0xce   : > { %v13322_v38 = vadd.f32 %v1914_v47, %v1725_v34  ;;  %v1392_v34 = vrot.slane %v1390_v18, 4  ;;  %v592_v24 = vrot.slane %v590_v7, 4 }
  0xcf   : > { %v871_v51 = vmax.f32 %v839_v35, 0.0  ;;  %v1919_v55 = vpop.f32.mrf.mxu3  ;;  %v1393_v35 = vrot.slane %v10840_v23, 5  ;;  %v1265_v53 = vsel %vm12962_vm6, %v1263_v27, %v1264_v28 }
  0xd0   : > { %v1631_v1 = vunpack.c.l.b16 %v1265_v53 }
  0xd1   : > { %940 = vrot.lane.b32.xlu2 %v871_v51, %s12809_s12  ;;  %v1262_v51 = vsel %vm12962_vm6, %v10865_v26, %v1261_v10  ;;  %v1394_v60 = vsel %vm12946_vm4, %v1392_v34, %v1393_v35  ;;  %v10738_v10 = vld [vmem:[%s12943_s18 + $0x36c] sm:$0xf]  ;;  %v1397_v34 = vrot.slane %v10843_v17, 5  ;;  %v10841_v35 = vld [vmem:[%s12943_s18 + $0x2c0] sm:$0xf] }
  0xd2   : > { %v735_v63 = vpop.f32.mrf.mxu0  ;;  %v1630_v0 = vunpack.c.l.b16 %v1262_v51  ;;  %v10866_v51 = vrot.slane %v10841_v35, 10 }
  0xd3   : > { %v807_v2 = vmul.f32 %v13204_v37, %v735_v63  ;;  %v1726_v47 = vpop.f32.mrf.mxu2 }
  0xd4   : > { %v1727_v11 = vadd.f32 %v1726_v47, %v1538_v40  ;;  %v1541_v16 = vpop.f32.mrf.mxu1  ;;  %v1442_v47 = vunpack.c.l.b16 %v1391_v59  ;;  %v1650_v22 = vpack.c.b16 %v1631_v1, %v1630_v0 }
  0xd5   : > { %v840_v13 = vadd.f32 %v13208_v45, %v807_v2  ;;  %10784 = vmatmul.msk.bf16.gmra.mxu0 %vm658_vm3, %v13325_v39 }
  0xd6   : > { %v13341_v8 = vadd.f32 %v13298_v14, %v1727_v11  ;;  %v634_v14 = vunpack.c.l.b16 %v584_v31  ;;  %v10842_v11 = vld [vmem:[%s12943_s18 + $0x2c4] sm:$0xf] }
  0xd7   : > { %v872_v4 = vmax.f32 %v840_v13, 0.0  ;;  %10897 = vmatmul.msk.bf16.gmra.mxu1 %vm658_vm3, %v1461_v6  ;;  %v13338_v25 = vpop.f32.mrf.mxu3  ;;  %v1443_v6 = vunpack.c.l.b16 %v1394_v60  ;;  %v1268_v26 = vrot.slane %v10842_v11, 6  ;;  %v1271_v60 = vrot.slane %v10843_v17, 6  ;;  %v10746_v17 = vld [vmem:[%s12943_s18 + $0x38c] sm:$0xf] }
  0xd8   : > { %10913 = vmatmul.msk.bf16.gmra.mxu2 %vm658_vm3, %v1649_v3  ;;  %v13365_v9 = vpack.c.b16 %v635_v50, %v634_v14  ;;  %v1400_v50 = vrot.slane %v10844_v33, 5  ;;  %v10747_v33 = vld [vmem:[%s12943_s18 + $0x390] sm:$0xf] }
  0xd9   : > { %942 = vrot.lane.b32.xlu0 %v872_v4, %s12809_s12  ;;  %v1462_v23 = vpack.c.b16 %v1443_v6, %v1442_v47  ;;  %v10770_v4 = vrot.slane %v10738_v10, 9  ;;  %v1270_v59 = vrot.slane %v1268_v26, 4  ;;  %v1269_v6 = vsel %vm12962_vm6, %v10866_v51, %v1268_v26 }
  0xda   : > { %v737_v40 = vpop.f32.mrf.mxu0  ;;  %17391 = vst [vmem:[#allocation18_spill] sm:$0xff] %v13365_v9 }
  0xdb   : > { %v808_v41 = vmul.f32 %v13204_v37, %v737_v40  ;;  %v1729_v48 = vpop.f32.mrf.mxu2  ;;  %v591_v14 = vsel %vm12946_vm4, %v10770_v4, %v590_v7 }
  0xdc   : > { %v1730_v54 = vadd.f32 %v1729_v48, %v1541_v16  ;;  %v1543_v57 = vpop.f32.mrf.mxu1  ;;  %10995 = vmatmul.msk.bf16.gmra.mxu3 %vm658_vm3, %v12400_v29  ;;  %v10740_v16 = vld [vmem:[%s12943_s18 + $0x374] sm:$0xf]  ;;  %v636_v1 = vunpack.c.l.b16 %v591_v14 }
  0xdd   : > { %v841_v56 = vadd.f32 %v13208_v45, %v808_v41  ;;  %v593_v31 = vrot.slane %v10740_v16, 5  ;;  %v10882_v41 = vrot.slane %v10842_v11, 9  ;;  %v1272_v16 = vsel %vm12962_vm6, %v1270_v59, %v1271_v60 }
  0xde   : > { %v13362_v2 = vadd.f32 %v1919_v55, %v1730_v54  ;;  %v12401_v54 = vld [vmem:[%s12943_s18 + $0x2c8] sm:$0xff]  ;;  %v1633_v26 = vunpack.c.l.b16 %v1272_v16  ;;  %v600_v59 = vrot.slane %v10747_v33, 5 }
  0xdf   : > { %v873_v63 = vmax.f32 %v841_v56, 0.0  ;;  %v1924_v3 = vpop.f32.mrf.mxu3  ;;  %v594_v56 = vsel %vm12946_vm4, %v592_v24, %v593_v31  ;;  %v1632_v24 = vunpack.c.l.b16 %v1269_v6 }
  0xe0   : > { %v637_v47 = vunpack.c.l.b16 %v594_v56 }
  0xe1   : > { %944 = vrot.lane.b32.xlu1 %v873_v63, %s12809_s12  ;;  %v1651_v14 = vpack.c.b16 %v1633_v26, %v1632_v24 }
  0xe2   : > { %v740_v13 = vpop.f32.mrf.mxu0 }
  0xe3   : > { %v809_v18 = vmul.f32 %v13204_v37, %v740_v13  ;;  %v1731_v55 = vpop.f32.mrf.mxu2 }
  0xe4   : > { %v1732_v27 = vadd.f32 %v1731_v55, %v1543_v57  ;;  %v1546_v29 = vpop.f32.mrf.mxu1  ;;  %v1399_v57 = vrot.slane %v1397_v34, 4 }
  0xe5   : > { %v842_v28 = vadd.f32 %v13208_v45, %v809_v18  ;;  %10785 = vmatmul.msk.bf16.gmra.mxu0 %vm658_vm3, %v13365_v9 }
  0xe6   : > { %v13381_v53 = vadd.f32 %v13338_v25, %v1732_v27  ;;  %v1398_v25 = vsel %vm12946_vm4, %v10882_v41, %v1397_v34  ;;  %v1401_v13 = vsel %vm12946_vm4, %v1399_v57, %v1400_v50  ;;  %v597_v27 = vrot.slane %v10746_v17, 5  ;;  %v10847_v34 = vld [vmem:[%s12943_s18 + $0x2e4] sm:$0xf] }
  0xe7   : > { %v874_v40 = vmax.f32 %v842_v28, 0.0  ;;  %10898 = vmatmul.msk.bf16.gmra.mxu1 %vm658_vm3, %v1462_v23  ;;  %v1926_v48 = vpop.f32.mrf.mxu3  ;;  %v1445_v4 = vunpack.c.l.b16 %v1401_v13  ;;  %v13405_v28 = vpack.c.b16 %v637_v47, %v636_v1  ;;  %v1404_v60 = vrot.slane %v10847_v34, 5  ;;  %v10845_v1 = vld [vmem:[%s12943_s18 + $0x2dc] sm:$0xf] }
  0xe8   : > { %10914 = vmatmul.msk.bf16.gmra.mxu2 %vm658_vm3, %v1650_v22  ;;  %v1444_v22 = vunpack.c.l.b16 %v1398_v25  ;;  %v599_v51 = vrot.slane %v597_v27, 4 }
  0xe9   : > { %946 = vrot.lane.b32.xlu2 %v874_v40, %s12809_s12  ;;  %17392 = vst [vmem:[#allocation19_spill] sm:$0xff] %v13405_v28  ;;  %v1406_v13 = vrot.slane %v1404_v60, 4 }
  0xea   : > { %v742_v61 = vpop.f32.mrf.mxu0  ;;  %v1463_v41 = vpack.c.b16 %v1445_v4, %v1444_v22  ;;  %v1278_v22 = vrot.slane %v10847_v34, 6  ;;  %v10753_v34 = vld [vmem:[%s12943_s18 + $0x3a8] sm:$0xf] }
  0xeb   : > { %v810_v63 = vmul.f32 %v13204_v37, %v742_v61  ;;  %v1734_v0 = vpop.f32.mrf.mxu2  ;;  %v10848_v61 = vld [vmem:[%s12943_s18 + $0x2e8] sm:$0xf] }
  0xec   : > { %v1735_v7 = vadd.f32 %v1734_v0, %v1546_v29  ;;  %v1548_v11 = vpop.f32.mrf.mxu1  ;;  %10996 = vmatmul.msk.bf16.gmra.mxu3 %vm658_vm3, %v12401_v54  ;;  %v10745_v29 = vld [vmem:[%s12943_s18 + $0x388] sm:$0xf]  ;;  %v1407_v16 = vrot.slane %v10848_v61, 5 }
  0xed   : > { %v843_v10 = vadd.f32 %v13208_v45, %v810_v63  ;;  %v10771_v50 = vrot.slane %v10745_v29, 9 }
  0xee   : > { %v13400_v55 = vadd.f32 %v1924_v3, %v1735_v7  ;;  %v10846_v3 = vld [vmem:[%s12943_s18 + $0x2e0] sm:$0xf]  ;;  %v12402_v7 = vld [vmem:[%s12943_s18 + $0x2e4] sm:$0xff] }
  0xef   : > { %v875_v18 = vmax.f32 %v843_v10, 0.0  ;;  %v13402_v23 = vpop.f32.mrf.mxu3  ;;  %v1275_v63 = vrot.slane %v10846_v3, 6  ;;  %v10883_v25 = vrot.slane %v10846_v3, 9  ;;  %v598_v10 = vsel %vm12946_vm4, %v10771_v50, %v597_v27 }
  0xf0   : > { %v638_v26 = vunpack.c.l.b16 %v598_v10  ;;  %v1408_v3 = vsel %vm12946_vm4, %v1406_v13, %v1407_v16  ;;  %v10852_v13 = vld [vmem:[%s12943_s18 + $0x304] sm:$0xf]  ;;  %v10849_v16 = vld [vmem:[%s12943_s18 + $0x2f8] sm:$0xf] }
  0xf1   : > { %948 = vrot.lane.b32.xlu0 %v875_v18, %s12809_s12  ;;  %v1277_v18 = vrot.slane %v1275_v63, 4  ;;  %v1405_v27 = vsel %vm12946_vm4, %v10883_v25, %v1404_v60  ;;  %v13460_v60 = vld [vmem:[%s12943_s18 + $0x2fc] sm:$0xf]  ;;  %v10754_v25 = vld [vmem:[%s12943_s18 + $0x3ac] sm:$0xf] }
  0xf2   : > { %v745_v31 = vpop.f32.mrf.mxu0 }
  0xf3   : > { %v811_v35 = vmul.f32 %v13204_v37, %v745_v31  ;;  %v1736_v40 = vpop.f32.mrf.mxu2 }
  0xf4   : > { %v1737_v54 = vadd.f32 %v1736_v40, %v1548_v11  ;;  %v1551_v57 = vpop.f32.mrf.mxu1  ;;  %v601_v11 = vsel %vm12946_vm4, %v599_v51, %v600_v59  ;;  %v13445_v40 = vld [vmem:[%s282_s30] ss:$0 sm:$0xff]  ;;  %v10752_v51 = vld [vmem:[%s12943_s18 + $0x3a4] sm:$0xf]  ;;  %v604_v59 = vrot.slane %v10753_v34, 5  ;;  %v10868_v34 = vrot.slane %v10849_v16, 10 }
  0xf5   : > { %v844_v56 = vadd.f32 %v13208_v45, %v811_v35  ;;  %10786 = vmatmul.msk.bf16.gmra.mxu0 %vm658_vm3, %v13405_v28  ;;  %v639_v29 = vunpack.c.l.b16 %v601_v11  ;;  %301 = vst.msk [vmem:[%s13452_s19] sm:$0xff] %vm300_vm7, %v13445_v40  ;;  %v10772_v11 = vrot.slane %v10752_v51, 9  ;;  %s12812_s30 = smov 32  }
  0xf6   : > { %v13421_v6 = vadd.f32 %v1926_v48, %v1737_v54  ;;  %v10867_v48 = vrot.slane %v10845_v1, 10  ;;  %302 = vst.msk [vmem:[%s13452_s19 + $0x8] sm:$0xff] %vm300_vm7, %v13445_v40 }
  0xf7   : > { %v876_v0 = vmax.f32 %v844_v56, 0.0  ;;  %10899 = vmatmul.msk.bf16.gmra.mxu1 %vm658_vm3, %v1463_v41  ;;  %v13419_v47 = vpop.f32.mrf.mxu3  ;;  %v1446_v56 = vunpack.c.l.b16 %v1405_v27  ;;  %303 = vst.msk [vmem:[%s13452_s19 + $0x10] sm:$0xff] %vm300_vm7, %v13445_v40 }
  0xf8   : > { %10915 = vmatmul.msk.bf16.gmra.mxu2 %vm658_vm3, %v1651_v14  ;;  %v1276_v41 = vsel %vm12962_vm6, %v10867_v48, %v1275_v63  ;;  %v1279_v14 = vsel %vm12962_vm6, %v1277_v18, %v1278_v22  ;;  %v13469_v63 = vpack.c.b16 %v639_v29, %v638_v26  ;;  %304 = vst.msk [vmem:[%s13452_s19 + $0x18] sm:$0xff] %vm300_vm7, %v13445_v40  ;;  %v606_v22 = vrot.slane %v604_v59, 4 }
  0xf9   : > { %950 = vrot.lane.b32.xlu1 %v876_v0, %s12809_s12  ;;  %v1634_v0 = vunpack.c.l.b16 %v1276_v41  ;;  %v1635_v1 = vunpack.c.l.b16 %v1279_v14  ;;  %305 = vst.msk [vmem:[%s13452_s19 + $0x20] sm:$0xff] %vm300_vm7, %v13445_v40  ;;  %v13507_v41 = vld [vmem:[%s12943_s18 + $0x2a8] sm:$0xf] }
  0xfa   : > { %v747_v17 = vpop.f32.mrf.mxu0  ;;  %17393 = vst [vmem:[#allocation20_spill] sm:$0xff] %v13469_v63 }
  0xfb   : > { %v812_v4 = vmul.f32 %v13204_v37, %v747_v17  ;;  %v1739_v24 = vpop.f32.mrf.mxu2  ;;  %v1282_v17 = vrot.slane %v13460_v60, 6  ;;  %306 = vst.msk [vmem:[%s13452_s19 + $0x28] sm:$0xff] %vm300_vm7, %v13445_v40 }
  0xfc   : > { %v1740_v31 = vadd.f32 %v1739_v24, %v1551_v57  ;;  %v1553_v35 = vpop.f32.mrf.mxu1  ;;  %10997 = vmatmul.msk.bf16.gmra.mxu3 %vm658_vm3, %v12402_v7  ;;  %v1447_v57 = vunpack.c.l.b16 %v1408_v3  ;;  %v13473_v7 = vld [vmem:[%s12943_s18 + $0x300] sm:$0xf]  ;;  %307 = vst.msk [vmem:[%s13452_s19 + $0x30] sm:$0xff] %vm300_vm7, %v13445_v40  ;;  %v10884_v3 = vrot.slane %v13460_v60, 9 }
  0xfd   : > { %v845_v33 = vadd.f32 %v13208_v45, %v812_v4  ;;  %v607_v4 = vrot.slane %v10754_v25, 5  ;;  %v1411_v24 = vrot.slane %v13473_v7, 5  ;;  %308 = vst.msk [vmem:[%s13452_s19 + $0x38] sm:$0xff] %vm300_vm7, %v13445_v40  ;;  %v1284_v51 = vrot.slane %v1282_v17, 4  ;;  %v11132_v25 = vld [vmem:[%s12943_s18 + $0x2ac] sm:$0xf] }
  0xfe   : > { %v13466_v61 = vadd.f32 %v13402_v23, %v1740_v31  ;;  %v1464_v18 = vpack.c.b16 %v1447_v57, %v1446_v56  ;;  %v1652_v31 = vpack.c.b16 %v1635_v1, %v1634_v0  ;;  %v1285_v56 = vrot.slane %v13473_v7, 6  ;;  %309 = vst.msk [vmem:[%s13452_s19 + $0x40] sm:$0xff] %vm300_vm7, %v13445_v40  ;;  %v11130_v1 = vld [vmem:[%s12943_s18 + $0x2a4] sm:$0xf]  ;;  %v11470_v7 = vld [vmem:[%s17335_s3 + $0x14] sm:$0x3] }
  0xff   : > { %v877_v50 = vmax.f32 %v845_v33, 0.0  ;;  %v13457_v54 = vpop.f32.mrf.mxu3  ;;  %v13500_v33 = vsel %vm12946_vm4, %v10772_v11, %v604_v59  ;;  %v608_v60 = vsel %vm12946_vm4, %v606_v22, %v607_v4  ;;  %v1413_v0 = vrot.slane %v1411_v24, 4  ;;  %310 = vst.msk [vmem:[%s13452_s19 + $0x48] sm:$0xff] %vm300_vm7, %v13445_v40 }
 0x100   : > { %311 = vst.msk [vmem:[%s13452_s19 + $0x50] sm:$0xff] %vm300_vm7, %v13445_v40  ;;  %v641_v22 = vunpack.c.l.b16 %v608_v60  ;;  %v1412_v4 = vsel %vm12946_vm4, %v10884_v3, %v1411_v24  ;;  %v11194_v24 = vrot.slane %v11130_v1, 10 }
 0x101   : > { %952 = vrot.lane.b32.xlu2 %v877_v50, %s12809_s12  ;;  %v12403_v50 = vld [vmem:[%s12943_s18 + $0x300] sm:$0xff]  ;;  %312 = vst.msk [vmem:[%s13452_s19 + $0x58] sm:$0xff] %vm300_vm7, %v13445_v40 }
 0x102   : > { %v750_v10 = vpop.f32.mrf.mxu0  ;;  %313 = vst.msk [vmem:[%s13452_s19 + $0x60] sm:$0xff] %vm300_vm7, %v13445_v40 }
 0x103   : > { %v813_v23 = vmul.f32 %v13204_v37, %v750_v10  ;;  %v1741_v48 = vpop.f32.mrf.mxu2  ;;  %v11243_v10 = vld [vmem:[%s17335_s3 + $0xe] sm:$0x3]  ;;  %314 = vst.msk [vmem:[%s13452_s19 + $0x68] sm:$0xff] %vm300_vm7, %v13445_v40 }
 0x104   : > { %v1742_v26 = vadd.f32 %v1741_v48, %v1553_v35  ;;  %v1556_v27 = vpop.f32.mrf.mxu1  ;;  %v1414_v35 = vrot.slane %v10852_v13, 5  ;;  %v4497_v13 = vsel %vm707_vm0, %v11470_v7, 0  ;;  %v3388_v16 = vsel %vm707_vm0, %v11243_v10, 0  ;;  %v11453_v48 = vld [vmem:[%s17335_s3 + $0x12] sm:$0x3]  ;;  %315 = vst.msk [vmem:[%s13452_s19 + $0x70] sm:$0xff] %vm300_vm7, %v13445_v40 }
 0x105   : > { %v846_v29 = vadd.f32 %v13208_v45, %v813_v23  ;;  %10787 = vmatmul.msk.bf16.gmra.mxu0 %vm658_vm3, %v13469_v63  ;;  %v640_v23 = vunpack.c.l.b16 %v13500_v33  ;;  %4506 = vmatpush.bf16.msra.mxu2 %v4497_v13  ;;  %v1283_v33 = vsel %vm12962_vm6, %v10868_v34, %v1282_v17  ;;  %v11260_v34 = vld [vmem:[%s17335_s3 + $0x10] sm:$0x3]  ;;  %316 = vst.msk [vmem:[%s13452_s19 + $0x78] sm:$0xff] %vm300_vm7, %v13445_v40  ;;  %v10646_v13 = vld [vmem:[%s12943_s18 + $0x1fc] sm:$0xf] }
 0x106   : > { %v13515_v57 = vadd.f32 %v13419_v47, %v1742_v26  ;;  %v2829_v47 = vrot.slane %v13507_v41, 6  ;;  %3397 = vmatpush.bf16.msra.mxu0 %v3388_v16  ;;  %v4685_v26 = vsel %vm707_vm0, %v11453_v48, 0  ;;  %v1286_v41 = vsel %vm12962_vm6, %v1284_v51, %v1285_v56  ;;  %317 = vst.msk [vmem:[%s13452_s19 + $0x80] sm:$0xff] %vm300_vm7, %v13445_v40  ;;  %v12515_v16 = vld [vmem:[%s12943_s18 + $0x200] sm:$0xf] }
 0x107   : > { %v878_v14 = vmax.f32 %v846_v29, 0.0  ;;  %10900 = vmatmul.msk.bf16.gmra.mxu1 %vm658_vm3, %v1464_v18  ;;  %v13518_v59 = vpop.f32.mrf.mxu3  ;;  %4694 = vmatpush.bf16.msra.mxu3 %v4685_v26  ;;  %v1637_v56 = vunpack.c.l.b16 %v1286_v41  ;;  %318 = vst.msk [vmem:[%s13452_s19 + $0x88] sm:$0xff] %vm300_vm7, %v13445_v40  ;;  %v13588_v10 = vpack.c.b16 %v641_v22, %v640_v23  ;;  %v2034_v48 = vrot.slane %v12515_v16, 6 }
 0x108   : > { %10916 = vmatmul.msk.bf16.gmra.mxu2 %vm658_vm3, %v1652_v31  ;;  %v1415_v31 = vsel %vm12946_vm4, %v1413_v0, %v1414_v35  ;;  %v2831_v17 = vrot.slane %v2829_v47, 4  ;;  %v2832_v35 = vrot.slane %v11132_v25, 6  ;;  %v1448_v25 = vunpack.c.l.b16 %v1412_v4  ;;  %319 = vst.msk [vmem:[%s13452_s19 + $0x90] sm:$0xff] %vm300_vm7, %v13445_v40 }
 0x109   : > { %954 = vrot.lane.b32.xlu0 %v878_v14, %s12809_s12  ;;  %v1449_v7 = vunpack.c.l.b16 %v1415_v31  ;;  %17394 = vst [vmem:[#allocation21_spill] sm:$0xff] %v13588_v10  ;;  %v10999_v31 = vrot.slane %v10646_v13, 10 }
 0x10a   : > { %v752_v11 = vpop.f32.mrf.mxu0  ;;  %320 = vst.msk [vmem:[%s13452_s19 + $0x98] sm:$0xff] %vm300_vm7, %v13445_v40 }
 0x10b   : > { %v814_v18 = vmul.f32 %v13204_v37, %v752_v11  ;;  %v1744_v29 = vpop.f32.mrf.mxu2  ;;  %v2833_v11 = vsel %vm12962_vm6, %v2831_v17, %v2832_v35  ;;  %321 = vst.msk [vmem:[%s13452_s19 + $0xa0] sm:$0xff] %vm300_vm7, %v13445_v40  ;;  %v1465_v4 = vpack.c.b16 %v1449_v7, %v1448_v25  ;;  %v11135_v35 = vld [vmem:[%s12943_s18 + $0x2c4] sm:$0xf] }
 0x10c   : > { %v1745_v3 = vadd.f32 %v1744_v29, %v1556_v27  ;;  %v1558_v60 = vpop.f32.mrf.mxu1  ;;  %10998 = vmatmul.msk.bf16.gmra.mxu3 %vm658_vm3, %v12403_v50  ;;  %v3610_v27 = vsel %vm707_vm0, %v11260_v34, 0  ;;  %v1636_v50 = vunpack.c.l.b16 %v1283_v33  ;;  %322 = vst.msk [vmem:[%s13452_s19 + $0xa8] sm:$0xff] %vm300_vm7, %v13445_v40  ;;  %v2942_v29 = vunpack.c.l.b16 %v2833_v11 }
 0x10d   : > { %v847_v14 = vadd.f32 %v13208_v45, %v814_v18  ;;  %3619 = vmatpush.bf16.msra.mxu1 %v3610_v27  ;;  %323 = vst.msk [vmem:[%s13452_s19 + $0xb0] sm:$0xff] %vm300_vm7, %v13445_v40  ;;  %v2836_v25 = vrot.slane %v11135_v35, 6  ;;  %v12517_v35 = vld [vmem:[%s12943_s18 + $0x21c] sm:$0xf] }
 0x10e   : > { %v13580_v0 = vadd.f32 %v13457_v54, %v1745_v3  ;;  %v2830_v54 = vsel %vm12962_vm6, %v11194_v24, %v2829_v47  ;;  %v1653_v22 = vpack.c.b16 %v1637_v56, %v1636_v50  ;;  %v2036_v3 = vrot.slane %v2034_v48, 4  ;;  %324 = vst.msk [vmem:[%s13452_s19 + $0xb8] sm:$0xff] %vm300_vm7, %v13445_v40  ;;  %v11134_v56 = vld [vmem:[%s12943_s18 + $0x2c0] sm:$0xf] }
 0x10f   : > { %v879_v51 = vmax.f32 %v847_v14, 0.0  ;;  %v13582_v1 = vpop.f32.mrf.mxu3  ;;  %v2941_v26 = vunpack.c.l.b16 %v2830_v54  ;;  %v12516_v14 = vld [vmem:[%s12943_s18 + $0x204] sm:$0xf]  ;;  %325 = vst.msk [vmem:[%s13452_s19 + $0xc0] sm:$0xff] %vm300_vm7, %v13445_v40  ;;  %v11136_v54 = vld [vmem:[%s12943_s18 + $0x2c8] sm:$0xf] }
 0x110   : > { %v2037_v17 = vrot.slane %v12516_v14, 6  ;;  %326 = vst.msk [vmem:[%s13452_s19 + $0xc8] sm:$0xff] %vm300_vm7, %v13445_v40 }
 0x111   : > { %956 = vrot.lane.b32.xlu1 %v879_v51, %s12809_s12  ;;  %v2973_v51 = vpack.c.b16 %v2942_v29, %v2941_v26  ;;  %327 = vst.msk [vmem:[%s13452_s19 + $0xd0] sm:$0xff] %vm300_vm7, %v13445_v40  ;;  %v2838_v26 = vrot.slane %v2836_v25, 4  ;;  %v2839_v29 = vrot.slane %v11136_v54, 6 }
 0x112   : > { %v755_v18 = vpop.f32.mrf.mxu0  ;;  %v2038_v50 = vsel %vm12962_vm6, %v2036_v3, %v2037_v17  ;;  %328 = vst.msk [vmem:[%s13452_s19 + $0xd8] sm:$0xff] %vm300_vm7, %v13445_v40  ;;  %v10653_v17 = vld [vmem:[%s12943_s18 + $0x218] sm:$0xf] }
 0x113   : > { %v815_v23 = vmul.f32 %v13204_v37, %v755_v18  ;;  %v1746_v47 = vpop.f32.mrf.mxu2  ;;  %329 = vst.msk [vmem:[%s13452_s19 + $0xe0] sm:$0xff] %vm300_vm7, %v13445_v40  ;;  %v2147_v18 = vunpack.c.l.b16 %v2038_v50  ;;  %v2840_v14 = vsel %vm12962_vm6, %v2838_v26, %v2839_v29 }
 0x114   : > { %v1747_v33 = vadd.f32 %v1746_v47, %v1558_v60  ;;  %v1561_v24 = vpop.f32.mrf.mxu1  ;;  %330 = vst.msk [vmem:[%s13452_s19 + $0xe8] sm:$0xff] %vm300_vm7, %v13445_v40 }
 0x115   : > { %v848_v41 = vadd.f32 %v13208_v45, %v815_v23  ;;  %10788 = vmatmul.msk.bf16.gmra.mxu0 %vm658_vm3, %v13588_v10  ;;  %v11195_v23 = vrot.slane %v11134_v56, 10  ;;  %331 = vst.msk [vmem:[%s13452_s19 + $0xf0] sm:$0xff] %vm300_vm7, %v13445_v40 }
 0x116   : > { %v13624_v60 = vadd.f32 %v13518_v59, %v1747_v33  ;;  %v2035_v59 = vsel %vm12962_vm6, %v10999_v31, %v2034_v48  ;;  %332 = vst.msk [vmem:[%s13452_s19 + $0xf8] sm:$0xff] %vm300_vm7, %v13445_v40  ;;  %v2041_v40 = vrot.slane %v12517_v35, 6 }
 0x117   : > { %v880_v34 = vmax.f32 %v848_v41, 0.0  ;;  %10901 = vmatmul.msk.bf16.gmra.mxu1 %vm658_vm3, %v1465_v4  ;;  %v1941_v27 = vpop.f32.mrf.mxu3  ;;  %v2146_v48 = vunpack.c.l.b16 %v2035_v59  ;;  %v2837_v3 = vsel %vm12962_vm6, %v11195_v23, %v2836_v25  ;;  %v2944_v25 = vunpack.c.l.b16 %v2840_v14 }
 0x118   : > { %10917 = vmatmul.msk.bf16.gmra.mxu2 %vm658_vm3, %v1653_v22  ;;  %v2943_v56 = vunpack.c.l.b16 %v2837_v3  ;;  %v11138_v3 = vld [vmem:[%s12943_s18 + $0x2dc] sm:$0xf] }
 0x119   : > { %958 = vrot.lane.b32.xlu2 %v880_v34, %s12809_s12 }
 0x11a   : > { %v757_v7 = vpop.f32.mrf.mxu0  ;;  %v2974_v29 = vpack.c.b16 %v2944_v25, %v2943_v56  ;;  %v11196_v56 = vrot.slane %v11138_v3, 10 }
 0x11b   : > { %v816_v11 = vmul.f32 %v13204_v37, %v757_v7  ;;  %v931_v13 = vpop.permute.xlu0 %930  ;;  %v1749_v16 = vpop.f32.mrf.mxu2  ;;  %v11000_v7 = vrot.slane %v10653_v17, 10  ;;  %v11140_v17 = vld [vmem:[%s12943_s18 + $0x2e4] sm:$0xf] }
 0x11c   : > { %1027 = vst.msk [vmem:[%s13452_s19] sm:$0xff] %vm1026_vm8, %v931_v13  ;;  %v1750_v22 = vadd.f32 %v1749_v16, %v1561_v24  ;;  %v1563_v4 = vpop.f32.mrf.mxu1  ;;  %11211 = vmatmul.msk.bf16.vlgmr.msrb.gmra.mxu3 %vm658_vm3, %v2973_v51  ;;  %v2178_v24 = vpack.c.b16 %v2147_v18, %v2146_v48  ;;  %v12357_v16 = vld [vmem:[%s12943_s18 + $0x204] sm:$0xff]  ;;  %v2043_v48 = vrot.slane %v2041_v40, 4  ;;  %v12518_v18 = vld [vmem:[%s12943_s18 + $0x220] sm:$0xf] }
 0x11d   : > { %v849_v47 = vadd.f32 %v13208_v45, %v816_v11  ;;  %v2044_v23 = vrot.slane %v12518_v18, 6 }
 0x11e   : > { %v13662_v33 = vadd.f32 %v13582_v1, %v1750_v22  ;;  %v11139_v22 = vld [vmem:[%s12943_s18 + $0x2e0] sm:$0xf] }
 0x11f   : > { %v881_v31 = vmax.f32 %v849_v47, 0.0  ;;  %v1944_v41 = vpop.f32.mrf.mxu3 }
 0x121   : > { %960 = vrot.lane.b32.xlu0 %v881_v31, %s12809_s12  ;;  %v2042_v31 = vsel %vm12962_vm6, %v11000_v7, %v2041_v40 }
 0x122   : > { %v760_v34 = vpop.f32.mrf.mxu0 }
 0x123   : > { %v817_v1 = vmul.f32 %v13204_v37, %v760_v34  ;;  %v933_v51 = vpop.permute.xlu0 %932  ;;  %v939_v59 = vpop.permute.xlu2 %938 }
 0x124   : > { %v1751_v50 = vpop.f32.mrf.mxu2  ;;  %1028 = vst.msk [vmem:[%s13452_s19 + $0x8] sm:$0xff] %vm1026_vm8, %v933_v51  ;;  %v1566_v13 = vpop.f32.mrf.mxu1 }
 0x125   : > { %v1752_v54 = vadd.f32 %v1751_v50, %v1563_v4  ;;  %v850_v11 = vadd.f32 %v13208_v45, %v817_v1  ;;  %1031 = vst.msk [vmem:[%s13452_s19 + $0x20] sm:$0xff] %vm1026_vm8, %v939_v59  ;;  %11016 = vmatmul.msk.bf16.vlgmr.msrb.gmra.mxu0 %vm658_vm3, %v2178_v24  ;;  %v2045_v24 = vsel %vm12962_vm6, %v2043_v48, %v2044_v23  ;;  %v2148_v59 = vunpack.c.l.b16 %v2042_v31  ;;  %v12519_v31 = vld [vmem:[%s12943_s18 + $0x238] sm:$0xf] }
 0x126   : > { %v2149_v50 = vunpack.c.l.b16 %v2045_v24 }
 0x127   : > { %v882_v47 = vmax.f32 %v850_v11, 0.0  ;;  %v13681_v26 = vadd.f32 %v1941_v27, %v1752_v54  ;;  %11033 = vmatmul.msk.bf16.vlgmr.msrb.gmra.mxu1 %vm658_vm3, %v12976_v49  ;;  %v1946_v4 = vpop.f32.mrf.mxu3  ;;  %v2843_v27 = vrot.slane %v11139_v22, 6  ;;  %v2846_v11 = vrot.slane %v11140_v17, 6 }
 0x128   : > { %11114 = vmatmul.msk.bf16.vlgmr.msrb.gmra.mxu2 %vm658_vm3, %v12357_v16  ;;  %v2179_v23 = vpack.c.b16 %v2149_v50, %v2148_v59  ;;  %v12359_v59 = vld [vmem:[%s12943_s18 + $0x220] sm:$0xff] }
 0x129   : > { %962 = vrot.lane.b32.xlu1 %v882_v47, %s12809_s12  ;;  %v2845_v54 = vrot.slane %v2843_v27, 4  ;;  %v10660_v47 = vld [vmem:[%s12943_s18 + $0x234] sm:$0xf] }
 0x12a   : > { %v762_v14 = vpop.f32.mrf.mxu0 }
 0x12b   : > { %v818_v35 = vmul.f32 %v13204_v37, %v762_v14  ;;  %v935_v34 = vpop.permute.xlu1 %934  ;;  %v941_v1 = vpop.permute.xlu2 %940  ;;  %v2847_v22 = vsel %vm12962_vm6, %v2845_v54, %v2846_v11 }
 0x12c   : > { %v1754_v51 = vpop.f32.mrf.mxu2  ;;  %1029 = vst.msk [vmem:[%s13452_s19 + $0x10] sm:$0xff] %vm1026_vm8, %v935_v34  ;;  %v1568_v7 = vpop.f32.mrf.mxu1  ;;  %11212 = vmatmul.msk.bf16.gmra.mxu3 %vm658_vm3, %v2974_v29  ;;  %v2048_v29 = vrot.slane %v12519_v31, 6  ;;  %v11001_v34 = vrot.slane %v10660_v47, 10 }
 0x12d   : > { %v1755_v40 = vadd.f32 %v1754_v51, %v1566_v13  ;;  %v851_v25 = vadd.f32 %v13208_v45, %v818_v35  ;;  %1032 = vst.msk [vmem:[%s13452_s19 + $0x28] sm:$0xff] %vm1026_vm8, %v941_v1  ;;  %v2844_v13 = vsel %vm12962_vm6, %v11196_v56, %v2843_v27  ;;  %v2946_v35 = vunpack.c.l.b16 %v2847_v22  ;;  %v12520_v56 = vld [vmem:[%s12943_s18 + $0x23c] sm:$0xf]  ;;  %v11142_v22 = vld [vmem:[%s12943_s18 + $0x2f8] sm:$0xf] }
 0x12e   : > { %v2945_v17 = vunpack.c.l.b16 %v2844_v13  ;;  %v2050_v50 = vrot.slane %v2048_v29, 4 }
 0x12f   : > { %v883_v16 = vmax.f32 %v851_v25, 0.0  ;;  %v13700_v48 = vadd.f32 %v1944_v41, %v1755_v40  ;;  %v1949_v18 = vpop.f32.mrf.mxu3  ;;  %v2051_v40 = vrot.slane %v12520_v56, 6  ;;  %v11143_v25 = vld [vmem:[%s12943_s18 + $0x2fc] sm:$0xf] }
 0x130   : > { %v2850_v47 = vrot.slane %v11143_v25, 6 }
 0x131   : > { %964 = vrot.lane.b32.xlu2 %v883_v16, %s12809_s12  ;;  %v2052_v13 = vsel %vm12962_vm6, %v2050_v50, %v2051_v40 }
 0x132   : > { %v765_v24 = vpop.f32.mrf.mxu0 }
 0x133   : > { %v819_v41 = vmul.f32 %v13204_v37, %v765_v24  ;;  %v937_v3 = vpop.permute.xlu1 %936 }
 0x134   : > { %v1756_v14 = vpop.f32.mrf.mxu2  ;;  %1030 = vst.msk [vmem:[%s13452_s19 + $0x18] sm:$0xff] %vm1026_vm8, %v937_v3  ;;  %v1571_v51 = vpop.f32.mrf.mxu1 }
 0x135   : > { %v1757_v27 = vadd.f32 %v1756_v14, %v1568_v7  ;;  %v852_v1 = vadd.f32 %v13208_v45, %v819_v41  ;;  %11017 = vmatmul.msk.bf16.gmra.mxu0 %vm658_vm3, %v2179_v23  ;;  %v2975_v7 = vpack.c.b16 %v2946_v35, %v2945_v17  ;;  %v2049_v23 = vsel %vm12962_vm6, %v11001_v34, %v2048_v29 }
 0x136   : > { %v2150_v3 = vunpack.c.l.b16 %v2049_v23  ;;  %v2151_v14 = vunpack.c.l.b16 %v2052_v13  ;;  %v2852_v29 = vrot.slane %v2850_v47, 4  ;;  %v12521_v23 = vld [vmem:[%s12943_s18 + $0x254] sm:$0xf] }
 0x137   : > { %v884_v54 = vmax.f32 %v852_v1, 0.0  ;;  %v13717_v11 = vadd.f32 %v1946_v4, %v1757_v27  ;;  %11034 = vmatmul.msk.bf16.gmra.mxu1 %vm658_vm3, %v13005_v21  ;;  %v1951_v16 = vpop.f32.mrf.mxu3  ;;  %v11144_v4 = vld [vmem:[%s12943_s18 + $0x300] sm:$0xf]  ;;  %v11197_v27 = vrot.slane %v11142_v22, 10 }
 0x138   : > { %11115 = vmatmul.msk.bf16.gmra.mxu2 %vm658_vm3, %v12359_v59  ;;  %v2853_v34 = vrot.slane %v11144_v4, 6  ;;  %v2180_v40 = vpack.c.b16 %v2151_v14, %v2150_v3 }
 0x139   : > { %966 = vrot.lane.b32.xlu0 %v884_v54, %s12809_s12  ;;  %v2851_v25 = vsel %vm12962_vm6, %v11197_v27, %v2850_v47  ;;  %v10667_v54 = vld [vmem:[%s12943_s18 + $0x250] sm:$0xf]  ;;  %v12361_v27 = vld [vmem:[%s12943_s18 + $0x23c] sm:$0xff] }
 0x13a   : > { %v767_v31 = vpop.f32.mrf.mxu0  ;;  %v2947_v4 = vunpack.c.l.b16 %v2851_v25 }
 0x13b   : > { %v820_v24 = vmul.f32 %v13204_v37, %v767_v31 }
 0x13c   : > { %v1759_v41 = vpop.f32.mrf.mxu2  ;;  %v1573_v35 = vpop.f32.mrf.mxu1  ;;  %11213 = vmatmul.msk.bf16.gmra.mxu3 %vm658_vm3, %v2975_v7  ;;  %v2055_v7 = vrot.slane %v12521_v23, 6 }
 0x13d   : > { %v1760_v1 = vadd.f32 %v1759_v41, %v1571_v51  ;;  %v853_v17 = vadd.f32 %v13208_v45, %v820_v24  ;;  %v2854_v51 = vsel %vm12962_vm6, %v2852_v29, %v2853_v34  ;;  %v11002_v41 = vrot.slane %v10667_v54, 10  ;;  %v11147_v34 = vld [vmem:[%s12943_s18 + $0x318] sm:$0xf]  ;;  %v11146_v54 = vld [vmem:[%s12943_s18 + $0x314] sm:$0xf] }
 0x13e   : > { %v2948_v24 = vunpack.c.l.b16 %v2854_v51 }
 0x13f   : > { %v885_v59 = vmax.f32 %v853_v17, 0.0  ;;  %v13732_v50 = vadd.f32 %v1949_v18, %v1760_v1  ;;  %v1954_v56 = vpop.f32.mrf.mxu3  ;;  %v2057_v1 = vrot.slane %v2055_v7, 4  ;;  %v12522_v17 = vld [vmem:[%s12943_s18 + $0x258] sm:$0xf] }
 0x140   : > { %v2058_v29 = vrot.slane %v12522_v17, 6  ;;  %v2976_v25 = vpack.c.b16 %v2948_v24, %v2947_v4  ;;  %v11198_v4 = vrot.slane %v11146_v54, 10  ;;  %v10674_v54 = vld [vmem:[%s12943_s18 + $0x26c] sm:$0xf] }
 0x141   : > { %968 = vrot.lane.b32.xlu1 %v885_v59, %s12809_s12 }
 0x142   : > { %v770_v13 = vpop.f32.mrf.mxu0  ;;  %v2059_v51 = vsel %vm12962_vm6, %v2057_v1, %v2058_v29 }
 0x143   : > { %v821_v18 = vmul.f32 %v13204_v37, %v770_v13  ;;  %v947_v22 = vpop.permute.xlu2 %946  ;;  %v2857_v13 = vrot.slane %v11147_v34, 6 }
 0x144   : > { %v1761_v31 = vpop.f32.mrf.mxu2  ;;  %1035 = vst.msk [vmem:[%s13452_s19 + $0x40] sm:$0xff] %vm1026_vm8, %v947_v22  ;;  %v1576_v14 = vpop.f32.mrf.mxu1 }
 0x145   : > { %v1762_v47 = vadd.f32 %v1761_v31, %v1573_v35  ;;  %v854_v3 = vadd.f32 %v13208_v45, %v821_v18  ;;  %11018 = vmatmul.msk.bf16.gmra.mxu0 %vm658_vm3, %v2180_v40  ;;  %v2056_v40 = vsel %vm12962_vm6, %v11002_v41, %v2055_v7  ;;  %v2859_v1 = vrot.slane %v2857_v13, 4 }
 0x147   : > { %v886_v59 = vmax.f32 %v854_v3, 0.0  ;;  %v13749_v23 = vadd.f32 %v1951_v16, %v1762_v47  ;;  %11035 = vmatmul.msk.bf16.gmra.mxu1 %vm658_vm3, %v13032_v58  ;;  %v1956_v35 = vpop.f32.mrf.mxu3  ;;  %v11148_v16 = vld [vmem:[%s12943_s18 + $0x31c] sm:$0xf]  ;;  %v2152_v3 = vunpack.c.l.b16 %v2056_v40 }
 0x148   : > { %11116 = vmatmul.msk.bf16.gmra.mxu2 %vm658_vm3, %v12361_v27  ;;  %v2153_v27 = vunpack.c.l.b16 %v2059_v51  ;;  %v2860_v17 = vrot.slane %v11148_v16, 6  ;;  %v2858_v51 = vsel %vm12962_vm6, %v11198_v4, %v2857_v13 }
 0x149   : > { %970 = vrot.lane.b32.xlu2 %v886_v59, %s12809_s12 }
 0x14a   : > { %v772_v18 = vpop.f32.mrf.mxu0  ;;  %v2181_v40 = vpack.c.b16 %v2153_v27, %v2152_v3  ;;  %v11003_v27 = vrot.slane %v10674_v54, 10  ;;  %v11150_v54 = vld [vmem:[%s12943_s18 + $0x330] sm:$0xf] }
 0x14b   : > { %v822_v22 = vmul.f32 %v13204_v37, %v772_v18  ;;  %v943_v31 = vpop.permute.xlu0 %942  ;;  %v12523_v18 = vld [vmem:[%s12943_s18 + $0x270] sm:$0xf] }
 0x14c   : > { %v1764_v47 = vpop.f32.mrf.mxu2  ;;  %1033 = vst.msk [vmem:[%s13452_s19 + $0x30] sm:$0xff] %vm1026_vm8, %v943_v31  ;;  %v1578_v41 = vpop.f32.mrf.mxu1  ;;  %11214 = vmatmul.msk.bf16.gmra.mxu3 %vm658_vm3, %v2976_v25  ;;  %v2062_v25 = vrot.slane %v12523_v18, 6  ;;  %v11151_v18 = vld [vmem:[%s12943_s18 + $0x334] sm:$0xf] }
 0x14d   : > { %v1765_v24 = vadd.f32 %v1764_v47, %v1576_v14  ;;  %v855_v7 = vadd.f32 %v13208_v45, %v822_v22  ;;  %v2861_v14 = vsel %vm12962_vm6, %v2859_v1, %v2860_v17  ;;  %v2949_v47 = vunpack.c.l.b16 %v2858_v51  ;;  %v12524_v17 = vld [vmem:[%s12943_s18 + $0x274] sm:$0xf] }
 0x14e   : > { %v2950_v3 = vunpack.c.l.b16 %v2861_v14  ;;  %v2064_v1 = vrot.slane %v2062_v25, 4 }
 0x14f   : > { %v887_v29 = vmax.f32 %v855_v7, 0.0  ;;  %v13766_v34 = vadd.f32 %v1954_v56, %v1765_v24  ;;  %v1959_v59 = vpop.f32.mrf.mxu3  ;;  %v12363_v7 = vld [vmem:[%s12943_s18 + $0x258] sm:$0xff] }
 0x150   : > { %v2977_v51 = vpack.c.b16 %v2950_v3, %v2949_v47  ;;  %v11199_v47 = vrot.slane %v11150_v54, 10  ;;  %v10681_v54 = vld [vmem:[%s12943_s18 + $0x288] sm:$0xf] }
 0x151   : > { %972 = vrot.lane.b32.xlu0 %v887_v29, %s12809_s12  ;;  %v2065_v29 = vrot.slane %v12524_v17, 6 }
 0x152   : > { %v775_v22 = vpop.f32.mrf.mxu0 }
 0x153   : > { %v823_v56 = vmul.f32 %v13204_v37, %v775_v22  ;;  %v945_v16 = vpop.permute.xlu1 %944  ;;  %v2066_v14 = vsel %vm12962_vm6, %v2064_v1, %v2065_v29 }
 0x154   : > { %v1766_v31 = vpop.f32.mrf.mxu2  ;;  %1034 = vst.msk [vmem:[%s13452_s19 + $0x38] sm:$0xff] %vm1026_vm8, %v945_v16  ;;  %v1581_v24 = vpop.f32.mrf.mxu1  ;;  %v2155_v17 = vunpack.c.l.b16 %v2066_v14 }
 0x155   : > { %v1767_v13 = vadd.f32 %v1766_v31, %v1578_v41  ;;  %v856_v4 = vadd.f32 %v13208_v45, %v823_v56  ;;  %11019 = vmatmul.msk.bf16.gmra.mxu0 %vm658_vm3, %v2181_v40  ;;  %v2063_v40 = vsel %vm12962_vm6, %v11003_v27, %v2062_v25  ;;  %v2864_v56 = vrot.slane %v11151_v18, 6 }
 0x157   : > { %v888_v22 = vmax.f32 %v856_v4, 0.0  ;;  %v13783_v58 = vadd.f32 %v1956_v35, %v1767_v13  ;;  %11036 = vmatmul.msk.bf16.gmra.mxu1 %vm658_vm3, %v13059_v32  ;;  %v1961_v41 = vpop.f32.mrf.mxu3  ;;  %v11152_v35 = vld [vmem:[%s12943_s18 + $0x338] sm:$0xf]  ;;  %v2866_v1 = vrot.slane %v2864_v56, 4  ;;  %v2865_v14 = vsel %vm12962_vm6, %v11199_v47, %v2864_v56 }
 0x158   : > { %11117 = vmatmul.msk.bf16.gmra.mxu2 %vm658_vm3, %v12363_v7  ;;  %v2154_v7 = vunpack.c.l.b16 %v2063_v40  ;;  %v2867_v29 = vrot.slane %v11152_v35, 6 }
 0x159   : > { %974 = vrot.lane.b32.xlu1 %v888_v22, %s12809_s12 }
 0x15a   : > { %v777_v16 = vpop.f32.mrf.mxu0  ;;  %v2182_v40 = vpack.c.b16 %v2155_v17, %v2154_v7  ;;  %v2951_v7 = vunpack.c.l.b16 %v2865_v14 }
 0x15b   : > { %v824_v31 = vmul.f32 %v13204_v37, %v777_v16  ;;  %v953_v13 = vpop.permute.xlu2 %952 }
 0x15c   : > { %v1769_v4 = vpop.f32.mrf.mxu2  ;;  %1038 = vst.msk [vmem:[%s13452_s19 + $0x58] sm:$0xff] %vm1026_vm8, %v953_v13  ;;  %v1583_v27 = vpop.f32.mrf.mxu1  ;;  %11215 = vmatmul.msk.bf16.gmra.mxu3 %vm658_vm3, %v2977_v51 }
 0x15d   : > { %v1770_v3 = vadd.f32 %v1769_v4, %v1581_v24  ;;  %v857_v25 = vadd.f32 %v13208_v45, %v824_v31  ;;  %v2868_v24 = vsel %vm12962_vm6, %v2866_v1, %v2867_v29  ;;  %v12525_v31 = vld [vmem:[%s12943_s18 + $0x28c] sm:$0xf]  ;;  %v12365_v1 = vld [vmem:[%s12943_s18 + $0x274] sm:$0xff] }
 0x15e   : > { %v2069_v51 = vrot.slane %v12525_v31, 6  ;;  %v2952_v17 = vunpack.c.l.b16 %v2868_v24 }
 0x15f   : > { %v889_v18 = vmax.f32 %v857_v25, 0.0  ;;  %v13800_v22 = vadd.f32 %v1959_v59, %v1770_v3  ;;  %v1964_v16 = vpop.f32.mrf.mxu3  ;;  %v11004_v3 = vrot.slane %v10681_v54, 10  ;;  %v11154_v54 = vld [vmem:[%s12943_s18 + $0x34c] sm:$0xf] }
 0x160   : > { %v2071_v29 = vrot.slane %v2069_v51, 4  ;;  %v2978_v14 = vpack.c.b16 %v2952_v17, %v2951_v7  ;;  %v11200_v7 = vrot.slane %v11154_v54, 10  ;;  %v10688_v54 = vld [vmem:[%s12943_s18 + $0x2a4] sm:$0xf] }
 0x161   : > { %976 = vrot.lane.b32.xlu2 %v889_v18, %s12809_s12  ;;  %v12526_v18 = vld [vmem:[%s12943_s18 + $0x290] sm:$0xf] }
 0x162   : > { %v780_v13 = vpop.f32.mrf.mxu0  ;;  %v2072_v31 = vrot.slane %v12526_v18, 6 }
 0x163   : > { %v825_v59 = vmul.f32 %v13204_v37, %v780_v13  ;;  %v949_v35 = vpop.permute.xlu0 %948  ;;  %v11155_v13 = vld [vmem:[%s12943_s18 + $0x350] sm:$0xf] }
 0x164   : > { %v1771_v4 = vpop.f32.mrf.mxu2  ;;  %1036 = vst.msk [vmem:[%s13452_s19 + $0x48] sm:$0xff] %vm1026_vm8, %v949_v35  ;;  %v1586_v25 = vpop.f32.mrf.mxu1  ;;  %v2073_v24 = vsel %vm12962_vm6, %v2071_v29, %v2072_v31 }
 0x165   : > { %v1772_v56 = vadd.f32 %v1771_v4, %v1583_v27  ;;  %v858_v47 = vadd.f32 %v13208_v45, %v825_v59  ;;  %11020 = vmatmul.msk.bf16.gmra.mxu0 %vm658_vm3, %v2182_v40  ;;  %v2070_v40 = vsel %vm12962_vm6, %v11004_v3, %v2069_v51  ;;  %v2871_v59 = vrot.slane %v11155_v13, 6 }
 0x167   : > { %v890_v32 = vmax.f32 %v858_v47, 0.0  ;;  %v13817_v21 = vadd.f32 %v1961_v41, %v1772_v56  ;;  %11037 = vmatmul.msk.bf16.gmra.mxu1 %vm658_vm3, %v13086_v5  ;;  %v1966_v27 = vpop.f32.mrf.mxu3  ;;  %v11156_v41 = vld [vmem:[%s12943_s18 + $0x354] sm:$0xf]  ;;  %v2873_v29 = vrot.slane %v2871_v59, 4 }
 0x168   : > { %11118 = vmatmul.msk.bf16.gmra.mxu2 %vm658_vm3, %v12365_v1  ;;  %v2156_v1 = vunpack.c.l.b16 %v2070_v40  ;;  %v2874_v18 = vrot.slane %v11156_v41, 6 }
 0x169   : > { %978 = vrot.lane.b32.xlu0 %v890_v32, %s12809_s12  ;;  %v2157_v32 = vunpack.c.l.b16 %v2073_v24  ;;  %v2872_v24 = vsel %vm12962_vm6, %v11200_v7, %v2871_v59 }
 0x16a   : > { %v782_v35 = vpop.f32.mrf.mxu0 }
 0x16b   : > { %v826_v4 = vmul.f32 %v13204_v37, %v782_v35  ;;  %v951_v56 = vpop.permute.xlu1 %950  ;;  %v2183_v40 = vpack.c.b16 %v2157_v32, %v2156_v1  ;;  %v2953_v1 = vunpack.c.l.b16 %v2872_v24 }
 0x16c   : > { %v1774_v47 = vpop.f32.mrf.mxu2  ;;  %1037 = vst.msk [vmem:[%s13452_s19 + $0x50] sm:$0xff] %vm1026_vm8, %v951_v56  ;;  %v1588_v3 = vpop.f32.mrf.mxu1  ;;  %11216 = vmatmul.msk.bf16.gmra.mxu3 %vm658_vm3, %v2978_v14 }
 0x16d   : > { %v1775_v17 = vadd.f32 %v1774_v47, %v1586_v25  ;;  %v859_v51 = vadd.f32 %v13208_v45, %v826_v4  ;;  %v2875_v25 = vsel %vm12962_vm6, %v2873_v29, %v2874_v18  ;;  %v12527_v4 = vld [vmem:[%s12943_s18 + $0x2a8] sm:$0xf]  ;;  %v12367_v29 = vld [vmem:[%s12943_s18 + $0x290] sm:$0xff] }
 0x16e   : > { %v2076_v14 = vrot.slane %v12527_v4, 6  ;;  %v2954_v32 = vunpack.c.l.b16 %v2875_v25 }
 0x16f   : > { %v891_v31 = vmax.f32 %v859_v51, 0.0  ;;  %v13834_v13 = vadd.f32 %v1964_v16, %v1775_v17  ;;  %v1969_v35 = vpop.f32.mrf.mxu3  ;;  %v11005_v17 = vrot.slane %v10688_v54, 10  ;;  %v11158_v54 = vld [vmem:[%s12943_s18 + $0x368] sm:$0xf] }
 0x170   : > { %v2078_v18 = vrot.slane %v2076_v14, 4  ;;  %v2979_v24 = vpack.c.b16 %v2954_v32, %v2953_v1  ;;  %v11201_v1 = vrot.slane %v11158_v54, 10  ;;  %v10695_v54 = vld [vmem:[%s12943_s18 + $0x2c0] sm:$0xf] }
 0x171   : > { %980 = vrot.lane.b32.xlu1 %v891_v31, %s12809_s12  ;;  %v12528_v31 = vld [vmem:[%s12943_s18 + $0x2ac] sm:$0xf] }
 0x172   : > { %v785_v56 = vpop.f32.mrf.mxu0  ;;  %v2079_v4 = vrot.slane %v12528_v31, 6 }
 0x173   : > { %v827_v16 = vmul.f32 %v13204_v37, %v785_v56  ;;  %v959_v41 = vpop.permute.xlu2 %958  ;;  %v11159_v56 = vld [vmem:[%s12943_s18 + $0x36c] sm:$0xf] }
 0x174   : > { %v1776_v47 = vpop.f32.mrf.mxu2  ;;  %1041 = vst.msk [vmem:[%s13452_s19 + $0x70] sm:$0xff] %vm1026_vm8, %v959_v41  ;;  %v1591_v51 = vpop.f32.mrf.mxu1  ;;  %v2080_v25 = vsel %vm12962_vm6, %v2078_v18, %v2079_v4 }
 0x175   : > { %v1777_v59 = vadd.f32 %v1776_v47, %v1588_v3  ;;  %v860_v7 = vadd.f32 %v13208_v45, %v827_v16  ;;  %11021 = vmatmul.msk.bf16.gmra.mxu0 %vm658_vm3, %v2183_v40  ;;  %v2077_v40 = vsel %vm12962_vm6, %v11005_v17, %v2076_v14  ;;  %v2878_v16 = vrot.slane %v11159_v56, 6 }
 0x177   : > { %v892_v5 = vmax.f32 %v860_v7, 0.0  ;;  %v13851_v49 = vadd.f32 %v1966_v27, %v1777_v59  ;;  %11038 = vmatmul.msk.bf16.gmra.mxu1 %vm658_vm3, %v13113_v44  ;;  %v1971_v3 = vpop.f32.mrf.mxu3  ;;  %v11160_v27 = vld [vmem:[%s12943_s18 + $0x370] sm:$0xf]  ;;  %v2880_v18 = vrot.slane %v2878_v16, 4 }
 0x178   : > { %11119 = vmatmul.msk.bf16.gmra.mxu2 %vm658_vm3, %v12367_v29  ;;  %v2158_v29 = vunpack.c.l.b16 %v2077_v40  ;;  %v2881_v31 = vrot.slane %v11160_v27, 6 }
 0x179   : > { %982 = vrot.lane.b32.xlu2 %v892_v5, %s12809_s12  ;;  %v2159_v5 = vunpack.c.l.b16 %v2080_v25  ;;  %v2879_v25 = vsel %vm12962_vm6, %v11201_v1, %v2878_v16 }
 0x17a   : > { %v787_v41 = vpop.f32.mrf.mxu0 }
 0x17b   : > { %v828_v47 = vmul.f32 %v13204_v37, %v787_v41  ;;  %v955_v59 = vpop.permute.xlu0 %954  ;;  %v2184_v40 = vpack.c.b16 %v2159_v5, %v2158_v29  ;;  %v2955_v29 = vunpack.c.l.b16 %v2879_v25 }
 0x17c   : > { %v1779_v7 = vpop.f32.mrf.mxu2  ;;  %1039 = vst.msk [vmem:[%s13452_s19 + $0x60] sm:$0xff] %vm1026_vm8, %v955_v59  ;;  %v1593_v17 = vpop.f32.mrf.mxu1  ;;  %11217 = vmatmul.msk.bf16.gmra.mxu3 %vm658_vm3, %v2979_v24 }
 0x17d   : > { %v1780_v32 = vadd.f32 %v1779_v7, %v1591_v51  ;;  %v861_v14 = vadd.f32 %v13208_v45, %v828_v47  ;;  %v2882_v51 = vsel %vm12962_vm6, %v2880_v18, %v2881_v31  ;;  %v12529_v47 = vld [vmem:[%s12943_s18 + $0x2c4] sm:$0xf]  ;;  %v12369_v18 = vld [vmem:[%s12943_s18 + $0x2ac] sm:$0xff] }
 0x17e   : > { %v2083_v24 = vrot.slane %v12529_v47, 6  ;;  %v2956_v5 = vunpack.c.l.b16 %v2882_v51 }
 0x17f   : > { %v893_v4 = vmax.f32 %v861_v14, 0.0  ;;  %v13868_v56 = vadd.f32 %v1969_v35, %v1780_v32  ;;  %v1974_v41 = vpop.f32.mrf.mxu3  ;;  %v11006_v32 = vrot.slane %v10695_v54, 10  ;;  %v11162_v54 = vld [vmem:[%s12943_s18 + $0x384] sm:$0xf] }
 0x180   : > { %v2085_v31 = vrot.slane %v2083_v24, 4  ;;  %v2980_v25 = vpack.c.b16 %v2956_v5, %v2955_v29  ;;  %v11202_v29 = vrot.slane %v11162_v54, 10  ;;  %v10702_v54 = vld [vmem:[%s12943_s18 + $0x2dc] sm:$0xf] }
 0x181   : > { %17395 = vst [vmem:[#allocation22_spill] sm:$0xff] %v13868_v56  ;;  %984 = vrot.lane.b32.xlu0 %v893_v4, %s12809_s12  ;;  %v12530_v4 = vld [vmem:[%s12943_s18 + $0x2c8] sm:$0xf] }
 0x182   : > { %v790_v59 = vpop.f32.mrf.mxu0  ;;  %v2086_v47 = vrot.slane %v12530_v4, 6 }
 0x183   : > { %v829_v35 = vmul.f32 %v13204_v37, %v790_v59  ;;  %v957_v27 = vpop.permute.xlu1 %956  ;;  %v11163_v59 = vld [vmem:[%s12943_s18 + $0x388] sm:$0xf] }
 0x184   : > { %v1781_v7 = vpop.f32.mrf.mxu2  ;;  %1040 = vst.msk [vmem:[%s13452_s19 + $0x68] sm:$0xff] %vm1026_vm8, %v957_v27  ;;  %v1596_v14 = vpop.f32.mrf.mxu1  ;;  %v2087_v51 = vsel %vm12962_vm6, %v2085_v31, %v2086_v47 }
 0x185   : > { %v1782_v16 = vadd.f32 %v1781_v7, %v1593_v17  ;;  %v862_v1 = vadd.f32 %v13208_v45, %v829_v35  ;;  %11022 = vmatmul.msk.bf16.gmra.mxu0 %vm658_vm3, %v2184_v40  ;;  %v2084_v40 = vsel %vm12962_vm6, %v11006_v32, %v2083_v24  ;;  %v2885_v35 = vrot.slane %v11163_v59, 6 }
 0x187   : > { %v894_v44 = vmax.f32 %v862_v1, 0.0  ;;  %v13885_v56 = vadd.f32 %v1971_v3, %v1782_v16  ;;  %11039 = vmatmul.msk.bf16.gmra.mxu1 %vm658_vm3, %v13140_v20  ;;  %v1976_v17 = vpop.f32.mrf.mxu3  ;;  %v11164_v3 = vld [vmem:[%s12943_s18 + $0x38c] sm:$0xf]  ;;  %v2887_v31 = vrot.slane %v2885_v35, 4 }
 0x188   : > { %11120 = vmatmul.msk.bf16.gmra.mxu2 %vm658_vm3, %v12369_v18  ;;  %v2160_v18 = vunpack.c.l.b16 %v2084_v40  ;;  %v2888_v4 = vrot.slane %v11164_v3, 6 }
 0x189   : > { %986 = vrot.lane.b32.xlu1 %v894_v44, %s12809_s12  ;;  %v2161_v44 = vunpack.c.l.b16 %v2087_v51  ;;  %v2886_v51 = vsel %vm12962_vm6, %v11202_v29, %v2885_v35 }
 0x18a   : > { %v792_v27 = vpop.f32.mrf.mxu0 }
 0x18b   : > { %v830_v7 = vmul.f32 %v13204_v37, %v792_v27  ;;  %v965_v16 = vpop.permute.xlu2 %964  ;;  %v2185_v40 = vpack.c.b16 %v2161_v44, %v2160_v18  ;;  %v2957_v18 = vunpack.c.l.b16 %v2886_v51 }
 0x18c   : > { %v1784_v1 = vpop.f32.mrf.mxu2  ;;  %1044 = vst.msk [vmem:[%s13452_s19 + $0x88] sm:$0xff] %vm1026_vm8, %v965_v16  ;;  %v1598_v32 = vpop.f32.mrf.mxu1  ;;  %11218 = vmatmul.msk.bf16.gmra.mxu3 %vm658_vm3, %v2980_v25 }
 0x18d   : > { %v1785_v5 = vadd.f32 %v1784_v1, %v1596_v14  ;;  %v863_v24 = vadd.f32 %v13208_v45, %v830_v7  ;;  %v2889_v14 = vsel %vm12962_vm6, %v2887_v31, %v2888_v4  ;;  %v12531_v7 = vld [vmem:[%s12943_s18 + $0x2e0] sm:$0xf]  ;;  %v12371_v31 = vld [vmem:[%s12943_s18 + $0x2c8] sm:$0xff] }
 0x18e   : > { %v2090_v25 = vrot.slane %v12531_v7, 6  ;;  %v2958_v44 = vunpack.c.l.b16 %v2889_v14 }
 0x18f   : > { %v895_v47 = vmax.f32 %v863_v24, 0.0  ;;  %v13902_v59 = vadd.f32 %v1974_v41, %v1785_v5  ;;  %v1979_v27 = vpop.f32.mrf.mxu3  ;;  %v11007_v5 = vrot.slane %v10702_v54, 10  ;;  %v11166_v54 = vld [vmem:[%s12943_s18 + $0x3a0] sm:$0xf] }
 0x190   : > { %v2092_v4 = vrot.slane %v2090_v25, 4  ;;  %v2981_v51 = vpack.c.b16 %v2958_v44, %v2957_v18  ;;  %v11203_v18 = vrot.slane %v11166_v54, 10 }
 0x191   : > { %17396 = vst [vmem:[#allocation23_spill] sm:$0xff] %v13902_v59  ;;  %988 = vrot.lane.b32.xlu2 %v895_v47, %s12809_s12  ;;  %v12532_v47 = vld [vmem:[%s12943_s18 + $0x2e4] sm:$0xf] }
 0x192   : > { %v795_v16 = vpop.f32.mrf.mxu0  ;;  %v2093_v7 = vrot.slane %v12532_v47, 6 }
 0x193   : > { %v831_v41 = vmul.f32 %v13204_v37, %v795_v16  ;;  %v961_v3 = vpop.permute.xlu0 %960  ;;  %v11167_v16 = vld [vmem:[%s12943_s18 + $0x3a4] sm:$0xf] }
 0x194   : > { %v1786_v1 = vpop.f32.mrf.mxu2  ;;  %1042 = vst.msk [vmem:[%s13452_s19 + $0x78] sm:$0xff] %vm1026_vm8, %v961_v3  ;;  %v1601_v24 = vpop.f32.mrf.mxu1  ;;  %v2094_v14 = vsel %vm12962_vm6, %v2092_v4, %v2093_v7 }
 0x195   : > { %v1787_v35 = vadd.f32 %v1786_v1, %v1598_v32  ;;  %v864_v29 = vadd.f32 %v13208_v45, %v831_v41  ;;  %11023 = vmatmul.msk.bf16.gmra.mxu0 %vm658_vm3, %v2185_v40  ;;  %v2091_v40 = vsel %vm12962_vm6, %v11007_v5, %v2090_v25  ;;  %v2892_v41 = vrot.slane %v11167_v16, 6 }
 0x197   : > { %v896_v20 = vmax.f32 %v864_v29, 0.0  ;;  %v13919_v59 = vadd.f32 %v1976_v17, %v1787_v35  ;;  %11040 = vmatmul.msk.bf16.gmra.mxu1 %vm658_vm3, %v13167_v62  ;;  %v1981_v32 = vpop.f32.mrf.mxu3  ;;  %v11168_v17 = vld [vmem:[%s12943_s18 + $0x3a8] sm:$0xf]  ;;  %v2894_v4 = vrot.slane %v2892_v41, 4 }
 0x198   : > { %11121 = vmatmul.msk.bf16.gmra.mxu2 %vm658_vm3, %v12371_v31  ;;  %v2162_v31 = vunpack.c.l.b16 %v2091_v40  ;;  %v2895_v47 = vrot.slane %v11168_v17, 6 }
 0x199   : > { %990 = vrot.lane.b32.xlu0 %v896_v20, %s12809_s12  ;;  %v2163_v20 = vunpack.c.l.b16 %v2094_v14  ;;  %v12533_v14 = vld [vmem:[%s12943_s18 + $0x2fc] sm:$0xf] }
 0x19a   : > { %v797_v3 = vpop.f32.mrf.mxu0 }
 0x19b   : > { %v832_v1 = vmul.f32 %v13204_v37, %v797_v3  ;;  %v963_v35 = vpop.permute.xlu1 %962  ;;  %v2186_v40 = vpack.c.b16 %v2163_v20, %v2162_v31  ;;  %v10709_v3 = vld [vmem:[%s12943_s18 + $0x2f8] sm:$0xf] }
 0x19c   : > { %v1789_v29 = vpop.f32.mrf.mxu2  ;;  %1043 = vst.msk [vmem:[%s13452_s19 + $0x80] sm:$0xff] %vm1026_vm8, %v963_v35  ;;  %v1603_v5 = vpop.f32.mrf.mxu1  ;;  %11219 = vmatmul.msk.bf16.gmra.mxu3 %vm658_vm3, %v2981_v51  ;;  %v2097_v51 = vrot.slane %v12533_v14, 6 }
 0x19d   : > { %v1790_v44 = vadd.f32 %v1789_v29, %v1601_v24  ;;  %v865_v25 = vadd.f32 %v13208_v45, %v832_v1  ;;  %v2893_v24 = vsel %vm12962_vm6, %v11203_v18, %v2892_v41  ;;  %v2896_v45 = vsel %vm12962_vm6, %v2894_v4, %v2895_v47  ;;  %v12373_v41 = vld [vmem:[%s12943_s18 + $0x2e4] sm:$0xff] }
 0x19e   : > { %v2959_v35 = vunpack.c.l.b16 %v2893_v24  ;;  %v2960_v29 = vunpack.c.l.b16 %v2896_v45  ;;  %v11008_v18 = vrot.slane %v10709_v3, 10  ;;  %v11170_v3 = vld [vmem:[%s12943_s18 + $0x3bc] sm:$0xf] }
 0x19f   : > { %v897_v7 = vmax.f32 %v865_v25, 0.0  ;;  %v13936_v37 = vadd.f32 %v1979_v27, %v1790_v44  ;;  %v3049_v16 = vpop.f32.mrf.mxu3  ;;  %v2099_v44 = vrot.slane %v2097_v51, 4  ;;  %v12534_v25 = vld [vmem:[%s12943_s18 + $0x300] sm:$0xf] }
 0x1a0   : > { %v2100_v4 = vrot.slane %v12534_v25, 6 }
 0x1a1   : > { %992 = vrot.lane.b32.xlu1 %v897_v7, %s12809_s12 }
 0x1a2   : > { %v2254_v54 = vpop.f32.mrf.mxu0  ;;  %v2101_v45 = vsel %vm12962_vm6, %v2099_v44, %v2100_v4 }
 0x1a3   : > { %v2334_v27 = vadd.f32 %v2254_v54, %v13242_v36  ;;  %v971_v17 = vpop.permute.xlu2 %970  ;;  %v11171_v36 = vld [vmem:[%s12943_s18 + $0x3c0] sm:$0xf] }
 0x1a4   : > { %v1791_v1 = vpop.f32.mrf.mxu2  ;;  %1047 = vst.msk [vmem:[%s13452_s19 + $0xa0] sm:$0xff] %vm1026_vm8, %v971_v17  ;;  %v2380_v20 = vpop.f32.mrf.mxu1  ;;  %v2899_v14 = vrot.slane %v11171_v36, 6 }
 0x1a5   : > { %v1792_v31 = vadd.f32 %v1791_v1, %v1603_v5  ;;  %11024 = vmatmul.msk.bf16.gmra.mxu0 %vm658_vm3, %v2186_v40  ;;  %v2460_v47 = vadd.f32 %v2380_v20, %v2334_v27  ;;  %v2982_v5 = vpack.c.b16 %v2960_v29, %v2959_v35  ;;  %v2098_v40 = vsel %vm12962_vm6, %v11008_v18, %v2097_v51  ;;  %v11172_v27 = vld [vmem:[%s12943_s18 + $0x3c4] sm:$0xf] }
 0x1a6   : > { %v2165_v20 = vunpack.c.l.b16 %v2101_v45  ;;  %v11204_v51 = vrot.slane %v11170_v3, 10  ;;  %v2902_v18 = vrot.slane %v11172_v27, 6 }
 0x1a7   : > { %v13952_v7 = vadd.f32 %v1981_v32, %v1792_v31  ;;  %11041 = vmatmul.msk.bf16.gmra.mxu1 %vm658_vm3, %v13206_v43  ;;  %v3051_v24 = vpop.f32.mrf.mxu3  ;;  %v2164_v31 = vunpack.c.l.b16 %v2098_v40  ;;  %v11408_v43 = vld [vmem:[%s12943_s18 + $0x1e0] sm:$0xf] }
 0x1a8   : > { %11122 = vmatmul.msk.bf16.gmra.mxu2 %vm658_vm3, %v12373_v41  ;;  %v2901_v41 = vrot.slane %v2899_v14, 4  ;;  %v2900_v36 = vsel %vm12962_vm6, %v11204_v51, %v2899_v14  ;;  %v12375_v14 = vld [vmem:[%s12943_s18 + $0x300] sm:$0xff] }
 0x1a9   : > { %v2187_v4 = vpack.c.b16 %v2165_v20, %v2164_v31 }
 0x1aa   : > { %v2256_v54 = vpop.f32.mrf.mxu0  ;;  %v2903_v40 = vsel %vm12962_vm6, %v2901_v41, %v2902_v18 }
 0x1ab   : > { %v2335_v32 = vadd.f32 %v2256_v54, %v13261_v12  ;;  %v967_v17 = vpop.permute.xlu0 %966  ;;  %v10716_v54 = vld [vmem:[%s12943_s18 + $0x314] sm:$0xf] }
 0x1ac   : > { %v2602_v1 = vpop.f32.mrf.mxu2  ;;  %1045 = vst.msk [vmem:[%s13452_s19 + $0x90] sm:$0xff] %vm1026_vm8, %v967_v17  ;;  %v2382_v29 = vpop.f32.mrf.mxu1  ;;  %11220 = vmatmul.msk.bf16.gmra.mxu3 %vm658_vm3, %v2982_v5  ;;  %v2962_v17 = vunpack.c.l.b16 %v2903_v40  ;;  %v11009_v20 = vrot.slane %v10716_v54, 10  ;;  %v11174_v54 = vld [vmem:[%s12943_s18 + $0x3d8] sm:$0xf] }
 0x1ad   : > { %v2682_v35 = vadd.f32 %v2602_v1, %v2460_v47  ;;  %v2461_v44 = vadd.f32 %v2382_v29, %v2335_v32  ;;  %v12535_v47 = vld [vmem:[%s12943_s18 + $0x318] sm:$0xf]  ;;  %v2961_v32 = vunpack.c.l.b16 %v2900_v36  ;;  %v12536_v29 = vld [vmem:[%s12943_s18 + $0x31c] sm:$0xf] }
 0x1ae   : > { %v2104_v45 = vrot.slane %v12535_v47, 6  ;;  %v2107_v51 = vrot.slane %v12536_v29, 6 }
 0x1af   : > { %v13967_v25 = vadd.f32 %v3049_v16, %v2682_v35  ;;  %v3054_v12 = vpop.f32.mrf.mxu3 }
 0x1b0   : > { %v2106_v35 = vrot.slane %v2104_v45, 4 }
 0x1b2   : > { %v2259_v5 = vpop.f32.mrf.mxu0  ;;  %v2108_v40 = vsel %vm12962_vm6, %v2106_v35, %v2107_v51 }
 0x1b3   : > { %v2336_v3 = vadd.f32 %v2259_v5, %v13282_v42  ;;  %v969_v27 = vpop.permute.xlu1 %968  ;;  %v11175_v42 = vld [vmem:[%s12943_s18 + $0x3dc] sm:$0xf] }
 0x1b4   : > { %v2604_v16 = vpop.f32.mrf.mxu2  ;;  %1046 = vst.msk [vmem:[%s13452_s19 + $0x98] sm:$0xff] %vm1026_vm8, %v969_v27  ;;  %v2385_v31 = vpop.f32.mrf.mxu1  ;;  %v2906_v47 = vrot.slane %v11175_v42, 6 }
 0x1b5   : > { %v2683_v1 = vadd.f32 %v2604_v16, %v2461_v44  ;;  %11025 = vmatmul.msk.bf16.gmra.mxu0 %vm658_vm3, %v2187_v4  ;;  %v2462_v41 = vadd.f32 %v2385_v31, %v2336_v3  ;;  %v2983_v44 = vpack.c.b16 %v2962_v17, %v2961_v32  ;;  %v2105_v4 = vsel %vm12962_vm6, %v11009_v20, %v2104_v45  ;;  %v11176_v3 = vld [vmem:[%s12943_s18 + $0x3e0] sm:$0xf] }
 0x1b6   : > { %v2167_v31 = vunpack.c.l.b16 %v2108_v40  ;;  %v11205_v45 = vrot.slane %v11174_v54, 10  ;;  %v2909_v20 = vrot.slane %v11176_v3, 6 }
 0x1b7   : > { %v13982_v18 = vadd.f32 %v3051_v24, %v2683_v1  ;;  %11042 = vmatmul.msk.bf16.gmra.mxu1 %vm658_vm3, %v13246_v46  ;;  %v3056_v36 = vpop.f32.mrf.mxu3  ;;  %v2166_v1 = vunpack.c.l.b16 %v2105_v4  ;;  %v11402_v46 = vld [vmem:[%s12943_s18 + $0x1c4] sm:$0xf] }
 0x1b8   : > { %11123 = vmatmul.msk.bf16.gmra.mxu2 %vm658_vm3, %v12375_v14  ;;  %v2908_v14 = vrot.slane %v2906_v47, 4  ;;  %v2907_v42 = vsel %vm12962_vm6, %v11205_v45, %v2906_v47  ;;  %v12377_v47 = vld [vmem:[%s12943_s18 + $0x31c] sm:$0xff] }
 0x1b9   : > { %v2188_v51 = vpack.c.b16 %v2167_v31, %v2166_v1 }
 0x1ba   : > { %v2261_v5 = vpop.f32.mrf.mxu0  ;;  %v2910_v4 = vsel %vm12962_vm6, %v2908_v14, %v2909_v20 }
 0x1bb   : > { %v2337_v24 = vadd.f32 %v2261_v5, %v13301_v19  ;;  %v977_v27 = vpop.permute.xlu2 %976  ;;  %v10723_v5 = vld [vmem:[%s12943_s18 + $0x330] sm:$0xf] }
 0x1bc   : > { %v2607_v16 = vpop.f32.mrf.mxu2  ;;  %1050 = vst.msk [vmem:[%s13452_s19 + $0xb8] sm:$0xff] %vm1026_vm8, %v977_v27  ;;  %v2387_v17 = vpop.f32.mrf.mxu1  ;;  %11221 = vmatmul.msk.bf16.gmra.mxu3 %vm658_vm3, %v2983_v44  ;;  %v2964_v27 = vunpack.c.l.b16 %v2910_v4  ;;  %v11010_v31 = vrot.slane %v10723_v5, 10  ;;  %v11178_v5 = vld [vmem:[%s12943_s18 + $0x3f4] sm:$0xf] }
 0x1bd   : > { %v2684_v32 = vadd.f32 %v2607_v16, %v2462_v41  ;;  %v2463_v35 = vadd.f32 %v2387_v17, %v2337_v24  ;;  %v12537_v41 = vld [vmem:[%s12943_s18 + $0x334] sm:$0xf]  ;;  %v2963_v24 = vunpack.c.l.b16 %v2907_v42  ;;  %v12538_v17 = vld [vmem:[%s12943_s18 + $0x338] sm:$0xf] }
 0x1be   : > { %v2111_v40 = vrot.slane %v12537_v41, 6  ;;  %v2114_v45 = vrot.slane %v12538_v17, 6 }
 0x1bf   : > { %v13997_v29 = vadd.f32 %v3054_v12, %v2684_v32  ;;  %v3059_v19 = vpop.f32.mrf.mxu3 }
 0x1c0   : > { %v2113_v32 = vrot.slane %v2111_v40, 4 }
 0x1c2   : > { %v2264_v44 = vpop.f32.mrf.mxu0  ;;  %v2115_v4 = vsel %vm12962_vm6, %v2113_v32, %v2114_v45 }
 0x1c3   : > { %v2338_v54 = vadd.f32 %v2264_v44, %v13322_v38  ;;  %v973_v3 = vpop.permute.xlu0 %972  ;;  %v11179_v38 = vld [vmem:[%s12943_s18 + $0x3f8] sm:$0xf] }
 0x1c4   : > { %v2609_v12 = vpop.f32.mrf.mxu2  ;;  %1048 = vst.msk [vmem:[%s13452_s19 + $0xa8] sm:$0xff] %vm1026_vm8, %v973_v3  ;;  %v2390_v1 = vpop.f32.mrf.mxu1  ;;  %v2913_v41 = vrot.slane %v11179_v38, 6 }
 0x1c5   : > { %v2685_v16 = vadd.f32 %v2609_v12, %v2463_v35  ;;  %11026 = vmatmul.msk.bf16.gmra.mxu0 %vm658_vm3, %v2188_v51  ;;  %v2464_v14 = vadd.f32 %v2390_v1, %v2338_v54  ;;  %v2984_v35 = vpack.c.b16 %v2964_v27, %v2963_v24  ;;  %v2112_v51 = vsel %vm12962_vm6, %v11010_v31, %v2111_v40  ;;  %v11180_v54 = vld [vmem:[%s12943_s18 + $0x3fc] sm:$0xf] }
 0x1c6   : > { %v2169_v1 = vunpack.c.l.b16 %v2115_v4  ;;  %v11206_v40 = vrot.slane %v11178_v5, 10  ;;  %v2916_v31 = vrot.slane %v11180_v54, 6 }
 0x1c7   : > { %v14012_v20 = vadd.f32 %v3056_v36, %v2685_v16  ;;  %11043 = vmatmul.msk.bf16.gmra.mxu1 %vm658_vm3, %v13285_v52  ;;  %v3061_v42 = vpop.f32.mrf.mxu3  ;;  %v2168_v16 = vunpack.c.l.b16 %v2112_v51 }
 0x1c8   : > { %11124 = vmatmul.msk.bf16.gmra.mxu2 %vm658_vm3, %v12377_v47  ;;  %v2915_v47 = vrot.slane %v2913_v41, 4  ;;  %v2914_v38 = vsel %vm12962_vm6, %v11206_v40, %v2913_v41  ;;  %v12379_v41 = vld [vmem:[%s12943_s18 + $0x338] sm:$0xff] }
 0x1c9   : > { %v2189_v45 = vpack.c.b16 %v2169_v1, %v2168_v16 }
 0x1ca   : > { %v2266_v44 = vpop.f32.mrf.mxu0  ;;  %v2917_v51 = vsel %vm12962_vm6, %v2915_v47, %v2916_v31 }
 0x1cb   : > { %v2339_v36 = vadd.f32 %v2266_v44, %v13341_v8  ;;  %v975_v3 = vpop.permute.xlu1 %974  ;;  %v10730_v44 = vld [vmem:[%s12943_s18 + $0x34c] sm:$0xf] }
 0x1cc   : > { %v2612_v12 = vpop.f32.mrf.mxu2  ;;  %1049 = vst.msk [vmem:[%s13452_s19 + $0xb0] sm:$0xff] %vm1026_vm8, %v975_v3  ;;  %v2392_v27 = vpop.f32.mrf.mxu1  ;;  %11222 = vmatmul.msk.bf16.gmra.mxu3 %vm658_vm3, %v2984_v35  ;;  %v2966_v3 = vunpack.c.l.b16 %v2917_v51  ;;  %v11011_v1 = vrot.slane %v10730_v44, 10  ;;  %v11182_v44 = vld [vmem:[%s12943_s18 + $0x410] sm:$0xf] }
 0x1cd   : > { %v2686_v24 = vadd.f32 %v2612_v12, %v2464_v14  ;;  %v2465_v32 = vadd.f32 %v2392_v27, %v2339_v36  ;;  %v12539_v14 = vld [vmem:[%s12943_s18 + $0x350] sm:$0xf]  ;;  %v2965_v36 = vunpack.c.l.b16 %v2914_v38  ;;  %v12540_v27 = vld [vmem:[%s12943_s18 + $0x354] sm:$0xf] }
 0x1ce   : > { %v2118_v4 = vrot.slane %v12539_v14, 6  ;;  %v2121_v40 = vrot.slane %v12540_v27, 6 }
 0x1cf   : > { %v14027_v17 = vadd.f32 %v3059_v19, %v2686_v24  ;;  %v3064_v8 = vpop.f32.mrf.mxu3 }
 0x1d0   : > { %v2120_v24 = vrot.slane %v2118_v4, 4 }
 0x1d2   : > { %v2269_v35 = vpop.f32.mrf.mxu0  ;;  %v2122_v51 = vsel %vm12962_vm6, %v2120_v24, %v2121_v40 }
 0x1d3   : > { %v2340_v5 = vadd.f32 %v2269_v35, %v13362_v2  ;;  %v983_v54 = vpop.permute.xlu2 %982  ;;  %v11183_v2 = vld [vmem:[%s12943_s18 + $0x414] sm:$0xf] }
 0x1d4   : > { %v2614_v19 = vpop.f32.mrf.mxu2  ;;  %1053 = vst.msk [vmem:[%s13452_s19 + $0xd0] sm:$0xff] %vm1026_vm8, %v983_v54  ;;  %v2395_v16 = vpop.f32.mrf.mxu1  ;;  %v2920_v14 = vrot.slane %v11183_v2, 6 }
 0x1d5   : > { %v2687_v12 = vadd.f32 %v2614_v19, %v2465_v32  ;;  %11027 = vmatmul.msk.bf16.gmra.mxu0 %vm658_vm3, %v2189_v45  ;;  %v2466_v47 = vadd.f32 %v2395_v16, %v2340_v5  ;;  %v2985_v32 = vpack.c.b16 %v2966_v3, %v2965_v36  ;;  %v2119_v45 = vsel %vm12962_vm6, %v11011_v1, %v2118_v4  ;;  %v11184_v5 = vld [vmem:[%s12943_s18 + $0x418] sm:$0xf] }
 0x1d6   : > { %v2171_v16 = vunpack.c.l.b16 %v2122_v51  ;;  %v11207_v4 = vrot.slane %v11182_v44, 10  ;;  %v2923_v1 = vrot.slane %v11184_v5, 6 }
 0x1d7   : > { %v14042_v31 = vadd.f32 %v3061_v42, %v2687_v12  ;;  %11044 = vmatmul.msk.bf16.gmra.mxu1 %vm658_vm3, %v13325_v39  ;;  %v3066_v38 = vpop.f32.mrf.mxu3  ;;  %v2170_v12 = vunpack.c.l.b16 %v2119_v45 }
 0x1d8   : > { %11125 = vmatmul.msk.bf16.gmra.mxu2 %vm658_vm3, %v12379_v41  ;;  %v2922_v41 = vrot.slane %v2920_v14, 4  ;;  %v2921_v2 = vsel %vm12962_vm6, %v11207_v4, %v2920_v14  ;;  %v12381_v14 = vld [vmem:[%s12943_s18 + $0x354] sm:$0xff] }
 0x1d9   : > { %v2190_v40 = vpack.c.b16 %v2171_v16, %v2170_v12 }
 0x1da   : > { %v2271_v35 = vpop.f32.mrf.mxu0  ;;  %v2924_v45 = vsel %vm12962_vm6, %v2922_v41, %v2923_v1 }
 0x1db   : > { %v2341_v42 = vadd.f32 %v2271_v35, %v13381_v53  ;;  %v979_v54 = vpop.permute.xlu0 %978  ;;  %v10737_v35 = vld [vmem:[%s12943_s18 + $0x368] sm:$0xf] }
 0x1dc   : > { %v2617_v19 = vpop.f32.mrf.mxu2  ;;  %1051 = vst.msk [vmem:[%s13452_s19 + $0xc0] sm:$0xff] %vm1026_vm8, %v979_v54  ;;  %v2397_v3 = vpop.f32.mrf.mxu1  ;;  %11223 = vmatmul.msk.bf16.gmra.mxu3 %vm658_vm3, %v2985_v32  ;;  %v2968_v54 = vunpack.c.l.b16 %v2924_v45  ;;  %v11012_v16 = vrot.slane %v10737_v35, 10  ;;  %v11186_v35 = vld [vmem:[%s12943_s18 + $0x42c] sm:$0xf] }
 0x1dd   : > { %v2688_v36 = vadd.f32 %v2617_v19, %v2466_v47  ;;  %v2467_v24 = vadd.f32 %v2397_v3, %v2341_v42  ;;  %v12541_v47 = vld [vmem:[%s12943_s18 + $0x36c] sm:$0xf]  ;;  %v2967_v42 = vunpack.c.l.b16 %v2921_v2  ;;  %v12542_v3 = vld [vmem:[%s12943_s18 + $0x370] sm:$0xf] }
 0x1de   : > { %v2125_v51 = vrot.slane %v12541_v47, 6  ;;  %v2128_v4 = vrot.slane %v12542_v3, 6 }
 0x1df   : > { %v14057_v27 = vadd.f32 %v3064_v8, %v2688_v36  ;;  %v3069_v53 = vpop.f32.mrf.mxu3 }
 0x1e0   : > { %v2127_v36 = vrot.slane %v2125_v51, 4 }
 0x1e2   : > { %v2274_v32 = vpop.f32.mrf.mxu0  ;;  %v2129_v45 = vsel %vm12962_vm6, %v2127_v36, %v2128_v4 }
 0x1e3   : > { %v2342_v44 = vadd.f32 %v2274_v32, %v13400_v55  ;;  %v981_v5 = vpop.permute.xlu1 %980  ;;  %v11187_v55 = vld [vmem:[%s12943_s18 + $0x430] sm:$0xf] }
 0x1e4   : > { %v2619_v8 = vpop.f32.mrf.mxu2  ;;  %1052 = vst.msk [vmem:[%s13452_s19 + $0xc8] sm:$0xff] %vm1026_vm8, %v981_v5  ;;  %v2400_v12 = vpop.f32.mrf.mxu1  ;;  %v2927_v47 = vrot.slane %v11187_v55, 6 }
 0x1e5   : > { %v2689_v19 = vadd.f32 %v2619_v8, %v2467_v24  ;;  %11028 = vmatmul.msk.bf16.gmra.mxu0 %vm658_vm3, %v2190_v40  ;;  %v2468_v41 = vadd.f32 %v2400_v12, %v2342_v44  ;;  %v2986_v24 = vpack.c.b16 %v2968_v54, %v2967_v42  ;;  %v2126_v40 = vsel %vm12962_vm6, %v11012_v16, %v2125_v51  ;;  %v11188_v44 = vld [vmem:[%s12943_s18 + $0x434] sm:$0xf] }
 0x1e6   : > { %v2173_v12 = vunpack.c.l.b16 %v2129_v45  ;;  %v11208_v51 = vrot.slane %v11186_v35, 10  ;;  %v2930_v16 = vrot.slane %v11188_v44, 6 }
 0x1e7   : > { %v14072_v1 = vadd.f32 %v3066_v38, %v2689_v19  ;;  %11045 = vmatmul.msk.bf16.gmra.mxu1 %vm658_vm3, %v13365_v9  ;;  %v3071_v2 = vpop.f32.mrf.mxu3  ;;  %v2172_v19 = vunpack.c.l.b16 %v2126_v40 }
 0x1e8   : > { %11126 = vmatmul.msk.bf16.gmra.mxu2 %vm658_vm3, %v12381_v14  ;;  %v2929_v14 = vrot.slane %v2927_v47, 4  ;;  %v2928_v55 = vsel %vm12962_vm6, %v11208_v51, %v2927_v47  ;;  %v12383_v47 = vld [vmem:[%s12943_s18 + $0x370] sm:$0xff] }
 0x1e9   : > { %v2191_v4 = vpack.c.b16 %v2173_v12, %v2172_v19 }
 0x1ea   : > { %v2276_v32 = vpop.f32.mrf.mxu0  ;;  %v2931_v40 = vsel %vm12962_vm6, %v2929_v14, %v2930_v16 }
 0x1eb   : > { %v2343_v38 = vadd.f32 %v2276_v32, %v13421_v6  ;;  %v989_v5 = vpop.permute.xlu2 %988  ;;  %v10744_v32 = vld [vmem:[%s12943_s18 + $0x384] sm:$0xf] }
 0x1ec   : > { %v2622_v8 = vpop.f32.mrf.mxu2  ;;  %1056 = vst.msk [vmem:[%s13452_s19 + $0xe8] sm:$0xff] %vm1026_vm8, %v989_v5  ;;  %v2402_v54 = vpop.f32.mrf.mxu1  ;;  %11224 = vmatmul.msk.bf16.gmra.mxu3 %vm658_vm3, %v2986_v24  ;;  %v2970_v5 = vunpack.c.l.b16 %v2931_v40  ;;  %v11013_v12 = vrot.slane %v10744_v32, 10  ;;  %v11190_v32 = vld [vmem:[%s12943_s18 + $0x448] sm:$0xf] }
 0x1ed   : > { %v2690_v42 = vadd.f32 %v2622_v8, %v2468_v41  ;;  %v2469_v36 = vadd.f32 %v2402_v54, %v2343_v38  ;;  %v12543_v41 = vld [vmem:[%s12943_s18 + $0x388] sm:$0xf]  ;;  %v2969_v38 = vunpack.c.l.b16 %v2928_v55  ;;  %v12544_v54 = vld [vmem:[%s12943_s18 + $0x38c] sm:$0xf] }
 0x1ee   : > { %v2132_v45 = vrot.slane %v12543_v41, 6  ;;  %v2135_v51 = vrot.slane %v12544_v54, 6 }
 0x1ef   : > { %v14087_v3 = vadd.f32 %v3069_v53, %v2690_v42  ;;  %v3074_v6 = vpop.f32.mrf.mxu3 }
 0x1f0   : > { %v2134_v42 = vrot.slane %v2132_v45, 4  ;;  %v2133_v55 = vsel %vm12962_vm6, %v11013_v12, %v2132_v45  ;;  %v11209_v12 = vrot.slane %v11190_v32, 10  ;;  %v10751_v32 = vld [vmem:[%s12943_s18 + $0x3a0] sm:$0xf] }
 0x1f2   : > { %v2279_v24 = vpop.f32.mrf.mxu0  ;;  %v2136_v40 = vsel %vm12962_vm6, %v2134_v42, %v2135_v51 }
 0x1f3   : > { %v2344_v35 = vadd.f32 %v2279_v24, %v13466_v61  ;;  %v985_v44 = vpop.permute.xlu0 %984  ;;  %v11191_v61 = vld [vmem:[%s12943_s18 + $0x44c] sm:$0xf] }
 0x1f4   : > { %v2624_v53 = vpop.f32.mrf.mxu2  ;;  %1054 = vst.msk [vmem:[%s13452_s19 + $0xd8] sm:$0xff] %vm1026_vm8, %v985_v44  ;;  %v2405_v19 = vpop.f32.mrf.mxu1  ;;  %v2934_v41 = vrot.slane %v11191_v61, 6  ;;  %v12546_v61 = vld [vmem:[%s12943_s18 + $0x2a8] sm:$0xf] }
 0x1f5   : > { %v2691_v8 = vadd.f32 %v2624_v53, %v2469_v36  ;;  %11029 = vmatmul.msk.bf16.gmra.mxu0 %vm658_vm3, %v2191_v4  ;;  %v2470_v14 = vadd.f32 %v2405_v19, %v2344_v35  ;;  %v2987_v4 = vpack.c.b16 %v2970_v5, %v2969_v38  ;;  %v11192_v35 = vld [vmem:[%s12943_s18 + $0x450] sm:$0xf]  ;;  %v12545_v53 = vld [vmem:[%s12943_s18 + $0x2ac] sm:$0xf]  ;;  %v2174_v38 = vunpack.c.l.b16 %v2133_v55 }
 0x1f6   : > { %v2175_v5 = vunpack.c.l.b16 %v2136_v40  ;;  %v2936_v42 = vrot.slane %v2934_v41, 4  ;;  %v2937_v54 = vrot.slane %v11192_v35, 6 }
 0x1f7   : > { %v14102_v16 = vadd.f32 %v3071_v2, %v2691_v8  ;;  %11046 = vmatmul.msk.bf16.gmra.mxu1 %vm658_vm3, %v13405_v28  ;;  %v3076_v36 = vpop.f32.mrf.mxu3  ;;  %v3179_v8 = vrot.slane %v12545_v53, 5  ;;  %v12547_v28 = vld [vmem:[%s12943_s18 + $0x3a4] sm:$0xf] }
 0x1f8   : > { %11127 = vmatmul.msk.bf16.gmra.mxu2 %vm658_vm3, %v12383_v47  ;;  %v2192_v40 = vpack.c.b16 %v2175_v5, %v2174_v38 }
 0x1f9   : > { %v3181_v55 = vrot.slane %v3179_v8, 4 }
 0x1fa   : > { %v2281_v24 = vpop.f32.mrf.mxu0 }
 0x1fb   : > { %v2345_v2 = vadd.f32 %v2281_v24, %v13515_v57  ;;  %v987_v44 = vpop.permute.xlu1 %986  ;;  %v11227_v24 = vrot.slane %v12546_v61, 9  ;;  %v11014_v61 = vrot.slane %v10751_v32, 10 }
 0x1fc   : > { %v2627_v19 = vpop.f32.mrf.mxu2  ;;  %1055 = vst.msk [vmem:[%s13452_s19 + $0xe0] sm:$0xff] %vm1026_vm8, %v987_v44  ;;  %v2407_v47 = vpop.f32.mrf.mxu1  ;;  %11225 = vmatmul.msk.bf16.gmra.mxu3 %vm658_vm3, %v2987_v4  ;;  %v2139_v44 = vrot.slane %v12547_v28, 6  ;;  %v2938_v4 = vsel %vm12962_vm6, %v2936_v42, %v2937_v54 }
 0x1fd   : > { %v2692_v45 = vadd.f32 %v2627_v19, %v2470_v14  ;;  %v2471_v57 = vadd.f32 %v2407_v47, %v2345_v2  ;;  %v2935_v14 = vsel %vm12962_vm6, %v11209_v12, %v2934_v41  ;;  %v2972_v28 = vunpack.c.l.b16 %v2938_v4  ;;  %v12385_v41 = vld [vmem:[%s12943_s18 + $0x38c] sm:$0xff]  ;;  %v12548_v12 = vld [vmem:[%s12943_s18 + $0x3a8] sm:$0xf] }
 0x1fe   : > { %v2971_v47 = vunpack.c.l.b16 %v2935_v14  ;;  %v2141_v38 = vrot.slane %v2139_v44, 4  ;;  %v2142_v39 = vrot.slane %v12548_v12, 6  ;;  %v3180_v42 = vsel %vm12946_vm4, %v11227_v24, %v3179_v8  ;;  %v11342_v4 = vld [vmem:[%s12943_s18 + $0xac] sm:$0xf] }
 0x1ff   : > { %v14118_v51 = vadd.f32 %v3074_v6, %v2692_v45  ;;  %v14121_v53 = vpop.f32.mrf.mxu3  ;;  %v11133_v6 = vld [vmem:[%s12943_s18 + $0x2b0] sm:$0xf]  ;;  %v2140_v24 = vsel %vm12962_vm6, %v11014_v61, %v2139_v44 }
 0x200   : > { %v3182_v19 = vrot.slane %v11133_v6, 5  ;;  %v2988_v8 = vpack.c.b16 %v2972_v28, %v2971_v47  ;;  %v11602_v6 = vld [vmem:[%s17335_s3 + $0x1c] sm:$0x3] }
 0x201   : > { %v5829_v47 = vsel %vm707_vm0, %v11602_v6, 0 }
 0x202   : > { %v2284_v35 = vpop.f32.mrf.mxu0  ;;  %5838 = vmatpush.bf16.msrb.mxu3 %v5829_v47 }
 0x203   : > { %v2346_v2 = vadd.f32 %v2284_v35, %v13580_v0  ;;  %v3183_v0 = vsel %vm12946_vm4, %v3181_v55, %v3182_v19  ;;  %v3291_v35 = vunpack.c.l.b16 %v3180_v42  ;;  %v11519_v55 = vld [vmem:[%s17335_s3 + $0x16] sm:$0x3]  ;;  %v11341_v19 = vld [vmem:[%s12943_s18 + $0xa8] sm:$0xf]  ;;  %v2176_v42 = vunpack.c.l.b16 %v2140_v24 }
 0x204   : > { %v2629_v45 = vpop.f32.mrf.mxu2  ;;  %v2410_v9 = vpop.f32.mrf.mxu1  ;;  %v3292_v14 = vunpack.c.l.b16 %v3183_v0 }
 0x205   : > { %v2693_v5 = vadd.f32 %v2629_v45, %v2471_v57  ;;  %11030 = vmatmul.msk.bf16.gmra.mxu0 %vm658_vm3, %v2192_v40  ;;  %v2472_v54 = vadd.f32 %v2410_v9, %v2346_v2  ;;  %v2143_v9 = vsel %vm12962_vm6, %v2141_v38, %v2142_v39  ;;  %v4142_v45 = vrot.slane %v11342_v4, 7  ;;  %v11343_v38 = vld [vmem:[%s12943_s18 + $0xb0] sm:$0xf] }
 0x206   : > { %v14143_v40 = vpack.c.b16 %v3292_v14, %v3291_v35  ;;  %v5003_v39 = vsel %vm707_vm0, %v11519_v55, 0  ;;  %v2177_v0 = vunpack.c.l.b16 %v2143_v9  ;;  %v11437_v35 = vrot.slane %v11341_v19, 11  ;;  %v11344_v9 = vld [vmem:[%s12943_s18 + $0xb4] sm:$0xf] }
 0x207   : > { %v14139_v32 = vadd.f32 %v3076_v36, %v2693_v5  ;;  %11047 = vmatmul.msk.bf16.gmra.mxu1 %vm658_vm3, %v13469_v63  ;;  %v3081_v57 = vpop.f32.mrf.mxu3  ;;  %v11569_v36 = vld [vmem:[%s17335_s3 + $0x1a] sm:$0x3]  ;;  %5012 = vmatpush.bf16.msrb.mxu0 %v5003_v39  ;;  %v4144_v4 = vrot.slane %v4142_v45, 4 }
 0x208   : > { %11128 = vmatmul.msk.bf16.gmra.mxu2 %vm658_vm3, %v12385_v41  ;;  %v5479_v44 = vsel %vm707_vm0, %v11569_v36, 0  ;;  %v4145_v36 = vrot.slane %v11343_v38, 7  ;;  %v2193_v24 = vpack.c.b16 %v2177_v0, %v2176_v42  ;;  %v4143_v19 = vsel %vm14172_vm11, %v11437_v35, %v4142_v45  ;;  %v11345_v45 = vld [vmem:[%s12943_s18 + $0xb8] sm:$0xf]  ;;  %v11348_v35 = vld [vmem:[%s12943_s18 + $0xc8] sm:$0xf] }
 0x209   : > { %5488 = vmatpush.bf16.msrb.mxu2 %v5479_v44 }
 0x20a   : > { %v2286_v2 = vpop.f32.mrf.mxu0  ;;  %v4146_v44 = vsel %vm14172_vm11, %v4144_v4, %v4145_v36  ;;  %v11454_v4 = vrot.slane %v11343_v38, 9 }
 0x20b   : > { %v2347_v28 = vadd.f32 %v2286_v2, %v13624_v60  ;;  %v991_v61 = vpop.permute.xlu0 %990  ;;  %v11552_v60 = vld [vmem:[%s17335_s3 + $0x18] sm:$0x3]  ;;  %v4589_v42 = vunpack.c.l.b16 %v4146_v44 }
 0x20c   : > { %v2632_v5 = vpop.f32.mrf.mxu2  ;;  %1057 = vst.msk [vmem:[%s13452_s19 + $0xf0] sm:$0xff] %vm1026_vm8, %v991_v61  ;;  %v2412_v12 = vpop.f32.mrf.mxu1  ;;  %11226 = vmatmul.msk.bf16.gmra.mxu3 %vm658_vm3, %v2988_v8  ;;  %v5353_v55 = vsel %vm707_vm0, %v11552_v60, 0 }
 0x20d   : > { %v2694_v41 = vadd.f32 %v2632_v5, %v2472_v54  ;;  %v2473_v14 = vadd.f32 %v2412_v12, %v2347_v28  ;;  %5362 = vmatpush.bf16.msrb.mxu1 %v5353_v55  ;;  %v4588_v12 = vunpack.c.l.b16 %v4143_v19  ;;  %v11349_v19 = vld [vmem:[%s12943_s18 + $0xcc] sm:$0xf] }
 0x20f   : > { %v14177_v54 = vadd.f32 %v14121_v53, %v2694_v41  ;;  %v3084_v8 = vpop.f32.mrf.mxu3  ;;  %v4288_v53 = vrot.slane %v11344_v9, 5  ;;  %v12387_v41 = vld [vmem:[%s12943_s18 + $0x3a8] sm:$0xff]  ;;  %v4620_v55 = vpack.c.b16 %v4589_v42, %v4588_v12 }
 0x211   : > { %v4290_v36 = vrot.slane %v4288_v53, 4 }
 0x212   : > { %v2289_v2 = vpop.f32.mrf.mxu0 }
 0x213   : > { %v2348_v39 = vadd.f32 %v2289_v2, %v13662_v33  ;;  %v993_v47 = vpop.permute.xlu1 %992  ;;  %v11347_v2 = vld [vmem:[%s12943_s18 + $0xc4] sm:$0xf] }
 0x214   : > { %v2634_v28 = vpop.f32.mrf.mxu2  ;;  %1058 = vst.msk [vmem:[%s13452_s19 + $0xf8] sm:$0xff] %vm1026_vm8, %v993_v47  ;;  %v2415_v5 = vpop.f32.mrf.mxu1 }
 0x215   : > { %v2695_v61 = vadd.f32 %v2634_v28, %v2473_v14  ;;  %11031 = vmatmul.msk.bf16.gmra.mxu0 %vm658_vm3, %v2193_v24  ;;  %v2474_v0 = vadd.f32 %v2415_v5, %v2348_v39  ;;  %v4291_v14 = vrot.slane %v11345_v45, 5  ;;  %v4149_v24 = vrot.slane %v11348_v35, 7 }
 0x217   : > { %v14191_v60 = vadd.f32 %v3081_v57, %v2695_v61  ;;  %11048 = vmatmul.msk.bf16.gmra.mxu1 %vm658_vm3, %v13588_v10  ;;  %v3086_v33 = vpop.f32.mrf.mxu3  ;;  %v4289_v57 = vsel %vm12946_vm4, %v11454_v4, %v4288_v53  ;;  %v4292_v47 = vsel %vm12946_vm4, %v4290_v36, %v4291_v14  ;;  %v11438_v61 = vrot.slane %v11347_v2, 11  ;;  %v12549_v4 = vld [vmem:[%s12943_s18 + $0x2c8] sm:$0xf]  ;;  %v11350_v14 = vld [vmem:[%s12943_s18 + $0xd0] sm:$0xf] }
 0x218   : > { %11129 = vmatmul.msk.bf16.gmra.mxu2 %vm658_vm3, %v12387_v41  ;;  %v4151_v5 = vrot.slane %v4149_v24, 4  ;;  %v4152_v41 = vrot.slane %v11349_v19, 7  ;;  %v4400_v45 = vunpack.c.l.b16 %v4289_v57  ;;  %v4401_v35 = vunpack.c.l.b16 %v4292_v47 }
 0x219   : > { %v4150_v53 = vsel %vm14172_vm11, %v11438_v61, %v4149_v24  ;;  %v3186_v36 = vrot.slane %v12549_v4, 5  ;;  %v12550_v61 = vld [vmem:[%s12943_s18 + $0x2c4] sm:$0xf] }
 0x21a   : > { %v2291_v9 = vpop.f32.mrf.mxu0  ;;  %v4590_v57 = vunpack.c.l.b16 %v4150_v53  ;;  %v4298_v53 = vrot.slane %v11351_v30, 5 }
 0x21b   : > { %v2349_v44 = vadd.f32 %v2291_v9, %v13681_v26  ;;  %v11137_v9 = vld [vmem:[%s12943_s18 + $0x2cc] sm:$0xf] }
 0x21c   : > { %v2637_v39 = vpop.f32.mrf.mxu2  ;;  %v2417_v28 = vpop.f32.mrf.mxu1  ;;  %11487 = vmatmul.msk.bf16.vlgmr.msra.gmra.mxu3 %vm658_vm3, %v4620_v55  ;;  %v3189_v4 = vrot.slane %v11137_v9, 5 }
 0x21d   : > { %v2696_v38 = vadd.f32 %v2637_v39, %v2474_v0  ;;  %v2475_v12 = vadd.f32 %v2417_v28, %v2349_v44  ;;  %v4153_v0 = vsel %vm14172_vm11, %v4151_v5, %v4152_v41  ;;  %v12404_v44 = vld [vmem:[%s12943_s18 + $0x2ac] sm:$0xff]  ;;  %v4432_v39 = vpack.c.b16 %v4401_v35, %v4400_v45 }
 0x21e   : > { %v4591_v47 = vunpack.c.l.b16 %v4153_v0  ;;  %v11228_v5 = vrot.slane %v12550_v61, 9  ;;  %v3188_v41 = vrot.slane %v3186_v36, 4  ;;  %v11455_v35 = vrot.slane %v11349_v19, 9 }
 0x21f   : > { %v14204_v26 = vadd.f32 %v3084_v8, %v2696_v38  ;;  %v3089_v42 = vpop.f32.mrf.mxu3  ;;  %v4295_v38 = vrot.slane %v11350_v14, 5 }
 0x220   : > { %v3187_v0 = vsel %vm12946_vm4, %v11228_v5, %v3186_v36  ;;  %v3190_v14 = vsel %vm12946_vm4, %v3188_v41, %v3189_v4 }
 0x221   : > { %v3293_v19 = vunpack.c.l.b16 %v3187_v0  ;;  %v4296_v30 = vsel %vm12946_vm4, %v11455_v35, %v4295_v38  ;;  %v11356_v0 = vld [vmem:[%s12943_s18 + $0xec] sm:$0xf] }
 0x222   : > { %v2294_v55 = vpop.f32.mrf.mxu0 }
 0x223   : > { %v2350_v2 = vadd.f32 %v2294_v55, %v13700_v48  ;;  %v11354_v55 = vld [vmem:[%s12943_s18 + $0xe4] sm:$0xf] }
 0x224   : > { %v2639_v8 = vpop.f32.mrf.mxu2  ;;  %v2420_v28 = vpop.f32.mrf.mxu1  ;;  %v4156_v9 = vrot.slane %v11354_v55, 7 }
 0x225   : > { %v2697_v24 = vadd.f32 %v2639_v8, %v2475_v12  ;;  %11244 = vmatmul.msk.bf16.vlgmr.msra.gmra.mxu0 %vm658_vm3, %v14143_v40  ;;  %v2476_v48 = vadd.f32 %v2420_v28, %v2350_v2  ;;  %v4297_v12 = vrot.slane %v4295_v38, 4  ;;  %v4621_v40 = vpack.c.b16 %v4591_v47, %v4590_v57  ;;  %v11353_v8 = vld [vmem:[%s12943_s18 + $0xe0] sm:$0xf] }
 0x226   : > { %v3294_v28 = vunpack.c.l.b16 %v3190_v14  ;;  %v11439_v47 = vrot.slane %v11353_v8, 11  ;;  %v4158_v61 = vrot.slane %v4156_v9, 4  ;;  %v4402_v38 = vunpack.c.l.b16 %v4296_v30 }
 0x227   : > { %v14220_v10 = vadd.f32 %v3086_v33, %v2697_v24  ;;  %11325 = vmatmul.msk.bf16.vlgmr.msra.gmra.mxu1 %vm658_vm3, %v12404_v44  ;;  %v3091_v45 = vpop.f32.mrf.mxu3  ;;  %v14230_v33 = vld [vmem:[%s12943_s18 + $0xe8] sm:$0xf]  ;;  %v4299_v36 = vsel %vm12946_vm4, %v4297_v12, %v4298_v53  ;;  %v12551_v53 = vld [vmem:[%s12943_s18 + $0x2e4] sm:$0xf]  ;;  %v4302_v30 = vrot.slane %v11356_v0, 5 }
 0x228   : > { %11471 = vmatmul.msk.bf16.vlgmr.msra.gmra.mxu2 %vm658_vm3, %v4432_v39  ;;  %v4403_v55 = vunpack.c.l.b16 %v4299_v36  ;;  %v3324_v35 = vpack.c.b16 %v3294_v28, %v3293_v19 }
 0x22a   : > { %v2296_v2 = vpop.f32.mrf.mxu0 }
 0x22b   : > { %v2351_v44 = vadd.f32 %v2296_v2, %v13717_v11  ;;  %v4159_v11 = vrot.slane %v14230_v33, 7  ;;  %v11141_v2 = vld [vmem:[%s12943_s18 + $0x2e8] sm:$0xf] }
 0x22c   : > { %v2642_v24 = vpop.f32.mrf.mxu2  ;;  %v2422_v57 = vpop.f32.mrf.mxu1  ;;  %11488 = vmatmul.msk.bf16.gmra.mxu3 %vm658_vm3, %v4621_v40  ;;  %v3193_v40 = vrot.slane %v12551_v53, 5 }
 0x22d   : > { %v2698_v39 = vadd.f32 %v2642_v24, %v2476_v48  ;;  %v2477_v5 = vadd.f32 %v2422_v57, %v2351_v44  ;;  %v4157_v48 = vsel %vm14172_vm11, %v11439_v47, %v4156_v9  ;;  %v4160_v12 = vsel %vm14172_vm11, %v4158_v61, %v4159_v11  ;;  %v12405_v44 = vld [vmem:[%s12943_s18 + $0x2c8] sm:$0xff]  ;;  %v11357_v11 = vld [vmem:[%s12943_s18 + $0xf0] sm:$0xf] }
 0x22e   : > { %v4433_v24 = vpack.c.b16 %v4403_v55, %v4402_v38  ;;  %v4592_v19 = vunpack.c.l.b16 %v4157_v48  ;;  %v4593_v28 = vunpack.c.l.b16 %v4160_v12  ;;  %v3195_v47 = vrot.slane %v3193_v40, 4 }
 0x22f   : > { %v14239_v41 = vadd.f32 %v3089_v42, %v2698_v39  ;;  %v3094_v4 = vpop.f32.mrf.mxu3  ;;  %v12552_v39 = vld [vmem:[%s12943_s18 + $0x2e0] sm:$0xf]  ;;  %v3196_v61 = vrot.slane %v11141_v2, 5  ;;  %v11456_v55 = vrot.slane %v14230_v33, 9  ;;  %v4305_v48 = vrot.slane %v11357_v11, 5 }
 0x230   : > { %v11229_v57 = vrot.slane %v12552_v39, 9 }
 0x231   : > { %v3197_v0 = vsel %vm12946_vm4, %v3195_v47, %v3196_v61 }
 0x232   : > { %v2299_v14 = vpop.f32.mrf.mxu0  ;;  %v3194_v12 = vsel %vm12946_vm4, %v11229_v57, %v3193_v40 }
 0x233   : > { %v2352_v42 = vadd.f32 %v2299_v14, %v13732_v50  ;;  %v11360_v50 = vld [vmem:[%s12943_s18 + $0x100] sm:$0xf]  ;;  %v3295_v33 = vunpack.c.l.b16 %v3194_v12  ;;  %v11362_v12 = vld [vmem:[%s12943_s18 + $0x108] sm:$0xf] }
 0x234   : > { %v2644_v8 = vpop.f32.mrf.mxu2  ;;  %v2425_v36 = vpop.f32.mrf.mxu1  ;;  %v4163_v2 = vrot.slane %v11360_v50, 7 }
 0x235   : > { %v2699_v9 = vadd.f32 %v2644_v8, %v2477_v5  ;;  %11245 = vmatmul.msk.bf16.gmra.mxu0 %vm658_vm3, %v3324_v35  ;;  %v2478_v53 = vadd.f32 %v2425_v36, %v2352_v42  ;;  %v4304_v5 = vrot.slane %v4302_v30, 4  ;;  %v4622_v35 = vpack.c.b16 %v4593_v28, %v4592_v19  ;;  %v14265_v8 = vld [vmem:[%s12943_s18 + $0x104] sm:$0xf] }
 0x236   : > { %v3296_v36 = vunpack.c.l.b16 %v3197_v0  ;;  %v4165_v57 = vrot.slane %v4163_v2, 4 }
 0x237   : > { %v14254_v14 = vadd.f32 %v3091_v45, %v2699_v9  ;;  %11326 = vmatmul.msk.bf16.gmra.mxu1 %vm658_vm3, %v12405_v44  ;;  %v3096_v38 = vpop.f32.mrf.mxu3  ;;  %v11359_v45 = vld [vmem:[%s12943_s18 + $0xfc] sm:$0xf]  ;;  %v4306_v40 = vsel %vm12946_vm4, %v4304_v5, %v4305_v48  ;;  %v12553_v48 = vld [vmem:[%s12943_s18 + $0x300] sm:$0xf] }
 0x238   : > { %11472 = vmatmul.msk.bf16.gmra.mxu2 %vm658_vm3, %v4433_v24  ;;  %v4303_v24 = vsel %vm12946_vm4, %v11456_v55, %v4302_v30  ;;  %v11440_v39 = vrot.slane %v11359_v45, 11  ;;  %v4405_v50 = vunpack.c.l.b16 %v4306_v40  ;;  %v3325_v55 = vpack.c.b16 %v3296_v36, %v3295_v33 }
 0x239   : > { %v4404_v30 = vunpack.c.l.b16 %v4303_v24  ;;  %v4309_v24 = vrot.slane %v11362_v12, 5 }
 0x23a   : > { %v2301_v42 = vpop.f32.mrf.mxu0 }
 0x23b   : > { %v2353_v44 = vadd.f32 %v2301_v42, %v13749_v23  ;;  %v4166_v23 = vrot.slane %v14265_v8, 7  ;;  %v11145_v42 = vld [vmem:[%s12943_s18 + $0x304] sm:$0xf] }
 0x23c   : > { %v2647_v9 = vpop.f32.mrf.mxu2  ;;  %v2427_v28 = vpop.f32.mrf.mxu1  ;;  %11489 = vmatmul.msk.bf16.gmra.mxu3 %vm658_vm3, %v4622_v35  ;;  %v3200_v35 = vrot.slane %v12553_v48, 5 }
 0x23d   : > { %v2700_v19 = vadd.f32 %v2647_v9, %v2478_v53  ;;  %v2479_v47 = vadd.f32 %v2427_v28, %v2353_v44  ;;  %v4164_v53 = vsel %vm14172_vm11, %v11440_v39, %v4163_v2  ;;  %v4167_v5 = vsel %vm14172_vm11, %v4165_v57, %v4166_v23  ;;  %v12406_v44 = vld [vmem:[%s12943_s18 + $0x2e4] sm:$0xff]  ;;  %v11363_v23 = vld [vmem:[%s12943_s18 + $0x10c] sm:$0xf] }
 0x23e   : > { %v4434_v9 = vpack.c.b16 %v4405_v50, %v4404_v30  ;;  %v4594_v33 = vunpack.c.l.b16 %v4164_v53  ;;  %v4595_v36 = vunpack.c.l.b16 %v4167_v5  ;;  %v3202_v39 = vrot.slane %v3200_v35, 4 }
 0x23f   : > { %v14274_v61 = vadd.f32 %v3094_v4, %v2700_v19  ;;  %v3099_v11 = vpop.f32.mrf.mxu3  ;;  %v12554_v19 = vld [vmem:[%s12943_s18 + $0x2fc] sm:$0xf]  ;;  %v3203_v57 = vrot.slane %v11145_v42, 5  ;;  %v11457_v50 = vrot.slane %v14265_v8, 9  ;;  %v4312_v53 = vrot.slane %v11363_v23, 5 }
 0x240   : > { %v11230_v28 = vrot.slane %v12554_v19, 9 }
 0x241   : > { %v3204_v12 = vsel %vm12946_vm4, %v3202_v39, %v3203_v57 }
 0x242   : > { %v2304_v0 = vpop.f32.mrf.mxu0  ;;  %v3201_v5 = vsel %vm12946_vm4, %v11230_v28, %v3200_v35 }
 0x243   : > { %v2354_v4 = vadd.f32 %v2304_v0, %v13766_v34  ;;  %v11366_v34 = vld [vmem:[%s12943_s18 + $0x11c] sm:$0xf]  ;;  %v3297_v8 = vunpack.c.l.b16 %v3201_v5  ;;  %v11368_v5 = vld [vmem:[%s12943_s18 + $0x124] sm:$0xf] }
 0x244   : > { %v2649_v45 = vpop.f32.mrf.mxu2  ;;  %v2430_v40 = vpop.f32.mrf.mxu1  ;;  %v4170_v42 = vrot.slane %v11366_v34, 7 }
 0x245   : > { %v2701_v2 = vadd.f32 %v2649_v45, %v2479_v47  ;;  %11246 = vmatmul.msk.bf16.gmra.mxu0 %vm658_vm3, %v3325_v55  ;;  %v2480_v48 = vadd.f32 %v2430_v40, %v2354_v4  ;;  %v4311_v47 = vrot.slane %v4309_v24, 4  ;;  %v4623_v55 = vpack.c.b16 %v4595_v36, %v4594_v33  ;;  %v14300_v45 = vld [vmem:[%s12943_s18 + $0x120] sm:$0xf] }
 0x246   : > { %v3298_v40 = vunpack.c.l.b16 %v3204_v12  ;;  %v4172_v28 = vrot.slane %v4170_v42, 4 }
 0x247   : > { %v14289_v0 = vadd.f32 %v3096_v38, %v2701_v2  ;;  %11327 = vmatmul.msk.bf16.gmra.mxu1 %vm658_vm3, %v12406_v44  ;;  %v3101_v30 = vpop.f32.mrf.mxu3  ;;  %v11365_v38 = vld [vmem:[%s12943_s18 + $0x118] sm:$0xf]  ;;  %v4313_v35 = vsel %vm12946_vm4, %v4311_v47, %v4312_v53  ;;  %v12555_v53 = vld [vmem:[%s12943_s18 + $0x31c] sm:$0xf] }
 0x248   : > { %11473 = vmatmul.msk.bf16.gmra.mxu2 %vm658_vm3, %v4434_v9  ;;  %v4310_v9 = vsel %vm12946_vm4, %v11457_v50, %v4309_v24  ;;  %v11441_v19 = vrot.slane %v11365_v38, 11  ;;  %v4407_v34 = vunpack.c.l.b16 %v4313_v35  ;;  %v3326_v50 = vpack.c.b16 %v3298_v40, %v3297_v8 }
 0x249   : > { %v4406_v24 = vunpack.c.l.b16 %v4310_v9  ;;  %v4316_v9 = vrot.slane %v11368_v5, 5 }
 0x24a   : > { %v2306_v4 = vpop.f32.mrf.mxu0 }
 0x24b   : > { %v2355_v44 = vadd.f32 %v2306_v4, %v13783_v58  ;;  %v4173_v58 = vrot.slane %v14300_v45, 7  ;;  %v11149_v4 = vld [vmem:[%s12943_s18 + $0x320] sm:$0xf] }
 0x24c   : > { %v2652_v2 = vpop.f32.mrf.mxu2  ;;  %v2432_v36 = vpop.f32.mrf.mxu1  ;;  %11490 = vmatmul.msk.bf16.gmra.mxu3 %vm658_vm3, %v4623_v55  ;;  %v3207_v55 = vrot.slane %v12555_v53, 5 }
 0x24d   : > { %v2702_v33 = vadd.f32 %v2652_v2, %v2480_v48  ;;  %v2481_v39 = vadd.f32 %v2432_v36, %v2355_v44  ;;  %v4171_v48 = vsel %vm14172_vm11, %v11441_v19, %v4170_v42  ;;  %v4174_v47 = vsel %vm14172_vm11, %v4172_v28, %v4173_v58  ;;  %v12407_v44 = vld [vmem:[%s12943_s18 + $0x300] sm:$0xff]  ;;  %v11369_v58 = vld [vmem:[%s12943_s18 + $0x128] sm:$0xf] }
 0x24e   : > { %v4435_v2 = vpack.c.b16 %v4407_v34, %v4406_v24  ;;  %v4596_v8 = vunpack.c.l.b16 %v4171_v48  ;;  %v4597_v40 = vunpack.c.l.b16 %v4174_v47  ;;  %v3209_v19 = vrot.slane %v3207_v55, 4 }
 0x24f   : > { %v14309_v57 = vadd.f32 %v3099_v11, %v2702_v33  ;;  %v3104_v23 = vpop.f32.mrf.mxu3  ;;  %v12556_v33 = vld [vmem:[%s12943_s18 + $0x318] sm:$0xf]  ;;  %v3210_v28 = vrot.slane %v11149_v4, 5  ;;  %v11458_v34 = vrot.slane %v14300_v45, 9  ;;  %v4319_v48 = vrot.slane %v11369_v58, 5 }
 0x250   : > { %v11231_v36 = vrot.slane %v12556_v33, 9 }
 0x251   : > { %v3211_v5 = vsel %vm12946_vm4, %v3209_v19, %v3210_v28 }
 0x252   : > { %v2309_v12 = vpop.f32.mrf.mxu0  ;;  %v3208_v47 = vsel %vm12946_vm4, %v11231_v36, %v3207_v55 }
 0x253   : > { %v2356_v11 = vadd.f32 %v2309_v12, %v13800_v22  ;;  %v11372_v22 = vld [vmem:[%s12943_s18 + $0x138] sm:$0xf]  ;;  %v3299_v45 = vunpack.c.l.b16 %v3208_v47  ;;  %v11374_v47 = vld [vmem:[%s12943_s18 + $0x140] sm:$0xf] }
 0x254   : > { %v2654_v38 = vpop.f32.mrf.mxu2  ;;  %v2435_v35 = vpop.f32.mrf.mxu1  ;;  %v4177_v4 = vrot.slane %v11372_v22, 7 }
 0x255   : > { %v2703_v42 = vadd.f32 %v2654_v38, %v2481_v39  ;;  %11247 = vmatmul.msk.bf16.gmra.mxu0 %vm658_vm3, %v3326_v50  ;;  %v2482_v53 = vadd.f32 %v2435_v35, %v2356_v11  ;;  %v4318_v39 = vrot.slane %v4316_v9, 4  ;;  %v4624_v50 = vpack.c.b16 %v4597_v40, %v4596_v8  ;;  %v14335_v38 = vld [vmem:[%s12943_s18 + $0x13c] sm:$0xf] }
 0x256   : > { %v3300_v35 = vunpack.c.l.b16 %v3211_v5  ;;  %v4179_v36 = vrot.slane %v4177_v4, 4 }
 0x257   : > { %v14324_v12 = vadd.f32 %v3101_v30, %v2703_v42  ;;  %11328 = vmatmul.msk.bf16.gmra.mxu1 %vm658_vm3, %v12407_v44  ;;  %v3106_v24 = vpop.f32.mrf.mxu3  ;;  %v11371_v30 = vld [vmem:[%s12943_s18 + $0x134] sm:$0xf]  ;;  %v4320_v55 = vsel %vm12946_vm4, %v4318_v39, %v4319_v48  ;;  %v12557_v48 = vld [vmem:[%s12943_s18 + $0x338] sm:$0xf] }
 0x258   : > { %11474 = vmatmul.msk.bf16.gmra.mxu2 %vm658_vm3, %v4435_v2  ;;  %v4317_v2 = vsel %vm12946_vm4, %v11458_v34, %v4316_v9  ;;  %v11442_v33 = vrot.slane %v11371_v30, 11  ;;  %v4409_v22 = vunpack.c.l.b16 %v4320_v55  ;;  %v3327_v34 = vpack.c.b16 %v3300_v35, %v3299_v45 }
 0x259   : > { %v4408_v9 = vunpack.c.l.b16 %v4317_v2  ;;  %v4323_v2 = vrot.slane %v11374_v47, 5 }
 0x25a   : > { %v2311_v11 = vpop.f32.mrf.mxu0 }
 0x25b   : > { %v2357_v44 = vadd.f32 %v2311_v11, %v13817_v21  ;;  %v4180_v21 = vrot.slane %v14335_v38, 7  ;;  %v11153_v11 = vld [vmem:[%s12943_s18 + $0x33c] sm:$0xf] }
 0x25c   : > { %v2657_v42 = vpop.f32.mrf.mxu2  ;;  %v2437_v40 = vpop.f32.mrf.mxu1  ;;  %11491 = vmatmul.msk.bf16.gmra.mxu3 %vm658_vm3, %v4624_v50  ;;  %v3214_v50 = vrot.slane %v12557_v48, 5 }
 0x25d   : > { %v2704_v8 = vadd.f32 %v2657_v42, %v2482_v53  ;;  %v2483_v19 = vadd.f32 %v2437_v40, %v2357_v44  ;;  %v4178_v53 = vsel %vm14172_vm11, %v11442_v33, %v4177_v4  ;;  %v4181_v39 = vsel %vm14172_vm11, %v4179_v36, %v4180_v21  ;;  %v12408_v44 = vld [vmem:[%s12943_s18 + $0x31c] sm:$0xff]  ;;  %v11375_v21 = vld [vmem:[%s12943_s18 + $0x144] sm:$0xf] }
 0x25e   : > { %v4436_v42 = vpack.c.b16 %v4409_v22, %v4408_v9  ;;  %v4598_v45 = vunpack.c.l.b16 %v4178_v53  ;;  %v4599_v35 = vunpack.c.l.b16 %v4181_v39  ;;  %v3216_v33 = vrot.slane %v3214_v50, 4 }
 0x25f   : > { %v14344_v28 = vadd.f32 %v3104_v23, %v2704_v8  ;;  %v3109_v58 = vpop.f32.mrf.mxu3  ;;  %v12558_v8 = vld [vmem:[%s12943_s18 + $0x334] sm:$0xf]  ;;  %v3217_v36 = vrot.slane %v11153_v11, 5  ;;  %v11459_v22 = vrot.slane %v14335_v38, 9  ;;  %v4326_v53 = vrot.slane %v11375_v21, 5 }
 0x260   : > { %v11232_v40 = vrot.slane %v12558_v8, 9 }
 0x261   : > { %v3218_v47 = vsel %vm12946_vm4, %v3216_v33, %v3217_v36 }
 0x262   : > { %v2314_v5 = vpop.f32.mrf.mxu0  ;;  %v3215_v39 = vsel %vm12946_vm4, %v11232_v40, %v3214_v50 }
 0x263   : > { %v2358_v23 = vadd.f32 %v2314_v5, %v13834_v13  ;;  %v11378_v13 = vld [vmem:[%s12943_s18 + $0x154] sm:$0xf]  ;;  %v3301_v38 = vunpack.c.l.b16 %v3215_v39  ;;  %v11380_v39 = vld [vmem:[%s12943_s18 + $0x15c] sm:$0xf] }
 0x264   : > { %v2659_v30 = vpop.f32.mrf.mxu2  ;;  %v2440_v55 = vpop.f32.mrf.mxu1  ;;  %v4184_v11 = vrot.slane %v11378_v13, 7 }
 0x265   : > { %v2705_v4 = vadd.f32 %v2659_v30, %v2483_v19  ;;  %11248 = vmatmul.msk.bf16.gmra.mxu0 %vm658_vm3, %v3327_v34  ;;  %v2484_v48 = vadd.f32 %v2440_v55, %v2358_v23  ;;  %v4325_v19 = vrot.slane %v4323_v2, 4  ;;  %v4625_v34 = vpack.c.b16 %v4599_v35, %v4598_v45  ;;  %v14370_v30 = vld [vmem:[%s12943_s18 + $0x158] sm:$0xf] }
 0x266   : > { %v3302_v55 = vunpack.c.l.b16 %v3218_v47  ;;  %v4186_v40 = vrot.slane %v4184_v11, 4 }
 0x267   : > { %v14359_v5 = vadd.f32 %v3106_v24, %v2705_v4  ;;  %11329 = vmatmul.msk.bf16.gmra.mxu1 %vm658_vm3, %v12408_v44  ;;  %v3111_v9 = vpop.f32.mrf.mxu3  ;;  %v11377_v24 = vld [vmem:[%s12943_s18 + $0x150] sm:$0xf]  ;;  %v4327_v50 = vsel %vm12946_vm4, %v4325_v19, %v4326_v53  ;;  %v12559_v53 = vld [vmem:[%s12943_s18 + $0x354] sm:$0xf] }
 0x268   : > { %11475 = vmatmul.msk.bf16.gmra.mxu2 %vm658_vm3, %v4436_v42  ;;  %v4324_v42 = vsel %vm12946_vm4, %v11459_v22, %v4323_v2  ;;  %v11443_v8 = vrot.slane %v11377_v24, 11  ;;  %v4411_v13 = vunpack.c.l.b16 %v4327_v50  ;;  %v3328_v22 = vpack.c.b16 %v3302_v55, %v3301_v38  ;;  %v17399_v24 = vld [vmem:[#allocation22_spill] sm:$0xff] }
 0x269   : > { %v4410_v2 = vunpack.c.l.b16 %v4324_v42  ;;  %v4330_v50 = vrot.slane %v11380_v39, 5 }
 0x26a   : > { %v2316_v23 = vpop.f32.mrf.mxu0 }
 0x26b   : > { %v2359_v44 = vadd.f32 %v2316_v23, %v13851_v49  ;;  %v4187_v49 = vrot.slane %v14370_v30, 7  ;;  %v11157_v23 = vld [vmem:[%s12943_s18 + $0x358] sm:$0xf]  ;;  %v4437_v42 = vpack.c.b16 %v4411_v13, %v4410_v2  ;;  %v11460_v13 = vrot.slane %v14370_v30, 9 }
 0x26c   : > { %v2662_v4 = vpop.f32.mrf.mxu2  ;;  %v2442_v35 = vpop.f32.mrf.mxu1  ;;  %11492 = vmatmul.msk.bf16.gmra.mxu3 %vm658_vm3, %v4625_v34  ;;  %v3221_v34 = vrot.slane %v12559_v53, 5  ;;  %v11381_v53 = vld [vmem:[%s12943_s18 + $0x160] sm:$0xf] }
 0x26d   : > { %v2706_v45 = vadd.f32 %v2662_v4, %v2484_v48  ;;  %v2485_v33 = vadd.f32 %v2442_v35, %v2359_v44  ;;  %v4185_v48 = vsel %vm14172_vm11, %v11443_v8, %v4184_v11  ;;  %v4188_v19 = vsel %vm14172_vm11, %v4186_v40, %v4187_v49  ;;  %v12409_v4 = vld [vmem:[%s12943_s18 + $0x338] sm:$0xff]  ;;  %v12560_v35 = vld [vmem:[%s12943_s18 + $0x350] sm:$0xf] }
 0x26e   : > { %v4600_v38 = vunpack.c.l.b16 %v4185_v48  ;;  %v4601_v55 = vunpack.c.l.b16 %v4188_v19  ;;  %v11233_v8 = vrot.slane %v12560_v35, 9  ;;  %v3223_v40 = vrot.slane %v3221_v34, 4 }
 0x26f   : > { %v14379_v36 = vadd.f32 %v3109_v58, %v2706_v45  ;;  %v3114_v21 = vpop.f32.mrf.mxu3  ;;  %v3224_v49 = vrot.slane %v11157_v23, 5  ;;  %v4333_v48 = vrot.slane %v11381_v53, 5 }
 0x270   : > { %v3222_v19 = vsel %vm12946_vm4, %v11233_v8, %v3221_v34 }
 0x271   : > { %v3225_v39 = vsel %vm12946_vm4, %v3223_v40, %v3224_v49  ;;  %v3303_v30 = vunpack.c.l.b16 %v3222_v19  ;;  %v11386_v19 = vld [vmem:[%s12943_s18 + $0x178] sm:$0xf] }
 0x272   : > { %v2319_v47 = vpop.f32.mrf.mxu0 }
 0x273   : > { %v2360_v58 = vadd.f32 %v2319_v47, %v17399_v24  ;;  %v11384_v47 = vld [vmem:[%s12943_s18 + $0x170] sm:$0xf] }
 0x274   : > { %v2664_v44 = vpop.f32.mrf.mxu2  ;;  %v2445_v45 = vpop.f32.mrf.mxu1  ;;  %v4191_v23 = vrot.slane %v11384_v47, 7 }
 0x275   : > { %v2707_v11 = vadd.f32 %v2664_v44, %v2485_v33  ;;  %11249 = vmatmul.msk.bf16.gmra.mxu0 %vm658_vm3, %v3328_v22  ;;  %v2486_v63 = vadd.f32 %v2445_v45, %v2360_v58  ;;  %v4332_v33 = vrot.slane %v4330_v50, 4  ;;  %v4626_v22 = vpack.c.b16 %v4601_v55, %v4600_v38  ;;  %v14405_v44 = vld [vmem:[%s12943_s18 + $0x174] sm:$0xf] }
 0x276   : > { %v3304_v45 = vunpack.c.l.b16 %v3225_v39  ;;  %v4193_v8 = vrot.slane %v4191_v23, 4 }
 0x277   : > { %v14394_v24 = vadd.f32 %v3111_v9, %v2707_v11  ;;  %11330 = vmatmul.msk.bf16.gmra.mxu1 %vm658_vm3, %v12409_v4  ;;  %v3116_v2 = vpop.f32.mrf.mxu3  ;;  %v11383_v9 = vld [vmem:[%s12943_s18 + $0x16c] sm:$0xf]  ;;  %v4334_v34 = vsel %vm12946_vm4, %v4332_v33, %v4333_v48  ;;  %v12561_v48 = vld [vmem:[%s12943_s18 + $0x370] sm:$0xf] }
 0x278   : > { %11476 = vmatmul.msk.bf16.gmra.mxu2 %vm658_vm3, %v4437_v42  ;;  %v4331_v42 = vsel %vm12946_vm4, %v11460_v13, %v4330_v50  ;;  %v11444_v35 = vrot.slane %v11383_v9, 11  ;;  %v4413_v47 = vunpack.c.l.b16 %v4334_v34  ;;  %v3329_v13 = vpack.c.b16 %v3304_v45, %v3303_v30  ;;  %v17400_v9 = vld [vmem:[#allocation23_spill] sm:$0xff] }
 0x279   : > { %v4412_v50 = vunpack.c.l.b16 %v4331_v42  ;;  %v4337_v34 = vrot.slane %v11386_v19, 5 }
 0x27a   : > { %v2321_v58 = vpop.f32.mrf.mxu0 }
 0x27b   : > { %v2361_v4 = vadd.f32 %v2321_v58, %v13885_v56  ;;  %v4194_v56 = vrot.slane %v14405_v44, 7  ;;  %v11161_v58 = vld [vmem:[%s12943_s18 + $0x374] sm:$0xf]  ;;  %v4438_v42 = vpack.c.b16 %v4413_v47, %v4412_v50  ;;  %v11461_v47 = vrot.slane %v14405_v44, 9 }
 0x27c   : > { %v2667_v11 = vpop.f32.mrf.mxu2  ;;  %v2447_v55 = vpop.f32.mrf.mxu1  ;;  %11493 = vmatmul.msk.bf16.gmra.mxu3 %vm658_vm3, %v4626_v22  ;;  %v3228_v22 = vrot.slane %v12561_v48, 5  ;;  %v11387_v48 = vld [vmem:[%s12943_s18 + $0x17c] sm:$0xf] }
 0x27d   : > { %v2708_v38 = vadd.f32 %v2667_v11, %v2486_v63  ;;  %v2487_v40 = vadd.f32 %v2447_v55, %v2361_v4  ;;  %v4192_v63 = vsel %vm14172_vm11, %v11444_v35, %v4191_v23  ;;  %v4195_v33 = vsel %vm14172_vm11, %v4193_v8, %v4194_v56  ;;  %v12410_v11 = vld [vmem:[%s12943_s18 + $0x354] sm:$0xff]  ;;  %v12562_v55 = vld [vmem:[%s12943_s18 + $0x36c] sm:$0xf] }
 0x27e   : > { %v4602_v30 = vunpack.c.l.b16 %v4192_v63  ;;  %v4603_v45 = vunpack.c.l.b16 %v4195_v33  ;;  %v11234_v35 = vrot.slane %v12562_v55, 9  ;;  %v3230_v8 = vrot.slane %v3228_v22, 4 }
 0x27f   : > { %v14414_v49 = vadd.f32 %v3114_v21, %v2708_v38  ;;  %v3119_v53 = vpop.f32.mrf.mxu3  ;;  %v3231_v56 = vrot.slane %v11161_v58, 5  ;;  %v4340_v63 = vrot.slane %v11387_v48, 5 }
 0x280   : > { %v3229_v33 = vsel %vm12946_vm4, %v11234_v35, %v3228_v22 }
 0x281   : > { %v3232_v19 = vsel %vm12946_vm4, %v3230_v8, %v3231_v56  ;;  %v3305_v44 = vunpack.c.l.b16 %v3229_v33  ;;  %v11392_v33 = vld [vmem:[%s12943_s18 + $0x194] sm:$0xf] }
 0x282   : > { %v2324_v39 = vpop.f32.mrf.mxu0 }
 0x283   : > { %v2362_v21 = vadd.f32 %v2324_v39, %v17400_v9  ;;  %v11390_v39 = vld [vmem:[%s12943_s18 + $0x18c] sm:$0xf] }
 0x284   : > { %v2669_v4 = vpop.f32.mrf.mxu2  ;;  %v2450_v38 = vpop.f32.mrf.mxu1  ;;  %v4198_v58 = vrot.slane %v11390_v39, 7 }
 0x285   : > { %v2709_v23 = vadd.f32 %v2669_v4, %v2487_v40  ;;  %11250 = vmatmul.msk.bf16.gmra.mxu0 %vm658_vm3, %v3329_v13  ;;  %v2488_v52 = vadd.f32 %v2450_v38, %v2362_v21  ;;  %v4339_v40 = vrot.slane %v4337_v34, 4  ;;  %v4627_v13 = vpack.c.b16 %v4603_v45, %v4602_v30  ;;  %v14440_v4 = vld [vmem:[%s12943_s18 + $0x190] sm:$0xf] }
 0x286   : > { %v3306_v38 = vunpack.c.l.b16 %v3232_v19  ;;  %v4200_v35 = vrot.slane %v4198_v58, 4 }
 0x287   : > { %v14429_v9 = vadd.f32 %v3116_v2, %v2709_v23  ;;  %11331 = vmatmul.msk.bf16.gmra.mxu1 %vm658_vm3, %v12410_v11  ;;  %v3121_v50 = vpop.f32.mrf.mxu3  ;;  %v11389_v2 = vld [vmem:[%s12943_s18 + $0x188] sm:$0xf]  ;;  %v4341_v22 = vsel %vm12946_vm4, %v4339_v40, %v4340_v63  ;;  %v12563_v63 = vld [vmem:[%s12943_s18 + $0x38c] sm:$0xf] }
 0x288   : > { %11477 = vmatmul.msk.bf16.gmra.mxu2 %vm658_vm3, %v4438_v42  ;;  %v4338_v42 = vsel %vm12946_vm4, %v11461_v47, %v4337_v34  ;;  %v11445_v55 = vrot.slane %v11389_v2, 11  ;;  %v4415_v39 = vunpack.c.l.b16 %v4341_v22  ;;  %v3330_v47 = vpack.c.b16 %v3306_v38, %v3305_v44 }
 0x289   : > { %v4414_v34 = vunpack.c.l.b16 %v4338_v42  ;;  %v4344_v42 = vrot.slane %v11392_v33, 5 }
 0x28a   : > { %v2326_v21 = vpop.f32.mrf.mxu0 }
 0x28b   : > { %v2363_v11 = vadd.f32 %v2326_v21, %v13919_v59  ;;  %v4201_v59 = vrot.slane %v14440_v4, 7  ;;  %v11165_v21 = vld [vmem:[%s12943_s18 + $0x390] sm:$0xf] }
 0x28c   : > { %v2672_v23 = vpop.f32.mrf.mxu2  ;;  %v2452_v45 = vpop.f32.mrf.mxu1  ;;  %11494 = vmatmul.msk.bf16.gmra.mxu3 %vm658_vm3, %v4627_v13  ;;  %v3235_v13 = vrot.slane %v12563_v63, 5 }
 0x28d   : > { %v2710_v30 = vadd.f32 %v2672_v23, %v2488_v52  ;;  %v2489_v8 = vadd.f32 %v2452_v45, %v2363_v11  ;;  %v4199_v52 = vsel %vm14172_vm11, %v11445_v55, %v4198_v58  ;;  %v4202_v40 = vsel %vm14172_vm11, %v4200_v35, %v4201_v59  ;;  %v12411_v11 = vld [vmem:[%s12943_s18 + $0x370] sm:$0xff]  ;;  %v11393_v59 = vld [vmem:[%s12943_s18 + $0x198] sm:$0xf] }
 0x28e   : > { %v4439_v23 = vpack.c.b16 %v4415_v39, %v4414_v34  ;;  %v4604_v44 = vunpack.c.l.b16 %v4199_v52  ;;  %v4605_v38 = vunpack.c.l.b16 %v4202_v40  ;;  %v3237_v55 = vrot.slane %v3235_v13, 4 }
 0x28f   : > { %v14449_v56 = vadd.f32 %v3119_v53, %v2710_v30  ;;  %v3124_v48 = vpop.f32.mrf.mxu3  ;;  %v12564_v30 = vld [vmem:[%s12943_s18 + $0x388] sm:$0xf]  ;;  %v3238_v35 = vrot.slane %v11165_v21, 5  ;;  %v11462_v39 = vrot.slane %v14440_v4, 9  ;;  %v4347_v52 = vrot.slane %v11393_v59, 5 }
 0x290   : > { %v11235_v45 = vrot.slane %v12564_v30, 9 }
 0x291   : > { %v3239_v33 = vsel %vm12946_vm4, %v3237_v55, %v3238_v35 }
 0x292   : > { %v2329_v19 = vpop.f32.mrf.mxu0  ;;  %v3236_v40 = vsel %vm12946_vm4, %v11235_v45, %v3235_v13 }
 0x293   : > { %v2364_v53 = vadd.f32 %v2329_v19, %v13936_v37  ;;  %v11396_v37 = vld [vmem:[%s12943_s18 + $0x1a8] sm:$0xf]  ;;  %v3307_v4 = vunpack.c.l.b16 %v3236_v40 }
 0x294   : > { %v2674_v2 = vpop.f32.mrf.mxu2  ;;  %v2455_v22 = vpop.f32.mrf.mxu1  ;;  %v4205_v21 = vrot.slane %v11396_v37, 7 }
 0x295   : > { %v2711_v58 = vadd.f32 %v2674_v2, %v2489_v8  ;;  %11251 = vmatmul.msk.bf16.gmra.mxu0 %vm658_vm3, %v3330_v47  ;;  %v2490_v63 = vadd.f32 %v2455_v22, %v2364_v53  ;;  %v4346_v8 = vrot.slane %v4344_v42, 4  ;;  %v4628_v47 = vpack.c.b16 %v4605_v38, %v4604_v44  ;;  %v14475_v2 = vld [vmem:[%s12943_s18 + $0x1ac] sm:$0xf] }
 0x296   : > { %v3308_v22 = vunpack.c.l.b16 %v3239_v33  ;;  %v4207_v45 = vrot.slane %v4205_v21, 4  ;;  %v11169_v33 = vld [vmem:[%s12943_s18 + $0x3ac] sm:$0xf] }
 0x297   : > { %v14464_v19 = vadd.f32 %v3121_v50, %v2711_v58  ;;  %11332 = vmatmul.msk.bf16.gmra.mxu1 %vm658_vm3, %v12411_v11  ;;  %v3126_v34 = vpop.f32.mrf.mxu3  ;;  %v11395_v50 = vld [vmem:[%s12943_s18 + $0x1a4] sm:$0xf]  ;;  %v4348_v13 = vsel %vm12946_vm4, %v4346_v8, %v4347_v52  ;;  %v12565_v52 = vld [vmem:[%s12943_s18 + $0x3a8] sm:$0xf] }
 0x298   : > { %11478 = vmatmul.msk.bf16.gmra.mxu2 %vm658_vm3, %v4439_v23  ;;  %v4345_v23 = vsel %vm12946_vm4, %v11462_v39, %v4344_v42  ;;  %v11446_v30 = vrot.slane %v11395_v50, 11  ;;  %v4417_v37 = vunpack.c.l.b16 %v4348_v13  ;;  %v3331_v39 = vpack.c.b16 %v3308_v22, %v3307_v4 }
 0x299   : > { %v4416_v42 = vunpack.c.l.b16 %v4345_v23 }
 0x29a   : > { %v2331_v53 = vpop.f32.mrf.mxu0 }
 0x29b   : > { %v2365_v11 = vadd.f32 %v2331_v53, %v13952_v7  ;;  %v4208_v7 = vrot.slane %v14475_v2, 7  ;;  %v4440_v4 = vpack.c.b16 %v4417_v37, %v4416_v42  ;;  %v11399_v42 = vld [vmem:[%s12943_s18 + $0x1b4] sm:$0xf] }
 0x29c   : > { %v2677_v58 = vpop.f32.mrf.mxu2  ;;  %v2457_v38 = vpop.f32.mrf.mxu1  ;;  %11495 = vmatmul.msk.bf16.gmra.mxu3 %vm658_vm3, %v4628_v47  ;;  %v3242_v47 = vrot.slane %v12565_v52, 5  ;;  %v12568_v52 = vld [vmem:[%s17337_s5] sm:$0xf] }
 0x29d   : > { %v2712_v44 = vadd.f32 %v2677_v58, %v2490_v63  ;;  %v2491_v55 = vadd.f32 %v2457_v38, %v2365_v11  ;;  %v4206_v63 = vsel %vm14172_vm11, %v11446_v30, %v4205_v21  ;;  %v4209_v8 = vsel %vm14172_vm11, %v4207_v45, %v4208_v7  ;;  %v12566_v11 = vld [vmem:[%s17336_s4] sm:$0xf]  ;;  %v12412_v21 = vld [vmem:[%s12943_s18 + $0x38c] sm:$0xff]  ;;  %v12567_v38 = vld [vmem:[%s12943_s18 + $0x3a4] sm:$0xf] }
 0x29e   : > { %v14497_v58 = vperm.slane %v12566_v11, 1  ;;  %v4606_v22 = vunpack.c.l.b16 %v4206_v63  ;;  %v4607_v23 = vunpack.c.l.b16 %v4209_v8  ;;  %v3244_v30 = vrot.slane %v3242_v47, 4 }
 0x29f   : > { %v14484_v35 = vadd.f32 %v3124_v48, %v2712_v44  ;;  %v4696_v59 = vpop.f32.mrf.mxu3  ;;  %v11398_v48 = vld [vmem:[%s12943_s18 + $0x1b0] sm:$0xf]  ;;  %v3245_v45 = vrot.slane %v11169_v33, 5  ;;  %v11463_v63 = vrot.slane %v14475_v2, 9 }
 0x2a0   : > { %v4351_v11 = vrot.slane %v11398_v48, 5  ;;  %v4629_v8 = vpack.c.b16 %v4607_v23, %v4606_v22  ;;  %v4212_v48 = vrot.slane %v11402_v46, 7 }
 0x2a2   : > { %v3399_v40 = vpop.f32.mrf.mxu0 }
 0x2a3   : > { %v3479_v53 = vadd.f32 %v3399_v40, %v13967_v25  ;;  %v11236_v25 = vrot.slane %v12567_v38, 9  ;;  %v14505_v40 = vperm.slane %v12568_v52, 1  ;;  %v11401_v38 = vld [vmem:[%s12943_s18 + $0x1c0] sm:$0xf] }
 0x2a4   : > { %v2679_v50 = vpop.f32.mrf.mxu2  ;;  %v3621_v44 = vpop.f32.mrf.mxu1 }
 0x2a5   : > { %v2713_v13 = vadd.f32 %v2679_v50, %v2491_v55  ;;  %11252 = vmatmul.msk.bf16.gmra.mxu0 %vm658_vm3, %v3331_v39  ;;  %v3701_v7 = vadd.f32 %v3621_v44, %v3479_v53  ;;  %v3243_v33 = vsel %vm12946_vm4, %v11236_v25, %v3242_v47  ;;  %v3246_v53 = vsel %vm12946_vm4, %v3244_v30, %v3245_v45 }
 0x2a6   : > { %v4354_v44 = vrot.slane %v11399_v42, 5  ;;  %v3309_v22 = vunpack.c.l.b16 %v3243_v33  ;;  %v3310_v23 = vunpack.c.l.b16 %v3246_v53  ;;  %v4352_v47 = vsel %vm12946_vm4, %v11463_v63, %v4351_v11 }
 0x2a7   : > { %v14509_v55 = vadd.f32 %v3126_v34, %v2713_v13  ;;  %v3734_v37 = vmul.f32 %v14497_v58, %v3701_v7  ;;  %11333 = vmatmul.msk.bf16.gmra.mxu1 %vm658_vm3, %v12412_v21  ;;  %v4698_v39 = vpop.f32.mrf.mxu3  ;;  %v4353_v13 = vrot.slane %v4351_v11, 4  ;;  %v14522_v21 = vld [vmem:[%s12943_s18 + $0x1c8] sm:$0xf]  ;;  %v11447_v30 = vrot.slane %v11401_v38, 11  ;;  %v12569_v38 = vld [vmem:[%s12943_s18 + $0x3c4] sm:$0xf] }
 0x2a8   : > { %11479 = vmatmul.msk.bf16.gmra.mxu2 %vm658_vm3, %v4440_v4  ;;  %v4214_v45 = vrot.slane %v4212_v48, 4  ;;  %v4215_v52 = vrot.slane %v14522_v21, 7  ;;  %v3332_v63 = vpack.c.b16 %v3310_v23, %v3309_v22  ;;  %v12413_v22 = vld [vmem:[%s12943_s18 + $0x3a8] sm:$0xff] }
 0x2a9   : > { %v3767_v34 = vadd.f32 %v14505_v40, %v3734_v37  ;;  %v4418_v37 = vunpack.c.l.b16 %v4352_v47  ;;  %v4213_v33 = vsel %vm14172_vm11, %v11447_v30, %v4212_v48 }
 0x2aa   : > { %v3401_v50 = vpop.f32.mrf.mxu0  ;;  %v4216_v53 = vsel %vm14172_vm11, %v4214_v45, %v4215_v52  ;;  %v4608_v47 = vunpack.c.l.b16 %v4213_v33  ;;  %v12570_v52 = vld [vmem:[%s12943_s18 + $0x3c0] sm:$0xf] }
 0x2ab   : > { %v3480_v2 = vadd.f32 %v3401_v50, %v13982_v18  ;;  %v3799_v4 = vmax.f32 %v3767_v34, 0.0  ;;  %v4355_v18 = vsel %vm12946_vm4, %v4353_v13, %v4354_v44  ;;  %v11404_v13 = vld [vmem:[%s12943_s18 + $0x1cc] sm:$0xf]  ;;  %v4609_v48 = vunpack.c.l.b16 %v4216_v53 }
 0x2ac   : > { %v4508_v7 = vpop.f32.mrf.mxu2  ;;  %v3623_v46 = vpop.f32.mrf.mxu1  ;;  %11496 = vmatmul.msk.bf16.gmra.mxu3 %vm658_vm3, %v4629_v8  ;;  %v4419_v8 = vunpack.c.l.b16 %v4355_v18  ;;  %v4358_v18 = vrot.slane %v11404_v13, 5 }
 0x2ad   : > { %v14527_v25 = vadd.f32 %v4696_v59, %v4508_v7  ;;  %v3702_v42 = vadd.f32 %v3623_v46, %v3480_v2  ;;  %3863 = vrot.lane.b32.xlu2 %v3799_v4, %s12810_s17  ;;  %v3249_v2 = vrot.slane %v12569_v38, 5  ;;  %v11173_v7 = vld [vmem:[%s12943_s18 + $0x3c8] sm:$0xf]  ;;  %v11405_v38 = vld [vmem:[%s12943_s18 + $0x1d0] sm:$0xf]  ;;  %v4630_v53 = vpack.c.b16 %v4609_v48, %v4608_v47 }
 0x2ae   : > { %v4441_v45 = vpack.c.b16 %v4419_v8, %v4418_v37  ;;  %v4360_v8 = vrot.slane %v4358_v18, 4  ;;  %v14564_v47 = vld [vmem:[%s12943_s18 + $0x1e4] sm:$0xf] }
 0x2af   : > { %v3735_v59 = vmul.f32 %v14497_v58, %v3702_v42  ;;  %v4701_v11 = vpop.f32.mrf.mxu3  ;;  %v11237_v42 = vrot.slane %v12570_v52, 9 }
 0x2b1   : > { %v3768_v34 = vadd.f32 %v14505_v40, %v3735_v59  ;;  %v3250_v37 = vsel %vm12946_vm4, %v11237_v42, %v3249_v2 }
 0x2b2   : > { %v3404_v50 = vpop.f32.mrf.mxu0 }
 0x2b3   : > { %v3481_v44 = vadd.f32 %v3404_v50, %v13997_v29  ;;  %v3800_v23 = vmax.f32 %v3768_v34, 0.0  ;;  %v3251_v29 = vrot.slane %v3249_v2, 4  ;;  %v3252_v50 = vrot.slane %v11173_v7, 5 }
 0x2b4   : > { %v4510_v4 = vpop.f32.mrf.mxu2  ;;  %v3626_v30 = vpop.f32.mrf.mxu1  ;;  %v4361_v34 = vrot.slane %v11405_v38, 5 }
 0x2b5   : > { %v14545_v46 = vadd.f32 %v4698_v39, %v4510_v4  ;;  %11253 = vmatmul.msk.bf16.gmra.mxu0 %vm658_vm3, %v3332_v63  ;;  %v3703_v59 = vadd.f32 %v3626_v30, %v3481_v44  ;;  %3865 = vrot.lane.b32.xlu0 %v3800_v23, %s12810_s17  ;;  %v11464_v63 = vrot.slane %v14522_v21, 9  ;;  %v3253_v7 = vsel %vm12946_vm4, %v3251_v29, %v3252_v50  ;;  %v11407_v23 = vld [vmem:[%s12943_s18 + $0x1dc] sm:$0xf] }
 0x2b6   : > { %v4219_v4 = vrot.slane %v11408_v43, 7  ;;  %v3312_v52 = vunpack.c.l.b16 %v3253_v7  ;;  %v4362_v43 = vsel %vm12946_vm4, %v4360_v8, %v4361_v34 }
 0x2b7   : > { %v3736_v33 = vmul.f32 %v14497_v58, %v3703_v59  ;;  %11334 = vmatmul.msk.bf16.gmra.mxu1 %vm658_vm3, %v12413_v22  ;;  %v4703_v39 = vpop.f32.mrf.mxu3  ;;  %v4359_v42 = vsel %vm12946_vm4, %v11464_v63, %v4358_v18  ;;  %v11448_v59 = vrot.slane %v11407_v23, 11  ;;  %v11410_v18 = vld [vmem:[%s12943_s18 + $0x1e8] sm:$0xf]  ;;  %v11177_v23 = vld [vmem:[%s12943_s18 + $0x3e4] sm:$0xf] }
 0x2b8   : > { %11480 = vmatmul.msk.bf16.gmra.mxu2 %vm658_vm3, %v4441_v45  ;;  %v3311_v45 = vunpack.c.l.b16 %v3250_v37  ;;  %v4221_v29 = vrot.slane %v4219_v4, 4  ;;  %v4421_v37 = vunpack.c.l.b16 %v4362_v43 }
 0x2b9   : > { %v3769_v44 = vadd.f32 %v14505_v40, %v3736_v33  ;;  %v4220_v34 = vsel %vm14172_vm11, %v11448_v59, %v4219_v4  ;;  %v11411_v59 = vld [vmem:[%s12943_s18 + $0x1ec] sm:$0xf] }
 0x2ba   : > { %v3406_v13 = vpop.f32.mrf.mxu0  ;;  %v3333_v33 = vpack.c.b16 %v3312_v52, %v3311_v45  ;;  %v4610_v43 = vunpack.c.l.b16 %v4220_v34 }
 0x2bb   : > { %v3482_v22 = vadd.f32 %v3406_v13, %v14012_v20  ;;  %v3801_v30 = vmax.f32 %v3769_v44, 0.0  ;;  %v12571_v44 = vld [vmem:[%s12943_s18 + $0x3e0] sm:$0xf] }
 0x2bc   : > { %v4513_v48 = vpop.f32.mrf.mxu2  ;;  %v3628_v21 = vpop.f32.mrf.mxu1  ;;  %11497 = vmatmul.msk.bf16.gmra.mxu3 %vm658_vm3, %v4630_v53  ;;  %v4420_v53 = vunpack.c.l.b16 %v4359_v42  ;;  %v3256_v7 = vrot.slane %v12571_v44, 5  ;;  %v11414_v44 = vld [vmem:[%s12943_s18 + $0x1fc] sm:$0xf] }
 0x2bd   : > { %v14566_v2 = vadd.f32 %v4701_v11, %v4513_v48  ;;  %v3704_v20 = vadd.f32 %v3628_v21, %v3482_v22  ;;  %3867 = vrot.lane.b32.xlu1 %v3801_v30, %s12810_s17  ;;  %v4222_v11 = vrot.slane %v14564_v47, 7  ;;  %v12414_v30 = vld [vmem:[%s12943_s18 + $0x3c4] sm:$0xff]  ;;  %v4365_v21 = vrot.slane %v11410_v18, 5 }
 0x2be   : > { %v4442_v4 = vpack.c.b16 %v4421_v37, %v4420_v53  ;;  %v4368_v37 = vrot.slane %v11411_v59, 5 }
 0x2bf   : > { %v3737_v50 = vmul.f32 %v14497_v58, %v3704_v20  ;;  %v4706_v38 = vpop.f32.mrf.mxu3  ;;  %v4223_v13 = vsel %vm14172_vm11, %v4221_v29, %v4222_v11  ;;  %v12572_v11 = vld [vmem:[%s12943_s18 + $0x3dc] sm:$0xf]  ;;  %v4367_v53 = vrot.slane %v4365_v21, 4 }
 0x2c0   : > { %v4611_v20 = vunpack.c.l.b16 %v4223_v13 }
 0x2c1   : > { %v3770_v8 = vadd.f32 %v14505_v40, %v3737_v50  ;;  %v3258_v50 = vrot.slane %v3256_v7, 4 }
 0x2c2   : > { %v3409_v63 = vpop.f32.mrf.mxu0 }
 0x2c3   : > { %v3483_v22 = vadd.f32 %v3409_v63, %v14027_v17  ;;  %v3802_v45 = vmax.f32 %v3770_v8, 0.0  ;;  %v11238_v17 = vrot.slane %v12572_v11, 9  ;;  %v3259_v63 = vrot.slane %v11177_v23, 5 }
 0x2c4   : > { %v4515_v48 = vpop.f32.mrf.mxu2  ;;  %v3631_v42 = vpop.f32.mrf.mxu1  ;;  %v4631_v8 = vpack.c.b16 %v4611_v20, %v4610_v43  ;;  %v4369_v43 = vsel %vm12946_vm4, %v4367_v53, %v4368_v37  ;;  %v12573_v37 = vld [vmem:[%s12943_s18 + $0x3fc] sm:$0xf] }
 0x2c5   : > { %v14586_v52 = vadd.f32 %v4703_v39, %v4515_v48  ;;  %11254 = vmatmul.msk.bf16.gmra.mxu0 %vm658_vm3, %v3333_v33  ;;  %v3705_v29 = vadd.f32 %v3631_v42, %v3483_v22  ;;  %3869 = vrot.lane.b32.xlu2 %v3802_v45, %s12810_s17  ;;  %v11465_v33 = vrot.slane %v14564_v47, 9  ;;  %v3257_v22 = vsel %vm12946_vm4, %v11238_v17, %v3256_v7  ;;  %v11413_v48 = vld [vmem:[%s12943_s18 + $0x1f8] sm:$0xf]  ;;  %v14605_v42 = vld [vmem:[%s12943_s18 + $0x200] sm:$0xf] }
 0x2c6   : > { %v3260_v23 = vsel %vm12946_vm4, %v3258_v50, %v3259_v63  ;;  %v4226_v45 = vrot.slane %v11414_v44, 7  ;;  %v4423_v44 = vunpack.c.l.b16 %v4369_v43 }
 0x2c7   : > { %v3738_v39 = vmul.f32 %v14497_v58, %v3705_v29  ;;  %11335 = vmatmul.msk.bf16.gmra.mxu1 %vm658_vm3, %v12414_v30  ;;  %v4708_v18 = vpop.f32.mrf.mxu3  ;;  %v3313_v29 = vunpack.c.l.b16 %v3257_v22  ;;  %v3314_v11 = vunpack.c.l.b16 %v3260_v23 }
 0x2c8   : > { %11481 = vmatmul.msk.bf16.gmra.mxu2 %vm658_vm3, %v4442_v4  ;;  %v4366_v4 = vsel %vm12946_vm4, %v11465_v33, %v4365_v21  ;;  %v4228_v50 = vrot.slane %v4226_v45, 4  ;;  %v4229_v21 = vrot.slane %v14605_v42, 7 }
 0x2c9   : > { %v3771_v13 = vadd.f32 %v14505_v40, %v3738_v39  ;;  %v4422_v63 = vunpack.c.l.b16 %v4366_v4  ;;  %v3334_v33 = vpack.c.b16 %v3314_v11, %v3313_v29  ;;  %v12415_v4 = vld [vmem:[%s12943_s18 + $0x3e0] sm:$0xff] }
 0x2ca   : > { %v3411_v34 = vpop.f32.mrf.mxu0  ;;  %v4230_v23 = vsel %vm14172_vm11, %v4228_v50, %v4229_v21 }
 0x2cb   : > { %v3484_v30 = vadd.f32 %v3411_v34, %v14042_v31  ;;  %v3803_v59 = vmax.f32 %v3771_v13, 0.0  ;;  %v11449_v31 = vrot.slane %v11413_v48, 11  ;;  %v11416_v34 = vld [vmem:[%s12943_s18 + $0x204] sm:$0xf]  ;;  %v11181_v48 = vld [vmem:[%s12943_s18 + $0x400] sm:$0xf] }
 0x2cc   : > { %v4518_v47 = vpop.f32.mrf.mxu2  ;;  %v3633_v7 = vpop.f32.mrf.mxu1  ;;  %11498 = vmatmul.msk.bf16.gmra.mxu3 %vm658_vm3, %v4631_v8  ;;  %v3263_v8 = vrot.slane %v12573_v37, 5  ;;  %v4372_v11 = vrot.slane %v11416_v34, 5  ;;  %v3266_v21 = vrot.slane %v11181_v48, 5  ;;  %v11417_v37 = vld [vmem:[%s12943_s18 + $0x208] sm:$0xf] }
 0x2cd   : > { %v14611_v20 = vadd.f32 %v4706_v38, %v4518_v47  ;;  %v3706_v17 = vadd.f32 %v3633_v7, %v3484_v30  ;;  %3871 = vrot.lane.b32.xlu0 %v3803_v59, %s12810_s17  ;;  %v4227_v53 = vsel %vm14172_vm11, %v11449_v31, %v4226_v45  ;;  %v4443_v47 = vpack.c.b16 %v4423_v44, %v4422_v63  ;;  %v12574_v45 = vld [vmem:[%s12943_s18 + $0x3f8] sm:$0xf] }
 0x2ce   : > { %v4612_v7 = vunpack.c.l.b16 %v4227_v53  ;;  %v11239_v29 = vrot.slane %v12574_v45, 9  ;;  %v3265_v50 = vrot.slane %v3263_v8, 4  ;;  %v11466_v63 = vrot.slane %v14605_v42, 9 }
 0x2cf   : > { %17401 = vst [vmem:[#allocation22_spill] sm:$0xff] %v14611_v20  ;;  %v3739_v38 = vmul.f32 %v14497_v58, %v3706_v17  ;;  %v4711_v39 = vpop.f32.mrf.mxu3  ;;  %v4374_v53 = vrot.slane %v4372_v11, 4  ;;  %v4375_v34 = vrot.slane %v11417_v37, 5 }
 0x2d1   : > { %v3772_v22 = vadd.f32 %v14505_v40, %v3739_v38  ;;  %v4613_v38 = vunpack.c.l.b16 %v4230_v23 }
 0x2d2   : > { %v3414_v13 = vpop.f32.mrf.mxu0 }
 0x2d3   : > { %v3485_v30 = vadd.f32 %v3414_v13, %v14057_v27  ;;  %v3804_v43 = vmax.f32 %v3772_v22, 0.0  ;;  %v11420_v27 = vld [vmem:[%s12943_s18 + $0x218] sm:$0xf]  ;;  %v4632_v13 = vpack.c.b16 %v4613_v38, %v4612_v7  ;;  %v3267_v22 = vsel %vm12946_vm4, %v3265_v50, %v3266_v21 }
 0x2d4   : > { %v4520_v59 = vpop.f32.mrf.mxu2  ;;  %v3636_v17 = vpop.f32.mrf.mxu1  ;;  %v4233_v23 = vrot.slane %v11420_v27, 7  ;;  %v3316_v45 = vunpack.c.l.b16 %v3267_v22  ;;  %v4376_v7 = vsel %vm12946_vm4, %v4374_v53, %v4375_v34  ;;  %v12575_v53 = vld [vmem:[%s12943_s18 + $0x418] sm:$0xf] }
 0x2d5   : > { %v14628_v31 = vadd.f32 %v4708_v18, %v4520_v59  ;;  %11255 = vmatmul.msk.bf16.gmra.mxu0 %vm658_vm3, %v3334_v33  ;;  %v3707_v20 = vadd.f32 %v3636_v17, %v3485_v30  ;;  %3873 = vrot.lane.b32.xlu1 %v3804_v43, %s12810_s17  ;;  %v3264_v33 = vsel %vm12946_vm4, %v11239_v29, %v3263_v8  ;;  %v11419_v30 = vld [vmem:[%s12943_s18 + $0x214] sm:$0xf]  ;;  %v3270_v34 = vrot.slane %v12575_v53, 5 }
 0x2d6   : > { %v11450_v38 = vrot.slane %v11419_v30, 11  ;;  %v4235_v50 = vrot.slane %v4233_v23, 4  ;;  %v11422_v30 = vld [vmem:[%s12943_s18 + $0x220] sm:$0xf] }
 0x2d7   : > { %v3740_v44 = vmul.f32 %v14497_v58, %v3707_v20  ;;  %11336 = vmatmul.msk.bf16.gmra.mxu1 %vm658_vm3, %v12415_v4  ;;  %v4713_v18 = vpop.f32.mrf.mxu3  ;;  %v14645_v20 = vld [vmem:[%s12943_s18 + $0x21c] sm:$0xf]  ;;  %v3315_v4 = vunpack.c.l.b16 %v3264_v33 }
 0x2d8   : > { %11482 = vmatmul.msk.bf16.gmra.mxu2 %vm658_vm3, %v4443_v47  ;;  %v4373_v47 = vsel %vm12946_vm4, %v11466_v63, %v4372_v11  ;;  %v4425_v63 = vunpack.c.l.b16 %v4376_v7 }
 0x2d9   : > { %v3773_v42 = vadd.f32 %v14505_v40, %v3740_v44  ;;  %v4424_v27 = vunpack.c.l.b16 %v4373_v47  ;;  %v4234_v44 = vsel %vm14172_vm11, %v11450_v38, %v4233_v23 }
 0x2da   : > { %v3416_v48 = vpop.f32.mrf.mxu0  ;;  %v4614_v23 = vunpack.c.l.b16 %v4234_v44  ;;  %v11467_v44 = vrot.slane %v14645_v20, 9 }
 0x2db   : > { %v3486_v59 = vadd.f32 %v3416_v48, %v14072_v1  ;;  %v3805_v8 = vmax.f32 %v3773_v42, 0.0  ;;  %v4236_v1 = vrot.slane %v14645_v20, 7  ;;  %v11185_v48 = vld [vmem:[%s12943_s18 + $0x41c] sm:$0xf] }
 0x2dc   : > { %v4523_v43 = vpop.f32.mrf.mxu2  ;;  %v3638_v17 = vpop.f32.mrf.mxu1  ;;  %11499 = vmatmul.msk.bf16.gmra.mxu3 %vm658_vm3, %v4632_v13 }
 0x2dd   : > { %v14652_v29 = vadd.f32 %v4711_v39, %v4523_v43  ;;  %v3708_v21 = vadd.f32 %v3638_v17, %v3486_v59  ;;  %3875 = vrot.lane.b32.xlu2 %v3805_v8, %s12810_s17  ;;  %v3335_v39 = vpack.c.b16 %v3316_v45, %v3315_v4  ;;  %v4237_v33 = vsel %vm14172_vm11, %v4235_v50, %v4236_v1  ;;  %v12416_v43 = vld [vmem:[%s12943_s18 + $0x3fc] sm:$0xff]  ;;  %v12576_v17 = vld [vmem:[%s12943_s18 + $0x414] sm:$0xf] }
 0x2de   : > { %v4444_v4 = vpack.c.b16 %v4425_v63, %v4424_v27  ;;  %v4615_v45 = vunpack.c.l.b16 %v4237_v33  ;;  %v11240_v38 = vrot.slane %v12576_v17, 9  ;;  %v3272_v50 = vrot.slane %v3270_v34, 4  ;;  %v11423_v27 = vld [vmem:[%s12943_s18 + $0x224] sm:$0xf] }
 0x2df   : > { %v3741_v11 = vmul.f32 %v14497_v58, %v3708_v21  ;;  %v4716_v37 = vpop.f32.mrf.mxu3  ;;  %v3273_v1 = vrot.slane %v11185_v48, 5 }
 0x2e0   : > { %v3271_v33 = vsel %vm12946_vm4, %v11240_v38, %v3270_v34 }
 0x2e1   : > { %v3774_v22 = vadd.f32 %v14505_v40, %v3741_v11  ;;  %v11426_v11 = vld [vmem:[%s12943_s18 + $0x234] sm:$0xf]  ;;  %v3274_v53 = vsel %vm12946_vm4, %v3272_v50, %v3273_v1 }
 0x2e2   : > { %v3419_v13 = vpop.f32.mrf.mxu0 }
 0x2e3   : > { %v3487_v42 = vadd.f32 %v3419_v13, %v14087_v3  ;;  %v3806_v8 = vmax.f32 %v3774_v22, 0.0  ;;  %v4379_v3 = vrot.slane %v11422_v30, 5  ;;  %v4240_v13 = vrot.slane %v11426_v11, 7 }
 0x2e4   : > { %v4525_v59 = vpop.f32.mrf.mxu2  ;;  %v3641_v7 = vpop.f32.mrf.mxu1  ;;  %v4382_v30 = vrot.slane %v11423_v27, 5 }
 0x2e5   : > { %v14668_v47 = vadd.f32 %v4713_v18, %v4525_v59  ;;  %11256 = vmatmul.msk.bf16.gmra.mxu0 %vm658_vm3, %v3335_v39  ;;  %v3709_v21 = vadd.f32 %v3641_v7, %v3487_v42  ;;  %3877 = vrot.lane.b32.xlu0 %v3806_v8, %s12810_s17  ;;  %v4633_v39 = vpack.c.b16 %v4615_v45, %v4614_v23  ;;  %v4381_v42 = vrot.slane %v4379_v3, 4  ;;  %v11425_v59 = vld [vmem:[%s12943_s18 + $0x230] sm:$0xf] }
 0x2e6   : > { %v3317_v23 = vunpack.c.l.b16 %v3271_v33  ;;  %v3318_v45 = vunpack.c.l.b16 %v3274_v53  ;;  %v4380_v34 = vsel %vm12946_vm4, %v11467_v44, %v4379_v3  ;;  %v11451_v38 = vrot.slane %v11425_v59, 11  ;;  %v11189_v59 = vld [vmem:[%s12943_s18 + $0x438] sm:$0xf] }
 0x2e7   : > { %v3742_v63 = vmul.f32 %v14497_v58, %v3709_v21  ;;  %11337 = vmatmul.msk.bf16.gmra.mxu1 %vm658_vm3, %v12416_v43  ;;  %v4718_v18 = vpop.f32.mrf.mxu3  ;;  %v14686_v43 = vld [vmem:[%s12943_s18 + $0x238] sm:$0xf]  ;;  %v4242_v50 = vrot.slane %v4240_v13, 4  ;;  %v4426_v11 = vunpack.c.l.b16 %v4380_v34 }
 0x2e8   : > { %11483 = vmatmul.msk.bf16.gmra.mxu2 %vm658_vm3, %v4444_v4  ;;  %v4243_v1 = vrot.slane %v14686_v43, 7  ;;  %v3336_v27 = vpack.c.b16 %v3318_v45, %v3317_v23  ;;  %v4241_v44 = vsel %vm14172_vm11, %v11451_v38, %v4240_v13  ;;  %v12578_v38 = vld [vmem:[%s12943_s18 + $0x430] sm:$0xf] }
 0x2e9   : > { %v3775_v48 = vadd.f32 %v14505_v40, %v3742_v63  ;;  %v4616_v23 = vunpack.c.l.b16 %v4241_v44 }
 0x2ea   : > { %v3421_v22 = vpop.f32.mrf.mxu0 }
 0x2eb   : > { %v3488_v20 = vadd.f32 %v3421_v22, %v14102_v16  ;;  %v3807_v4 = vmax.f32 %v3775_v48, 0.0  ;;  %v4383_v16 = vsel %vm12946_vm4, %v4381_v42, %v4382_v30  ;;  %v12577_v22 = vld [vmem:[%s12943_s18 + $0x434] sm:$0xf]  ;;  %v11428_v42 = vld [vmem:[%s12943_s18 + $0x23c] sm:$0xf] }
 0x2ec   : > { %v4528_v8 = vpop.f32.mrf.mxu2  ;;  %v3643_v17 = vpop.f32.mrf.mxu1  ;;  %11500 = vmatmul.msk.bf16.gmra.mxu3 %vm658_vm3, %v4633_v39  ;;  %v4427_v63 = vunpack.c.l.b16 %v4383_v16  ;;  %v4244_v39 = vsel %vm14172_vm11, %v4242_v50, %v4243_v1  ;;  %v3277_v48 = vrot.slane %v12577_v22, 5  ;;  %v11241_v50 = vrot.slane %v12578_v38, 9 }
 0x2ed   : > { %v14691_v7 = vadd.f32 %v4716_v37, %v4528_v8  ;;  %v3710_v21 = vadd.f32 %v3643_v17, %v3488_v20  ;;  %3879 = vrot.lane.b32.xlu1 %v3807_v4, %s12810_s17  ;;  %v12417_v8 = vld [vmem:[%s12943_s18 + $0x418] sm:$0xff]  ;;  %v4617_v13 = vunpack.c.l.b16 %v4244_v39  ;;  %v4386_v1 = vrot.slane %v11428_v42, 5 }
 0x2ee   : > { %v4445_v17 = vpack.c.b16 %v4427_v63, %v4426_v11  ;;  %v3280_v16 = vrot.slane %v11189_v59, 5  ;;  %v3278_v11 = vsel %vm12946_vm4, %v11241_v50, %v3277_v48 }
 0x2ef   : > { %v3743_v37 = vmul.f32 %v14497_v58, %v3710_v21  ;;  %v4721_v3 = vpop.f32.mrf.mxu3  ;;  %v4634_v39 = vpack.c.b16 %v4617_v13, %v4616_v23  ;;  %v4388_v63 = vrot.slane %v4386_v1, 4 }
 0x2f1   : > { %v3776_v53 = vadd.f32 %v14505_v40, %v3743_v37  ;;  %v11429_v37 = vld [vmem:[%s12943_s18 + $0x240] sm:$0xf] }
 0x2f2   : > { %v3424_v33 = vpop.f32.mrf.mxu0 }
 0x2f3   : > { %v3489_v30 = vadd.f32 %v3424_v33, %v14118_v51  ;;  %v3808_v4 = vmax.f32 %v3776_v53, 0.0  ;;  %v3279_v51 = vrot.slane %v3277_v48, 4  ;;  %v11432_v33 = vld [vmem:[%s12943_s18 + $0x250] sm:$0xf]  ;;  %v4389_v53 = vrot.slane %v11429_v37, 5 }
 0x2f4   : > { %v4530_v20 = vpop.f32.mrf.mxu2  ;;  %v3646_v34 = vpop.f32.mrf.mxu1  ;;  %v4247_v59 = vrot.slane %v11432_v33, 7 }
 0x2f5   : > { %v14709_v45 = vadd.f32 %v4718_v18, %v4530_v20  ;;  %11257 = vmatmul.msk.bf16.gmra.mxu0 %vm658_vm3, %v3336_v27  ;;  %v3711_v21 = vadd.f32 %v3646_v34, %v3489_v30  ;;  %3881 = vrot.lane.b32.xlu2 %v3808_v4, %s12810_s17  ;;  %v11468_v27 = vrot.slane %v14686_v43, 9  ;;  %v3281_v30 = vsel %vm12946_vm4, %v3279_v51, %v3280_v16  ;;  %v14728_v4 = vld [vmem:[%s12943_s18 + $0x254] sm:$0xf] }
 0x2f6   : > { %v3319_v34 = vunpack.c.l.b16 %v3278_v11  ;;  %v4390_v50 = vsel %vm12946_vm4, %v4388_v63, %v4389_v53  ;;  %v4249_v51 = vrot.slane %v4247_v59, 4 }
 0x2f7   : > { %v3744_v44 = vmul.f32 %v14497_v58, %v3711_v21  ;;  %11338 = vmatmul.msk.bf16.gmra.mxu1 %vm658_vm3, %v12417_v8  ;;  %v4723_v18 = vpop.f32.mrf.mxu3  ;;  %v11431_v8 = vld [vmem:[%s12943_s18 + $0x24c] sm:$0xf]  ;;  %v4387_v38 = vsel %vm12946_vm4, %v11468_v27, %v4386_v1 }
 0x2f8   : > { %11484 = vmatmul.msk.bf16.gmra.mxu2 %vm658_vm3, %v4445_v17  ;;  %v3320_v17 = vunpack.c.l.b16 %v3281_v30  ;;  %v11452_v21 = vrot.slane %v11431_v8, 11  ;;  %v4428_v33 = vunpack.c.l.b16 %v4387_v38 }
 0x2f9   : > { %v3777_v42 = vadd.f32 %v14505_v40, %v3744_v44  ;;  %v4429_v44 = vunpack.c.l.b16 %v4390_v50 }
 0x2fa   : > { %v3426_v22 = vpop.f32.mrf.mxu0  ;;  %v3337_v1 = vpack.c.b16 %v3320_v17, %v3319_v34  ;;  %v4248_v63 = vsel %vm14172_vm11, %v11452_v21, %v4247_v59 }
 0x2fb   : > { %v3490_v20 = vadd.f32 %v3426_v22, %v14139_v32  ;;  %v3809_v13 = vmax.f32 %v3777_v42, 0.0  ;;  %v12579_v22 = vld [vmem:[%s12943_s18 + $0x450] sm:$0xf]  ;;  %v4618_v38 = vunpack.c.l.b16 %v4248_v63 }
 0x2fc   : > { %v4533_v23 = vpop.f32.mrf.mxu2  ;;  %v3648_v43 = vpop.f32.mrf.mxu1  ;;  %11501 = vmatmul.msk.bf16.gmra.mxu3 %vm658_vm3, %v4634_v39  ;;  %v14743_v39 = vld [vmem:[%s12943_s18 + $0x258] sm:$0xf]  ;;  %v3284_v42 = vrot.slane %v12579_v22, 5 }
 0x2fd   : > { %v14730_v48 = vadd.f32 %v4721_v3, %v4533_v23  ;;  %v3712_v32 = vadd.f32 %v3648_v43, %v3490_v20  ;;  %3883 = vrot.lane.b32.xlu0 %v3809_v13, %s12810_s17  ;;  %v4250_v3 = vrot.slane %v14728_v4, 7  ;;  %v11193_v20 = vld [vmem:[%s12943_s18 + $0x454] sm:$0xf]  ;;  %v4446_v13 = vpack.c.b16 %v4429_v44, %v4428_v33  ;;  %v12581_v33 = vld [vmem:[%s12943_s18 + $0x208] sm:$0xf] }
 0x2fe   : > { %v12418_v23 = vld [vmem:[%s12943_s18 + $0x434] sm:$0xff]  ;;  %v4393_v43 = vrot.slane %v14743_v39, 5  ;;  %v5620_v44 = vrot.slane %v12581_v33, 7 }
 0x2ff   : > { %v3745_v16 = vmul.f32 %v14497_v58, %v3712_v32  ;;  %v14740_v37 = vpop.f32.mrf.mxu3  ;;  %v4251_v53 = vsel %vm14172_vm11, %v4249_v51, %v4250_v3  ;;  %v12580_v32 = vld [vmem:[%s12943_s18 + $0x44c] sm:$0xf]  ;;  %v3286_v51 = vrot.slane %v3284_v42, 4  ;;  %v3287_v3 = vrot.slane %v11193_v20, 5 }
 0x300   : > { %v4619_v50 = vunpack.c.l.b16 %v4251_v53  ;;  %v11242_v21 = vrot.slane %v12580_v32, 9  ;;  %v12582_v32 = vld [vmem:[%s12943_s18 + $0x204] sm:$0xf] }
 0x301   : > { %v3778_v27 = vadd.f32 %v14505_v40, %v3745_v16  ;;  %v11435_v16 = vld [vmem:[%s12943_s18 + $0x25c] sm:$0xf] }
 0x302   : > { %v3429_v11 = vpop.f32.mrf.mxu0  ;;  %v4635_v63 = vpack.c.b16 %v4619_v50, %v4618_v38  ;;  %v3285_v53 = vsel %vm12946_vm4, %v11242_v21, %v3284_v42  ;;  %v4396_v22 = vrot.slane %v11435_v16, 5  ;;  %v11831_v42 = vld [vmem:[%s17335_s3 + $0x26] sm:$0x3]  ;;  %v10650_v38 = vld [vmem:[%s12943_s18 + $0x20c] sm:$0xf]  ;;  %v11586_v21 = vrot.slane %v12582_v32, 11 }
 0x303   : > { %v3491_v30 = vadd.f32 %v3429_v11, %v14177_v54  ;;  %v3810_v34 = vmax.f32 %v3778_v27, 0.0  ;;  %v11469_v11 = vrot.slane %v14728_v4, 9  ;;  %v4395_v27 = vrot.slane %v4393_v43, 4  ;;  %v11731_v4 = vld [vmem:[%s17335_s3 + $0x1e] sm:$0x3] }
 0x304   : > { %v4535_v8 = vpop.f32.mrf.mxu2  ;;  %v3651_v59 = vpop.f32.mrf.mxu1  ;;  %v7779_v50 = vsel %vm707_vm0, %v11831_v42, 0  ;;  %v5621_v42 = vsel %vm14172_vm11, %v11586_v21, %v5620_v44  ;;  %v12584_v32 = vld [vmem:[%s12943_s18 + $0x1fc] sm:$0xf] }
 0x305   : > { %v14755_v17 = vadd.f32 %v4723_v18, %v4535_v8  ;;  %11258 = vmatmul.msk.bf16.gmra.mxu0 %vm658_vm3, %v3337_v1  ;;  %v3713_v54 = vadd.f32 %v3651_v59, %v3491_v30  ;;  %3885 = vrot.lane.b32.xlu1 %v3810_v34, %s12810_s17  ;;  %v11797_v30 = vld [vmem:[%s17335_s3 + $0x22] sm:$0x3]  ;;  %v6308_v34 = vsel %vm707_vm0, %v11731_v4, 0  ;;  %v5732_v21 = vunpack.c.l.b16 %v5621_v42 }
 0x306   : > { %6317 = vmatpush.bf16.msra.mxu0 %v6308_v34  ;;  %7788 = vmatpush.bf16.msra.mxu3 %v7779_v50  ;;  %v11346_v50 = vld [vmem:[%s12943_s18 + $0xbc] sm:$0xf] }
 0x307   : > { %v3746_v18 = vmul.f32 %v14497_v58, %v3713_v54  ;;  %11339 = vmatmul.msk.bf16.gmra.mxu1 %vm658_vm3, %v12418_v23  ;;  %v3864_v39 = vpop.permute.xlu2 %3863  ;;  %v4728_v1 = vpop.f32.mrf.mxu3  ;;  %v3288_v23 = vsel %vm12946_vm4, %v3286_v51, %v3287_v3  ;;  %v5622_v54 = vrot.slane %v5620_v44, 4 }
 0x308   : > { %11485 = vmatmul.msk.bf16.gmra.mxu2 %vm658_vm3, %v4446_v13  ;;  %3960 = vst.msk [vmem:[%s13452_s19] sm:$0xff] %vm3959_vm12, %v3864_v39  ;;  %v7024_v13 = vsel %vm707_vm0, %v11797_v30, 0  ;;  %v3322_v39 = vunpack.c.l.b16 %v3288_v23  ;;  %v11764_v30 = vld [vmem:[%s17335_s3 + $0x20] sm:$0x3] }
 0x309   : > { %v3779_v8 = vadd.f32 %v14505_v40, %v3746_v18  ;;  %7033 = vmatpush.bf16.msra.mxu2 %v7024_v13  ;;  %v3321_v18 = vunpack.c.l.b16 %v3285_v53 }
 0x30a   : > { %v3431_v20 = vpop.f32.mrf.mxu0 }
 0x30b   : > { %v3492_v59 = vadd.f32 %v3431_v20, %v14191_v60  ;;  %v3811_v51 = vmax.f32 %v3779_v8, 0.0  ;;  %v4394_v60 = vsel %vm12946_vm4, %v11469_v11, %v4393_v43  ;;  %v5623_v20 = vrot.slane %v10650_v38, 7 }
 0x30c   : > { %v4538_v16 = vpop.f32.mrf.mxu2  ;;  %v3653_v33 = vpop.f32.mrf.mxu1  ;;  %11502 = vmatmul.msk.bf16.gmra.mxu3 %vm658_vm3, %v4635_v63  ;;  %v6674_v63 = vsel %vm707_vm0, %v11764_v30, 0  ;;  %v3338_v11 = vpack.c.b16 %v3322_v39, %v3321_v18  ;;  %v4430_v8 = vunpack.c.l.b16 %v4394_v60 }
 0x30d   : > { %v14789_v3 = vadd.f32 %v14740_v37, %v4538_v16  ;;  %v3714_v4 = vadd.f32 %v3653_v33, %v3492_v59  ;;  %3887 = vrot.lane.b32.xlu2 %v3811_v51, %s12810_s17  ;;  %v4397_v37 = vsel %vm12946_vm4, %v4395_v27, %v4396_v22  ;;  %6683 = vmatpush.bf16.msra.mxu1 %v6674_v63  ;;  %v12583_v22 = vld [vmem:[%s12943_s18 + $0xb8] sm:$0xf]  ;;  %v5144_v16 = vrot.slane %v12584_v32, 7  ;;  %v12419_v33 = vld [vmem:[%s12943_s18 + $0x450] sm:$0xff] }
 0x30e   : > { %v4431_v23 = vunpack.c.l.b16 %v4397_v37  ;;  %v5624_v27 = vsel %vm14172_vm11, %v5622_v54, %v5623_v20  ;;  %v4794_v59 = vrot.slane %v12583_v22, 7  ;;  %v4797_v20 = vrot.slane %v11346_v50, 7  ;;  %v10645_v63 = vld [vmem:[%s12943_s18 + $0x1f8] sm:$0xf]  ;;  %v12587_v50 = vld [vmem:[%s12943_s18 + $0x224] sm:$0xf] }
 0x30f   : > { %v3747_v53 = vmul.f32 %v14497_v58, %v3714_v4  ;;  %v4731_v43 = vpop.f32.mrf.mxu3  ;;  %v5733_v54 = vunpack.c.l.b16 %v5624_v27  ;;  %v5627_v32 = vrot.slane %v12587_v50, 7 }
 0x310   : > { %v4447_v44 = vpack.c.b16 %v4431_v23, %v4430_v8  ;;  %v4796_v37 = vrot.slane %v4794_v59, 4  ;;  %v11536_v23 = vrot.slane %v10645_v63, 11 }
 0x311   : > { %v3780_v34 = vadd.f32 %v14505_v40, %v3747_v53  ;;  %v12586_v53 = vld [vmem:[%s12943_s18 + $0x200] sm:$0xf]  ;;  %v5764_v8 = vpack.c.b16 %v5733_v54, %v5732_v21 }
 0x312   : > { %v3434_v13 = vpop.f32.mrf.mxu0 }
 0x313   : > { %v3493_v38 = vadd.f32 %v3434_v13, %v14204_v26  ;;  %v3812_v18 = vmax.f32 %v3780_v34, 0.0  ;;  %v12585_v26 = vld [vmem:[%s12943_s18 + $0xb4] sm:$0xf]  ;;  %v5147_v13 = vrot.slane %v12586_v53, 7 }
 0x314   : > { %v4540_v51 = vpop.f32.mrf.mxu2  ;;  %v3656_v60 = vpop.f32.mrf.mxu1  ;;  %v11503_v4 = vrot.slane %v12585_v26, 11  ;;  %v5145_v26 = vsel %vm14172_vm11, %v11536_v23, %v5144_v16 }
 0x315   : > { %v14812_v39 = vadd.f32 %v4728_v1, %v4540_v51  ;;  %11259 = vmatmul.msk.bf16.gmra.mxu0 %vm658_vm3, %v3338_v11  ;;  %v3715_v30 = vadd.f32 %v3656_v60, %v3493_v38  ;;  %3889 = vrot.lane.b32.xlu0 %v3812_v18, %s12810_s17  ;;  %v5146_v1 = vrot.slane %v5144_v16, 4  ;;  %v4798_v38 = vsel %vm14172_vm11, %v4796_v37, %v4797_v20 }
 0x316   : > { %v4795_v22 = vsel %vm14172_vm11, %v11503_v4, %v4794_v59  ;;  %v5629_v20 = vrot.slane %v5627_v32, 4 }
 0x317   : > { %v3748_v34 = vmul.f32 %v14497_v58, %v3715_v30  ;;  %11340 = vmatmul.msk.bf16.gmra.mxu1 %vm658_vm3, %v12419_v33  ;;  %v4733_v11 = vpop.f32.mrf.mxu3  ;;  %v10657_v33 = vld [vmem:[%s12943_s18 + $0x228] sm:$0xf]  ;;  %v4906_v59 = vunpack.c.l.b16 %v4795_v22  ;;  %v4907_v30 = vunpack.c.l.b16 %v4798_v38  ;;  %v12589_v22 = vld [vmem:[%s12943_s18 + $0xd4] sm:$0xf] }
 0x318   : > { %11486 = vmatmul.msk.bf16.gmra.mxu2 %vm658_vm3, %v4447_v44  ;;  %v5148_v44 = vsel %vm14172_vm11, %v5146_v1, %v5147_v13  ;;  %v5630_v63 = vrot.slane %v10657_v33, 7  ;;  %v5256_v1 = vunpack.c.l.b16 %v5145_v26  ;;  %v4801_v38 = vrot.slane %v12589_v22, 7 }
 0x319   : > { %v3781_v27 = vadd.f32 %v14505_v40, %v3748_v34  ;;  %v5257_v34 = vunpack.c.l.b16 %v5148_v44  ;;  %v12590_v44 = vld [vmem:[%s12943_s18 + $0x218] sm:$0xf] }
 0x31a   : > { %v3436_v42 = vpop.f32.mrf.mxu0 }
 0x31b   : > { %v3494_v51 = vadd.f32 %v3436_v42, %v14220_v10  ;;  %v3813_v60 = vmax.f32 %v3781_v27, 0.0  ;;  %v12588_v10 = vld [vmem:[%s12943_s18 + $0x220] sm:$0xf]  ;;  %v5631_v27 = vsel %vm14172_vm11, %v5629_v20, %v5630_v63  ;;  %v4803_v20 = vrot.slane %v4801_v38, 4 }
 0x31c   : > { %v4543_v18 = vpop.f32.mrf.mxu2  ;;  %v3658_v54 = vpop.f32.mrf.mxu1  ;;  %11603 = vmatmul.msk.bf16.vlgmr.msrb.gmra.mxu3 %vm658_vm3, %v5764_v8  ;;  %v11587_v37 = vrot.slane %v12588_v10, 11  ;;  %v4938_v8 = vpack.c.b16 %v4907_v30, %v4906_v59  ;;  %v5735_v26 = vunpack.c.l.b16 %v5631_v27 }
 0x31d   : > { %v14832_v21 = vadd.f32 %v4731_v43, %v4543_v18  ;;  %v3716_v4 = vadd.f32 %v3658_v54, %v3494_v51  ;;  %3891 = vrot.lane.b32.xlu1 %v3813_v60, %s12810_s17  ;;  %v11352_v51 = vld [vmem:[%s12943_s18 + $0xd8] sm:$0xf]  ;;  %v5288_v60 = vpack.c.b16 %v5257_v34, %v5256_v1  ;;  %v5151_v54 = vrot.slane %v12590_v44, 7  ;;  %v10664_v44 = vld [vmem:[%s12943_s18 + $0x244] sm:$0xf] }
 0x31e   : > { %v5628_v42 = vsel %vm14172_vm11, %v11587_v37, %v5627_v32  ;;  %v4804_v63 = vrot.slane %v11352_v51, 7 }
 0x31f   : > { %v3749_v43 = vmul.f32 %v14497_v58, %v3716_v4  ;;  %v3870_v53 = vpop.permute.xlu2 %3869  ;;  %v4736_v13 = vpop.f32.mrf.mxu3  ;;  %v5734_v32 = vunpack.c.l.b16 %v5628_v42  ;;  %v10652_v4 = vld [vmem:[%s12943_s18 + $0x214] sm:$0xf]  ;;  %v5153_v34 = vrot.slane %v5151_v54, 4 }
 0x320   : > { %3963 = vst.msk [vmem:[%s13452_s19 + $0x18] sm:$0xff] %vm3959_vm12, %v3870_v53  ;;  %v11537_v1 = vrot.slane %v10652_v4, 11  ;;  %v4805_v51 = vsel %vm14172_vm11, %v4803_v20, %v4804_v63  ;;  %v12594_v20 = vld [vmem:[%s12943_s18 + $0x23c] sm:$0xf] }
 0x321   : > { %v3782_v23 = vadd.f32 %v14505_v40, %v3749_v43  ;;  %v5765_v42 = vpack.c.b16 %v5735_v26, %v5734_v32 }
 0x322   : > { %v3439_v16 = vpop.f32.mrf.mxu0  ;;  %v5152_v32 = vsel %vm14172_vm11, %v11537_v1, %v5151_v54  ;;  %v5637_v54 = vrot.slane %v10664_v44, 7 }
 0x323   : > { %v3495_v50 = vadd.f32 %v3439_v16, %v14239_v41  ;;  %v3814_v18 = vmax.f32 %v3782_v23, 0.0  ;;  %v12591_v41 = vld [vmem:[%s12943_s18 + $0xd0] sm:$0xf]  ;;  %v17402_v23 = vld [vmem:[#allocation6_spill] sm:$0xff] }
 0x324   : > { %v4545_v33 = vpop.f32.mrf.mxu2  ;;  %v3661_v30 = vpop.f32.mrf.mxu1  ;;  %v11504_v37 = vrot.slane %v12591_v41, 11 }
 0x325   : > { %v14851_v59 = vadd.f32 %v4733_v11, %v4545_v33  ;;  %11520 = vmatmul.msk.bf16.vlgmr.msrb.gmra.mxu0 %vm658_vm3, %v4938_v8  ;;  %v3717_v10 = vadd.f32 %v3661_v30, %v3495_v50  ;;  %3893 = vrot.lane.b32.xlu2 %v3814_v18, %s12810_s17  ;;  %v12592_v8 = vld [vmem:[%s12943_s18 + $0x21c] sm:$0xf]  ;;  %v12593_v33 = vld [vmem:[%s12943_s18 + $0x240] sm:$0xf] }
 0x326   : > { %v5154_v16 = vrot.slane %v12592_v8, 7  ;;  %v4802_v50 = vsel %vm14172_vm11, %v11504_v37, %v4801_v38  ;;  %v5634_v18 = vrot.slane %v12593_v33, 7  ;;  %v4909_v37 = vunpack.c.l.b16 %v4805_v51 }
 0x327   : > { %v3750_v43 = vmul.f32 %v14497_v58, %v3717_v10  ;;  %11553 = vmatmul.msk.bf16.vlgmr.msrb.gmra.mxu1 %vm658_vm3, %v5288_v60  ;;  %v3866_v11 = vpop.permute.xlu0 %3865  ;;  %v4738_v53 = vpop.f32.mrf.mxu3  ;;  %v4908_v41 = vunpack.c.l.b16 %v4802_v50 }
 0x328   : > { %11570 = vmatmul.msk.bf16.vlgmr.msrb.gmra.mxu2 %vm658_vm3, %v17402_v23  ;;  %3961 = vst.msk [vmem:[%s13452_s19 + $0x8] sm:$0xff] %vm3959_vm12, %v3866_v11  ;;  %v5155_v26 = vsel %vm14172_vm11, %v5153_v34, %v5154_v16  ;;  %v5258_v11 = vunpack.c.l.b16 %v5152_v32 }
 0x329   : > { %v3783_v22 = vadd.f32 %v14505_v40, %v3750_v43  ;;  %v5636_v43 = vrot.slane %v5634_v18, 4  ;;  %v5259_v1 = vunpack.c.l.b16 %v5155_v26  ;;  %v4939_v16 = vpack.c.b16 %v4909_v37, %v4908_v41  ;;  %v10659_v37 = vld [vmem:[%s12943_s18 + $0x230] sm:$0xf] }
 0x32a   : > { %v3441_v27 = vpop.f32.mrf.mxu0 }
 0x32b   : > { %v3496_v60 = vadd.f32 %v3441_v27, %v14254_v14  ;;  %v3815_v4 = vmax.f32 %v3783_v22, 0.0  ;;  %v11588_v14 = vrot.slane %v12594_v20, 11  ;;  %v12595_v27 = vld [vmem:[%s12943_s18 + $0xf0] sm:$0xf]  ;;  %v5638_v33 = vsel %vm14172_vm11, %v5636_v43, %v5637_v54  ;;  %v12597_v20 = vld [vmem:[%s12943_s18 + $0x234] sm:$0xf] }
 0x32c   : > { %v4548_v30 = vpop.f32.mrf.mxu2  ;;  %v3663_v38 = vpop.f32.mrf.mxu1  ;;  %11604 = vmatmul.msk.bf16.gmra.mxu3 %vm658_vm3, %v5765_v42  ;;  %v4808_v22 = vrot.slane %v12595_v27, 7  ;;  %v5737_v43 = vunpack.c.l.b16 %v5638_v33  ;;  %v12598_v27 = vld [vmem:[%s12943_s18 + $0x238] sm:$0xf] }
 0x32d   : > { %v14876_v10 = vadd.f32 %v4736_v13, %v4548_v30  ;;  %v3718_v63 = vadd.f32 %v3663_v38, %v3496_v60  ;;  %3895 = vrot.lane.b32.xlu0 %v3815_v4, %s12810_s17  ;;  %v5635_v42 = vsel %vm14172_vm11, %v11588_v14, %v5634_v18  ;;  %v11358_v60 = vld [vmem:[%s12943_s18 + $0xf4] sm:$0xf]  ;;  %v5289_v30 = vpack.c.b16 %v5259_v1, %v5258_v11  ;;  %v12596_v38 = vld [vmem:[%s12943_s18 + $0xec] sm:$0xf] }
 0x32e   : > { %v5736_v26 = vunpack.c.l.b16 %v5635_v42  ;;  %v11505_v41 = vrot.slane %v12596_v38, 11  ;;  %v5158_v18 = vrot.slane %v12597_v20, 7  ;;  %v4810_v54 = vrot.slane %v4808_v22, 4  ;;  %v10671_v38 = vld [vmem:[%s12943_s18 + $0x260] sm:$0xf] }
 0x32f   : > { %v3751_v13 = vmul.f32 %v14497_v58, %v3718_v63  ;;  %v3868_v34 = vpop.permute.xlu1 %3867  ;;  %v4741_v8 = vpop.f32.mrf.mxu3  ;;  %v11538_v11 = vrot.slane %v10659_v37, 11 }
 0x330   : > { %3962 = vst.msk [vmem:[%s13452_s19 + $0x10] sm:$0xff] %vm3959_vm12, %v3868_v34  ;;  %v4809_v42 = vsel %vm14172_vm11, %v11505_v41, %v4808_v22  ;;  %v5766_v33 = vpack.c.b16 %v5737_v43, %v5736_v26 }
 0x331   : > { %v3784_v51 = vadd.f32 %v14505_v40, %v3751_v13  ;;  %v4811_v13 = vrot.slane %v11358_v60, 7  ;;  %v4910_v41 = vunpack.c.l.b16 %v4809_v42 }
 0x332   : > { %v3444_v50 = vpop.f32.mrf.mxu0 }
 0x333   : > { %v3497_v44 = vadd.f32 %v3444_v50, %v14274_v61  ;;  %v3816_v32 = vmax.f32 %v3784_v51, 0.0  ;;  %v5161_v50 = vrot.slane %v12598_v27, 7  ;;  %v17403_v51 = vld [vmem:[#allocation7_spill] sm:$0xff]  ;;  %v4812_v60 = vsel %vm14172_vm11, %v4810_v54, %v4811_v13  ;;  %v12600_v13 = vld [vmem:[%s12943_s18 + $0x258] sm:$0xf] }
 0x334   : > { %v4550_v4 = vpop.f32.mrf.mxu2  ;;  %v3666_v63 = vpop.f32.mrf.mxu1 }
 0x335   : > { %v14895_v14 = vadd.f32 %v4738_v53, %v4550_v4  ;;  %11521 = vmatmul.msk.bf16.gmra.mxu0 %vm658_vm3, %v4939_v16  ;;  %v3719_v61 = vadd.f32 %v3666_v63, %v3497_v44  ;;  %3897 = vrot.lane.b32.xlu1 %v3816_v32, %s12810_s17  ;;  %v5160_v16 = vrot.slane %v5158_v18, 4  ;;  %v12599_v44 = vld [vmem:[%s12943_s18 + $0x25c] sm:$0xf]  ;;  %v4911_v63 = vunpack.c.l.b16 %v4812_v60 }
 0x337   : > { %v3752_v1 = vmul.f32 %v14497_v58, %v3719_v61  ;;  %11554 = vmatmul.msk.bf16.gmra.mxu1 %vm658_vm3, %v5289_v30  ;;  %v3876_v34 = vpop.permute.xlu2 %3875  ;;  %v4743_v53 = vpop.f32.mrf.mxu3  ;;  %v5641_v30 = vrot.slane %v12599_v44, 7  ;;  %v5159_v61 = vsel %vm14172_vm11, %v11538_v11, %v5158_v18  ;;  %v5162_v26 = vsel %vm14172_vm11, %v5160_v16, %v5161_v50 }
 0x338   : > { %11571 = vmatmul.msk.bf16.gmra.mxu2 %vm658_vm3, %v17403_v51  ;;  %3966 = vst.msk [vmem:[%s13452_s19 + $0x30] sm:$0xff] %vm3959_vm12, %v3876_v34  ;;  %v5644_v34 = vrot.slane %v10671_v38, 7  ;;  %v5260_v60 = vunpack.c.l.b16 %v5159_v61  ;;  %v5261_v16 = vunpack.c.l.b16 %v5162_v26 }
 0x339   : > { %v3785_v32 = vadd.f32 %v14505_v40, %v3752_v1  ;;  %v11589_v1 = vrot.slane %v12600_v13, 11  ;;  %v12602_v13 = vld [vmem:[%s12943_s18 + $0x108] sm:$0xf] }
 0x33a   : > { %v3446_v4 = vpop.f32.mrf.mxu0 }
 0x33b   : > { %v3498_v22 = vadd.f32 %v3446_v4, %v14289_v0  ;;  %v3817_v20 = vmax.f32 %v3785_v32, 0.0  ;;  %v5643_v0 = vrot.slane %v5641_v30, 4  ;;  %v5642_v50 = vsel %vm14172_vm11, %v11589_v1, %v5641_v30  ;;  %v12601_v32 = vld [vmem:[%s12943_s18 + $0x10c] sm:$0xf] }
 0x33c   : > { %v4553_v37 = vpop.f32.mrf.mxu2  ;;  %v3668_v54 = vpop.f32.mrf.mxu1  ;;  %11605 = vmatmul.msk.bf16.gmra.mxu3 %vm658_vm3, %v5766_v33  ;;  %v4815_v38 = vrot.slane %v12601_v32, 7  ;;  %v11506_v1 = vrot.slane %v12602_v13, 11  ;;  %v12604_v32 = vld [vmem:[%s12943_s18 + $0x254] sm:$0xf] }
 0x33d   : > { %v14918_v43 = vadd.f32 %v4741_v8, %v4553_v37  ;;  %v3720_v42 = vadd.f32 %v3668_v54, %v3498_v22  ;;  %3899 = vrot.lane.b32.xlu2 %v3817_v20, %s12810_s17  ;;  %v4940_v8 = vpack.c.b16 %v4911_v63, %v4910_v41  ;;  %v5645_v33 = vsel %vm14172_vm11, %v5643_v0, %v5644_v34  ;;  %v11364_v37 = vld [vmem:[%s12943_s18 + $0x110] sm:$0xf] }
 0x33e   : > { %v5290_v41 = vpack.c.b16 %v5261_v16, %v5260_v60  ;;  %v5738_v63 = vunpack.c.l.b16 %v5642_v50  ;;  %v5739_v26 = vunpack.c.l.b16 %v5645_v33  ;;  %v12603_v0 = vld [vmem:[%s12943_s18 + $0x250] sm:$0xf]  ;;  %v17404_v50 = vld [vmem:[#allocation8_spill] sm:$0xff]  ;;  %v4816_v33 = vsel %vm14172_vm11, %v11506_v1, %v4815_v38 }
 0x33f   : > { %v3753_v18 = vmul.f32 %v14497_v58, %v3720_v42  ;;  %v3872_v11 = vpop.permute.xlu0 %3871  ;;  %v4746_v27 = vpop.f32.mrf.mxu3  ;;  %v5165_v34 = vrot.slane %v12603_v0, 7 }
 0x340   : > { %3964 = vst.msk [vmem:[%s13452_s19 + $0x20] sm:$0xff] %vm3959_vm12, %v3872_v11  ;;  %v10666_v11 = vld [vmem:[%s12943_s18 + $0x24c] sm:$0xf] }
 0x341   : > { %v3786_v4 = vadd.f32 %v14505_v40, %v3753_v18  ;;  %v4818_v18 = vrot.slane %v11364_v37, 7 }
 0x342   : > { %v3449_v44 = vpop.f32.mrf.mxu0 }
 0x343   : > { %v3499_v22 = vadd.f32 %v3449_v44, %v14309_v57  ;;  %v3818_v61 = vmax.f32 %v3786_v4, 0.0  ;;  %v4817_v57 = vrot.slane %v4815_v38, 4  ;;  %v11539_v44 = vrot.slane %v10666_v11, 11 }
 0x344   : > { %v4555_v20 = vpop.f32.mrf.mxu2  ;;  %v3671_v54 = vpop.f32.mrf.mxu1  ;;  %v5167_v4 = vrot.slane %v5165_v34, 4 }
 0x345   : > { %v14934_v30 = vadd.f32 %v4743_v53, %v4555_v20  ;;  %11522 = vmatmul.msk.bf16.gmra.mxu0 %vm658_vm3, %v4940_v8  ;;  %v3721_v42 = vadd.f32 %v3671_v54, %v3499_v22  ;;  %3901 = vrot.lane.b32.xlu0 %v3818_v61, %s12810_s17  ;;  %v5767_v8 = vpack.c.b16 %v5739_v26, %v5738_v63  ;;  %v5168_v22 = vrot.slane %v12604_v32, 7  ;;  %v10678_v54 = vld [vmem:[%s12943_s18 + $0x27c] sm:$0xf] }
 0x346   : > { %v4819_v61 = vsel %vm14172_vm11, %v4817_v57, %v4818_v18 }
 0x347   : > { %v3754_v60 = vmul.f32 %v14497_v58, %v3721_v42  ;;  %11555 = vmatmul.msk.bf16.gmra.mxu1 %vm658_vm3, %v5290_v41  ;;  %v3874_v53 = vpop.permute.xlu1 %3873  ;;  %v4748_v16 = vpop.f32.mrf.mxu3  ;;  %v12605_v41 = vld [vmem:[%s12943_s18 + $0x278] sm:$0xf]  ;;  %v4912_v42 = vunpack.c.l.b16 %v4816_v33  ;;  %v4913_v11 = vunpack.c.l.b16 %v4819_v61  ;;  %v5169_v57 = vsel %vm14172_vm11, %v5167_v4, %v5168_v22 }
 0x348   : > { %11572 = vmatmul.msk.bf16.gmra.mxu2 %vm658_vm3, %v17404_v50  ;;  %3965 = vst.msk [vmem:[%s13452_s19 + $0x28] sm:$0xff] %vm3959_vm12, %v3874_v53  ;;  %v5648_v63 = vrot.slane %v12605_v41, 7  ;;  %v5263_v61 = vunpack.c.l.b16 %v5169_v57 }
 0x349   : > { %v3787_v20 = vadd.f32 %v14505_v40, %v3754_v60  ;;  %v5166_v60 = vsel %vm14172_vm11, %v11539_v44, %v5165_v34  ;;  %v4941_v34 = vpack.c.b16 %v4913_v11, %v4912_v42  ;;  %v12608_v42 = vld [vmem:[%s12943_s18 + $0x26c] sm:$0xf] }
 0x34a   : > { %v3451_v37 = vpop.f32.mrf.mxu0  ;;  %v5650_v33 = vrot.slane %v5648_v63, 4  ;;  %v5172_v11 = vrot.slane %v12608_v42, 7  ;;  %v12611_v42 = vld [vmem:[%s12943_s18 + $0x294] sm:$0xf] }
 0x34b   : > { %v3500_v26 = vadd.f32 %v3451_v37, %v14324_v12  ;;  %v3819_v0 = vmax.f32 %v3787_v20, 0.0  ;;  %v12606_v12 = vld [vmem:[%s12943_s18 + $0x274] sm:$0xf]  ;;  %v5262_v20 = vunpack.c.l.b16 %v5166_v60 }
 0x34c   : > { %v4558_v13 = vpop.f32.mrf.mxu2  ;;  %v3673_v1 = vpop.f32.mrf.mxu1  ;;  %11606 = vmatmul.msk.bf16.gmra.mxu3 %vm658_vm3, %v5767_v8  ;;  %v11590_v53 = vrot.slane %v12606_v12, 11 }
 0x34d   : > { %v14956_v38 = vadd.f32 %v4746_v27, %v4558_v13  ;;  %v3722_v18 = vadd.f32 %v3673_v1, %v3500_v26  ;;  %3903 = vrot.lane.b32.xlu1 %v3819_v0, %s12810_s17  ;;  %v5651_v27 = vrot.slane %v10678_v54, 7  ;;  %v12607_v26 = vld [vmem:[%s12943_s18 + $0x128] sm:$0xf]  ;;  %v11370_v0 = vld [vmem:[%s12943_s18 + $0x12c] sm:$0xf]  ;;  %v5291_v57 = vpack.c.b16 %v5263_v61, %v5262_v20 }
 0x34e   : > { %v5649_v22 = vsel %vm14172_vm11, %v11590_v53, %v5648_v63  ;;  %v4822_v54 = vrot.slane %v12607_v26, 7  ;;  %v17405_v26 = vld [vmem:[#allocation9_spill] sm:$0xff] }
 0x34f   : > { %v3755_v32 = vmul.f32 %v14497_v58, %v3722_v18  ;;  %v3882_v37 = vpop.permute.xlu2 %3881  ;;  %v4751_v8 = vpop.f32.mrf.mxu3  ;;  %v5652_v41 = vsel %vm14172_vm11, %v5650_v33, %v5651_v27  ;;  %v5740_v63 = vunpack.c.l.b16 %v5649_v22  ;;  %v10673_v33 = vld [vmem:[%s12943_s18 + $0x268] sm:$0xf]  ;;  %v12610_v22 = vld [vmem:[%s12943_s18 + $0x270] sm:$0xf] }
 0x350   : > { %3969 = vst.msk [vmem:[%s13452_s19 + $0x48] sm:$0xff] %vm3959_vm12, %v3882_v37  ;;  %v5741_v53 = vunpack.c.l.b16 %v5652_v41  ;;  %v4824_v37 = vrot.slane %v4822_v54, 4  ;;  %v5175_v41 = vrot.slane %v12610_v22, 7 }
 0x351   : > { %v3788_v4 = vadd.f32 %v14505_v40, %v3755_v32 }
 0x352   : > { %v3454_v44 = vpop.f32.mrf.mxu0 }
 0x353   : > { %v3501_v13 = vadd.f32 %v3454_v44, %v14344_v28  ;;  %v3820_v60 = vmax.f32 %v3788_v4, 0.0  ;;  %v12609_v28 = vld [vmem:[%s12943_s18 + $0x124] sm:$0xf]  ;;  %v4825_v44 = vrot.slane %v11370_v0, 7  ;;  %v5174_v4 = vrot.slane %v5172_v11, 4 }
 0x354   : > { %v4560_v1 = vpop.f32.mrf.mxu2  ;;  %v3676_v12 = vpop.f32.mrf.mxu1  ;;  %v11507_v32 = vrot.slane %v12609_v28, 11 }
 0x355   : > { %v14977_v18 = vadd.f32 %v4748_v16, %v4560_v1  ;;  %11523 = vmatmul.msk.bf16.gmra.mxu0 %vm658_vm3, %v4941_v34  ;;  %v3723_v27 = vadd.f32 %v3676_v12, %v3501_v13  ;;  %3905 = vrot.lane.b32.xlu2 %v3820_v60, %s12810_s17  ;;  %v11540_v34 = vrot.slane %v10673_v33, 11  ;;  %v5768_v13 = vpack.c.b16 %v5741_v53, %v5740_v63 }
 0x356   : > { %v4823_v60 = vsel %vm14172_vm11, %v11507_v32, %v4822_v54  ;;  %v5655_v12 = vrot.slane %v12611_v42, 7  ;;  %v5176_v53 = vsel %vm14172_vm11, %v5174_v4, %v5175_v41 }
 0x357   : > { %v3756_v20 = vmul.f32 %v14497_v58, %v3723_v27  ;;  %11556 = vmatmul.msk.bf16.gmra.mxu1 %vm658_vm3, %v5291_v57  ;;  %v3878_v16 = vpop.permute.xlu0 %3877  ;;  %v4753_v61 = vpop.f32.mrf.mxu3  ;;  %v4826_v57 = vsel %vm14172_vm11, %v4824_v37, %v4825_v44  ;;  %v10685_v27 = vld [vmem:[%s12943_s18 + $0x298] sm:$0xf]  ;;  %v5173_v63 = vsel %vm14172_vm11, %v11540_v34, %v5172_v11  ;;  %v4914_v32 = vunpack.c.l.b16 %v4823_v60  ;;  %v12612_v44 = vld [vmem:[%s12943_s18 + $0x290] sm:$0xf] }
 0x358   : > { %11573 = vmatmul.msk.bf16.gmra.mxu2 %vm658_vm3, %v17405_v26  ;;  %3967 = vst.msk [vmem:[%s13452_s19 + $0x38] sm:$0xff] %vm3959_vm12, %v3878_v16  ;;  %v4915_v37 = vunpack.c.l.b16 %v4826_v57  ;;  %v5658_v11 = vrot.slane %v10685_v27, 7  ;;  %v5264_v34 = vunpack.c.l.b16 %v5173_v63  ;;  %v12613_v57 = vld [vmem:[%s12943_s18 + $0x144] sm:$0xf]  ;;  %v12615_v26 = vld [vmem:[%s12943_s18 + $0x288] sm:$0xf] }
 0x359   : > { %v3789_v0 = vadd.f32 %v14505_v40, %v3756_v20  ;;  %v4829_v42 = vrot.slane %v12613_v57, 7 }
 0x35a   : > { %v3456_v1 = vpop.f32.mrf.mxu0 }
 0x35b   : > { %v3502_v33 = vadd.f32 %v3456_v1, %v14359_v5  ;;  %v3821_v22 = vmax.f32 %v3789_v0, 0.0  ;;  %v11591_v5 = vrot.slane %v12612_v44, 11  ;;  %v5657_v1 = vrot.slane %v5655_v12, 4 }
 0x35c   : > { %v4563_v28 = vpop.f32.mrf.mxu2  ;;  %v3678_v54 = vpop.f32.mrf.mxu1  ;;  %11607 = vmatmul.msk.bf16.gmra.mxu3 %vm658_vm3, %v5768_v13  ;;  %v5265_v0 = vunpack.c.l.b16 %v5176_v53  ;;  %v4942_v13 = vpack.c.b16 %v4915_v37, %v4914_v32  ;;  %v12614_v32 = vld [vmem:[%s12943_s18 + $0x140] sm:$0xf] }
 0x35d   : > { %v15002_v20 = vadd.f32 %v4751_v8, %v4563_v28  ;;  %v3724_v16 = vadd.f32 %v3678_v54, %v3502_v33  ;;  %3907 = vrot.lane.b32.xlu0 %v3821_v22, %s12810_s17  ;;  %v5656_v60 = vsel %vm14172_vm11, %v11591_v5, %v5655_v12  ;;  %v5659_v28 = vsel %vm14172_vm11, %v5657_v1, %v5658_v11  ;;  %v11376_v22 = vld [vmem:[%s12943_s18 + $0x148] sm:$0xf] }
 0x35e   : > { %v5292_v53 = vpack.c.b16 %v5265_v0, %v5264_v34  ;;  %v11508_v37 = vrot.slane %v12614_v32, 11  ;;  %v5179_v12 = vrot.slane %v12615_v26, 7  ;;  %v5743_v1 = vunpack.c.l.b16 %v5659_v28  ;;  %v17406_v28 = vld [vmem:[#allocation10_spill] sm:$0xff] }
 0x35f   : > { %v3757_v8 = vmul.f32 %v14497_v58, %v3724_v16  ;;  %v3880_v4 = vpop.permute.xlu1 %3879  ;;  %v4756_v41 = vpop.f32.mrf.mxu3  ;;  %v5742_v16 = vunpack.c.l.b16 %v5656_v60  ;;  %v4831_v11 = vrot.slane %v4829_v42, 4 }
 0x360   : > { %3968 = vst.msk [vmem:[%s13452_s19 + $0x40] sm:$0xff] %vm3959_vm12, %v3880_v4  ;;  %v10680_v4 = vld [vmem:[%s12943_s18 + $0x284] sm:$0xf]  ;;  %v4830_v60 = vsel %vm14172_vm11, %v11508_v37, %v4829_v42 }
 0x361   : > { %v3790_v27 = vadd.f32 %v14505_v40, %v3757_v8  ;;  %v4832_v8 = vrot.slane %v11376_v22, 7  ;;  %v11541_v34 = vrot.slane %v10680_v4, 11  ;;  %v5769_v22 = vpack.c.b16 %v5743_v1, %v5742_v16  ;;  %v10692_v4 = vld [vmem:[%s12943_s18 + $0x2b4] sm:$0xf] }
 0x362   : > { %v3459_v33 = vpop.f32.mrf.mxu0  ;;  %v4916_v37 = vunpack.c.l.b16 %v4830_v60  ;;  %v5665_v60 = vrot.slane %v10692_v4, 7 }
 0x363   : > { %v3503_v63 = vadd.f32 %v3459_v33, %v14379_v36  ;;  %v3822_v44 = vmax.f32 %v3790_v27, 0.0  ;;  %v12616_v33 = vld [vmem:[%s12943_s18 + $0x28c] sm:$0xf] }
 0x364   : > { %v4565_v54 = vpop.f32.mrf.mxu2  ;;  %v3681_v57 = vpop.f32.mrf.mxu1  ;;  %v5182_v27 = vrot.slane %v12616_v33, 7 }
 0x365   : > { %v15021_v5 = vadd.f32 %v4753_v61, %v4565_v54  ;;  %11524 = vmatmul.msk.bf16.gmra.mxu0 %vm658_vm3, %v4942_v13  ;;  %v3725_v36 = vadd.f32 %v3681_v57, %v3503_v63  ;;  %3909 = vrot.lane.b32.xlu1 %v3822_v44, %s12810_s17  ;;  %v5181_v13 = vrot.slane %v5179_v12, 4  ;;  %v4833_v63 = vsel %vm14172_vm11, %v4831_v11, %v4832_v8  ;;  %v12617_v54 = vld [vmem:[%s12943_s18 + $0x2b0] sm:$0xf]  ;;  %v12618_v8 = vld [vmem:[%s12943_s18 + $0x2ac] sm:$0xf] }
 0x366   : > { %v4917_v33 = vunpack.c.l.b16 %v4833_v63 }
 0x367   : > { %v3758_v0 = vmul.f32 %v14497_v58, %v3725_v36  ;;  %11557 = vmatmul.msk.bf16.gmra.mxu1 %vm658_vm3, %v5292_v53  ;;  %v3888_v26 = vpop.permute.xlu2 %3887  ;;  %v4758_v61 = vpop.f32.mrf.mxu3  ;;  %v5662_v53 = vrot.slane %v12617_v54, 7  ;;  %v5183_v16 = vsel %vm14172_vm11, %v5181_v13, %v5182_v27 }
 0x368   : > { %11574 = vmatmul.msk.bf16.gmra.mxu2 %vm658_vm3, %v17406_v28  ;;  %3972 = vst.msk [vmem:[%s13452_s19 + $0x60] sm:$0xff] %vm3959_vm12, %v3888_v26  ;;  %v5180_v26 = vsel %vm14172_vm11, %v11541_v34, %v5179_v12  ;;  %v5267_v13 = vunpack.c.l.b16 %v5183_v16  ;;  %v12633_v28 = vld [vmem:[%s12943_s18 + $0x2dc] sm:$0xf] }
 0x369   : > { %v3791_v32 = vadd.f32 %v14505_v40, %v3758_v0  ;;  %v11592_v0 = vrot.slane %v12618_v8, 11 }
 0x36a   : > { %v3461_v44 = vpop.f32.mrf.mxu0 }
 0x36b   : > { %v3504_v42 = vadd.f32 %v3461_v44, %v14394_v24  ;;  %v3823_v36 = vmax.f32 %v3791_v32, 0.0  ;;  %v5664_v24 = vrot.slane %v5662_v53, 4  ;;  %v5266_v44 = vunpack.c.l.b16 %v5180_v26  ;;  %v11382_v26 = vld [vmem:[%s12943_s18 + $0x164] sm:$0xf] }
 0x36c   : > { %v4568_v57 = vpop.f32.mrf.mxu2  ;;  %v3683_v11 = vpop.f32.mrf.mxu1  ;;  %11608 = vmatmul.msk.bf16.gmra.mxu3 %vm658_vm3, %v5769_v22  ;;  %v5663_v27 = vsel %vm14172_vm11, %v11592_v0, %v5662_v53 }
 0x36d   : > { %v15044_v1 = vadd.f32 %v4756_v41, %v4568_v57  ;;  %v3726_v54 = vadd.f32 %v3683_v11, %v3504_v42  ;;  %3911 = vrot.lane.b32.xlu2 %v3823_v36, %s12810_s17  ;;  %v4943_v41 = vpack.c.b16 %v4917_v33, %v4916_v37  ;;  %v5666_v22 = vsel %vm14172_vm11, %v5664_v24, %v5665_v60  ;;  %v12619_v42 = vld [vmem:[%s12943_s18 + $0x160] sm:$0xf]  ;;  %v12620_v24 = vld [vmem:[%s12943_s18 + $0x15c] sm:$0xf] }
 0x36e   : > { %v4836_v57 = vrot.slane %v12619_v42, 7  ;;  %v5293_v37 = vpack.c.b16 %v5267_v13, %v5266_v44  ;;  %v5744_v33 = vunpack.c.l.b16 %v5663_v27  ;;  %v5745_v8 = vunpack.c.l.b16 %v5666_v22  ;;  %v17407_v27 = vld [vmem:[#allocation11_spill] sm:$0xff] }
 0x36f   : > { %v3759_v12 = vmul.f32 %v14497_v58, %v3726_v54  ;;  %v3884_v34 = vpop.permute.xlu0 %3883  ;;  %v4761_v63 = vpop.f32.mrf.mxu3  ;;  %v11509_v60 = vrot.slane %v12620_v24, 11  ;;  %v12621_v54 = vld [vmem:[%s12943_s18 + $0x2a4] sm:$0xf] }
 0x370   : > { %3970 = vst.msk [vmem:[%s13452_s19 + $0x50] sm:$0xff] %vm3959_vm12, %v3884_v34 }
 0x371   : > { %v3792_v4 = vadd.f32 %v14505_v40, %v3759_v12  ;;  %v5186_v12 = vrot.slane %v12621_v54, 7  ;;  %v4837_v22 = vsel %vm14172_vm11, %v11509_v60, %v4836_v57  ;;  %v10699_v54 = vld [vmem:[%s12943_s18 + $0x2d0] sm:$0xf] }
 0x372   : > { %v3464_v32 = vpop.f32.mrf.mxu0 }
 0x373   : > { %v3505_v36 = vadd.f32 %v3464_v32, %v14414_v49  ;;  %v3824_v11 = vmax.f32 %v3792_v4, 0.0  ;;  %v4838_v49 = vrot.slane %v4836_v57, 4  ;;  %v4839_v32 = vrot.slane %v11382_v26, 7  ;;  %v10687_v4 = vld [vmem:[%s12943_s18 + $0x2a0] sm:$0xf] }
 0x374   : > { %v4570_v16 = vpop.f32.mrf.mxu2  ;;  %v3686_v0 = vpop.f32.mrf.mxu1  ;;  %v11542_v42 = vrot.slane %v10687_v4, 11  ;;  %v12622_v26 = vld [vmem:[%s12943_s18 + $0x2a8] sm:$0xf] }
 0x375   : > { %v15060_v53 = vadd.f32 %v4758_v61, %v4570_v16  ;;  %11525 = vmatmul.msk.bf16.gmra.mxu0 %vm658_vm3, %v4943_v41  ;;  %v3727_v34 = vadd.f32 %v3686_v0, %v3505_v36  ;;  %3913 = vrot.lane.b32.xlu0 %v3824_v11, %s12810_s17  ;;  %v5770_v41 = vpack.c.b16 %v5745_v8, %v5744_v33  ;;  %v5188_v36 = vrot.slane %v5186_v12, 4  ;;  %v12623_v33 = vld [vmem:[%s12943_s18 + $0x2cc] sm:$0xf] }
 0x376   : > { %v5189_v16 = vrot.slane %v12622_v26, 7  ;;  %v5669_v8 = vrot.slane %v12623_v33, 7 }
 0x377   : > { %v3760_v44 = vmul.f32 %v14497_v58, %v3727_v34  ;;  %11558 = vmatmul.msk.bf16.gmra.mxu1 %vm658_vm3, %v5293_v37  ;;  %v3886_v61 = vpop.permute.xlu1 %3885  ;;  %v4763_v13 = vpop.f32.mrf.mxu3  ;;  %v4840_v37 = vsel %vm14172_vm11, %v4838_v49, %v4839_v32 }
 0x378   : > { %11575 = vmatmul.msk.bf16.gmra.mxu2 %vm658_vm3, %v17407_v27  ;;  %3971 = vst.msk [vmem:[%s13452_s19 + $0x58] sm:$0xff] %vm3959_vm12, %v3886_v61  ;;  %v4918_v27 = vunpack.c.l.b16 %v4837_v22  ;;  %v4919_v4 = vunpack.c.l.b16 %v4840_v37  ;;  %v5190_v49 = vsel %vm14172_vm11, %v5188_v36, %v5189_v16  ;;  %v5671_v22 = vrot.slane %v5669_v8, 4 }
 0x379   : > { %v3793_v0 = vadd.f32 %v14505_v40, %v3760_v44  ;;  %v5187_v44 = vsel %vm14172_vm11, %v11542_v42, %v5186_v12  ;;  %v5269_v33 = vunpack.c.l.b16 %v5190_v49 }
 0x37a   : > { %v3466_v11 = vpop.f32.mrf.mxu0  ;;  %v5268_v37 = vunpack.c.l.b16 %v5187_v44  ;;  %v4944_v12 = vpack.c.b16 %v4919_v4, %v4918_v27  ;;  %v12626_v27 = vld [vmem:[%s12943_s18 + $0x2c0] sm:$0xf] }
 0x37b   : > { %v3506_v24 = vadd.f32 %v3466_v11, %v14429_v9  ;;  %v3825_v61 = vmax.f32 %v3793_v0, 0.0  ;;  %v12624_v9 = vld [vmem:[%s12943_s18 + $0x2c8] sm:$0xf]  ;;  %v5193_v4 = vrot.slane %v12626_v27, 7 }
 0x37c   : > { %v4573_v34 = vpop.f32.mrf.mxu2  ;;  %v3688_v60 = vpop.f32.mrf.mxu1  ;;  %11609 = vmatmul.msk.bf16.gmra.mxu3 %vm658_vm3, %v5770_v41  ;;  %v11593_v26 = vrot.slane %v12624_v9, 11 }
 0x37d   : > { %v15082_v57 = vadd.f32 %v4761_v63, %v4573_v34  ;;  %v3728_v32 = vadd.f32 %v3688_v60, %v3506_v24  ;;  %3915 = vrot.lane.b32.xlu1 %v3825_v61, %s12810_s17  ;;  %v5672_v63 = vrot.slane %v10699_v54, 7  ;;  %v12625_v54 = vld [vmem:[%s12943_s18 + $0x17c] sm:$0xf]  ;;  %v11388_v60 = vld [vmem:[%s12943_s18 + $0x180] sm:$0xf] }
 0x37e   : > { %v5670_v16 = vsel %vm14172_vm11, %v11593_v26, %v5669_v8  ;;  %v4843_v34 = vrot.slane %v12625_v54, 7 }
 0x37f   : > { %v3761_v11 = vmul.f32 %v14497_v58, %v3728_v32  ;;  %v3894_v0 = vpop.permute.xlu2 %3893  ;;  %v4766_v41 = vpop.f32.mrf.mxu3  ;;  %v5673_v24 = vsel %vm14172_vm11, %v5671_v22, %v5672_v63  ;;  %v5294_v32 = vpack.c.b16 %v5269_v33, %v5268_v37  ;;  %v5746_v8 = vunpack.c.l.b16 %v5670_v16  ;;  %v10694_v22 = vld [vmem:[%s12943_s18 + $0x2bc] sm:$0xf] }
 0x380   : > { %3975 = vst.msk [vmem:[%s13452_s19 + $0x78] sm:$0xff] %vm3959_vm12, %v3894_v0  ;;  %v5747_v26 = vunpack.c.l.b16 %v5673_v24  ;;  %v5195_v16 = vrot.slane %v5193_v4, 4  ;;  %v12628_v24 = vld [vmem:[%s12943_s18 + $0x2c4] sm:$0xf] }
 0x381   : > { %v3794_v36 = vadd.f32 %v14505_v40, %v3761_v11  ;;  %v5196_v54 = vrot.slane %v12628_v24, 7 }
 0x382   : > { %v3469_v42 = vpop.f32.mrf.mxu0 }
 0x383   : > { %v3507_v61 = vadd.f32 %v3469_v42, %v14449_v56  ;;  %v3826_v49 = vmax.f32 %v3794_v36, 0.0  ;;  %v12627_v56 = vld [vmem:[%s12943_s18 + $0x178] sm:$0xf]  ;;  %v4845_v42 = vrot.slane %v4843_v34, 4  ;;  %v4846_v36 = vrot.slane %v11388_v60, 7 }
 0x384   : > { %v4575_v44 = vpop.f32.mrf.mxu2  ;;  %v3691_v11 = vpop.f32.mrf.mxu1  ;;  %v11510_v0 = vrot.slane %v12627_v56, 11  ;;  %v10706_v56 = vld [vmem:[%s12943_s18 + $0x2ec] sm:$0xf] }
 0x385   : > { %v15103_v9 = vadd.f32 %v4763_v13, %v4575_v44  ;;  %11526 = vmatmul.msk.bf16.gmra.mxu0 %vm658_vm3, %v4944_v12  ;;  %v3729_v63 = vadd.f32 %v3691_v11, %v3507_v61  ;;  %3917 = vrot.lane.b32.xlu2 %v3826_v49, %s12810_s17  ;;  %v11543_v12 = vrot.slane %v10694_v22, 11  ;;  %v17408_v44 = vld [vmem:[#allocation12_spill] sm:$0xff]  ;;  %v5771_v61 = vpack.c.b16 %v5747_v26, %v5746_v8  ;;  %v12629_v11 = vld [vmem:[%s12943_s18 + $0x2e8] sm:$0xf] }
 0x386   : > { %v4847_v27 = vsel %vm14172_vm11, %v4845_v42, %v4846_v36  ;;  %v5676_v22 = vrot.slane %v12629_v11, 7  ;;  %v5197_v26 = vsel %vm14172_vm11, %v5195_v16, %v5196_v54  ;;  %v12630_v36 = vld [vmem:[%s12943_s18 + $0x2e4] sm:$0xf] }
 0x387   : > { %v3762_v37 = vmul.f32 %v14497_v58, %v3729_v63  ;;  %11559 = vmatmul.msk.bf16.gmra.mxu1 %vm658_vm3, %v5294_v32  ;;  %v3890_v13 = vpop.permute.xlu0 %3889  ;;  %v4768_v33 = vpop.f32.mrf.mxu3  ;;  %v4844_v32 = vsel %vm14172_vm11, %v11510_v0, %v4843_v34  ;;  %v5194_v8 = vsel %vm14172_vm11, %v11543_v12, %v5193_v4  ;;  %v4921_v42 = vunpack.c.l.b16 %v4847_v27  ;;  %v12631_v27 = vld [vmem:[%s12943_s18 + $0x198] sm:$0xf] }
 0x388   : > { %11576 = vmatmul.msk.bf16.gmra.mxu2 %vm658_vm3, %v17408_v44  ;;  %3973 = vst.msk [vmem:[%s13452_s19 + $0x68] sm:$0xff] %vm3959_vm12, %v3890_v13  ;;  %v4920_v0 = vunpack.c.l.b16 %v4844_v32  ;;  %v5679_v4 = vrot.slane %v10706_v56, 7  ;;  %v5270_v12 = vunpack.c.l.b16 %v5194_v8 }
 0x389   : > { %v3795_v60 = vadd.f32 %v14505_v40, %v3762_v37 }
 0x38a   : > { %v3471_v49 = vpop.f32.mrf.mxu0 }
 0x38b   : > { %v3508_v63 = vadd.f32 %v3471_v49, %v14464_v19  ;;  %v3827_v44 = vmax.f32 %v3795_v60, 0.0  ;;  %v11594_v19 = vrot.slane %v12630_v36, 11  ;;  %v5678_v49 = vrot.slane %v5676_v22, 4 }
 0x38c   : > { %v4578_v24 = vpop.f32.mrf.mxu2  ;;  %v3693_v34 = vpop.f32.mrf.mxu1  ;;  %11610 = vmatmul.msk.bf16.gmra.mxu3 %vm658_vm3, %v5771_v61  ;;  %v5271_v60 = vunpack.c.l.b16 %v5197_v26  ;;  %v4945_v61 = vpack.c.b16 %v4921_v42, %v4920_v0  ;;  %v12632_v0 = vld [vmem:[%s12943_s18 + $0x194] sm:$0xf] }
 0x38d   : > { %v15128_v37 = vadd.f32 %v4766_v41, %v4578_v24  ;;  %v3730_v13 = vadd.f32 %v3693_v34, %v3508_v63  ;;  %3919 = vrot.lane.b32.xlu0 %v3827_v44, %s12810_s17  ;;  %v5677_v32 = vsel %vm14172_vm11, %v11594_v19, %v5676_v22  ;;  %v4850_v44 = vrot.slane %v12631_v27, 7  ;;  %v11394_v24 = vld [vmem:[%s12943_s18 + $0x19c] sm:$0xf] }
 0x38e   : > { %v5680_v56 = vsel %vm14172_vm11, %v5678_v49, %v5679_v4  ;;  %v5295_v26 = vpack.c.b16 %v5271_v60, %v5270_v12  ;;  %v11511_v42 = vrot.slane %v12632_v0, 11  ;;  %v5200_v22 = vrot.slane %v12633_v28, 7  ;;  %v10713_v0 = vld [vmem:[%s12943_s18 + $0x308] sm:$0xf] }
 0x38f   : > { %v3763_v41 = vmul.f32 %v14497_v58, %v3730_v13  ;;  %v3892_v16 = vpop.permute.xlu1 %3891  ;;  %v4771_v54 = vpop.f32.mrf.mxu3  ;;  %v5748_v13 = vunpack.c.l.b16 %v5677_v32  ;;  %v5749_v49 = vunpack.c.l.b16 %v5680_v56  ;;  %v4852_v4 = vrot.slane %v4850_v44, 4 }
 0x390   : > { %3974 = vst.msk [vmem:[%s13452_s19 + $0x70] sm:$0xff] %vm3959_vm12, %v3892_v16  ;;  %v10701_v16 = vld [vmem:[%s12943_s18 + $0x2d8] sm:$0xf]  ;;  %v4851_v32 = vsel %vm14172_vm11, %v11511_v42, %v4850_v44 }
 0x391   : > { %v3796_v63 = vadd.f32 %v14505_v40, %v3763_v41  ;;  %v4853_v41 = vrot.slane %v11394_v24, 7  ;;  %v11544_v12 = vrot.slane %v10701_v16, 11  ;;  %v5772_v56 = vpack.c.b16 %v5749_v49, %v5748_v13 }
 0x392   : > { %v3474_v11 = vpop.f32.mrf.mxu0  ;;  %v4922_v42 = vunpack.c.l.b16 %v4851_v32  ;;  %v5686_v32 = vrot.slane %v10713_v0, 7 }
 0x393   : > { %v3509_v8 = vadd.f32 %v3474_v11, %v14484_v35  ;;  %v3828_v36 = vmax.f32 %v3796_v63, 0.0  ;;  %v12634_v11 = vld [vmem:[%s12943_s18 + $0x2e0] sm:$0xf]  ;;  %v4854_v24 = vsel %vm14172_vm11, %v4852_v4, %v4853_v41 }
 0x394   : > { %v4580_v34 = vpop.f32.mrf.mxu2  ;;  %v3696_v27 = vpop.f32.mrf.mxu1  ;;  %v5203_v63 = vrot.slane %v12634_v11, 7  ;;  %v12636_v41 = vld [vmem:[%s12943_s18 + $0x300] sm:$0xf] }
 0x395   : > { %v15147_v19 = vadd.f32 %v4768_v33, %v4580_v34  ;;  %11527 = vmatmul.msk.bf16.gmra.mxu0 %vm658_vm3, %v4945_v61  ;;  %v3731_v35 = vadd.f32 %v3696_v27, %v3509_v8  ;;  %3921 = vrot.lane.b32.xlu1 %v3828_v36, %s12810_s17  ;;  %v5202_v61 = vrot.slane %v5200_v22, 4  ;;  %v12635_v8 = vld [vmem:[%s12943_s18 + $0x304] sm:$0xf] }
 0x397   : > { %v3764_v60 = vmul.f32 %v14497_v58, %v3731_v35  ;;  %11560 = vmatmul.msk.bf16.gmra.mxu1 %vm658_vm3, %v5295_v26  ;;  %v3900_v28 = vpop.permute.xlu2 %3899  ;;  %v4773_v33 = vpop.f32.mrf.mxu3  ;;  %v5683_v26 = vrot.slane %v12635_v8, 7  ;;  %v4923_v35 = vunpack.c.l.b16 %v4854_v24  ;;  %v5204_v13 = vsel %vm14172_vm11, %v5202_v61, %v5203_v63 }
 0x398   : > { %11577 = vmatmul.msk.bf16.gmra.mxu2 %vm658_vm3, %v13167_v62  ;;  %3978 = vst.msk [vmem:[%s13452_s19 + $0x90] sm:$0xff] %vm3959_vm12, %v3900_v28  ;;  %v5201_v28 = vsel %vm14172_vm11, %v11544_v12, %v5200_v22  ;;  %v5273_v22 = vunpack.c.l.b16 %v5204_v13 }
 0x399   : > { %v3797_v36 = vadd.f32 %v14505_v40, %v3764_v60  ;;  %v11595_v60 = vrot.slane %v12636_v41, 11  ;;  %v5272_v24 = vunpack.c.l.b16 %v5201_v28 }
 0x39a   : > { %v3476_v34 = vpop.f32.mrf.mxu0 }
 0x39b   : > { %v3510_v44 = vadd.f32 %v3476_v34, %v14509_v55  ;;  %v3829_v27 = vmax.f32 %v3797_v36, 0.0  ;;  %v5685_v55 = vrot.slane %v5683_v26, 4  ;;  %v5684_v63 = vsel %vm14172_vm11, %v11595_v60, %v5683_v26  ;;  %v12637_v34 = vld [vmem:[%s12943_s18 + $0x1b4] sm:$0xf] }
 0x39c   : > { %v4583_v16 = vpop.f32.mrf.mxu2  ;;  %v3698_v4 = vpop.f32.mrf.mxu1  ;;  %11611 = vmatmul.msk.bf16.gmra.mxu3 %vm658_vm3, %v5772_v56  ;;  %v4857_v36 = vrot.slane %v12637_v34, 7 }
 0x39d   : > { %v15170_v49 = vadd.f32 %v4771_v54, %v4583_v16  ;;  %v3732_v11 = vadd.f32 %v3698_v4, %v3510_v44  ;;  %3923 = vrot.lane.b32.xlu2 %v3829_v27, %s12810_s17  ;;  %v4946_v54 = vpack.c.b16 %v4923_v35, %v4922_v42  ;;  %v5687_v56 = vsel %vm14172_vm11, %v5685_v55, %v5686_v32  ;;  %v11400_v16 = vld [vmem:[%s12943_s18 + $0x1b8] sm:$0xf]  ;;  %v12639_v55 = vld [vmem:[%s12943_s18 + $0x1b0] sm:$0xf] }
 0x39e   : > { %v5296_v27 = vpack.c.b16 %v5273_v22, %v5272_v24  ;;  %v5750_v42 = vunpack.c.l.b16 %v5684_v63  ;;  %v5751_v35 = vunpack.c.l.b16 %v5687_v56  ;;  %v12638_v4 = vld [vmem:[%s12943_s18 + $0x2f8] sm:$0xf]  ;;  %v4859_v32 = vrot.slane %v4857_v36, 4  ;;  %v12640_v63 = vld [vmem:[%s12943_s18 + $0x2fc] sm:$0xf] }
 0x39f   : > { %v3765_v12 = vmul.f32 %v14497_v58, %v3732_v11  ;;  %v3896_v8 = vpop.permute.xlu0 %3895  ;;  %v5840_v61 = vpop.f32.mrf.mxu3  ;;  %v5207_v26 = vrot.slane %v12638_v4, 7  ;;  %v4860_v11 = vrot.slane %v11400_v16, 7  ;;  %v5210_v56 = vrot.slane %v12640_v63, 7  ;;  %v12641_v16 = vld [vmem:[%s12943_s18 + $0x320] sm:$0xf] }
 0x3a0   : > { %3976 = vst.msk [vmem:[%s13452_s19 + $0x80] sm:$0xff] %vm3959_vm12, %v3896_v8  ;;  %v5773_v34 = vpack.c.b16 %v5751_v35, %v5750_v42 }
 0x3a1   : > { %v3798_v44 = vadd.f32 %v14505_v40, %v3765_v12  ;;  %v11512_v40 = vrot.slane %v12639_v55, 11  ;;  %v5209_v8 = vrot.slane %v5207_v26, 4 }
 0x3a2   : > { %v5014_v0 = vpop.f32.mrf.mxu0 }
 0x3a3   : > { %v5094_v58 = vadd.f32 %v5014_v0, %v14527_v25  ;;  %v3830_v13 = vmax.f32 %v3798_v44, 0.0  ;;  %v10708_v25 = vld [vmem:[%s12943_s18 + $0x2f4] sm:$0xf]  ;;  %v4858_v0 = vsel %vm14172_vm11, %v11512_v40, %v4857_v36  ;;  %v4861_v44 = vsel %vm14172_vm11, %v4859_v32, %v4860_v11  ;;  %v12642_v32 = vld [vmem:[%s12943_s18 + $0x31c] sm:$0xf] }
 0x3a4   : > { %v4585_v28 = vpop.f32.mrf.mxu2  ;;  %v5364_v60 = vpop.f32.mrf.mxu1  ;;  %v4925_v55 = vunpack.c.l.b16 %v4861_v44  ;;  %v5211_v35 = vsel %vm14172_vm11, %v5209_v8, %v5210_v56  ;;  %v11596_v11 = vrot.slane %v12642_v32, 11 }
 0x3a5   : > { %v15187_v41 = vadd.f32 %v4773_v33, %v4585_v28  ;;  %11528 = vmatmul.msk.bf16.gmra.mxu0 %vm658_vm3, %v4946_v54  ;;  %v5444_v24 = vadd.f32 %v5364_v60, %v5094_v58  ;;  %3925 = vrot.lane.b32.xlu0 %v3830_v13, %s12810_s17  ;;  %v11545_v33 = vrot.slane %v10708_v25, 11  ;;  %v17409_v54 = vld [vmem:[#allocation14_spill] sm:$0xff]  ;;  %v5690_v58 = vrot.slane %v12641_v16, 7  ;;  %v10720_v28 = vld [vmem:[%s12943_s18 + $0x324] sm:$0xf]  ;;  %s10529_s17 = scalar_lea.sflag [#allocation3], %s277_s13 }
 0x3a6   : > { %v4924_v60 = vunpack.c.l.b16 %v4858_v0 }
 0x3a7   : > { %11561 = vmatmul.msk.bf16.gmra.mxu1 %vm658_vm3, %v5296_v27  ;;  %v3898_v22 = vpop.permute.xlu1 %3897  ;;  %v5842_v12 = vpop.f32.mrf.mxu3  ;;  %v5208_v42 = vsel %vm14172_vm11, %v11545_v33, %v5207_v26  ;;  %v5692_v25 = vrot.slane %v5690_v58, 4  ;;  %v5275_v33 = vunpack.c.l.b16 %v5211_v35  ;;  %v5691_v8 = vsel %vm14172_vm11, %v11596_v11, %v5690_v58 }
 0x3a8   : > { %11578 = vmatmul.msk.bf16.gmra.mxu2 %vm658_vm3, %v17409_v54  ;;  %3977 = vst.msk [vmem:[%s13452_s19 + $0x88] sm:$0xff] %vm3959_vm12, %v3898_v22  ;;  %v5274_v26 = vunpack.c.l.b16 %v5208_v42  ;;  %v5752_v42 = vunpack.c.l.b16 %v5691_v8 }
 0x3aa   : > { %v5016_v27 = vpop.f32.mrf.mxu0 }
 0x3ab   : > { %v5095_v13 = vadd.f32 %v5016_v27, %v14545_v46  ;;  %v5693_v46 = vrot.slane %v10720_v28, 7 }
 0x3ac   : > { %v5490_v4 = vpop.f32.mrf.mxu2  ;;  %v5366_v40 = vpop.f32.mrf.mxu1  ;;  %11612 = vmatmul.msk.bf16.gmra.mxu3 %vm658_vm3, %v5773_v34  ;;  %v12643_v34 = vld [vmem:[%s12943_s18 + $0x1d0] sm:$0xf] }
 0x3ad   : > { %v5570_v36 = vadd.f32 %v5490_v4, %v5444_v24  ;;  %v5445_v22 = vadd.f32 %v5366_v40, %v5095_v13  ;;  %v4947_v24 = vpack.c.b16 %v4925_v55, %v4924_v60  ;;  %v5694_v56 = vsel %vm14172_vm11, %v5692_v25, %v5693_v46  ;;  %v12645_v40 = vld [vmem:[%s12943_s18 + $0x1cc] sm:$0xf]  ;;  %v10715_v46 = vld [vmem:[%s12943_s18 + $0x310] sm:$0xf] }
 0x3ae   : > { %v4864_v16 = vrot.slane %v12643_v34, 7  ;;  %v5297_v4 = vpack.c.b16 %v5275_v33, %v5274_v26  ;;  %v5753_v35 = vunpack.c.l.b16 %v5694_v56  ;;  %v11513_v32 = vrot.slane %v12645_v40, 11  ;;  %v12646_v56 = vld [vmem:[%s12943_s18 + $0x318] sm:$0xf] }
 0x3af   : > { %v15212_v63 = vadd.f32 %v5840_v61, %v5570_v36  ;;  %v3906_v0 = vpop.permute.xlu2 %3905  ;;  %v5845_v44 = vpop.f32.mrf.mxu3  ;;  %v11406_v61 = vld [vmem:[%s12943_s18 + $0x1d4] sm:$0xf]  ;;  %v11546_v8 = vrot.slane %v10715_v46, 11  ;;  %v5217_v34 = vrot.slane %v12646_v56, 7 }
 0x3b0   : > { %3981 = vst.msk [vmem:[%s13452_s19 + $0xa8] sm:$0xff] %vm3959_vm12, %v3906_v0  ;;  %v12644_v36 = vld [vmem:[%s12943_s18 + $0x314] sm:$0xf]  ;;  %v4866_v11 = vrot.slane %v4864_v16, 4  ;;  %v4867_v25 = vrot.slane %v11406_v61, 7 }
 0x3b1   : > { %v5214_v60 = vrot.slane %v12644_v36, 7  ;;  %v10727_v36 = vld [vmem:[%s12943_s18 + $0x340] sm:$0xf] }
 0x3b2   : > { %v5019_v27 = vpop.f32.mrf.mxu0  ;;  %v4868_v61 = vsel %vm14172_vm11, %v4866_v11, %v4867_v25  ;;  %v12648_v11 = vld [vmem:[%s12943_s18 + $0x338] sm:$0xf] }
 0x3b3   : > { %v5096_v28 = vadd.f32 %v5019_v27, %v14566_v2  ;;  %v5774_v27 = vpack.c.b16 %v5753_v35, %v5752_v42  ;;  %v4927_v46 = vunpack.c.l.b16 %v4868_v61  ;;  %v5215_v42 = vsel %vm14172_vm11, %v11546_v8, %v5214_v60 }
 0x3b4   : > { %v5492_v13 = vpop.f32.mrf.mxu2  ;;  %v5369_v58 = vpop.f32.mrf.mxu1  ;;  %v11597_v25 = vrot.slane %v12648_v11, 11  ;;  %v12650_v11 = vld [vmem:[%s12943_s18 + $0x330] sm:$0xf] }
 0x3b5   : > { %v5571_v55 = vadd.f32 %v5492_v13, %v5445_v22  ;;  %11529 = vmatmul.msk.bf16.gmra.mxu0 %vm658_vm3, %v4947_v24  ;;  %v5446_v0 = vadd.f32 %v5369_v58, %v5096_v28  ;;  %v5216_v22 = vrot.slane %v5214_v60, 4  ;;  %v17410_v24 = vld [vmem:[#allocation15_spill] sm:$0xff]  ;;  %v12647_v28 = vld [vmem:[%s12943_s18 + $0x33c] sm:$0xf]  ;;  %v5276_v60 = vunpack.c.l.b16 %v5215_v42 }
 0x3b6   : > { %v5697_v13 = vrot.slane %v12647_v28, 7 }
 0x3b7   : > { %v15227_v2 = vadd.f32 %v5842_v12, %v5571_v55  ;;  %11562 = vmatmul.msk.bf16.gmra.mxu1 %vm658_vm3, %v5297_v4  ;;  %v3902_v26 = vpop.permute.xlu0 %3901  ;;  %v5847_v33 = vpop.f32.mrf.mxu3  ;;  %v4865_v12 = vsel %vm14172_vm11, %v11513_v32, %v4864_v16  ;;  %v5218_v35 = vsel %vm14172_vm11, %v5216_v22, %v5217_v34 }
 0x3b8   : > { %11579 = vmatmul.msk.bf16.gmra.mxu2 %vm658_vm3, %v17410_v24  ;;  %3979 = vst.msk [vmem:[%s13452_s19 + $0x98] sm:$0xff] %vm3959_vm12, %v3902_v26  ;;  %v4926_v40 = vunpack.c.l.b16 %v4865_v12  ;;  %v5699_v26 = vrot.slane %v5697_v13, 4  ;;  %v5277_v8 = vunpack.c.l.b16 %v5218_v35  ;;  %v5698_v22 = vsel %vm14172_vm11, %v11597_v25, %v5697_v13  ;;  %v12651_v25 = vld [vmem:[%s12943_s18 + $0x1e8] sm:$0xf] }
 0x3b9   : > { %v5754_v35 = vunpack.c.l.b16 %v5698_v22 }
 0x3ba   : > { %v5021_v4 = vpop.f32.mrf.mxu0  ;;  %v5298_v42 = vpack.c.b16 %v5277_v8, %v5276_v60 }
 0x3bb   : > { %v5097_v55 = vadd.f32 %v5021_v4, %v14586_v52  ;;  %v5700_v52 = vrot.slane %v10727_v36, 7 }
 0x3bc   : > { %v5495_v58 = vpop.f32.mrf.mxu2  ;;  %v5371_v32 = vpop.f32.mrf.mxu1  ;;  %11613 = vmatmul.msk.bf16.gmra.mxu3 %vm658_vm3, %v5774_v27  ;;  %v12649_v27 = vld [vmem:[%s12943_s18 + $0x1ec] sm:$0xf] }
 0x3bd   : > { %v5572_v16 = vadd.f32 %v5495_v58, %v5446_v0  ;;  %v5447_v56 = vadd.f32 %v5371_v32, %v5097_v55  ;;  %v4948_v0 = vpack.c.b16 %v4927_v46, %v4926_v40  ;;  %v5701_v34 = vsel %vm14172_vm11, %v5699_v26, %v5700_v52  ;;  %v17411_v55 = vld [vmem:[#allocation22_spill] sm:$0xff] }
 0x3be   : > { %v4871_v4 = vrot.slane %v12649_v27, 7  ;;  %v5755_v32 = vunpack.c.l.b16 %v5701_v34  ;;  %v5221_v40 = vrot.slane %v12650_v11, 7  ;;  %v11514_v26 = vrot.slane %v12651_v25, 11  ;;  %v10722_v27 = vld [vmem:[%s12943_s18 + $0x32c] sm:$0xf] }
 0x3bf   : > { %v15248_v12 = vadd.f32 %v5845_v44, %v5572_v16  ;;  %v3904_v61 = vpop.permute.xlu1 %3903  ;;  %v5850_v28 = vpop.f32.mrf.mxu3  ;;  %v11412_v44 = vld [vmem:[%s12943_s18 + $0x1f0] sm:$0xf]  ;;  %v11547_v22 = vrot.slane %v10722_v27, 11  ;;  %v12652_v34 = vld [vmem:[%s12943_s18 + $0x334] sm:$0xf] }
 0x3c0   : > { %3980 = vst.msk [vmem:[%s13452_s19 + $0xa0] sm:$0xff] %vm3959_vm12, %v3904_v61  ;;  %v4873_v52 = vrot.slane %v4871_v4, 4  ;;  %v4874_v61 = vrot.slane %v11412_v44, 7  ;;  %v5775_v44 = vpack.c.b16 %v5755_v32, %v5754_v35 }
 0x3c1   : > { %v5222_v35 = vsel %vm14172_vm11, %v11547_v22, %v5221_v40 }
 0x3c2   : > { %v5024_v36 = vpop.f32.mrf.mxu0 }
 0x3c3   : > { %v5098_v58 = vadd.f32 %v5024_v36, %v17411_v55  ;;  %v5224_v55 = vrot.slane %v12652_v34, 7 }
 0x3c4   : > { %v5497_v16 = vpop.f32.mrf.mxu2  ;;  %v5374_v13 = vpop.f32.mrf.mxu1 }
 0x3c5   : > { %v5573_v46 = vadd.f32 %v5497_v16, %v5447_v56  ;;  %11530 = vmatmul.msk.bf16.gmra.mxu0 %vm658_vm3, %v4948_v0  ;;  %v5448_v24 = vadd.f32 %v5374_v13, %v5098_v58  ;;  %v5223_v56 = vrot.slane %v5221_v40, 4  ;;  %v17412_v0 = vld [vmem:[#allocation16_spill] sm:$0xff]  ;;  %v4875_v58 = vsel %vm14172_vm11, %v4873_v52, %v4874_v61  ;;  %v12654_v52 = vld [vmem:[%s12943_s18 + $0x354] sm:$0xf] }
 0x3c6   : > { %v12653_v16 = vld [vmem:[%s12943_s18 + $0x358] sm:$0xf]  ;;  %v4929_v34 = vunpack.c.l.b16 %v4875_v58  ;;  %v11598_v61 = vrot.slane %v12654_v52, 11  ;;  %v5278_v40 = vunpack.c.l.b16 %v5222_v35  ;;  %v12656_v52 = vld [vmem:[%s12943_s18 + $0x34c] sm:$0xf] }
 0x3c7   : > { %v15263_v36 = vadd.f32 %v5847_v33, %v5573_v46  ;;  %11563 = vmatmul.msk.bf16.gmra.mxu1 %vm658_vm3, %v5298_v42  ;;  %v3912_v60 = vpop.permute.xlu2 %3911  ;;  %v5852_v8 = vpop.f32.mrf.mxu3  ;;  %v4872_v33 = vsel %vm14172_vm11, %v11514_v26, %v4871_v4  ;;  %v5704_v42 = vrot.slane %v12653_v16, 7  ;;  %v10734_v46 = vld [vmem:[%s12943_s18 + $0x35c] sm:$0xf]  ;;  %v5225_v32 = vsel %vm14172_vm11, %v5223_v56, %v5224_v55 }
 0x3c8   : > { %11580 = vmatmul.msk.bf16.gmra.mxu2 %vm658_vm3, %v17412_v0  ;;  %3984 = vst.msk [vmem:[%s13452_s19 + $0xc0] sm:$0xff] %vm3959_vm12, %v3912_v60  ;;  %v4928_v27 = vunpack.c.l.b16 %v4872_v33  ;;  %v5279_v22 = vunpack.c.l.b16 %v5225_v32 }
 0x3c9   : > { %v5706_v60 = vrot.slane %v5704_v42, 4  ;;  %v5705_v56 = vsel %vm14172_vm11, %v11598_v61, %v5704_v42  ;;  %v12657_v61 = vld [vmem:[%s12943_s18 + $0x204] sm:$0xf] }
 0x3ca   : > { %v5026_v11 = vpop.f32.mrf.mxu0  ;;  %v5299_v35 = vpack.c.b16 %v5279_v22, %v5278_v40  ;;  %v5756_v32 = vunpack.c.l.b16 %v5705_v56 }
 0x3cb   : > { %v5099_v13 = vadd.f32 %v5026_v11, %v14628_v31  ;;  %v5707_v31 = vrot.slane %v10734_v46, 7 }
 0x3cc   : > { %v5500_v25 = vpop.f32.mrf.mxu2  ;;  %v5376_v26 = vpop.f32.mrf.mxu1  ;;  %11614 = vmatmul.msk.bf16.gmra.mxu3 %vm658_vm3, %v5775_v44  ;;  %v12655_v44 = vld [vmem:[%s12943_s18 + $0x208] sm:$0xf] }
 0x3cd   : > { %v5574_v4 = vadd.f32 %v5500_v25, %v5448_v24  ;;  %v5449_v16 = vadd.f32 %v5376_v26, %v5099_v13  ;;  %v4949_v24 = vpack.c.b16 %v4929_v34, %v4928_v27  ;;  %v5708_v55 = vsel %vm14172_vm11, %v5706_v60, %v5707_v31 }
 0x3ce   : > { %v4878_v46 = vrot.slane %v12655_v44, 7  ;;  %v5757_v26 = vunpack.c.l.b16 %v5708_v55  ;;  %v5228_v27 = vrot.slane %v12656_v52, 7  ;;  %v11515_v60 = vrot.slane %v12657_v61, 11  ;;  %v10729_v44 = vld [vmem:[%s12943_s18 + $0x348] sm:$0xf] }
 0x3cf   : > { %v15284_v33 = vadd.f32 %v5850_v28, %v5574_v4  ;;  %v3908_v58 = vpop.permute.xlu0 %3907  ;;  %v5855_v11 = vpop.f32.mrf.mxu3  ;;  %v11418_v28 = vld [vmem:[%s12943_s18 + $0x20c] sm:$0xf]  ;;  %v11548_v56 = vrot.slane %v10729_v44, 11  ;;  %v12658_v55 = vld [vmem:[%s12943_s18 + $0x350] sm:$0xf] }
 0x3d0   : > { %3982 = vst.msk [vmem:[%s13452_s19 + $0xb0] sm:$0xff] %vm3959_vm12, %v3908_v58  ;;  %v4880_v31 = vrot.slane %v4878_v46, 4  ;;  %v4881_v58 = vrot.slane %v11418_v28, 7  ;;  %v5776_v28 = vpack.c.b16 %v5757_v26, %v5756_v32 }
 0x3d1   : > { %v5229_v32 = vsel %vm14172_vm11, %v11548_v56, %v5228_v27 }
 0x3d2   : > { %v5029_v13 = vpop.f32.mrf.mxu0 }
 0x3d3   : > { %v5100_v25 = vadd.f32 %v5029_v13, %v14652_v29  ;;  %v5231_v13 = vrot.slane %v12658_v55, 7 }
 0x3d4   : > { %v5502_v4 = vpop.f32.mrf.mxu2  ;;  %v5379_v42 = vpop.f32.mrf.mxu1 }
 0x3d5   : > { %v5575_v34 = vadd.f32 %v5502_v4, %v5449_v16  ;;  %11531 = vmatmul.msk.bf16.gmra.mxu0 %vm658_vm3, %v4949_v24  ;;  %v5450_v0 = vadd.f32 %v5379_v42, %v5100_v25  ;;  %v5230_v16 = vrot.slane %v5228_v27, 4  ;;  %v17413_v24 = vld [vmem:[#allocation17_spill] sm:$0xff]  ;;  %v4882_v25 = vsel %vm14172_vm11, %v4880_v31, %v4881_v58  ;;  %v12659_v4 = vld [vmem:[%s12943_s18 + $0x374] sm:$0xf]  ;;  %v12660_v31 = vld [vmem:[%s12943_s18 + $0x370] sm:$0xf] }
 0x3d6   : > { %v4931_v55 = vunpack.c.l.b16 %v4882_v25  ;;  %v11599_v58 = vrot.slane %v12660_v31, 11  ;;  %v5280_v27 = vunpack.c.l.b16 %v5229_v32  ;;  %v12662_v31 = vld [vmem:[%s12943_s18 + $0x368] sm:$0xf] }
 0x3d7   : > { %v15299_v29 = vadd.f32 %v5852_v8, %v5575_v34  ;;  %11564 = vmatmul.msk.bf16.gmra.mxu1 %vm658_vm3, %v5299_v35  ;;  %v3910_v40 = vpop.permute.xlu1 %3909  ;;  %v5857_v22 = vpop.f32.mrf.mxu3  ;;  %v4879_v8 = vsel %vm14172_vm11, %v11515_v60, %v4878_v46  ;;  %v5711_v35 = vrot.slane %v12659_v4, 7  ;;  %v10741_v34 = vld [vmem:[%s12943_s18 + $0x378] sm:$0xf]  ;;  %v5232_v26 = vsel %vm14172_vm11, %v5230_v16, %v5231_v13 }
 0x3d8   : > { %11581 = vmatmul.msk.bf16.gmra.mxu2 %vm658_vm3, %v17413_v24  ;;  %3983 = vst.msk [vmem:[%s13452_s19 + $0xb8] sm:$0xff] %vm3959_vm12, %v3910_v40  ;;  %v4930_v44 = vunpack.c.l.b16 %v4879_v8  ;;  %v5281_v56 = vunpack.c.l.b16 %v5232_v26 }
 0x3d9   : > { %v5713_v40 = vrot.slane %v5711_v35, 4  ;;  %v5712_v16 = vsel %vm14172_vm11, %v11599_v58, %v5711_v35  ;;  %v12663_v58 = vld [vmem:[%s12943_s18 + $0x220] sm:$0xf] }
 0x3da   : > { %v5031_v52 = vpop.f32.mrf.mxu0  ;;  %v5300_v32 = vpack.c.b16 %v5281_v56, %v5280_v27  ;;  %v5758_v26 = vunpack.c.l.b16 %v5712_v16 }
 0x3db   : > { %v5101_v42 = vadd.f32 %v5031_v52, %v14668_v47  ;;  %v5714_v47 = vrot.slane %v10741_v34, 7 }
 0x3dc   : > { %v5505_v61 = vpop.f32.mrf.mxu2  ;;  %v5381_v60 = vpop.f32.mrf.mxu1  ;;  %11615 = vmatmul.msk.bf16.gmra.mxu3 %vm658_vm3, %v5776_v28  ;;  %v12661_v28 = vld [vmem:[%s12943_s18 + $0x224] sm:$0xf] }
 0x3dd   : > { %v5576_v46 = vadd.f32 %v5505_v61, %v5450_v0  ;;  %v5451_v4 = vadd.f32 %v5381_v60, %v5101_v42  ;;  %v4950_v0 = vpack.c.b16 %v4931_v55, %v4930_v44  ;;  %v5715_v13 = vsel %vm14172_vm11, %v5713_v40, %v5714_v47 }
 0x3de   : > { %v4885_v34 = vrot.slane %v12661_v28, 7  ;;  %v5759_v60 = vunpack.c.l.b16 %v5715_v13  ;;  %v5235_v44 = vrot.slane %v12662_v31, 7  ;;  %v11516_v40 = vrot.slane %v12663_v58, 11  ;;  %v10736_v28 = vld [vmem:[%s12943_s18 + $0x364] sm:$0xf] }
 0x3df   : > { %v15320_v8 = vadd.f32 %v5855_v11, %v5576_v46  ;;  %v3918_v25 = vpop.permute.xlu2 %3917  ;;  %v5860_v52 = vpop.f32.mrf.mxu3  ;;  %v11424_v11 = vld [vmem:[%s12943_s18 + $0x228] sm:$0xf]  ;;  %v11549_v16 = vrot.slane %v10736_v28, 11  ;;  %v12664_v13 = vld [vmem:[%s12943_s18 + $0x36c] sm:$0xf] }
 0x3e0   : > { %3987 = vst.msk [vmem:[%s13452_s19 + $0xd8] sm:$0xff] %vm3959_vm12, %v3918_v25  ;;  %v4887_v47 = vrot.slane %v4885_v34, 4  ;;  %v4888_v25 = vrot.slane %v11424_v11, 7  ;;  %v5777_v11 = vpack.c.b16 %v5759_v60, %v5758_v26 }
 0x3e1   : > { %v5236_v26 = vsel %vm14172_vm11, %v11549_v16, %v5235_v44 }
 0x3e2   : > { %v5034_v42 = vpop.f32.mrf.mxu0 }
 0x3e3   : > { %v5102_v61 = vadd.f32 %v5034_v42, %v14691_v7  ;;  %v5238_v42 = vrot.slane %v12664_v13, 7 }
 0x3e4   : > { %v5507_v46 = vpop.f32.mrf.mxu2  ;;  %v5384_v35 = vpop.f32.mrf.mxu1 }
 0x3e5   : > { %v5577_v55 = vadd.f32 %v5507_v46, %v5451_v4  ;;  %11532 = vmatmul.msk.bf16.gmra.mxu0 %vm658_vm3, %v4950_v0  ;;  %v5452_v24 = vadd.f32 %v5384_v35, %v5102_v61  ;;  %v5237_v4 = vrot.slane %v5235_v44, 4  ;;  %v17414_v0 = vld [vmem:[#allocation18_spill] sm:$0xff]  ;;  %v4889_v61 = vsel %vm14172_vm11, %v4887_v47, %v4888_v25  ;;  %v12665_v46 = vld [vmem:[%s12943_s18 + $0x390] sm:$0xf] }
 0x3e6   : > { %v4933_v13 = vunpack.c.l.b16 %v4889_v61  ;;  %v12666_v47 = vld [vmem:[%s12943_s18 + $0x38c] sm:$0xf] }
 0x3e7   : > { %v15335_v7 = vadd.f32 %v5857_v22, %v5577_v55  ;;  %11565 = vmatmul.msk.bf16.gmra.mxu1 %vm658_vm3, %v5300_v32  ;;  %v3914_v27 = vpop.permute.xlu0 %3913  ;;  %v5862_v56 = vpop.f32.mrf.mxu3  ;;  %v4886_v22 = vsel %vm14172_vm11, %v11516_v40, %v4885_v34  ;;  %v5718_v32 = vrot.slane %v12665_v46, 7  ;;  %v10748_v55 = vld [vmem:[%s12943_s18 + $0x394] sm:$0xf]  ;;  %v5239_v60 = vsel %vm14172_vm11, %v5237_v4, %v5238_v42 }
 0x3e8   : > { %11582 = vmatmul.msk.bf16.gmra.mxu2 %vm658_vm3, %v17414_v0  ;;  %3985 = vst.msk [vmem:[%s13452_s19 + $0xc8] sm:$0xff] %vm3959_vm12, %v3914_v27  ;;  %v4932_v28 = vunpack.c.l.b16 %v4886_v22  ;;  %v11600_v25 = vrot.slane %v12666_v47, 11  ;;  %v5282_v0 = vunpack.c.l.b16 %v5236_v26  ;;  %v5283_v44 = vunpack.c.l.b16 %v5239_v60  ;;  %v12669_v47 = vld [vmem:[%s12943_s18 + $0x384] sm:$0xf] }
 0x3e9   : > { %v5720_v27 = vrot.slane %v5718_v32, 4 }
 0x3ea   : > { %v5036_v31 = vpop.f32.mrf.mxu0  ;;  %v5719_v16 = vsel %vm14172_vm11, %v11600_v25, %v5718_v32  ;;  %v5301_v26 = vpack.c.b16 %v5283_v44, %v5282_v0  ;;  %v12668_v32 = vld [vmem:[%s12943_s18 + $0x23c] sm:$0xf]  ;;  %v5242_v25 = vrot.slane %v12669_v47, 7 }
 0x3eb   : > { %v5103_v35 = vadd.f32 %v5036_v31, %v14709_v45  ;;  %v5721_v45 = vrot.slane %v10748_v55, 7  ;;  %v5760_v60 = vunpack.c.l.b16 %v5719_v16 }
 0x3ec   : > { %v5510_v58 = vpop.f32.mrf.mxu2  ;;  %v5386_v40 = vpop.f32.mrf.mxu1  ;;  %11616 = vmatmul.msk.bf16.gmra.mxu3 %vm658_vm3, %v5777_v11  ;;  %v12667_v11 = vld [vmem:[%s12943_s18 + $0x240] sm:$0xf] }
 0x3ed   : > { %v5578_v34 = vadd.f32 %v5510_v58, %v5452_v24  ;;  %v5453_v46 = vadd.f32 %v5386_v40, %v5103_v35  ;;  %v4951_v24 = vpack.c.b16 %v4933_v13, %v4932_v28  ;;  %v5722_v4 = vsel %vm14172_vm11, %v5720_v27, %v5721_v45  ;;  %v11430_v35 = vld [vmem:[%s12943_s18 + $0x244] sm:$0xf] }
 0x3ee   : > { %v4892_v55 = vrot.slane %v12667_v11, 7  ;;  %v11517_v13 = vrot.slane %v12668_v32, 11  ;;  %v5244_v11 = vrot.slane %v5242_v25, 4 }
 0x3ef   : > { %v15356_v22 = vadd.f32 %v5860_v52, %v5578_v34  ;;  %v3916_v61 = vpop.permute.xlu1 %3915  ;;  %v5865_v31 = vpop.f32.mrf.mxu3  ;;  %v5761_v34 = vunpack.c.l.b16 %v5722_v4 }
 0x3f0   : > { %3986 = vst.msk [vmem:[%s13452_s19 + $0xd0] sm:$0xff] %vm3959_vm12, %v3916_v61  ;;  %v4894_v45 = vrot.slane %v4892_v55, 4  ;;  %v4895_v61 = vrot.slane %v11430_v35, 7  ;;  %v4893_v16 = vsel %vm14172_vm11, %v11517_v13, %v4892_v55 }
 0x3f1   : > { %v5778_v44 = vpack.c.b16 %v5761_v34, %v5760_v60  ;;  %v10755_v34 = vld [vmem:[%s12943_s18 + $0x3b0] sm:$0xf]  ;;  %v4934_v32 = vunpack.c.l.b16 %v4893_v16 }
 0x3f2   : > { %v5039_v42 = vpop.f32.mrf.mxu0 }
 0x3f3   : > { %v5104_v52 = vadd.f32 %v5039_v42, %v14730_v48  ;;  %v10743_v48 = vld [vmem:[%s12943_s18 + $0x380] sm:$0xf] }
 0x3f4   : > { %v5512_v58 = vpop.f32.mrf.mxu2  ;;  %v5389_v28 = vpop.f32.mrf.mxu1  ;;  %v11550_v4 = vrot.slane %v10743_v48, 11 }
 0x3f5   : > { %v5579_v40 = vadd.f32 %v5512_v58, %v5453_v46  ;;  %11533 = vmatmul.msk.bf16.gmra.mxu0 %vm658_vm3, %v4951_v24  ;;  %v5454_v27 = vadd.f32 %v5389_v28, %v5104_v52  ;;  %v17415_v24 = vld [vmem:[#allocation19_spill] sm:$0xff]  ;;  %v12670_v52 = vld [vmem:[%s12943_s18 + $0x388] sm:$0xf]  ;;  %v4896_v58 = vsel %vm14172_vm11, %v4894_v45, %v4895_v61 }
 0x3f6   : > { %v4935_v55 = vunpack.c.l.b16 %v4896_v58  ;;  %v5243_v13 = vsel %vm14172_vm11, %v11550_v4, %v5242_v25  ;;  %v12672_v61 = vld [vmem:[%s12943_s18 + $0x3a8] sm:$0xf] }
 0x3f7   : > { %v15371_v42 = vadd.f32 %v5862_v56, %v5579_v40  ;;  %11566 = vmatmul.msk.bf16.gmra.mxu1 %vm658_vm3, %v5301_v26  ;;  %v3924_v0 = vpop.permute.xlu2 %3923  ;;  %v15374_v46 = vpop.f32.mrf.mxu3  ;;  %v5245_v56 = vrot.slane %v12670_v52, 7  ;;  %v12671_v26 = vld [vmem:[%s12943_s18 + $0x3ac] sm:$0xf]  ;;  %v11601_v52 = vrot.slane %v12672_v61, 11  ;;  %v5284_v58 = vunpack.c.l.b16 %v5243_v13  ;;  %v10750_v13 = vld [vmem:[%s12943_s18 + $0x39c] sm:$0xf] }
 0x3f8   : > { %11583 = vmatmul.msk.bf16.gmra.mxu2 %vm658_vm3, %v17415_v24  ;;  %3990 = vst.msk [vmem:[%s13452_s19 + $0xf0] sm:$0xff] %vm3959_vm12, %v3924_v0  ;;  %v5725_v40 = vrot.slane %v12671_v26, 7  ;;  %v4952_v25 = vpack.c.b16 %v4935_v55, %v4934_v32  ;;  %v7410_v24 = vld [vmem:[%s12943_s18 + $0x10] sm:$0xf] }
 0x3f9   : > { %v5246_v48 = vsel %vm14172_vm11, %v5244_v11, %v5245_v56 }
 0x3fa   : > { %v5041_v35 = vpop.f32.mrf.mxu0  ;;  %v5285_v26 = vunpack.c.l.b16 %v5246_v48  ;;  %v5726_v11 = vsel %vm14172_vm11, %v11601_v52, %v5725_v40  ;;  %v12674_v48 = vld [vmem:[%s12943_s18 + $0x3a0] sm:$0xf] }
 0x3fb   : > { %v5105_v60 = vadd.f32 %v5041_v35, %v14755_v17  ;;  %v5727_v17 = vrot.slane %v5725_v40, 4  ;;  %v5728_v35 = vrot.slane %v10755_v34, 7  ;;  %v5249_v61 = vrot.slane %v12674_v48, 7  ;;  %v7408_v48 = vld [vmem:[%s12943_s18 + $0x8] sm:$0xf] }
 0x3fc   : > { %v5515_v28 = vpop.f32.mrf.mxu2  ;;  %v5391_v0 = vpop.f32.mrf.mxu1  ;;  %11617 = vmatmul.msk.bf16.gmra.mxu3 %vm658_vm3, %v5778_v44  ;;  %v5762_v40 = vunpack.c.l.b16 %v5726_v11 }
 0x3fd   : > { %v5580_v47 = vadd.f32 %v5515_v28, %v5454_v27  ;;  %v5455_v45 = vadd.f32 %v5391_v0, %v5105_v60  ;;  %v5729_v56 = vsel %vm14172_vm11, %v5727_v17, %v5728_v35  ;;  %v11436_v28 = vld [vmem:[%s12943_s18 + $0x260] sm:$0xf]  ;;  %v5302_v0 = vpack.c.b16 %v5285_v26, %v5284_v58  ;;  %v12675_v17 = vld [vmem:[%s12943_s18 + $0x258] sm:$0xf] }
 0x3fe   : > { %v5763_v52 = vunpack.c.l.b16 %v5729_v56  ;;  %v11518_v35 = vrot.slane %v12675_v17, 11  ;;  %v11551_v58 = vrot.slane %v10750_v13, 11  ;;  %v17416_v56 = vld [vmem:[#allocation20_spill] sm:$0xff] }
 0x3ff   : > { %v15394_v16 = vadd.f32 %v5865_v31, %v5580_v47  ;;  %v3920_v27 = vpop.permute.xlu0 %3919  ;;  %v15396_v44 = vpop.f32.mrf.mxu3  ;;  %v12673_v31 = vld [vmem:[%s12943_s18 + $0x25c] sm:$0xf] }
 0x400   : > { %3988 = vst.msk [vmem:[%s13452_s19 + $0xe0] sm:$0xff] %vm3959_vm12, %v3920_v27  ;;  %v4899_v60 = vrot.slane %v12673_v31, 7  ;;  %v7409_v27 = vld [vmem:[%s12943_s18 + $0xc] sm:$0xf] }
 0x402   : > { %v5044_v4 = vpop.f32.mrf.mxu0 }
 0x403   : > { %v5106_v34 = vadd.f32 %v5044_v4, %v14789_v3  ;;  %v4901_v3 = vrot.slane %v4899_v60, 4  ;;  %v4902_v4 = vrot.slane %v11436_v28, 7  ;;  %v4900_v28 = vsel %vm14172_vm11, %v11518_v35, %v4899_v60  ;;  %v12042_v60 = vld [vmem:[%s17335_s3 + $0x2c] sm:$0x3] }
 0x404   : > { %v5517_v47 = vpop.f32.mrf.mxu2  ;;  %v5394_v55 = vpop.f32.mrf.mxu1  ;;  %v8681_v35 = vsel %vm707_vm0, %v12042_v60, 0  ;;  %v11622_v60 = vld [vmem:[%s12943_s18 + $0x354] sm:$0xf] }
 0x405   : > { %v5581_v32 = vadd.f32 %v5517_v47, %v5455_v45  ;;  %11534 = vmatmul.msk.bf16.gmra.mxu0 %vm658_vm3, %v4952_v25  ;;  %v5456_v31 = vadd.f32 %v5394_v55, %v5106_v34  ;;  %v5251_v47 = vrot.slane %v5249_v61, 4  ;;  %v7570_v25 = vrot.slane %v7409_v27, 5  ;;  %v11961_v55 = vld [vmem:[%s17335_s3 + $0x2a] sm:$0x3]  ;;  %8690 = vmatpush.bf16.msrb.mxu3 %v8681_v35 }
 0x406   : > { %v5779_v34 = vpack.c.b16 %v5763_v52, %v5762_v40  ;;  %v4903_v17 = vsel %vm14172_vm11, %v4901_v3, %v4902_v4  ;;  %v8555_v27 = vsel %vm707_vm0, %v11961_v55, 0  ;;  %v7573_v3 = vrot.slane %v7410_v24, 5 }
 0x407   : > { %11567 = vmatmul.msk.bf16.gmra.mxu1 %vm658_vm3, %v5302_v0  ;;  %v3922_v26 = vpop.permute.xlu1 %3921  ;;  %v15413_v45 = vpop.f32.mrf.mxu3  ;;  %v15418_v11 = vadd.f32 %v15374_v46, %v5581_v32  ;;  %v12676_v0 = vld [vmem:[%s12943_s18 + $0x3a4] sm:$0xf]  ;;  %8564 = vmatpush.bf16.msrb.mxu2 %v8555_v27  ;;  %v7572_v54 = vrot.slane %v7570_v25, 4 }
 0x408   : > { %11584 = vmatmul.msk.bf16.gmra.mxu2 %vm658_vm3, %v17416_v56  ;;  %3989 = vst.msk [vmem:[%s13452_s19 + $0xe8] sm:$0xff] %vm3959_vm12, %v3922_v26  ;;  %v5252_v13 = vrot.slane %v12676_v0, 7  ;;  %v11814_v46 = vld [vmem:[%s17335_s3 + $0x24] sm:$0x3]  ;;  %v4936_v0 = vunpack.c.l.b16 %v4900_v28  ;;  %v11815_v56 = vrot.slane %v7408_v48, 9 }
 0x409   : > { %v7999_v40 = vsel %vm707_vm0, %v11814_v46, 0  ;;  %v4937_v46 = vunpack.c.l.b16 %v4903_v17  ;;  %v11944_v48 = vld [vmem:[%s17335_s3 + $0x28] sm:$0x3] }
 0x40a   : > { %v5046_v32 = vpop.f32.mrf.mxu0  ;;  %8008 = vmatpush.bf16.msrb.mxu0 %v7999_v40  ;;  %v8333_v28 = vsel %vm707_vm0, %v11944_v48, 0 }
 0x40b   : > { %v5107_v52 = vadd.f32 %v5046_v32, %v14812_v39  ;;  %v5250_v39 = vsel %vm14172_vm11, %v11551_v58, %v5249_v61  ;;  %v5253_v32 = vsel %vm14172_vm11, %v5251_v47, %v5252_v13  ;;  %8342 = vmatpush.bf16.msrb.mxu1 %v8333_v28  ;;  %v7571_v47 = vsel %vm12946_vm4, %v11815_v56, %v7570_v25 }
 0x40c   : > { %v5520_v26 = vpop.f32.mrf.mxu2  ;;  %v5396_v55 = vpop.f32.mrf.mxu1  ;;  %11618 = vmatmul.msk.bf16.gmra.mxu3 %vm658_vm3, %v5779_v34  ;;  %v5286_v61 = vunpack.c.l.b16 %v5250_v39  ;;  %v5287_v58 = vunpack.c.l.b16 %v5253_v32  ;;  %v7574_v13 = vsel %vm12946_vm4, %v7572_v54, %v7573_v3  ;;  %v4953_v27 = vpack.c.b16 %v4937_v46, %v4936_v0 }
 0x40d   : > { %v5582_v4 = vadd.f32 %v5520_v26, %v5456_v31  ;;  %v5457_v24 = vadd.f32 %v5396_v55, %v5107_v52  ;;  %v11620_v31 = vld [vmem:[%s12943_s18 + $0x34c] sm:$0xf]  ;;  %v11623_v52 = vld [vmem:[%s12943_s18 + $0x358] sm:$0xf]  ;;  %v11619_v26 = vld [vmem:[%s12943_s18 + $0x348] sm:$0xf]  ;;  %v7683_v39 = vunpack.c.l.b16 %v7574_v13 }
 0x40e   : > { %v6099_v40 = vrot.slane %v11620_v31, 7  ;;  %v11621_v55 = vld [vmem:[%s12943_s18 + $0x350] sm:$0xf]  ;;  %v5303_v48 = vpack.c.b16 %v5287_v58, %v5286_v61  ;;  %v6465_v28 = vrot.slane %v11622_v60, 5  ;;  %v6815_v25 = vrot.slane %v11623_v52, 7 }
 0x40f   : > { %v15453_v34 = vadd.f32 %v15396_v44, %v5582_v4  ;;  %v15455_v17 = vpop.f32.mrf.mxu3  ;;  %v7682_v4 = vunpack.c.l.b16 %v7571_v47  ;;  %v11715_v54 = vrot.slane %v11619_v26, 11  ;;  %v6102_v3 = vrot.slane %v11621_v55, 7  ;;  %v11624_v31 = vld [vmem:[%s12943_s18 + $0x35c] sm:$0xf] }
 0x410   : > { %v6101_v0 = vrot.slane %v6099_v40, 4  ;;  %v11748_v51 = vrot.slane %v11621_v55, 9  ;;  %v6468_v58 = vrot.slane %v11623_v52, 5  ;;  %v11781_v13 = vrot.slane %v11622_v60, 11  ;;  %v7415_v52 = vld [vmem:[%s12943_s18 + $0x24] sm:$0xf] }
 0x411   : > { %v7714_v50 = vpack.c.b16 %v7683_v39, %v7682_v4  ;;  %v6817_v55 = vrot.slane %v6815_v25, 4 }
 0x412   : > { %v5049_v35 = vpop.f32.mrf.mxu0  ;;  %v6103_v26 = vsel %vm14172_vm11, %v6101_v0, %v6102_v3 }
 0x413   : > { %v5108_v44 = vadd.f32 %v5049_v35, %v14832_v21  ;;  %v7416_v21 = vld [vmem:[%s12943_s18 + $0x28] sm:$0xf]  ;;  %v17418_v35 = vld [vmem:[#allocation21_spill] sm:$0xff] }
 0x414   : > { %v5522_v32 = vpop.f32.mrf.mxu2  ;;  %v5399_v62 = vpop.f32.mrf.mxu1  ;;  %v7577_v39 = vrot.slane %v7416_v21, 5 }
 0x415   : > { %v5583_v56 = vadd.f32 %v5522_v32, %v5457_v24  ;;  %11535 = vmatmul.msk.bf16.gmra.mxu0 %vm658_vm3, %v4953_v27  ;;  %v5458_v46 = vadd.f32 %v5399_v62, %v5108_v44  ;;  %v6467_v24 = vrot.slane %v6465_v28, 4  ;;  %v6100_v62 = vsel %vm14172_vm11, %v11715_v54, %v6099_v40 }
 0x416   : > { %v6818_v44 = vrot.slane %v11624_v31, 7  ;;  %v11816_v31 = vrot.slane %v7415_v52, 9  ;;  %v7579_v21 = vrot.slane %v7577_v39, 4 }
 0x417   : > { %11568 = vmatmul.msk.bf16.gmra.mxu1 %vm658_vm3, %v5303_v48  ;;  %v3926_v47 = vpop.permute.xlu0 %3925  ;;  %v15470_v61 = vpop.f32.mrf.mxu3  ;;  %v15473_v27 = vadd.f32 %v15413_v45, %v5583_v56  ;;  %v7417_v45 = vld [vmem:[%s12943_s18 + $0x2c] sm:$0xf]  ;;  %v6211_v48 = vunpack.c.l.b16 %v6100_v62  ;;  %v6212_v56 = vunpack.c.l.b16 %v6103_v26  ;;  %v6469_v54 = vsel %vm12946_vm4, %v6467_v24, %v6468_v58 }
 0x418   : > { %11585 = vmatmul.msk.bf16.gmra.mxu2 %vm658_vm3, %v17418_v35  ;;  %3991 = vst.msk [vmem:[%s13452_s19 + $0xf8] sm:$0xff] %vm3959_vm12, %v3926_v47  ;;  %v6466_v47 = vsel %vm12946_vm4, %v11748_v51, %v6465_v28  ;;  %v6819_v0 = vsel %vm14172_vm11, %v6817_v55, %v6818_v44  ;;  %v7580_v51 = vrot.slane %v7417_v45, 5  ;;  %v11626_v28 = vld [vmem:[%s12943_s18 + $0x368] sm:$0xf]  ;;  %v6578_v58 = vunpack.c.l.b16 %v6469_v54  ;;  %v11627_v45 = vld [vmem:[%s12943_s18 + $0x36c] sm:$0xf] }
 0x419   : > { %17417 = vst [vmem:[#allocation23_spill] sm:$0xff] %v15473_v27  ;;  %v6577_v24 = vunpack.c.l.b16 %v6466_v47  ;;  %v6928_v26 = vunpack.c.l.b16 %v6819_v0  ;;  %v7578_v44 = vsel %vm12946_vm4, %v11816_v31, %v7577_v39  ;;  %v6106_v52 = vrot.slane %v11626_v28, 7 }
 0x41a   : > { %v5051_v4 = vpop.f32.mrf.mxu0  ;;  %v7684_v39 = vunpack.c.l.b16 %v7578_v44  ;;  %v6109_v23 = vrot.slane %v11627_v45, 7 }
 0x41b   : > { %v5109_v60 = vadd.f32 %v5051_v4, %v14851_v59  ;;  %v6816_v59 = vsel %vm14172_vm11, %v11781_v13, %v6815_v25  ;;  %v11628_v25 = vld [vmem:[%s12943_s18 + $0x370] sm:$0xf]  ;;  %v6243_v13 = vpack.c.b16 %v6212_v56, %v6211_v48  ;;  %v11625_v4 = vld [vmem:[%s12943_s18 + $0x364] sm:$0xf]  ;;  %v6108_v28 = vrot.slane %v6106_v52, 4 }
 0x41c   : > { %v5525_v32 = vpop.f32.mrf.mxu2  ;;  %v5401_v40 = vpop.f32.mrf.mxu1  ;;  %11832 = vmatmul.msk.bf16.vlgmr.msra.gmra.mxu3 %vm658_vm3, %v7714_v50  ;;  %v6927_v62 = vunpack.c.l.b16 %v6816_v59  ;;  %v11716_v48 = vrot.slane %v11625_v4, 11 }
 0x41d   : > { %v5584_v35 = vadd.f32 %v5525_v32, %v5458_v46  ;;  %v5459_v3 = vadd.f32 %v5401_v40, %v5109_v60  ;;  %v7581_v60 = vsel %vm12946_vm4, %v7579_v21, %v7580_v51  ;;  %v6472_v32 = vrot.slane %v11628_v25, 5  ;;  %v7423_v21 = vld [vmem:[%s12943_s18 + $0x44] sm:$0xf] }
 0x41e   : > { %v6609_v40 = vpack.c.b16 %v6578_v58, %v6577_v24  ;;  %v6959_v54 = vpack.c.b16 %v6928_v26, %v6927_v62  ;;  %v7685_v0 = vunpack.c.l.b16 %v7581_v60  ;;  %v11782_v58 = vrot.slane %v11628_v25, 11  ;;  %v7422_v60 = vld [vmem:[%s12943_s18 + $0x40] sm:$0xf] }
 0x41f   : > { %v15497_v46 = vadd.f32 %v15455_v17, %v5584_v35  ;;  %v15499_v50 = vpop.f32.mrf.mxu3  ;;  %v11629_v17 = vld [vmem:[%s12943_s18 + $0x374] sm:$0xf]  ;;  %v7584_v62 = vrot.slane %v7423_v21, 5 }
 0x420   : > { %v6822_v31 = vrot.slane %v11629_v17, 7  ;;  %v6475_v27 = vrot.slane %v11629_v17, 5 }
 0x421   : > { %17419 = vst [vmem:[#allocation22_spill] sm:$0xff] %v15497_v46  ;;  %v6474_v46 = vrot.slane %v6472_v32, 4 }
 0x422   : > { %v5054_v55 = vpop.f32.mrf.mxu0  ;;  %v6824_v4 = vrot.slane %v6822_v31, 4 }
 0x423   : > { %v5110_v35 = vadd.f32 %v5054_v55, %v14876_v10  ;;  %v11630_v10 = vld [vmem:[%s12943_s18 + $0x378] sm:$0xf]  ;;  %v11749_v55 = vrot.slane %v11627_v45, 9  ;;  %v6110_v45 = vsel %vm14172_vm11, %v6108_v28, %v6109_v23 }
 0x424   : > { %v5527_v47 = vpop.f32.mrf.mxu2  ;;  %v5404_v59 = vpop.f32.mrf.mxu1  ;;  %v6825_v44 = vrot.slane %v11630_v10, 7  ;;  %v6214_v23 = vunpack.c.l.b16 %v6110_v45 }
 0x425   : > { %v5585_v56 = vadd.f32 %v5527_v47, %v5459_v3  ;;  %11732 = vmatmul.msk.bf16.vlgmr.msra.gmra.mxu0 %vm658_vm3, %v6243_v13  ;;  %v5460_v51 = vadd.f32 %v5404_v59, %v5110_v35  ;;  %v6107_v3 = vsel %vm14172_vm11, %v11716_v48, %v6106_v52  ;;  %v7715_v13 = vpack.c.b16 %v7685_v0, %v7684_v39  ;;  %v7424_v35 = vld [vmem:[%s12943_s18 + $0x48] sm:$0xf] }
 0x426   : > { %v6213_v52 = vunpack.c.l.b16 %v6107_v3  ;;  %v6473_v25 = vsel %vm12946_vm4, %v11749_v55, %v6472_v32  ;;  %v7586_v48 = vrot.slane %v7584_v62, 4  ;;  %v6826_v32 = vsel %vm14172_vm11, %v6824_v4, %v6825_v44  ;;  %v11634_v4 = vld [vmem:[%s12943_s18 + $0x38c] sm:$0xf]  ;;  %v11635_v44 = vld [vmem:[%s12943_s18 + $0x390] sm:$0xf] }
 0x427   : > { %11765 = vmatmul.msk.bf16.vlgmr.msra.gmra.mxu1 %vm658_vm3, %v6609_v40  ;;  %v15514_v24 = vpop.f32.mrf.mxu3  ;;  %v15519_v26 = vadd.f32 %v15470_v61, %v5585_v56  ;;  %v6476_v40 = vsel %vm12946_vm4, %v6474_v46, %v6475_v27  ;;  %v7587_v56 = vrot.slane %v7424_v35, 5  ;;  %v11632_v27 = vld [vmem:[%s12943_s18 + $0x384] sm:$0xf]  ;;  %v6579_v46 = vunpack.c.l.b16 %v6473_v25  ;;  %v11631_v35 = vld [vmem:[%s12943_s18 + $0x380] sm:$0xf] }
 0x428   : > { %11798 = vmatmul.msk.bf16.vlgmr.msra.gmra.mxu2 %vm658_vm3, %v6959_v54  ;;  %v11817_v54 = vrot.slane %v7422_v60, 9  ;;  %v6580_v21 = vunpack.c.l.b16 %v6476_v40  ;;  %v6930_v55 = vunpack.c.l.b16 %v6826_v32 }
 0x42a   : > { %v5056_v17 = vpop.f32.mrf.mxu0  ;;  %v7585_v3 = vsel %vm12946_vm4, %v11817_v54, %v7584_v62  ;;  %v6479_v62 = vrot.slane %v11634_v4, 5  ;;  %v6829_v54 = vrot.slane %v11635_v44, 7 }
 0x42b   : > { %v5111_v47 = vadd.f32 %v5056_v17, %v14895_v14  ;;  %v6823_v14 = vsel %vm14172_vm11, %v11782_v58, %v6822_v31  ;;  %v7588_v31 = vsel %vm12946_vm4, %v7586_v48, %v7587_v56  ;;  %v6244_v58 = vpack.c.b16 %v6214_v23, %v6213_v52  ;;  %v11633_v17 = vld [vmem:[%s12943_s18 + $0x388] sm:$0xf] }
 0x42c   : > { %v5530_v61 = vpop.f32.mrf.mxu2  ;;  %v5406_v39 = vpop.f32.mrf.mxu1  ;;  %11833 = vmatmul.msk.bf16.gmra.mxu3 %vm658_vm3, %v7715_v13  ;;  %v6929_v10 = vunpack.c.l.b16 %v6823_v14  ;;  %v6113_v13 = vrot.slane %v11632_v27, 7  ;;  %v7686_v45 = vunpack.c.l.b16 %v7585_v3  ;;  %v11717_v52 = vrot.slane %v11631_v35, 11  ;;  %v11636_v14 = vld [vmem:[%s12943_s18 + $0x394] sm:$0xf] }
 0x42d   : > { %v5586_v59 = vadd.f32 %v5530_v61, %v5460_v51  ;;  %v5461_v0 = vadd.f32 %v5406_v39, %v5111_v47  ;;  %v7687_v47 = vunpack.c.l.b16 %v7588_v31  ;;  %v6610_v61 = vpack.c.b16 %v6580_v21, %v6579_v46 }
 0x42e   : > { %v6960_v40 = vpack.c.b16 %v6930_v55, %v6929_v10  ;;  %v6115_v56 = vrot.slane %v6113_v13, 4  ;;  %v6116_v39 = vrot.slane %v11633_v17, 7  ;;  %v11750_v27 = vrot.slane %v11633_v17, 9 }
 0x42f   : > { %v15538_v51 = vadd.f32 %v15499_v50, %v5586_v59  ;;  %v5885_v28 = vpop.f32.mrf.mxu3  ;;  %v7716_v32 = vpack.c.b16 %v7687_v47, %v7686_v45  ;;  %v6481_v21 = vrot.slane %v6479_v62, 4  ;;  %v6482_v10 = vrot.slane %v11635_v44, 5  ;;  %v7429_v45 = vld [vmem:[%s12943_s18 + $0x5c] sm:$0xf] }
 0x430   : > { %v6114_v3 = vsel %vm14172_vm11, %v11717_v52, %v6113_v13  ;;  %v6117_v31 = vsel %vm14172_vm11, %v6115_v56, %v6116_v39  ;;  %v11818_v52 = vrot.slane %v7429_v45, 9  ;;  %v11638_v39 = vld [vmem:[%s12943_s18 + $0x3a0] sm:$0xf] }
 0x431   : > { %v6216_v47 = vunpack.c.l.b16 %v6117_v31 }
 0x432   : > { %v5059_v60 = vpop.f32.mrf.mxu0 }
 0x433   : > { %v5112_v50 = vadd.f32 %v5059_v60, %v14918_v43  ;;  %v7430_v43 = vld [vmem:[%s12943_s18 + $0x60] sm:$0xf]  ;;  %v6832_v60 = vrot.slane %v11636_v14, 7 }
 0x434   : > { %v5532_v25 = vpop.f32.mrf.mxu2  ;;  %v5409_v48 = vpop.f32.mrf.mxu1  ;;  %v7591_v17 = vrot.slane %v7430_v43, 5 }
 0x435   : > { %v5587_v59 = vadd.f32 %v5532_v25, %v5461_v0  ;;  %11733 = vmatmul.msk.bf16.gmra.mxu0 %vm658_vm3, %v6244_v58  ;;  %v5462_v23 = vadd.f32 %v5409_v48, %v5112_v50  ;;  %v11783_v0 = vrot.slane %v11634_v4, 11  ;;  %v6831_v58 = vrot.slane %v6829_v54, 4  ;;  %v7431_v4 = vld [vmem:[%s12943_s18 + $0x64] sm:$0xf] }
 0x436   : > { %v6480_v25 = vsel %vm12946_vm4, %v11750_v27, %v6479_v62  ;;  %v7593_v56 = vrot.slane %v7591_v17, 4  ;;  %v7594_v62 = vrot.slane %v7431_v4, 5  ;;  %v7592_v31 = vsel %vm12946_vm4, %v11818_v52, %v7591_v17 }
 0x437   : > { %11766 = vmatmul.msk.bf16.gmra.mxu1 %vm658_vm3, %v6610_v61  ;;  %v15553_v46 = vpop.f32.mrf.mxu3  ;;  %v15556_v55 = vadd.f32 %v15514_v24, %v5587_v59  ;;  %v6215_v24 = vunpack.c.l.b16 %v6114_v3  ;;  %v6833_v59 = vsel %vm14172_vm11, %v6831_v58, %v6832_v60  ;;  %v6120_v60 = vrot.slane %v11638_v39, 7 }
 0x438   : > { %11799 = vmatmul.msk.bf16.gmra.mxu2 %vm658_vm3, %v6960_v40  ;;  %v6483_v40 = vsel %vm12946_vm4, %v6481_v21, %v6482_v10  ;;  %v6932_v21 = vunpack.c.l.b16 %v6833_v59  ;;  %v11640_v10 = vld [vmem:[%s12943_s18 + $0x3a8] sm:$0xf]  ;;  %v7595_v58 = vsel %vm12946_vm4, %v7593_v56, %v7594_v62  ;;  %v7688_v17 = vunpack.c.l.b16 %v7592_v31 }
 0x439   : > { %v6582_v27 = vunpack.c.l.b16 %v6483_v40  ;;  %v6486_v45 = vrot.slane %v11640_v10, 5  ;;  %v6122_v52 = vrot.slane %v6120_v60, 4 }
 0x43a   : > { %v5061_v35 = vpop.f32.mrf.mxu0 }
 0x43b   : > { %v5113_v50 = vadd.f32 %v5061_v35, %v14934_v30  ;;  %v6830_v30 = vsel %vm14172_vm11, %v11783_v0, %v6829_v54  ;;  %v6245_v54 = vpack.c.b16 %v6216_v47, %v6215_v24  ;;  %v11637_v0 = vld [vmem:[%s12943_s18 + $0x39c] sm:$0xf]  ;;  %v6488_v39 = vrot.slane %v6486_v45, 4 }
 0x43c   : > { %v5535_v44 = vpop.f32.mrf.mxu2  ;;  %v5411_v13 = vpop.f32.mrf.mxu1  ;;  %11834 = vmatmul.msk.bf16.gmra.mxu3 %vm658_vm3, %v7716_v32  ;;  %v6581_v32 = vunpack.c.l.b16 %v6480_v25  ;;  %v6931_v43 = vunpack.c.l.b16 %v6830_v30  ;;  %v11718_v24 = vrot.slane %v11637_v0, 11  ;;  %v7437_v30 = vld [vmem:[%s12943_s18 + $0x7c] sm:$0xf] }
 0x43d   : > { %v5588_v61 = vadd.f32 %v5535_v44, %v5462_v23  ;;  %v5463_v48 = vadd.f32 %v5411_v13, %v5113_v50  ;;  %v11639_v50 = vld [vmem:[%s12943_s18 + $0x3a4] sm:$0xf]  ;;  %v7689_v13 = vunpack.c.l.b16 %v7595_v58  ;;  %v7436_v58 = vld [vmem:[%s12943_s18 + $0x78] sm:$0xf] }
 0x43e   : > { %v6611_v44 = vpack.c.b16 %v6582_v27, %v6581_v32  ;;  %v6961_v25 = vpack.c.b16 %v6932_v21, %v6931_v43  ;;  %v6123_v56 = vrot.slane %v11639_v50, 7  ;;  %v11751_v62 = vrot.slane %v11639_v50, 9 }
 0x43f   : > { %v15576_v23 = vadd.f32 %v5885_v28, %v5588_v61  ;;  %v15578_v14 = vpop.f32.mrf.mxu3  ;;  %v11641_v28 = vld [vmem:[%s12943_s18 + $0x3ac] sm:$0xf]  ;;  %v11784_v27 = vrot.slane %v11640_v10, 11  ;;  %v7598_v43 = vrot.slane %v7437_v30, 5 }
 0x440   : > { %v6836_v40 = vrot.slane %v11641_v28, 7  ;;  %v6124_v50 = vsel %vm14172_vm11, %v6122_v52, %v6123_v56  ;;  %v6487_v10 = vsel %vm12946_vm4, %v11751_v62, %v6486_v45  ;;  %v11644_v52 = vld [vmem:[%s12943_s18 + $0x3bc] sm:$0xf] }
 0x441   : > { %v6583_v56 = vunpack.c.l.b16 %v6487_v10 }
 0x442   : > { %v5064_v3 = vpop.f32.mrf.mxu0  ;;  %v6838_v0 = vrot.slane %v6836_v40, 4 }
 0x443   : > { %v5114_v35 = vadd.f32 %v5064_v3, %v14956_v38  ;;  %v11642_v38 = vld [vmem:[%s12943_s18 + $0x3b0] sm:$0xf]  ;;  %v6489_v3 = vrot.slane %v11641_v28, 5 }
 0x444   : > { %v5537_v4 = vpop.f32.mrf.mxu2  ;;  %v5414_v61 = vpop.f32.mrf.mxu1  ;;  %v6839_v31 = vrot.slane %v11642_v38, 7 }
 0x445   : > { %v5589_v47 = vadd.f32 %v5537_v4, %v5463_v48  ;;  %11734 = vmatmul.msk.bf16.gmra.mxu0 %vm658_vm3, %v6245_v54  ;;  %v5464_v59 = vadd.f32 %v5414_v61, %v5114_v35  ;;  %v6121_v48 = vsel %vm14172_vm11, %v11718_v24, %v6120_v60  ;;  %v7717_v54 = vpack.c.b16 %v7689_v13, %v7688_v17  ;;  %v7438_v35 = vld [vmem:[%s12943_s18 + $0x80] sm:$0xf] }
 0x446   : > { %v6217_v60 = vunpack.c.l.b16 %v6121_v48  ;;  %v7600_v24 = vrot.slane %v7598_v43, 4  ;;  %v6218_v13 = vunpack.c.l.b16 %v6124_v50  ;;  %v6840_v45 = vsel %vm14172_vm11, %v6838_v0, %v6839_v31  ;;  %v11646_v0 = vld [vmem:[%s12943_s18 + $0x3c4] sm:$0xf]  ;;  %v11647_v31 = vld [vmem:[%s12943_s18 + $0x3c8] sm:$0xf] }
 0x447   : > { %11767 = vmatmul.msk.bf16.gmra.mxu1 %vm658_vm3, %v6611_v44  ;;  %v15593_v32 = vpop.f32.mrf.mxu3  ;;  %v15598_v21 = vadd.f32 %v15553_v46, %v5589_v47  ;;  %v6490_v44 = vsel %vm12946_vm4, %v6488_v39, %v6489_v3  ;;  %v7601_v47 = vrot.slane %v7438_v35, 5  ;;  %v6934_v3 = vunpack.c.l.b16 %v6840_v45  ;;  %v11643_v35 = vld [vmem:[%s12943_s18 + $0x3b8] sm:$0xf] }
 0x448   : > { %11800 = vmatmul.msk.bf16.gmra.mxu2 %vm658_vm3, %v6961_v25  ;;  %v11819_v25 = vrot.slane %v7436_v58, 9  ;;  %v6584_v38 = vunpack.c.l.b16 %v6490_v44 }
 0x44a   : > { %v5066_v28 = vpop.f32.mrf.mxu0  ;;  %v7599_v48 = vsel %vm12946_vm4, %v11819_v25, %v7598_v43  ;;  %v6493_v43 = vrot.slane %v11646_v0, 5  ;;  %v6843_v25 = vrot.slane %v11647_v31, 7 }
 0x44b   : > { %v5115_v4 = vadd.f32 %v5066_v28, %v14977_v18  ;;  %v6837_v18 = vsel %vm14172_vm11, %v11784_v27, %v6836_v40  ;;  %v7602_v40 = vsel %vm12946_vm4, %v7600_v24, %v7601_v47  ;;  %v6246_v27 = vpack.c.b16 %v6218_v13, %v6217_v60  ;;  %v11645_v28 = vld [vmem:[%s12943_s18 + $0x3c0] sm:$0xf] }
 0x44c   : > { %v5540_v46 = vpop.f32.mrf.mxu2  ;;  %v5416_v17 = vpop.f32.mrf.mxu1  ;;  %11835 = vmatmul.msk.bf16.gmra.mxu3 %vm658_vm3, %v7717_v54  ;;  %v6933_v39 = vunpack.c.l.b16 %v6837_v18  ;;  %v6127_v54 = vrot.slane %v11644_v52, 7  ;;  %v7690_v50 = vunpack.c.l.b16 %v7599_v48  ;;  %v11719_v60 = vrot.slane %v11643_v35, 11  ;;  %v11648_v18 = vld [vmem:[%s12943_s18 + $0x3cc] sm:$0xf] }
 0x44d   : > { %v5590_v61 = vadd.f32 %v5540_v46, %v5464_v59  ;;  %v5465_v30 = vadd.f32 %v5416_v17, %v5115_v4  ;;  %v7691_v4 = vunpack.c.l.b16 %v7602_v40  ;;  %v6612_v46 = vpack.c.b16 %v6584_v38, %v6583_v56 }
 0x44e   : > { %v6962_v44 = vpack.c.b16 %v6934_v3, %v6933_v39  ;;  %v6129_v47 = vrot.slane %v6127_v54, 4  ;;  %v6130_v17 = vrot.slane %v11645_v28, 7  ;;  %v11752_v52 = vrot.slane %v11645_v28, 9 }
 0x44f   : > { %v15617_v59 = vadd.f32 %v15578_v14, %v5590_v61  ;;  %v5895_v62 = vpop.f32.mrf.mxu3  ;;  %v7718_v45 = vpack.c.b16 %v7691_v4, %v7690_v50  ;;  %v6495_v38 = vrot.slane %v6493_v43, 4  ;;  %v6496_v39 = vrot.slane %v11647_v31, 5  ;;  %v7443_v50 = vld [vmem:[%s12943_s18 + $0x94] sm:$0xf] }
 0x450   : > { %v6128_v48 = vsel %vm14172_vm11, %v11719_v60, %v6127_v54  ;;  %v6131_v40 = vsel %vm14172_vm11, %v6129_v47, %v6130_v17  ;;  %v11820_v60 = vrot.slane %v7443_v50, 9  ;;  %v11650_v17 = vld [vmem:[%s12943_s18 + $0x3d8] sm:$0xf] }
 0x451   : > { %v6220_v4 = vunpack.c.l.b16 %v6131_v40 }
 0x452   : > { %v5069_v58 = vpop.f32.mrf.mxu0 }
 0x453   : > { %v5116_v14 = vadd.f32 %v5069_v58, %v15002_v20  ;;  %v7444_v20 = vld [vmem:[%s12943_s18 + $0x98] sm:$0xf]  ;;  %v6846_v58 = vrot.slane %v11648_v18, 7 }
 0x454   : > { %v5542_v10 = vpop.f32.mrf.mxu2  ;;  %v5419_v24 = vpop.f32.mrf.mxu1  ;;  %v7605_v28 = vrot.slane %v7444_v20, 5 }
 0x455   : > { %v5591_v61 = vadd.f32 %v5542_v10, %v5465_v30  ;;  %11735 = vmatmul.msk.bf16.gmra.mxu0 %vm658_vm3, %v6246_v27  ;;  %v5466_v13 = vadd.f32 %v5419_v24, %v5116_v14  ;;  %v11785_v30 = vrot.slane %v11646_v0, 11  ;;  %v6845_v27 = vrot.slane %v6843_v25, 4  ;;  %v7445_v0 = vld [vmem:[%s12943_s18 + $0x9c] sm:$0xf] }
 0x456   : > { %v6494_v10 = vsel %vm12946_vm4, %v11752_v52, %v6493_v43  ;;  %v7607_v47 = vrot.slane %v7605_v28, 4  ;;  %v7608_v43 = vrot.slane %v7445_v0, 5  ;;  %v7606_v40 = vsel %vm12946_vm4, %v11820_v60, %v7605_v28 }
 0x457   : > { %11768 = vmatmul.msk.bf16.gmra.mxu1 %vm658_vm3, %v6612_v46  ;;  %v15632_v56 = vpop.f32.mrf.mxu3  ;;  %v15635_v3 = vadd.f32 %v15593_v32, %v5591_v61  ;;  %v6219_v32 = vunpack.c.l.b16 %v6128_v48  ;;  %v6847_v61 = vsel %vm14172_vm11, %v6845_v27, %v6846_v58  ;;  %v6134_v58 = vrot.slane %v11650_v17, 7 }
 0x458   : > { %11801 = vmatmul.msk.bf16.gmra.mxu2 %vm658_vm3, %v6962_v44  ;;  %v6497_v44 = vsel %vm12946_vm4, %v6495_v38, %v6496_v39  ;;  %v6936_v38 = vunpack.c.l.b16 %v6847_v61  ;;  %v11652_v39 = vld [vmem:[%s12943_s18 + $0x3e0] sm:$0xf]  ;;  %v7609_v27 = vsel %vm12946_vm4, %v7607_v47, %v7608_v43  ;;  %v7692_v28 = vunpack.c.l.b16 %v7606_v40 }
 0x459   : > { %v6586_v52 = vunpack.c.l.b16 %v6497_v44  ;;  %v6500_v50 = vrot.slane %v11652_v39, 5  ;;  %v6136_v60 = vrot.slane %v6134_v58, 4 }
 0x45a   : > { %v5071_v35 = vpop.f32.mrf.mxu0 }
 0x45b   : > { %v5117_v14 = vadd.f32 %v5071_v35, %v15021_v5  ;;  %v6844_v5 = vsel %vm14172_vm11, %v11785_v30, %v6843_v25  ;;  %v6247_v25 = vpack.c.b16 %v6220_v4, %v6219_v32  ;;  %v11649_v30 = vld [vmem:[%s12943_s18 + $0x3d4] sm:$0xf]  ;;  %v6502_v17 = vrot.slane %v6500_v50, 4 }
 0x45c   : > { %v5545_v31 = vpop.f32.mrf.mxu2  ;;  %v5421_v54 = vpop.f32.mrf.mxu1  ;;  %11836 = vmatmul.msk.bf16.gmra.mxu3 %vm658_vm3, %v7718_v45  ;;  %v6585_v45 = vunpack.c.l.b16 %v6494_v10  ;;  %v6935_v20 = vunpack.c.l.b16 %v6844_v5  ;;  %v11720_v32 = vrot.slane %v11649_v30, 11  ;;  %v7451_v5 = vld [vmem:[%s12943_s18 + $0xb4] sm:$0xf] }
 0x45d   : > { %v5592_v46 = vadd.f32 %v5545_v31, %v5466_v13  ;;  %v5467_v24 = vadd.f32 %v5421_v54, %v5117_v14  ;;  %v11651_v14 = vld [vmem:[%s12943_s18 + $0x3dc] sm:$0xf]  ;;  %v7693_v54 = vunpack.c.l.b16 %v7609_v27  ;;  %v7450_v27 = vld [vmem:[%s12943_s18 + $0xb0] sm:$0xf] }
 0x45e   : > { %v6613_v31 = vpack.c.b16 %v6586_v52, %v6585_v45  ;;  %v6963_v10 = vpack.c.b16 %v6936_v38, %v6935_v20  ;;  %v6137_v47 = vrot.slane %v11651_v14, 7  ;;  %v11753_v43 = vrot.slane %v11651_v14, 9 }
 0x45f   : > { %v15655_v13 = vadd.f32 %v5895_v62, %v5592_v46  ;;  %v15657_v18 = vpop.f32.mrf.mxu3  ;;  %v11653_v62 = vld [vmem:[%s12943_s18 + $0x3e4] sm:$0xf]  ;;  %v11786_v52 = vrot.slane %v11652_v39, 11  ;;  %v7612_v20 = vrot.slane %v7451_v5, 5 }
 0x460   : > { %v6850_v44 = vrot.slane %v11653_v62, 7  ;;  %v6138_v14 = vsel %vm14172_vm11, %v6136_v60, %v6137_v47  ;;  %v6501_v39 = vsel %vm12946_vm4, %v11753_v43, %v6500_v50  ;;  %v11656_v60 = vld [vmem:[%s12943_s18 + $0x3f4] sm:$0xf] }
 0x461   : > { %v6587_v47 = vunpack.c.l.b16 %v6501_v39 }
 0x462   : > { %v5074_v48 = vpop.f32.mrf.mxu0  ;;  %v6852_v30 = vrot.slane %v6850_v44, 4 }
 0x463   : > { %v5118_v35 = vadd.f32 %v5074_v48, %v15044_v1  ;;  %v11654_v1 = vld [vmem:[%s12943_s18 + $0x3e8] sm:$0xf]  ;;  %v6503_v48 = vrot.slane %v11653_v62, 5 }
 0x464   : > { %v5547_v0 = vpop.f32.mrf.mxu2  ;;  %v5424_v46 = vpop.f32.mrf.mxu1  ;;  %v6853_v40 = vrot.slane %v11654_v1, 7 }
 0x465   : > { %v5593_v4 = vadd.f32 %v5547_v0, %v5467_v24  ;;  %11736 = vmatmul.msk.bf16.gmra.mxu0 %vm658_vm3, %v6247_v25  ;;  %v5468_v61 = vadd.f32 %v5424_v46, %v5118_v35  ;;  %v6135_v24 = vsel %vm14172_vm11, %v11720_v32, %v6134_v58  ;;  %v7719_v25 = vpack.c.b16 %v7693_v54, %v7692_v28  ;;  %v7452_v35 = vld [vmem:[%s12943_s18 + $0xb8] sm:$0xf] }
 0x466   : > { %v6221_v58 = vunpack.c.l.b16 %v6135_v24  ;;  %v7614_v32 = vrot.slane %v7612_v20, 4  ;;  %v6222_v54 = vunpack.c.l.b16 %v6138_v14  ;;  %v6854_v50 = vsel %vm14172_vm11, %v6852_v30, %v6853_v40  ;;  %v11658_v30 = vld [vmem:[%s12943_s18 + $0x3fc] sm:$0xf]  ;;  %v11659_v40 = vld [vmem:[%s12943_s18 + $0x400] sm:$0xf] }
 0x467   : > { %11769 = vmatmul.msk.bf16.gmra.mxu1 %vm658_vm3, %v6613_v31  ;;  %v15672_v45 = vpop.f32.mrf.mxu3  ;;  %v15677_v38 = vadd.f32 %v15632_v56, %v5593_v4  ;;  %v6504_v31 = vsel %vm12946_vm4, %v6502_v17, %v6503_v48  ;;  %v7615_v4 = vrot.slane %v7452_v35, 5  ;;  %v6938_v48 = vunpack.c.l.b16 %v6854_v50  ;;  %v11655_v35 = vld [vmem:[%s12943_s18 + $0x3f0] sm:$0xf] }
 0x468   : > { %11802 = vmatmul.msk.bf16.gmra.mxu2 %vm658_vm3, %v6963_v10  ;;  %v11821_v10 = vrot.slane %v7450_v27, 9  ;;  %v6588_v1 = vunpack.c.l.b16 %v6504_v31 }
 0x46a   : > { %v5076_v62 = vpop.f32.mrf.mxu0  ;;  %v7613_v24 = vsel %vm12946_vm4, %v11821_v10, %v7612_v20  ;;  %v6507_v20 = vrot.slane %v11658_v30, 5  ;;  %v6857_v10 = vrot.slane %v11659_v40, 7 }
 0x46b   : > { %v5119_v0 = vadd.f32 %v5076_v62, %v15060_v53  ;;  %v6851_v53 = vsel %vm14172_vm11, %v11786_v52, %v6850_v44  ;;  %v7616_v44 = vsel %vm12946_vm4, %v7614_v32, %v7615_v4  ;;  %v6248_v52 = vpack.c.b16 %v6222_v54, %v6221_v58  ;;  %v11657_v62 = vld [vmem:[%s12943_s18 + $0x3f8] sm:$0xf] }
 0x46c   : > { %v5550_v56 = vpop.f32.mrf.mxu2  ;;  %v5426_v28 = vpop.f32.mrf.mxu1  ;;  %11837 = vmatmul.msk.bf16.gmra.mxu3 %vm658_vm3, %v7719_v25  ;;  %v6937_v17 = vunpack.c.l.b16 %v6851_v53  ;;  %v6141_v25 = vrot.slane %v11656_v60, 7  ;;  %v7694_v14 = vunpack.c.l.b16 %v7613_v24  ;;  %v11721_v58 = vrot.slane %v11655_v35, 11  ;;  %v11660_v53 = vld [vmem:[%s12943_s18 + $0x404] sm:$0xf] }
 0x46d   : > { %v5594_v46 = vadd.f32 %v5550_v56, %v5468_v61  ;;  %v5469_v5 = vadd.f32 %v5426_v28, %v5119_v0  ;;  %v7695_v0 = vunpack.c.l.b16 %v7616_v44  ;;  %v6614_v56 = vpack.c.b16 %v6588_v1, %v6587_v47 }
 0x46e   : > { %v6964_v31 = vpack.c.b16 %v6938_v48, %v6937_v17  ;;  %v6143_v4 = vrot.slane %v6141_v25, 4  ;;  %v6144_v28 = vrot.slane %v11657_v62, 7  ;;  %v11754_v60 = vrot.slane %v11657_v62, 9 }
 0x46f   : > { %v15696_v61 = vadd.f32 %v15657_v18, %v5594_v46  ;;  %v5905_v43 = vpop.f32.mrf.mxu3  ;;  %v7720_v50 = vpack.c.b16 %v7695_v0, %v7694_v14  ;;  %v6509_v1 = vrot.slane %v6507_v20, 4  ;;  %v6510_v17 = vrot.slane %v11659_v40, 5  ;;  %v7457_v14 = vld [vmem:[%s12943_s18 + $0xcc] sm:$0xf] }
 0x470   : > { %v6142_v24 = vsel %vm14172_vm11, %v11721_v58, %v6141_v25  ;;  %v6145_v44 = vsel %vm14172_vm11, %v6143_v4, %v6144_v28  ;;  %v11822_v58 = vrot.slane %v7457_v14, 9  ;;  %v11662_v28 = vld [vmem:[%s12943_s18 + $0x410] sm:$0xf] }
 0x471   : > { %v6224_v0 = vunpack.c.l.b16 %v6145_v44 }
 0x472   : > { %v5079_v27 = vpop.f32.mrf.mxu0 }
 0x473   : > { %v5120_v18 = vadd.f32 %v5079_v27, %v15082_v57  ;;  %v7458_v57 = vld [vmem:[%s12943_s18 + $0xd0] sm:$0xf]  ;;  %v6860_v27 = vrot.slane %v11660_v53, 7 }
 0x474   : > { %v5552_v39 = vpop.f32.mrf.mxu2  ;;  %v5429_v32 = vpop.f32.mrf.mxu1  ;;  %v7619_v62 = vrot.slane %v7458_v57, 5 }
 0x475   : > { %v5595_v46 = vadd.f32 %v5552_v39, %v5469_v5  ;;  %11737 = vmatmul.msk.bf16.gmra.mxu0 %vm658_vm3, %v6248_v52  ;;  %v5470_v54 = vadd.f32 %v5429_v32, %v5120_v18  ;;  %v11787_v5 = vrot.slane %v11658_v30, 11  ;;  %v6859_v52 = vrot.slane %v6857_v10, 4  ;;  %v7459_v30 = vld [vmem:[%s12943_s18 + $0xd4] sm:$0xf] }
 0x476   : > { %v6508_v39 = vsel %vm12946_vm4, %v11754_v60, %v6507_v20  ;;  %v7621_v4 = vrot.slane %v7619_v62, 4  ;;  %v7622_v20 = vrot.slane %v7459_v30, 5  ;;  %v7620_v44 = vsel %vm12946_vm4, %v11822_v58, %v7619_v62 }
 0x477   : > { %11770 = vmatmul.msk.bf16.gmra.mxu1 %vm658_vm3, %v6614_v56  ;;  %v15711_v47 = vpop.f32.mrf.mxu3  ;;  %v15714_v48 = vadd.f32 %v15672_v45, %v5595_v46  ;;  %v6223_v45 = vunpack.c.l.b16 %v6142_v24  ;;  %v6861_v46 = vsel %vm14172_vm11, %v6859_v52, %v6860_v27  ;;  %v6148_v27 = vrot.slane %v11662_v28, 7 }
 0x478   : > { %11803 = vmatmul.msk.bf16.gmra.mxu2 %vm658_vm3, %v6964_v31  ;;  %v6511_v31 = vsel %vm12946_vm4, %v6509_v1, %v6510_v17  ;;  %v6940_v1 = vunpack.c.l.b16 %v6861_v46  ;;  %v11664_v17 = vld [vmem:[%s12943_s18 + $0x418] sm:$0xf]  ;;  %v7623_v52 = vsel %vm12946_vm4, %v7621_v4, %v7622_v20  ;;  %v7696_v62 = vunpack.c.l.b16 %v7620_v44 }
 0x479   : > { %v6590_v60 = vunpack.c.l.b16 %v6511_v31  ;;  %v6514_v14 = vrot.slane %v11664_v17, 5  ;;  %v6150_v58 = vrot.slane %v6148_v27, 4 }
 0x47a   : > { %v5081_v35 = vpop.f32.mrf.mxu0 }
 0x47b   : > { %v5121_v18 = vadd.f32 %v5081_v35, %v15103_v9  ;;  %v6858_v9 = vsel %vm14172_vm11, %v11787_v5, %v6857_v10  ;;  %v6249_v10 = vpack.c.b16 %v6224_v0, %v6223_v45  ;;  %v11661_v5 = vld [vmem:[%s12943_s18 + $0x40c] sm:$0xf]  ;;  %v6516_v28 = vrot.slane %v6514_v14, 4 }
 0x47c   : > { %v5555_v40 = vpop.f32.mrf.mxu2  ;;  %v5431_v25 = vpop.f32.mrf.mxu1  ;;  %11838 = vmatmul.msk.bf16.gmra.mxu3 %vm658_vm3, %v7720_v50  ;;  %v6589_v50 = vunpack.c.l.b16 %v6508_v39  ;;  %v6939_v57 = vunpack.c.l.b16 %v6858_v9  ;;  %v11722_v45 = vrot.slane %v11661_v5, 11  ;;  %v7465_v9 = vld [vmem:[%s12943_s18 + $0xec] sm:$0xf] }
 0x47d   : > { %v5596_v56 = vadd.f32 %v5555_v40, %v5470_v54  ;;  %v5471_v32 = vadd.f32 %v5431_v25, %v5121_v18  ;;  %v11663_v18 = vld [vmem:[%s12943_s18 + $0x414] sm:$0xf]  ;;  %v7697_v25 = vunpack.c.l.b16 %v7623_v52  ;;  %v7464_v52 = vld [vmem:[%s12943_s18 + $0xe8] sm:$0xf] }
 0x47e   : > { %v6615_v40 = vpack.c.b16 %v6590_v60, %v6589_v50  ;;  %v6965_v39 = vpack.c.b16 %v6940_v1, %v6939_v57  ;;  %v6151_v4 = vrot.slane %v11663_v18, 7  ;;  %v11755_v20 = vrot.slane %v11663_v18, 9 }
 0x47f   : > { %v15734_v54 = vadd.f32 %v5905_v43, %v5596_v56  ;;  %v15736_v53 = vpop.f32.mrf.mxu3  ;;  %v11665_v43 = vld [vmem:[%s12943_s18 + $0x41c] sm:$0xf]  ;;  %v11788_v60 = vrot.slane %v11664_v17, 11  ;;  %v7626_v57 = vrot.slane %v7465_v9, 5 }
 0x480   : > { %v6864_v31 = vrot.slane %v11665_v43, 7  ;;  %v6152_v18 = vsel %vm14172_vm11, %v6150_v58, %v6151_v4  ;;  %v6515_v17 = vsel %vm12946_vm4, %v11755_v20, %v6514_v14  ;;  %v11668_v58 = vld [vmem:[%s12943_s18 + $0x42c] sm:$0xf] }
 0x481   : > { %v6591_v4 = vunpack.c.l.b16 %v6515_v17 }
 0x482   : > { %v5084_v24 = vpop.f32.mrf.mxu0  ;;  %v6866_v5 = vrot.slane %v6864_v31, 4 }
 0x483   : > { %v5122_v35 = vadd.f32 %v5084_v24, %v15128_v37  ;;  %v11666_v37 = vld [vmem:[%s12943_s18 + $0x420] sm:$0xf]  ;;  %v6517_v24 = vrot.slane %v11665_v43, 5 }
 0x484   : > { %v5557_v30 = vpop.f32.mrf.mxu2  ;;  %v5434_v56 = vpop.f32.mrf.mxu1  ;;  %v6867_v44 = vrot.slane %v11666_v37, 7 }
 0x485   : > { %v5597_v0 = vadd.f32 %v5557_v30, %v5471_v32  ;;  %11738 = vmatmul.msk.bf16.gmra.mxu0 %vm658_vm3, %v6249_v10  ;;  %v5472_v46 = vadd.f32 %v5434_v56, %v5122_v35  ;;  %v6149_v32 = vsel %vm14172_vm11, %v11722_v45, %v6148_v27  ;;  %v7721_v10 = vpack.c.b16 %v7697_v25, %v7696_v62  ;;  %v7466_v35 = vld [vmem:[%s12943_s18 + $0xf0] sm:$0xf] }
 0x486   : > { %v6225_v27 = vunpack.c.l.b16 %v6149_v32  ;;  %v7628_v45 = vrot.slane %v7626_v57, 4  ;;  %v6226_v25 = vunpack.c.l.b16 %v6152_v18  ;;  %v6868_v14 = vsel %vm14172_vm11, %v6866_v5, %v6867_v44  ;;  %v11670_v44 = vld [vmem:[%s12943_s18 + $0x434] sm:$0xf] }
 0x487   : > { %11771 = vmatmul.msk.bf16.gmra.mxu1 %vm658_vm3, %v6615_v40  ;;  %v15751_v50 = vpop.f32.mrf.mxu3  ;;  %v15756_v1 = vadd.f32 %v15711_v47, %v5597_v0  ;;  %v6518_v40 = vsel %vm12946_vm4, %v6516_v28, %v6517_v24  ;;  %v7629_v0 = vrot.slane %v7466_v35, 5  ;;  %v6942_v24 = vunpack.c.l.b16 %v6868_v14  ;;  %v11669_v35 = vld [vmem:[%s12943_s18 + $0x430] sm:$0xf] }
 0x488   : > { %11804 = vmatmul.msk.bf16.gmra.mxu2 %vm658_vm3, %v6965_v39  ;;  %v11823_v39 = vrot.slane %v7464_v52, 9  ;;  %v6592_v37 = vunpack.c.l.b16 %v6518_v40  ;;  %v6155_v5 = vrot.slane %v11668_v58, 7  ;;  %v7472_v58 = vld [vmem:[%s12943_s18 + $0x108] sm:$0xf] }
 0x48a   : > { %v5086_v43 = vpop.f32.mrf.mxu0  ;;  %v7627_v32 = vsel %vm12946_vm4, %v11823_v39, %v7626_v57  ;;  %v6521_v39 = vrot.slane %v11670_v44, 5 }
 0x48b   : > { %v5123_v30 = vadd.f32 %v5086_v43, %v15147_v19  ;;  %v6865_v19 = vsel %vm14172_vm11, %v11788_v60, %v6864_v31  ;;  %v7630_v31 = vsel %vm12946_vm4, %v7628_v45, %v7629_v0  ;;  %v6250_v60 = vpack.c.b16 %v6226_v25, %v6225_v27  ;;  %v11671_v43 = vld [vmem:[%s12943_s18 + $0x438] sm:$0xf] }
 0x48c   : > { %v5560_v47 = vpop.f32.mrf.mxu2  ;;  %v5436_v62 = vpop.f32.mrf.mxu1  ;;  %11839 = vmatmul.msk.bf16.gmra.mxu3 %vm658_vm3, %v7721_v10  ;;  %v6941_v28 = vunpack.c.l.b16 %v6865_v19  ;;  %v11667_v10 = vld [vmem:[%s12943_s18 + $0x428] sm:$0xf]  ;;  %v7698_v18 = vunpack.c.l.b16 %v7627_v32  ;;  %v6157_v27 = vrot.slane %v6155_v5, 4  ;;  %v6158_v0 = vrot.slane %v11669_v35, 7  ;;  %v11672_v19 = vld [vmem:[%s12943_s18 + $0x43c] sm:$0xf] }
 0x48d   : > { %v5598_v56 = vadd.f32 %v5560_v47, %v5472_v46  ;;  %v5473_v9 = vadd.f32 %v5436_v62, %v5123_v30  ;;  %v7699_v30 = vunpack.c.l.b16 %v7630_v31  ;;  %v6616_v47 = vpack.c.b16 %v6592_v37, %v6591_v4 }
 0x48e   : > { %v6966_v40 = vpack.c.b16 %v6942_v24, %v6941_v28  ;;  %v11723_v57 = vrot.slane %v11667_v10, 11  ;;  %v6871_v62 = vrot.slane %v11671_v43, 7  ;;  %v6523_v37 = vrot.slane %v6521_v39, 4 }
 0x48f   : > { %v15775_v46 = vadd.f32 %v15736_v53, %v5598_v56  ;;  %v5915_v20 = vpop.f32.mrf.mxu3  ;;  %v7722_v14 = vpack.c.b16 %v7699_v30, %v7698_v18  ;;  %v6524_v28 = vrot.slane %v11671_v43, 5  ;;  %v11789_v24 = vrot.slane %v11670_v44, 11 }
 0x490   : > { %v6159_v32 = vsel %vm14172_vm11, %v6157_v27, %v6158_v0  ;;  %v6873_v31 = vrot.slane %v6871_v62, 4  ;;  %v11674_v0 = vld [vmem:[%s12943_s18 + $0x448] sm:$0xf] }
 0x491   : > { %v6228_v44 = vunpack.c.l.b16 %v6159_v32  ;;  %v6162_v32 = vrot.slane %v11674_v0, 7  ;;  %v11678_v0 = vld [vmem:[%s12943_s18 + $0x458] sm:$0xf] }
 0x492   : > { %v5089_v52 = vpop.f32.mrf.mxu0 }
 0x493   : > { %v5124_v53 = vadd.f32 %v5089_v52, %v15170_v49  ;;  %v11756_v49 = vrot.slane %v11669_v35, 9  ;;  %v7471_v35 = vld [vmem:[%s12943_s18 + $0x104] sm:$0xf] }
 0x494   : > { %v5562_v17 = vpop.f32.mrf.mxu2  ;;  %v5439_v45 = vpop.f32.mrf.mxu1 }
 0x495   : > { %v5599_v56 = vadd.f32 %v5562_v17, %v5473_v9  ;;  %11739 = vmatmul.msk.bf16.gmra.mxu0 %vm658_vm3, %v6250_v60  ;;  %v5474_v25 = vadd.f32 %v5439_v45, %v5124_v53  ;;  %v6156_v9 = vsel %vm14172_vm11, %v11723_v57, %v6155_v5  ;;  %v6874_v60 = vrot.slane %v11672_v19, 7  ;;  %v7473_v5 = vld [vmem:[%s12943_s18 + $0x10c] sm:$0xf] }
 0x496   : > { %v7633_v53 = vrot.slane %v7472_v58, 5  ;;  %v6227_v43 = vunpack.c.l.b16 %v6156_v9  ;;  %v6522_v17 = vsel %vm12946_vm4, %v11756_v49, %v6521_v39  ;;  %v6872_v57 = vsel %vm14172_vm11, %v11789_v24, %v6871_v62  ;;  %v11676_v62 = vld [vmem:[%s12943_s18 + $0x450] sm:$0xf]  ;;  %v11673_v24 = vld [vmem:[%s12943_s18 + $0x444] sm:$0xf] }
 0x497   : > { %11772 = vmatmul.msk.bf16.gmra.mxu1 %vm658_vm3, %v6616_v47  ;;  %v15790_v4 = vpop.f32.mrf.mxu3  ;;  %v15798_v10 = vadd.f32 %v15751_v50, %v5599_v56  ;;  %v6525_v47 = vsel %vm12946_vm4, %v6523_v37, %v6524_v28  ;;  %v11824_v56 = vrot.slane %v7471_v35, 9  ;;  %v7636_v39 = vrot.slane %v7473_v5, 5 }
 0x498   : > { %11805 = vmatmul.msk.bf16.gmra.mxu2 %vm658_vm3, %v6966_v40  ;;  %v7635_v27 = vrot.slane %v7633_v53, 4  ;;  %v6593_v49 = vunpack.c.l.b16 %v6522_v17  ;;  %v6943_v58 = vunpack.c.l.b16 %v6872_v57  ;;  %v6251_v37 = vpack.c.b16 %v6228_v44, %v6227_v43 }
 0x499   : > { %v7634_v28 = vsel %vm12946_vm4, %v11824_v56, %v7633_v53  ;;  %v6528_v35 = vrot.slane %v11676_v62, 5 }
 0x49a   : > { %v5091_v52 = vpop.f32.mrf.mxu0  ;;  %v7700_v17 = vunpack.c.l.b16 %v7634_v28 }
 0x49b   : > { %v5125_v18 = vadd.f32 %v5091_v52, %v15187_v41  ;;  %v6875_v41 = vsel %vm14172_vm11, %v6873_v31, %v6874_v60  ;;  %v7637_v60 = vsel %vm12946_vm4, %v7635_v27, %v7636_v39  ;;  %v11677_v52 = vld [vmem:[%s12943_s18 + $0x454] sm:$0xf]  ;;  %v6530_v39 = vrot.slane %v6528_v35, 4 }
 0x49c   : > { %v5565_v30 = vpop.f32.mrf.mxu2  ;;  %v5441_v50 = vpop.f32.mrf.mxu1  ;;  %11840 = vmatmul.msk.bf16.gmra.mxu3 %vm658_vm3, %v7722_v14  ;;  %v6594_v14 = vunpack.c.l.b16 %v6525_v47  ;;  %v6944_v9 = vunpack.c.l.b16 %v6875_v41  ;;  %v11724_v47 = vrot.slane %v11673_v24, 11  ;;  %v7701_v53 = vunpack.c.l.b16 %v7637_v60  ;;  %v7479_v41 = vld [vmem:[%s12943_s18 + $0x124] sm:$0xf] }
 0x49d   : > { %v5600_v40 = vadd.f32 %v5565_v30, %v5474_v25  ;;  %v5475_v45 = vadd.f32 %v5441_v50, %v5125_v18  ;;  %v6878_v57 = vrot.slane %v11677_v52, 7  ;;  %v7640_v28 = vrot.slane %v7479_v41, 5 }
 0x49e   : > { %v6617_v5 = vpack.c.b16 %v6594_v14, %v6593_v49  ;;  %v6967_v30 = vpack.c.b16 %v6944_v9, %v6943_v58  ;;  %v6531_v14 = vrot.slane %v11677_v52, 5  ;;  %v11790_v58 = vrot.slane %v11676_v62, 11  ;;  %v12677_v62 = vld [vmem:[%s17336_s4] sm:$0xf] }
 0x49f   : > { %v15813_v19 = vadd.f32 %v5915_v20, %v5600_v40  ;;  %v15815_v25 = vpop.f32.mrf.mxu3  ;;  %v11675_v20 = vld [vmem:[%s12943_s18 + $0x44c] sm:$0xf]  ;;  %v6164_v40 = vrot.slane %v6162_v32, 4  ;;  %v6881_v60 = vrot.slane %v11678_v0, 7 }
 0x4a0   : > { %v6165_v50 = vrot.slane %v11675_v20, 7  ;;  %v11757_v27 = vrot.slane %v11675_v20, 9  ;;  %v7478_v20 = vld [vmem:[%s12943_s18 + $0x120] sm:$0xf] }
 0x4a1   : > { %v11825_v41 = vrot.slane %v7478_v20, 9 }
 0x4a2   : > { %v6319_v31 = vpop.f32.mrf.mxu0 }
 0x4a3   : > { %v6399_v56 = vadd.f32 %v6319_v31, %v15212_v63  ;;  %v7723_v63 = vpack.c.b16 %v7701_v53, %v7700_v17  ;;  %v6880_v31 = vrot.slane %v6878_v57, 4  ;;  %v6879_v53 = vsel %vm14172_vm11, %v11790_v58, %v6878_v57 }
 0x4a4   : > { %v5567_v18 = vpop.f32.mrf.mxu2  ;;  %v6685_v44 = vpop.f32.mrf.mxu1 }
 0x4a5   : > { %v5601_v43 = vadd.f32 %v5567_v18, %v5475_v45  ;;  %11740 = vmatmul.msk.bf16.gmra.mxu0 %vm658_vm3, %v6251_v37  ;;  %v6163_v45 = vsel %vm14172_vm11, %v11724_v47, %v6162_v32  ;;  %v6166_v37 = vsel %vm14172_vm11, %v6164_v40, %v6165_v50  ;;  %v7480_v18 = vld [vmem:[%s12943_s18 + $0x128] sm:$0xf]  ;;  %v15845_v32 = vperm.slane %v12677_v62, 2  ;;  %v11682_v62 = vld [vmem:[%s12943_s18 + $0x46c] sm:$0xf] }
 0x4a6   : > { %v6230_v47 = vunpack.c.l.b16 %v6166_v37  ;;  %v7643_v0 = vrot.slane %v7480_v18, 5  ;;  %v6945_v37 = vunpack.c.l.b16 %v6879_v53 }
 0x4a7   : > { %11773 = vmatmul.msk.bf16.gmra.mxu1 %vm658_vm3, %v6617_v5  ;;  %v15830_v49 = vpop.f32.mrf.mxu3  ;;  %v15835_v9 = vadd.f32 %v15790_v4, %v5601_v43  ;;  %v6765_v5 = vadd.f32 %v6685_v44, %v6399_v56  ;;  %v12678_v4 = vld [vmem:[%s17337_s5] sm:$0xf]  ;;  %v6529_v43 = vsel %vm12946_vm4, %v11757_v27, %v6528_v35  ;;  %v6532_v44 = vsel %vm12946_vm4, %v6530_v39, %v6531_v14  ;;  %v11680_v39 = vld [vmem:[%s12943_s18 + $0x464] sm:$0xf] }
 0x4a8   : > { %17420 = vst [vmem:[#allocation24_spill] sm:$0xff] %v15830_v49  ;;  %11806 = vmatmul.msk.bf16.gmra.mxu2 %vm658_vm3, %v6967_v30  ;;  %v15850_v52 = vperm.slane %v12678_v4, 2  ;;  %v6229_v30 = vunpack.c.l.b16 %v6163_v45  ;;  %v7642_v56 = vrot.slane %v7640_v28, 4  ;;  %v6882_v45 = vsel %vm14172_vm11, %v6880_v31, %v6881_v60 }
 0x4a9   : > { %v6595_v58 = vunpack.c.l.b16 %v6529_v43  ;;  %v6946_v18 = vunpack.c.l.b16 %v6882_v45  ;;  %v7641_v31 = vsel %vm12946_vm4, %v11825_v41, %v7640_v28 }
 0x4aa   : > { %v6321_v24 = vpop.f32.mrf.mxu0  ;;  %v6252_v57 = vpack.c.b16 %v6230_v47, %v6229_v30  ;;  %v7644_v60 = vsel %vm12946_vm4, %v7642_v56, %v7643_v0  ;;  %v11681_v30 = vld [vmem:[%s12943_s18 + $0x468] sm:$0xf]  ;;  %v11683_v47 = vld [vmem:[%s12943_s18 + $0x470] sm:$0xf]  ;;  %v7702_v53 = vunpack.c.l.b16 %v7641_v31  ;;  %v6535_v0 = vrot.slane %v11682_v62, 5 }
 0x4ab   : > { %v6400_v27 = vadd.f32 %v6321_v24, %v15227_v2  ;;  %v11679_v2 = vld [vmem:[%s12943_s18 + $0x460] sm:$0xf]  ;;  %v6169_v24 = vrot.slane %v11680_v39, 7  ;;  %v6968_v41 = vpack.c.b16 %v6946_v18, %v6945_v37  ;;  %v6885_v39 = vrot.slane %v11683_v47, 7 }
 0x4ac   : > { %v7035_v17 = vpop.f32.mrf.mxu2  ;;  %v6687_v50 = vpop.f32.mrf.mxu1  ;;  %11841 = vmatmul.msk.bf16.gmra.mxu3 %vm658_vm3, %v7723_v63  ;;  %v6596_v63 = vunpack.c.l.b16 %v6532_v44  ;;  %v11725_v56 = vrot.slane %v11679_v2, 11 }
 0x4ad   : > { %v7115_v40 = vadd.f32 %v7035_v17, %v6765_v5  ;;  %v6766_v4 = vadd.f32 %v6687_v50, %v6400_v27  ;;  %v7486_v50 = vld [vmem:[%s12943_s18 + $0x140] sm:$0xf]  ;;  %v6172_v27 = vrot.slane %v11681_v30, 7 }
 0x4ae   : > { %v6618_v44 = vpack.c.b16 %v6596_v63, %v6595_v58  ;;  %v7647_v37 = vrot.slane %v7486_v50, 5  ;;  %v6170_v2 = vsel %vm14172_vm11, %v11725_v56, %v6169_v24 }
 0x4af   : > { %v7148_v35 = vmul.f32 %v15845_v32, %v7115_v40  ;;  %v15864_v14 = vpop.f32.mrf.mxu3  ;;  %v7703_v40 = vunpack.c.l.b16 %v7644_v60 }
 0x4b0   : > { %17421 = vst [vmem:[#allocation25_spill] sm:$0xff] %v15864_v14  ;;  %v7649_v14 = vrot.slane %v7647_v37, 4 }
 0x4b1   : > { %v7181_v20 = vadd.f32 %v15850_v52, %v7148_v35  ;;  %v6171_v35 = vrot.slane %v6169_v24, 4  ;;  %v7724_v60 = vpack.c.b16 %v7703_v40, %v7702_v53 }
 0x4b2   : > { %v6324_v5 = vpop.f32.mrf.mxu0 }
 0x4b3   : > { %v7213_v17 = vmax.f32 %v7181_v20, 0.0  ;;  %v6401_v63 = vadd.f32 %v6324_v5, %v15248_v12  ;;  %v11684_v20 = vld [vmem:[%s12943_s18 + $0x474] sm:$0xf]  ;;  %v6173_v5 = vsel %vm14172_vm11, %v6171_v35, %v6172_v27 }
 0x4b4   : > { %v7037_v43 = vpop.f32.mrf.mxu2  ;;  %v6690_v28 = vpop.f32.mrf.mxu1  ;;  %v6888_v53 = vrot.slane %v11684_v20, 7  ;;  %v6232_v56 = vunpack.c.l.b16 %v6173_v5  ;;  %v11688_v5 = vld [vmem:[%s12943_s18 + $0x488] sm:$0xf] }
 0x4b5   : > { %v7116_v45 = vadd.f32 %v7037_v43, %v6766_v4  ;;  %7277 = vrot.lane.b32.xlu1 %v7213_v17, %s12811_s20  ;;  %11741 = vmatmul.msk.bf16.gmra.mxu0 %vm658_vm3, %v6252_v57  ;;  %v11758_v57 = vrot.slane %v11681_v30, 9  ;;  %v6537_v4 = vrot.slane %v6535_v0, 4  ;;  %v6538_v17 = vrot.slane %v11683_v47, 5  ;;  %v7485_v43 = vld [vmem:[%s12943_s18 + $0x13c] sm:$0xf] }
 0x4b6   : > { %v6767_v30 = vadd.f32 %v6690_v28, %v6401_v63 }
 0x4b7   : > { %v7149_v58 = vmul.f32 %v15845_v32, %v7116_v45  ;;  %11774 = vmatmul.msk.bf16.gmra.mxu1 %vm658_vm3, %v6618_v44  ;;  %v15882_v31 = vpop.f32.mrf.mxu3  ;;  %v7487_v45 = vld [vmem:[%s12943_s18 + $0x144] sm:$0xf]  ;;  %v11791_v44 = vrot.slane %v11682_v62, 11  ;;  %v6536_v62 = vsel %vm12946_vm4, %v11758_v57, %v6535_v0  ;;  %v6539_v28 = vsel %vm12946_vm4, %v6537_v4, %v6538_v17 }
 0x4b8   : > { %17422 = vst [vmem:[#allocation26_spill] sm:$0xff] %v15882_v31  ;;  %11807 = vmatmul.msk.bf16.gmra.mxu2 %vm658_vm3, %v6968_v41  ;;  %v6887_v31 = vrot.slane %v6885_v39, 4  ;;  %v6231_v41 = vunpack.c.l.b16 %v6170_v2  ;;  %v7650_v49 = vrot.slane %v7487_v45, 5  ;;  %v6597_v0 = vunpack.c.l.b16 %v6536_v62  ;;  %v11685_v45 = vld [vmem:[%s12943_s18 + $0x47c] sm:$0xf] }
 0x4b9   : > { %v7182_v18 = vadd.f32 %v15850_v52, %v7149_v58  ;;  %v11826_v58 = vrot.slane %v7485_v43, 9  ;;  %v6886_v35 = vsel %vm14172_vm11, %v11791_v44, %v6885_v39  ;;  %v6598_v57 = vunpack.c.l.b16 %v6539_v28  ;;  %v11689_v44 = vld [vmem:[%s12943_s18 + $0x48c] sm:$0xf] }
 0x4ba   : > { %v6326_v12 = vpop.f32.mrf.mxu0  ;;  %v6889_v27 = vsel %vm14172_vm11, %v6887_v31, %v6888_v53  ;;  %v7651_v39 = vsel %vm12946_vm4, %v7649_v14, %v7650_v49  ;;  %v6253_v31 = vpack.c.b16 %v6232_v56, %v6231_v41  ;;  %v6947_v17 = vunpack.c.l.b16 %v6886_v35 }
 0x4bb   : > { %v7214_v40 = vmax.f32 %v7182_v18, 0.0  ;;  %v6402_v20 = vadd.f32 %v6326_v12, %v15263_v36  ;;  %v7648_v2 = vsel %vm12946_vm4, %v11826_v58, %v7647_v37  ;;  %v6948_v43 = vunpack.c.l.b16 %v6889_v27  ;;  %v11690_v27 = vld [vmem:[%s12943_s18 + $0x490] sm:$0xf] }
 0x4bc   : > { %v7040_v50 = vpop.f32.mrf.mxu2  ;;  %v6692_v47 = vpop.f32.mrf.mxu1  ;;  %11842 = vmatmul.msk.bf16.gmra.mxu3 %vm658_vm3, %v7724_v60  ;;  %v11686_v60 = vld [vmem:[%s12943_s18 + $0x480] sm:$0xf]  ;;  %v6619_v58 = vpack.c.b16 %v6598_v57, %v6597_v0  ;;  %v11726_v49 = vrot.slane %v11685_v45, 11  ;;  %v6542_v14 = vrot.slane %v11688_v5, 5  ;;  %v6892_v28 = vrot.slane %v11689_v44, 7 }
 0x4bd   : > { %v7117_v24 = vadd.f32 %v7040_v50, %v6767_v30  ;;  %7279 = vrot.lane.b32.xlu2 %v7214_v40, %s12811_s20  ;;  %v6176_v12 = vrot.slane %v11686_v60, 7  ;;  %v6768_v53 = vadd.f32 %v6692_v47, %v6402_v20  ;;  %v7704_v40 = vunpack.c.l.b16 %v7648_v2  ;;  %v7493_v2 = vld [vmem:[%s12943_s18 + $0x15c] sm:$0xf] }
 0x4be   : > { %v7705_v50 = vunpack.c.l.b16 %v7651_v39  ;;  %v6969_v56 = vpack.c.b16 %v6948_v43, %v6947_v17  ;;  %v11792_v43 = vrot.slane %v11688_v5, 11  ;;  %v6895_v45 = vrot.slane %v11690_v27, 7 }
 0x4bf   : > { %v7150_v63 = vmul.f32 %v15845_v32, %v7117_v24  ;;  %v15905_v18 = vpop.f32.mrf.mxu3  ;;  %v11687_v24 = vld [vmem:[%s12943_s18 + $0x484] sm:$0xf]  ;;  %v6178_v35 = vrot.slane %v6176_v12, 4  ;;  %v6177_v57 = vsel %vm14172_vm11, %v11726_v49, %v6176_v12 }
 0x4c0   : > { %v6179_v47 = vrot.slane %v11687_v24, 7  ;;  %v7725_v60 = vpack.c.b16 %v7705_v50, %v7704_v40  ;;  %v11759_v39 = vrot.slane %v11687_v24, 9  ;;  %v6233_v24 = vunpack.c.l.b16 %v6177_v57 }
 0x4c1   : > { %v7183_v4 = vadd.f32 %v15850_v52, %v7150_v63 }
 0x4c2   : > { %v6329_v36 = vpop.f32.mrf.mxu0 }
 0x4c3   : > { %v7215_v30 = vmax.f32 %v7183_v4, 0.0  ;;  %v6403_v20 = vadd.f32 %v6329_v36, %v15284_v33  ;;  %v6544_v4 = vrot.slane %v6542_v14, 4  ;;  %v6894_v33 = vrot.slane %v6892_v28, 4 }
 0x4c4   : > { %v7042_v37 = vpop.f32.mrf.mxu2  ;;  %v6695_v41 = vpop.f32.mrf.mxu1 }
 0x4c5   : > { %v7118_v62 = vadd.f32 %v7042_v37, %v6768_v53  ;;  %7281 = vrot.lane.b32.xlu0 %v7215_v30, %s12811_s20  ;;  %11742 = vmatmul.msk.bf16.gmra.mxu0 %vm658_vm3, %v6253_v31  ;;  %v6545_v31 = vrot.slane %v11689_v44, 5  ;;  %v6180_v53 = vsel %vm14172_vm11, %v6178_v35, %v6179_v47  ;;  %v7654_v30 = vrot.slane %v7493_v2, 5  ;;  %v7492_v37 = vld [vmem:[%s12943_s18 + $0x158] sm:$0xf]  ;;  %v11692_v2 = vld [vmem:[%s12943_s18 + $0x49c] sm:$0xf] }
 0x4c6   : > { %v6769_v40 = vadd.f32 %v6695_v41, %v6403_v20  ;;  %v6543_v44 = vsel %vm12946_vm4, %v11759_v39, %v6542_v14  ;;  %v6234_v41 = vunpack.c.l.b16 %v6180_v53  ;;  %v6896_v35 = vsel %vm14172_vm11, %v6894_v33, %v6895_v45  ;;  %v11691_v33 = vld [vmem:[%s12943_s18 + $0x498] sm:$0xf] }
 0x4c7   : > { %v7151_v63 = vmul.f32 %v15845_v32, %v7118_v62  ;;  %11775 = vmatmul.msk.bf16.gmra.mxu1 %vm658_vm3, %v6619_v58  ;;  %v15923_v0 = vpop.f32.mrf.mxu3  ;;  %v7494_v58 = vld [vmem:[%s12943_s18 + $0x160] sm:$0xf]  ;;  %v6546_v5 = vsel %vm12946_vm4, %v6544_v4, %v6545_v31  ;;  %v11827_v47 = vrot.slane %v7492_v37, 9  ;;  %v7656_v14 = vrot.slane %v7654_v30, 4  ;;  %v15949_v31 = vld [vmem:[%s12943_s18 + $0x4a4] sm:$0xf] }
 0x4c8   : > { %11808 = vmatmul.msk.bf16.gmra.mxu2 %vm658_vm3, %v6969_v56  ;;  %v6893_v56 = vsel %vm14172_vm11, %v11792_v43, %v6892_v28  ;;  %v7657_v27 = vrot.slane %v7494_v58, 5  ;;  %v6600_v39 = vunpack.c.l.b16 %v6546_v5  ;;  %v6950_v28 = vunpack.c.l.b16 %v6896_v35  ;;  %v11693_v58 = vld [vmem:[%s12943_s18 + $0x4a0] sm:$0xf] }
 0x4c9   : > { %v7184_v17 = vadd.f32 %v15850_v52, %v7151_v63  ;;  %v6949_v4 = vunpack.c.l.b16 %v6893_v56  ;;  %v6254_v43 = vpack.c.b16 %v6234_v41, %v6233_v24  ;;  %v7655_v53 = vsel %vm12946_vm4, %v11827_v47, %v7654_v30 }
 0x4ca   : > { %v6331_v36 = vpop.f32.mrf.mxu0  ;;  %v7706_v56 = vunpack.c.l.b16 %v7655_v53 }
 0x4cb   : > { %v7216_v50 = vmax.f32 %v7184_v17, 0.0  ;;  %v6404_v20 = vadd.f32 %v6331_v36, %v15299_v29  ;;  %v7658_v29 = vsel %vm12946_vm4, %v7656_v14, %v7657_v27  ;;  %v6183_v36 = vrot.slane %v11692_v2, 7  ;;  %v7500_v14 = vld [vmem:[%s12943_s18 + $0x178] sm:$0xf] }
 0x4cc   : > { %v7045_v12 = vpop.f32.mrf.mxu2  ;;  %v6697_v62 = vpop.f32.mrf.mxu1  ;;  %11843 = vmatmul.msk.bf16.gmra.mxu3 %vm658_vm3, %v7725_v60  ;;  %v6599_v60 = vunpack.c.l.b16 %v6543_v44  ;;  %v6970_v24 = vpack.c.b16 %v6950_v28, %v6949_v4  ;;  %v7707_v35 = vunpack.c.l.b16 %v7658_v29  ;;  %v6186_v27 = vrot.slane %v11693_v58, 7 }
 0x4cd   : > { %v7119_v49 = vadd.f32 %v7045_v12, %v6769_v40  ;;  %7283 = vrot.lane.b32.xlu1 %v7216_v50, %s12811_s20  ;;  %v11695_v40 = vld [vmem:[%s12943_s18 + $0x4a8] sm:$0xf]  ;;  %v6770_v50 = vadd.f32 %v6697_v62, %v6404_v20  ;;  %v6549_v12 = vrot.slane %v15949_v31, 5  ;;  %v6185_v62 = vrot.slane %v6183_v36, 4 }
 0x4ce   : > { %v6620_v5 = vpack.c.b16 %v6600_v39, %v6599_v60  ;;  %v6899_v47 = vrot.slane %v11695_v40, 7  ;;  %v11760_v60 = vrot.slane %v11693_v58, 9  ;;  %v7726_v29 = vpack.c.b16 %v7707_v35, %v7706_v56 }
 0x4cf   : > { %v7152_v63 = vmul.f32 %v15845_v32, %v7119_v49  ;;  %v15946_v57 = vpop.f32.mrf.mxu3  ;;  %v11727_v49 = vrot.slane %v11691_v33, 11  ;;  %v6551_v39 = vrot.slane %v6549_v12, 4  ;;  %v7661_v33 = vrot.slane %v7500_v14, 5 }
 0x4d1   : > { %v7185_v17 = vadd.f32 %v15850_v52, %v7152_v63  ;;  %v11696_v63 = vld [vmem:[%s12943_s18 + $0x4ac] sm:$0xf]  ;;  %v6184_v28 = vsel %vm14172_vm11, %v11727_v49, %v6183_v36  ;;  %v7663_v56 = vrot.slane %v7661_v33, 4 }
 0x4d2   : > { %v6334_v45 = vpop.f32.mrf.mxu0 }
 0x4d3   : > { %v7217_v37 = vmax.f32 %v7185_v17, 0.0  ;;  %v6405_v2 = vadd.f32 %v6334_v45, %v15320_v8  ;;  %v6552_v17 = vrot.slane %v11695_v40, 5  ;;  %v6902_v8 = vrot.slane %v11696_v63, 7  ;;  %v7499_v45 = vld [vmem:[%s12943_s18 + $0x174] sm:$0xf] }
 0x4d4   : > { %v7047_v44 = vpop.f32.mrf.mxu2  ;;  %v6700_v30 = vpop.f32.mrf.mxu1  ;;  %v6235_v40 = vunpack.c.l.b16 %v6184_v28 }
 0x4d5   : > { %v7120_v41 = vadd.f32 %v7047_v44, %v6770_v50  ;;  %7285 = vrot.lane.b32.xlu2 %v7217_v37, %s12811_s20  ;;  %11743 = vmatmul.msk.bf16.gmra.mxu0 %vm658_vm3, %v6254_v43  ;;  %v11793_v43 = vrot.slane %v15949_v31, 11  ;;  %v6901_v50 = vrot.slane %v6899_v47, 4  ;;  %v7501_v37 = vld [vmem:[%s12943_s18 + $0x17c] sm:$0xf]  ;;  %v6187_v44 = vsel %vm14172_vm11, %v6185_v62, %v6186_v27  ;;  %v11698_v27 = vld [vmem:[%s12943_s18 + $0x4b8] sm:$0xf] }
 0x4d6   : > { %v6550_v31 = vsel %vm12946_vm4, %v11760_v60, %v6549_v12  ;;  %v7664_v35 = vrot.slane %v7501_v37, 5  ;;  %v11700_v37 = vld [vmem:[%s12943_s18 + $0x4c0] sm:$0xf] }
 0x4d7   : > { %v7153_v20 = vmul.f32 %v15845_v32, %v7120_v41  ;;  %11776 = vmatmul.msk.bf16.gmra.mxu1 %vm658_vm3, %v6620_v5  ;;  %v15967_v4 = vpop.f32.mrf.mxu3  ;;  %v6771_v5 = vadd.f32 %v6700_v30, %v6405_v2  ;;  %v11828_v41 = vrot.slane %v7499_v45, 9  ;;  %v6236_v30 = vunpack.c.l.b16 %v6187_v44 }
 0x4d8   : > { %11809 = vmatmul.msk.bf16.gmra.mxu2 %vm658_vm3, %v6970_v24  ;;  %v6553_v24 = vsel %vm12946_vm4, %v6551_v39, %v6552_v17  ;;  %v6900_v62 = vsel %vm14172_vm11, %v11793_v43, %v6899_v47  ;;  %v6903_v12 = vsel %vm14172_vm11, %v6901_v50, %v6902_v8  ;;  %v6601_v60 = vunpack.c.l.b16 %v6550_v31  ;;  %v11697_v8 = vld [vmem:[%s12943_s18 + $0x4b4] sm:$0xf] }
 0x4d9   : > { %v7186_v53 = vadd.f32 %v15850_v52, %v7153_v20  ;;  %v6602_v39 = vunpack.c.l.b16 %v6553_v24  ;;  %v6951_v17 = vunpack.c.l.b16 %v6900_v62  ;;  %v7662_v47 = vsel %vm12946_vm4, %v11828_v41, %v7661_v33 }
 0x4da   : > { %v6336_v58 = vpop.f32.mrf.mxu0  ;;  %v7665_v43 = vsel %vm12946_vm4, %v7663_v56, %v7664_v35  ;;  %v6255_v50 = vpack.c.b16 %v6236_v30, %v6235_v40  ;;  %v6190_v45 = vrot.slane %v11698_v27, 7  ;;  %v7708_v31 = vunpack.c.l.b16 %v7662_v47 }
 0x4db   : > { %v7218_v36 = vmax.f32 %v7186_v53, 0.0  ;;  %v6406_v2 = vadd.f32 %v6336_v58, %v15335_v7  ;;  %v6952_v53 = vunpack.c.l.b16 %v6903_v12  ;;  %v11699_v7 = vld [vmem:[%s12943_s18 + $0x4bc] sm:$0xf]  ;;  %v11701_v58 = vld [vmem:[%s12943_s18 + $0x4c4] sm:$0xf]  ;;  %v11728_v41 = vrot.slane %v11697_v8, 11 }
 0x4dc   : > { %v7050_v49 = vpop.f32.mrf.mxu2  ;;  %v6702_v63 = vpop.f32.mrf.mxu1  ;;  %11844 = vmatmul.msk.bf16.gmra.mxu3 %vm658_vm3, %v7726_v29  ;;  %v6556_v56 = vrot.slane %v11700_v37, 5  ;;  %v6192_v30 = vrot.slane %v6190_v45, 4  ;;  %v6193_v62 = vrot.slane %v11699_v7, 7  ;;  %v6906_v12 = vrot.slane %v11701_v58, 7 }
 0x4dd   : > { %v7121_v14 = vadd.f32 %v7050_v49, %v6771_v5  ;;  %7287 = vrot.lane.b32.xlu0 %v7218_v36, %s12811_s20  ;;  %v6772_v5 = vadd.f32 %v6702_v63, %v6406_v2  ;;  %v7709_v49 = vunpack.c.l.b16 %v7665_v43  ;;  %v6971_v33 = vpack.c.b16 %v6952_v53, %v6951_v17  ;;  %v11702_v63 = vld [vmem:[%s12943_s18 + $0x4c8] sm:$0xf] }
 0x4de   : > { %v6191_v53 = vsel %vm14172_vm11, %v11728_v41, %v6190_v45  ;;  %v6558_v47 = vrot.slane %v6556_v56, 4  ;;  %v6559_v43 = vrot.slane %v11701_v58, 5  ;;  %v6908_v8 = vrot.slane %v6906_v12, 4 }
 0x4df   : > { %v7154_v20 = vmul.f32 %v15845_v32, %v7121_v14  ;;  %v15991_v28 = vpop.f32.mrf.mxu3  ;;  %v6621_v14 = vpack.c.b16 %v6602_v39, %v6601_v60  ;;  %v7727_v2 = vpack.c.b16 %v7709_v49, %v7708_v31  ;;  %v11761_v60 = vrot.slane %v11699_v7, 9  ;;  %v7507_v39 = vld [vmem:[%s12943_s18 + $0x194] sm:$0xf] }
 0x4e1   : > { %v7187_v29 = vadd.f32 %v15850_v52, %v7154_v20 }
 0x4e2   : > { %v6339_v44 = vpop.f32.mrf.mxu0 }
 0x4e3   : > { %v7219_v36 = vmax.f32 %v7187_v29, 0.0  ;;  %v6407_v20 = vadd.f32 %v6339_v44, %v15356_v22  ;;  %v11794_v29 = vrot.slane %v11700_v37, 11  ;;  %v6194_v22 = vsel %vm14172_vm11, %v6192_v30, %v6193_v62 }
 0x4e4   : > { %v7052_v24 = vpop.f32.mrf.mxu2  ;;  %v6705_v40 = vpop.f32.mrf.mxu1  ;;  %v6909_v44 = vrot.slane %v11702_v63, 7  ;;  %v6238_v58 = vunpack.c.l.b16 %v6194_v22  ;;  %v6557_v37 = vsel %vm12946_vm4, %v11761_v60, %v6556_v56 }
 0x4e5   : > { %v7122_v35 = vadd.f32 %v7052_v24, %v6772_v5  ;;  %7289 = vrot.lane.b32.xlu1 %v7219_v36, %s12811_s20  ;;  %11744 = vmatmul.msk.bf16.gmra.mxu0 %vm658_vm3, %v6255_v50  ;;  %v7506_v5 = vld [vmem:[%s12943_s18 + $0x190] sm:$0xf]  ;;  %v7668_v36 = vrot.slane %v7507_v39, 5  ;;  %v6773_v31 = vadd.f32 %v6705_v40, %v6407_v20  ;;  %v7508_v24 = vld [vmem:[%s12943_s18 + $0x198] sm:$0xf]  ;;  %v6907_v40 = vsel %vm14172_vm11, %v11794_v29, %v6906_v12 }
 0x4e6   : > { %v6910_v30 = vsel %vm14172_vm11, %v6908_v8, %v6909_v44  ;;  %v11829_v62 = vrot.slane %v7506_v5, 9  ;;  %v7671_v56 = vrot.slane %v7508_v24, 5  ;;  %v11703_v12 = vld [vmem:[%s12943_s18 + $0x4d0] sm:$0xf]  ;;  %v11706_v29 = vld [vmem:[%s12943_s18 + $0x4dc] sm:$0xf] }
 0x4e7   : > { %v7155_v27 = vmul.f32 %v15845_v32, %v7122_v35  ;;  %11777 = vmatmul.msk.bf16.gmra.mxu1 %vm658_vm3, %v6621_v14  ;;  %v16009_v17 = vpop.f32.mrf.mxu3  ;;  %v6237_v14 = vunpack.c.l.b16 %v6191_v53  ;;  %v7670_v63 = vrot.slane %v7668_v36, 4  ;;  %v6603_v53 = vunpack.c.l.b16 %v6557_v37  ;;  %v11707_v5 = vld [vmem:[%s12943_s18 + $0x4e0] sm:$0xf] }
 0x4e8   : > { %11810 = vmatmul.msk.bf16.gmra.mxu2 %vm658_vm3, %v6971_v33  ;;  %v6560_v33 = vsel %vm12946_vm4, %v6558_v47, %v6559_v43  ;;  %v6953_v47 = vunpack.c.l.b16 %v6907_v40  ;;  %v6954_v43 = vunpack.c.l.b16 %v6910_v30  ;;  %v7669_v8 = vsel %vm12946_vm4, %v11829_v62, %v7668_v36 }
 0x4e9   : > { %v7188_v50 = vadd.f32 %v15850_v52, %v7155_v27  ;;  %v11704_v27 = vld [vmem:[%s12943_s18 + $0x4d4] sm:$0xf]  ;;  %v6256_v22 = vpack.c.b16 %v6238_v58, %v6237_v14  ;;  %v6563_v37 = vrot.slane %v11706_v29, 5  ;;  %v7710_v14 = vunpack.c.l.b16 %v7669_v8 }
 0x4ea   : > { %v6341_v7 = vpop.f32.mrf.mxu0  ;;  %v6197_v44 = vrot.slane %v11704_v27, 7  ;;  %v6972_v40 = vpack.c.b16 %v6954_v43, %v6953_v47  ;;  %v6913_v58 = vrot.slane %v11707_v5, 7 }
 0x4eb   : > { %v7220_v49 = vmax.f32 %v7188_v50, 0.0  ;;  %v6408_v60 = vadd.f32 %v6341_v7, %v15371_v42  ;;  %v7672_v42 = vsel %vm12946_vm4, %v7670_v63, %v7671_v56  ;;  %v11705_v7 = vld [vmem:[%s12943_s18 + $0x4d8] sm:$0xf]  ;;  %v6565_v47 = vrot.slane %v6563_v37, 4 }
 0x4ec   : > { %v7055_v45 = vpop.f32.mrf.mxu2  ;;  %v6707_v35 = vpop.f32.mrf.mxu1  ;;  %11845 = vmatmul.msk.bf16.gmra.mxu3 %vm658_vm3, %v7727_v2  ;;  %v6604_v2 = vunpack.c.l.b16 %v6560_v33  ;;  %v7711_v62 = vunpack.c.l.b16 %v7672_v42  ;;  %v6199_v63 = vrot.slane %v6197_v44, 4  ;;  %v6200_v56 = vrot.slane %v11705_v7, 7 }
 0x4ed   : > { %v7123_v41 = vadd.f32 %v7055_v45, %v6773_v31  ;;  %7291 = vrot.lane.b32.xlu2 %v7220_v49, %s12811_s20  ;;  %v6774_v49 = vadd.f32 %v6707_v35, %v6408_v60  ;;  %v11729_v45 = vrot.slane %v11703_v12, 11  ;;  %v11708_v35 = vld [vmem:[%s12943_s18 + $0x4e4] sm:$0xf]  ;;  %v11762_v27 = vrot.slane %v11705_v7, 9 }
 0x4ee   : > { %v6566_v12 = vrot.slane %v11707_v5, 5  ;;  %v6916_v8 = vrot.slane %v11708_v35, 7  ;;  %v7728_v7 = vpack.c.b16 %v7711_v62, %v7710_v14 }
 0x4ef   : > { %v7156_v20 = vmul.f32 %v15845_v32, %v7123_v41  ;;  %v16032_v39 = vpop.f32.mrf.mxu3  ;;  %v6622_v41 = vpack.c.b16 %v6604_v2, %v6603_v53  ;;  %v6198_v2 = vsel %vm14172_vm11, %v11729_v45, %v6197_v44  ;;  %v7513_v44 = vld [vmem:[%s12943_s18 + $0x1ac] sm:$0xf] }
 0x4f1   : > { %v7189_v50 = vadd.f32 %v15850_v52, %v7156_v20  ;;  %v7514_v20 = vld [vmem:[%s12943_s18 + $0x1b0] sm:$0xf] }
 0x4f2   : > { %v6344_v31 = vpop.f32.mrf.mxu0 }
 0x4f3   : > { %v7221_v24 = vmax.f32 %v7189_v50, 0.0  ;;  %v6409_v53 = vadd.f32 %v6344_v31, %v15394_v16  ;;  %v11795_v50 = vrot.slane %v11706_v29, 11  ;;  %v6201_v16 = vsel %vm14172_vm11, %v6199_v63, %v6200_v56 }
 0x4f4   : > { %v7057_v33 = vpop.f32.mrf.mxu2  ;;  %v6710_v36 = vpop.f32.mrf.mxu1  ;;  %v7675_v31 = vrot.slane %v7514_v20, 5  ;;  %v6564_v29 = vsel %vm12946_vm4, %v11762_v27, %v6563_v37  ;;  %v11830_v56 = vrot.slane %v7513_v44, 9  ;;  %v11710_v27 = vld [vmem:[%s12943_s18 + $0x4f0] sm:$0xf] }
 0x4f5   : > { %v7124_v30 = vadd.f32 %v7057_v33, %v6774_v49  ;;  %7293 = vrot.lane.b32.xlu0 %v7221_v24, %s12811_s20  ;;  %11745 = vmatmul.msk.bf16.gmra.mxu0 %vm658_vm3, %v6256_v22  ;;  %v6915_v22 = vrot.slane %v6913_v58, 4  ;;  %v7515_v24 = vld [vmem:[%s12943_s18 + $0x1b4] sm:$0xf]  ;;  %v6775_v45 = vadd.f32 %v6710_v36, %v6409_v53  ;;  %v6914_v14 = vsel %vm14172_vm11, %v11795_v50, %v6913_v58 }
 0x4f6   : > { %v7677_v37 = vrot.slane %v7675_v31, 4  ;;  %v7678_v35 = vrot.slane %v7515_v24, 5 }
 0x4f7   : > { %v7157_v60 = vmul.f32 %v15845_v32, %v7124_v30  ;;  %11778 = vmatmul.msk.bf16.gmra.mxu1 %vm658_vm3, %v6622_v41  ;;  %v16052_v43 = vpop.f32.mrf.mxu3  ;;  %v6239_v41 = vunpack.c.l.b16 %v6198_v2  ;;  %v6240_v30 = vunpack.c.l.b16 %v6201_v16  ;;  %v6917_v62 = vsel %vm14172_vm11, %v6915_v22, %v6916_v8  ;;  %v11712_v16 = vld [vmem:[%s12943_s18 + $0x4f8] sm:$0xf] }
 0x4f8   : > { %11811 = vmatmul.msk.bf16.gmra.mxu2 %vm658_vm3, %v6972_v40  ;;  %v6567_v40 = vsel %vm12946_vm4, %v6565_v47, %v6566_v12  ;;  %v6955_v12 = vunpack.c.l.b16 %v6914_v14  ;;  %v6956_v50 = vunpack.c.l.b16 %v6917_v62  ;;  %v7676_v8 = vsel %vm12946_vm4, %v11830_v56, %v7675_v31 }
 0x4f9   : > { %v7190_v42 = vadd.f32 %v15850_v52, %v7157_v60  ;;  %v6605_v60 = vunpack.c.l.b16 %v6564_v29  ;;  %v6606_v53 = vunpack.c.l.b16 %v6567_v40  ;;  %v6257_v47 = vpack.c.b16 %v6240_v30, %v6239_v41  ;;  %v11713_v41 = vld [vmem:[%s12943_s18 + $0x4fc] sm:$0xf] }
 0x4fa   : > { %v6346_v49 = vpop.f32.mrf.mxu0  ;;  %v7712_v30 = vunpack.c.l.b16 %v7676_v8  ;;  %v6570_v14 = vrot.slane %v11712_v16, 5 }
 0x4fb   : > { %v7222_v33 = vmax.f32 %v7190_v42, 0.0  ;;  %v6410_v58 = vadd.f32 %v6346_v49, %v15418_v11  ;;  %v7679_v42 = vsel %vm12946_vm4, %v7677_v37, %v7678_v35  ;;  %v11709_v11 = vld [vmem:[%s12943_s18 + $0x4ec] sm:$0xf]  ;;  %v11711_v49 = vld [vmem:[%s12943_s18 + $0x4f4] sm:$0xf] }
 0x4fc   : > { %v7060_v5 = vpop.f32.mrf.mxu2  ;;  %v6712_v36 = vpop.f32.mrf.mxu1  ;;  %11846 = vmatmul.msk.bf16.gmra.mxu3 %vm658_vm3, %v7728_v7  ;;  %v6204_v7 = vrot.slane %v11710_v27, 7  ;;  %v7713_v40 = vunpack.c.l.b16 %v7679_v42  ;;  %v6207_v37 = vrot.slane %v11711_v49, 7  ;;  %v11714_v35 = vld [vmem:[%s12943_s18 + $0x500] sm:$0xf] }
 0x4fd   : > { %v7125_v63 = vadd.f32 %v7060_v5, %v6775_v45  ;;  %7295 = vrot.lane.b32.xlu1 %v7222_v33, %s12811_s20  ;;  %v6776_v24 = vadd.f32 %v6712_v36, %v6410_v58  ;;  %v6623_v33 = vpack.c.b16 %v6606_v53, %v6605_v60  ;;  %v6973_v5 = vpack.c.b16 %v6956_v50, %v6955_v12 }
 0x4fe   : > { %v6206_v56 = vrot.slane %v6204_v7, 4  ;;  %v6920_v36 = vrot.slane %v11713_v41, 7  ;;  %v11763_v58 = vrot.slane %v11711_v49, 9  ;;  %v6572_v53 = vrot.slane %v6570_v14, 4 }
 0x4ff   : > { %v7158_v20 = vmul.f32 %v15845_v32, %v7125_v63  ;;  %v16073_v2 = vpop.f32.mrf.mxu3  ;;  %v11730_v63 = vrot.slane %v11709_v11, 11  ;;  %v6573_v12 = vrot.slane %v11713_v41, 5  ;;  %v11796_v50 = vrot.slane %v11712_v16, 11  ;;  %v12075_v16 = vld [vmem:[%s17335_s3 + $0x2e] sm:$0x3] }
 0x500   : > { %v7729_v8 = vpack.c.b16 %v7713_v40, %v7712_v30  ;;  %v12334_v11 = vld [vmem:[%s17335_s3 + $0x34] sm:$0x3] }
 0x501   : > { %v7191_v22 = vadd.f32 %v15850_v52, %v7158_v20  ;;  %v6205_v42 = vsel %vm14172_vm11, %v11730_v63, %v6204_v7  ;;  %v9031_v7 = vsel %vm707_vm0, %v12075_v16, 0 }
 0x502   : > { %v6349_v44 = vpop.f32.mrf.mxu0  ;;  %9040 = vmatpush.bf16.msra.mxu0 %v9031_v7  ;;  %v6241_v30 = vunpack.c.l.b16 %v6205_v42 }
 0x503   : > { %v7223_v45 = vmax.f32 %v7191_v22, 0.0  ;;  %v6411_v20 = vadd.f32 %v6349_v44, %v15453_v34  ;;  %v6923_v22 = vrot.slane %v11714_v35, 7  ;;  %v6208_v34 = vsel %vm14172_vm11, %v6206_v56, %v6207_v37  ;;  %v12301_v44 = vld [vmem:[%s17335_s3 + $0x32] sm:$0x3] }
 0x504   : > { %v7062_v29 = vpop.f32.mrf.mxu2  ;;  %v6715_v31 = vpop.f32.mrf.mxu1  ;;  %v6242_v63 = vunpack.c.l.b16 %v6208_v34  ;;  %v6571_v56 = vsel %vm12946_vm4, %v11763_v58, %v6570_v14  ;;  %v6574_v37 = vsel %vm12946_vm4, %v6572_v53, %v6573_v12  ;;  %v7411_v34 = vld [vmem:[%s12943_s18 + $0x14] sm:$0xf] }
 0x505   : > { %v7126_v62 = vadd.f32 %v7062_v29, %v6776_v24  ;;  %7297 = vrot.lane.b32.xlu2 %v7223_v45, %s12811_s20  ;;  %11746 = vmatmul.msk.bf16.gmra.mxu0 %vm658_vm3, %v6257_v47  ;;  %v6922_v24 = vrot.slane %v6920_v36, 4  ;;  %v9780_v45 = vsel %vm707_vm0, %v12301_v44, 0  ;;  %v6777_v41 = vadd.f32 %v6715_v31, %v6411_v20  ;;  %v17423_v20 = vld [vmem:[#allocation23_spill] sm:$0xff] }
 0x506   : > { %9789 = vmatpush.bf16.msra.mxu2 %v9780_v45  ;;  %v6921_v31 = vsel %vm14172_vm11, %v11796_v50, %v6920_v36  ;;  %v6607_v14 = vunpack.c.l.b16 %v6571_v56  ;;  %v6608_v58 = vunpack.c.l.b16 %v6574_v37  ;;  %v6258_v36 = vpack.c.b16 %v6242_v63, %v6241_v30  ;;  %v12679_v56 = vld [vmem:[%s12943_s18 + $0x10] sm:$0xf] }
 0x507   : > { %v7159_v27 = vmul.f32 %v15845_v32, %v7126_v62  ;;  %11779 = vmatmul.msk.bf16.gmra.mxu1 %vm658_vm3, %v6623_v33  ;;  %v16090_v60 = vpop.f32.mrf.mxu3  ;;  %v10146_v33 = vsel %vm707_vm0, %v12334_v11, 0  ;;  %v6924_v35 = vsel %vm14172_vm11, %v6922_v24, %v6923_v22  ;;  %v6957_v50 = vunpack.c.l.b16 %v6921_v31 }
 0x508   : > { %11812 = vmatmul.msk.bf16.gmra.mxu2 %vm658_vm3, %v6973_v5  ;;  %10155 = vmatpush.bf16.msra.mxu3 %v10146_v33  ;;  %v6958_v6 = vunpack.c.l.b16 %v6924_v35  ;;  %v8124_v33 = vrot.slane %v7411_v34, 6  ;;  %v11928_v37 = vrot.slane %v12679_v56, 10 }
 0x509   : > { %v7192_v47 = vadd.f32 %v15850_v52, %v7159_v27 }
 0x50a   : > { %v6351_v49 = vpop.f32.mrf.mxu0  ;;  %v6974_v7 = vpack.c.b16 %v6958_v6, %v6957_v50  ;;  %v8126_v31 = vrot.slane %v8124_v33, 4 }
 0x50b   : > { %v7224_v29 = vmax.f32 %v7192_v47, 0.0  ;;  %v6412_v47 = vadd.f32 %v6351_v49, %v17423_v20  ;;  %v6624_v49 = vpack.c.b16 %v6608_v58, %v6607_v14 }
 0x50c   : > { %v7065_v5 = vpop.f32.mrf.mxu2  ;;  %v6717_v62 = vpop.f32.mrf.mxu1  ;;  %11847 = vmatmul.msk.bf16.gmra.mxu3 %vm658_vm3, %v7729_v8  ;;  %v12204_v8 = vld [vmem:[%s17335_s3 + $0x30] sm:$0x3] }
 0x50d   : > { %v7127_v40 = vadd.f32 %v7065_v5, %v6777_v41  ;;  %7299 = vrot.lane.b32.xlu0 %v7224_v29, %s12811_s20  ;;  %v9398_v53 = vsel %vm707_vm0, %v12204_v8, 0  ;;  %v6778_v44 = vadd.f32 %v6717_v62, %v6412_v47  ;;  %v7412_v41 = vld [vmem:[%s12943_s18 + $0x18] sm:$0x3]  ;;  %v17424_v5 = vld [vmem:[#allocation22_spill] sm:$0xff] }
 0x50e   : > { %9407 = vmatpush.bf16.msra.mxu1 %v9398_v53  ;;  %v8127_v35 = vrot.slane %v7412_v41, 6  ;;  %v17425_v53 = vld [vmem:[#allocation6_spill] sm:$0xff] }
 0x50f   : > { %v7160_v27 = vmul.f32 %v15845_v32, %v7127_v40  ;;  %v16125_v42 = vpop.f32.mrf.mxu3 }
 0x510   : > { %v8128_v50 = vsel %vm12962_vm6, %v8126_v31, %v8127_v35 }
 0x511   : > { %v7193_v12 = vadd.f32 %v15850_v52, %v7160_v27 }
 0x512   : > { %v6354_v22 = vpop.f32.mrf.mxu0 }
 0x513   : > { %v7225_v16 = vmax.f32 %v7193_v12, 0.0  ;;  %v6413_v30 = vadd.f32 %v6354_v22, %v17424_v5 }
 0x514   : > { %v7067_v11 = vpop.f32.mrf.mxu2  ;;  %v6720_v45 = vpop.f32.mrf.mxu1 }
 0x515   : > { %v7128_v24 = vadd.f32 %v7067_v11, %v6778_v44  ;;  %7301 = vrot.lane.b32.xlu1 %v7225_v16, %s12811_s20  ;;  %11747 = vmatmul.msk.bf16.gmra.mxu0 %vm658_vm3, %v6258_v36  ;;  %v6779_v20 = vadd.f32 %v6720_v45, %v6413_v30  ;;  %v8125_v36 = vsel %vm12962_vm6, %v11928_v37, %v8124_v33  ;;  %v8237_v16 = vunpack.c.l.b16 %v8128_v50  ;;  %v7418_v45 = vld [vmem:[%s12943_s18 + $0x30] sm:$0xf]  ;;  %v12356_v30 = vld [vmem:[%s12943_s18 + $0x1f8] sm:$0xff] }
 0x516   : > { %v8236_v44 = vunpack.c.l.b16 %v8125_v36 }
 0x517   : > { %v7161_v29 = vmul.f32 %v15845_v32, %v7128_v24  ;;  %v7280_v40 = vpop.permute.xlu2 %7279  ;;  %11780 = vmatmul.msk.bf16.gmra.mxu1 %vm658_vm3, %v6624_v49  ;;  %v16138_v62 = vpop.f32.mrf.mxu3  ;;  %v12420_v49 = vld [vmem:[%s12943_s18] sm:$0xff] }
 0x518   : > { %7375 = vst.msk [vmem:[%s13452_s19 + $0x8] sm:$0xff] %vm7373_vm13, %v7280_v40  ;;  %11813 = vmatmul.msk.bf16.gmra.mxu2 %vm658_vm3, %v6974_v7  ;;  %v8131_v40 = vrot.slane %v7418_v45, 6 }
 0x519   : > { %v7194_v63 = vadd.f32 %v15850_v52, %v7161_v29  ;;  %v8268_v29 = vpack.c.b16 %v8237_v16, %v8236_v44 }
 0x51a   : > { %v6356_v27 = vpop.f32.mrf.mxu0 }
 0x51b   : > { %v7226_v47 = vmax.f32 %v7194_v63, 0.0  ;;  %v6414_v22 = vadd.f32 %v6356_v27, %v15519_v26  ;;  %v7419_v63 = vld [vmem:[%s12943_s18 + $0x34] sm:$0x3] }
 0x51c   : > { %v7070_v8 = vpop.f32.mrf.mxu2  ;;  %v6722_v58 = vpop.f32.mrf.mxu1  ;;  %12043 = vmatmul.msk.bf16.vlgmr.msrb.gmra.mxu3 %vm658_vm3, %v17425_v53 }
 0x51d   : > { %v7129_v14 = vadd.f32 %v7070_v8, %v6779_v20  ;;  %7303 = vrot.lane.b32.xlu2 %v7226_v47, %s12811_s20  ;;  %v6780_v7 = vadd.f32 %v6722_v58, %v6414_v22  ;;  %v12680_v20 = vld [vmem:[%s12943_s18 + $0x2c] sm:$0xf]  ;;  %v8133_v8 = vrot.slane %v8131_v40, 4  ;;  %v17427_v22 = vld [vmem:[#allocation7_spill] sm:$0xff] }
 0x51e   : > { %v11929_v47 = vrot.slane %v12680_v20, 10  ;;  %v7426_v20 = vld [vmem:[%s12943_s18 + $0x50] sm:$0x3] }
 0x51f   : > { %v7162_v6 = vmul.f32 %v15845_v32, %v7129_v14  ;;  %v16152_v34 = vpop.f32.mrf.mxu3  ;;  %v8134_v14 = vrot.slane %v7419_v63, 6 }
 0x520   : > { %v8132_v44 = vsel %vm12962_vm6, %v11929_v47, %v8131_v40 }
 0x521   : > { %v7195_v11 = vadd.f32 %v15850_v52, %v7162_v6  ;;  %v8135_v16 = vsel %vm12962_vm6, %v8133_v8, %v8134_v14 }
 0x522   : > { %v6359_v24 = vpop.f32.mrf.mxu0 }
 0x523   : > { %v7227_v33 = vmax.f32 %v7195_v11, 0.0  ;;  %v6415_v37 = vadd.f32 %v6359_v24, %v15538_v51 }
 0x524   : > { %v7072_v41 = vpop.f32.mrf.mxu2  ;;  %v6725_v26 = vpop.f32.mrf.mxu1 }
 0x525   : > { %v7130_v5 = vadd.f32 %v7072_v41, %v6780_v7  ;;  %7305 = vrot.lane.b32.xlu0 %v7227_v33, %s12811_s20  ;;  %11912 = vmatmul.msk.bf16.vlgmr.msrb.gmra.mxu0 %vm658_vm3, %v12420_v49  ;;  %v6781_v53 = vadd.f32 %v6725_v26, %v6415_v37  ;;  %v8238_v7 = vunpack.c.l.b16 %v8132_v44  ;;  %v8239_v33 = vunpack.c.l.b16 %v8135_v16  ;;  %v7425_v26 = vld [vmem:[%s12943_s18 + $0x4c] sm:$0xf] }
 0x527   : > { %v7163_v56 = vmul.f32 %v15845_v32, %v7130_v5  ;;  %v7278_v31 = vpop.permute.xlu1 %7277  ;;  %11945 = vmatmul.msk.bf16.vlgmr.msrb.gmra.mxu1 %vm658_vm3, %v8268_v29  ;;  %v16166_v35 = vpop.f32.mrf.mxu3  ;;  %v12421_v29 = vld [vmem:[%s12943_s18 + $0x1c] sm:$0xff] }
 0x528   : > { %7374 = vst.msk [vmem:[%s13452_s19] sm:$0xff] %vm7373_vm13, %v7278_v31  ;;  %12026 = vmatmul.msk.bf16.vlgmr.msrb.gmra.mxu2 %vm658_vm3, %v12356_v30  ;;  %v12358_v31 = vld [vmem:[%s12943_s18 + $0x214] sm:$0xff] }
 0x529   : > { %v7196_v27 = vadd.f32 %v15850_v52, %v7163_v56  ;;  %v8269_v56 = vpack.c.b16 %v8239_v33, %v8238_v7 }
 0x52a   : > { %v6361_v58 = vpop.f32.mrf.mxu0 }
 0x52b   : > { %v7228_v36 = vmax.f32 %v7196_v27, 0.0  ;;  %v6416_v49 = vadd.f32 %v6361_v58, %v15556_v55  ;;  %v8138_v27 = vrot.slane %v7425_v26, 6 }
 0x52c   : > { %v7075_v51 = vpop.f32.mrf.mxu2  ;;  %v6727_v6 = vpop.f32.mrf.mxu1  ;;  %12044 = vmatmul.msk.bf16.gmra.mxu3 %vm658_vm3, %v17427_v22 }
 0x52d   : > { %v7131_v50 = vadd.f32 %v7075_v51, %v6781_v53  ;;  %7307 = vrot.lane.b32.xlu1 %v7228_v36, %s12811_s20  ;;  %v6782_v30 = vadd.f32 %v6727_v6, %v6416_v49  ;;  %v12681_v36 = vld [vmem:[%s12943_s18 + $0x48] sm:$0xf]  ;;  %v8141_v6 = vrot.slane %v7426_v20, 6 }
 0x52e   : > { %v11930_v51 = vrot.slane %v12681_v36, 10  ;;  %v7433_v36 = vld [vmem:[%s12943_s18 + $0x6c] sm:$0x3] }
 0x52f   : > { %v7164_v11 = vmul.f32 %v15845_v32, %v7131_v50  ;;  %v7286_v24 = vpop.permute.xlu2 %7285  ;;  %v16182_v45 = vpop.f32.mrf.mxu3  ;;  %v8140_v50 = vrot.slane %v8138_v27, 4 }
 0x530   : > { %7378 = vst.msk [vmem:[%s13452_s19 + $0x20] sm:$0xff] %vm7373_vm13, %v7286_v24  ;;  %v17428_v24 = vld [vmem:[#allocation8_spill] sm:$0xff]  ;;  %v8139_v7 = vsel %vm12962_vm6, %v11930_v51, %v8138_v27 }
 0x531   : > { %v7197_v41 = vadd.f32 %v15850_v52, %v7164_v11  ;;  %v8142_v33 = vsel %vm12962_vm6, %v8140_v50, %v8141_v6 }
 0x532   : > { %v6364_v5 = vpop.f32.mrf.mxu0 }
 0x533   : > { %v7229_v40 = vmax.f32 %v7197_v41, 0.0  ;;  %v6417_v8 = vadd.f32 %v6364_v5, %v15576_v23 }
 0x534   : > { %v7077_v63 = vpop.f32.mrf.mxu2  ;;  %v6730_v37 = vpop.f32.mrf.mxu1 }
 0x535   : > { %v7132_v55 = vadd.f32 %v7077_v63, %v6782_v30  ;;  %7309 = vrot.lane.b32.xlu2 %v7229_v40, %s12811_s20  ;;  %11913 = vmatmul.msk.bf16.gmra.mxu0 %vm658_vm3, %v12421_v29  ;;  %v6783_v44 = vadd.f32 %v6730_v37, %v6417_v8  ;;  %v8240_v30 = vunpack.c.l.b16 %v8139_v7  ;;  %v8241_v40 = vunpack.c.l.b16 %v8142_v33  ;;  %v7432_v37 = vld [vmem:[%s12943_s18 + $0x68] sm:$0xf] }
 0x537   : > { %v7165_v47 = vmul.f32 %v15845_v32, %v7132_v55  ;;  %v7282_v14 = vpop.permute.xlu0 %7281  ;;  %11946 = vmatmul.msk.bf16.gmra.mxu1 %vm658_vm3, %v8269_v56  ;;  %v16196_v58 = vpop.f32.mrf.mxu3  ;;  %v12422_v56 = vld [vmem:[%s12943_s18 + $0x38] sm:$0xff] }
 0x538   : > { %7376 = vst.msk [vmem:[%s13452_s19 + $0x10] sm:$0xff] %vm7373_vm13, %v7282_v14  ;;  %12027 = vmatmul.msk.bf16.gmra.mxu2 %vm658_vm3, %v12358_v31  ;;  %v12360_v14 = vld [vmem:[%s12943_s18 + $0x230] sm:$0xff] }
 0x539   : > { %v7198_v53 = vadd.f32 %v15850_v52, %v7165_v47  ;;  %v8270_v47 = vpack.c.b16 %v8241_v40, %v8240_v30 }
 0x53a   : > { %v6366_v22 = vpop.f32.mrf.mxu0 }
 0x53b   : > { %v7230_v16 = vmax.f32 %v7198_v53, 0.0  ;;  %v6418_v29 = vadd.f32 %v6366_v22, %v15598_v21  ;;  %v8145_v53 = vrot.slane %v7432_v37, 6 }
 0x53c   : > { %v7080_v23 = vpop.f32.mrf.mxu2  ;;  %v6732_v49 = vpop.f32.mrf.mxu1  ;;  %12045 = vmatmul.msk.bf16.gmra.mxu3 %vm658_vm3, %v17428_v24 }
 0x53d   : > { %v7133_v11 = vadd.f32 %v7080_v23, %v6783_v44  ;;  %7311 = vrot.lane.b32.xlu0 %v7230_v16, %s12811_s20  ;;  %v6784_v31 = vadd.f32 %v6732_v49, %v6418_v29  ;;  %v12682_v16 = vld [vmem:[%s12943_s18 + $0x64] sm:$0xf]  ;;  %v8148_v49 = vrot.slane %v7433_v36, 6 }
 0x53e   : > { %v11931_v23 = vrot.slane %v12682_v16, 10  ;;  %v7440_v16 = vld [vmem:[%s12943_s18 + $0x88] sm:$0x3] }
 0x53f   : > { %v7166_v41 = vmul.f32 %v15845_v32, %v7133_v11  ;;  %v7284_v5 = vpop.permute.xlu1 %7283  ;;  %v16212_v26 = vpop.f32.mrf.mxu3  ;;  %v8147_v11 = vrot.slane %v8145_v53, 4 }
 0x540   : > { %7377 = vst.msk [vmem:[%s13452_s19 + $0x18] sm:$0xff] %vm7373_vm13, %v7284_v5  ;;  %v17429_v5 = vld [vmem:[#allocation9_spill] sm:$0xff]  ;;  %v8146_v30 = vsel %vm12962_vm6, %v11931_v23, %v8145_v53 }
 0x541   : > { %v7199_v63 = vadd.f32 %v15850_v52, %v7166_v41  ;;  %v8149_v40 = vsel %vm12962_vm6, %v8147_v11, %v8148_v49 }
 0x542   : > { %v6369_v55 = vpop.f32.mrf.mxu0 }
 0x543   : > { %v7231_v27 = vmax.f32 %v7199_v63, 0.0  ;;  %v6419_v50 = vadd.f32 %v6369_v55, %v15617_v59 }
 0x544   : > { %v7082_v20 = vpop.f32.mrf.mxu2  ;;  %v6735_v8 = vpop.f32.mrf.mxu1 }
 0x545   : > { %v7134_v21 = vadd.f32 %v7082_v20, %v6784_v31  ;;  %7313 = vrot.lane.b32.xlu1 %v7231_v27, %s12811_s20  ;;  %11914 = vmatmul.msk.bf16.gmra.mxu0 %vm658_vm3, %v12422_v56  ;;  %v6785_v7 = vadd.f32 %v6735_v8, %v6419_v50  ;;  %v8242_v31 = vunpack.c.l.b16 %v8146_v30  ;;  %v8243_v27 = vunpack.c.l.b16 %v8149_v40  ;;  %v7439_v8 = vld [vmem:[%s12943_s18 + $0x84] sm:$0xf] }
 0x547   : > { %v7167_v51 = vmul.f32 %v15845_v32, %v7134_v21  ;;  %v7292_v6 = vpop.permute.xlu2 %7291  ;;  %11947 = vmatmul.msk.bf16.gmra.mxu1 %vm658_vm3, %v8270_v47  ;;  %v16226_v22 = vpop.f32.mrf.mxu3  ;;  %v12423_v47 = vld [vmem:[%s12943_s18 + $0x54] sm:$0xff] }
 0x548   : > { %7381 = vst.msk [vmem:[%s13452_s19 + $0x38] sm:$0xff] %vm7373_vm13, %v7292_v6  ;;  %12028 = vmatmul.msk.bf16.gmra.mxu2 %vm658_vm3, %v12360_v14  ;;  %v12362_v6 = vld [vmem:[%s12943_s18 + $0x24c] sm:$0xff] }
 0x549   : > { %v7200_v44 = vadd.f32 %v15850_v52, %v7167_v51  ;;  %v8271_v51 = vpack.c.b16 %v8243_v27, %v8242_v31 }
 0x54a   : > { %v6371_v24 = vpop.f32.mrf.mxu0 }
 0x54b   : > { %v7232_v33 = vmax.f32 %v7200_v44, 0.0  ;;  %v6420_v56 = vadd.f32 %v6371_v24, %v15635_v3  ;;  %v8152_v44 = vrot.slane %v7439_v8, 6 }
 0x54c   : > { %v7085_v59 = vpop.f32.mrf.mxu2  ;;  %v6737_v29 = vpop.f32.mrf.mxu1  ;;  %12046 = vmatmul.msk.bf16.gmra.mxu3 %vm658_vm3, %v17429_v5 }
 0x54d   : > { %v7135_v41 = vadd.f32 %v7085_v59, %v6785_v7  ;;  %7315 = vrot.lane.b32.xlu2 %v7232_v33, %s12811_s20  ;;  %v6786_v14 = vadd.f32 %v6737_v29, %v6420_v56  ;;  %v12683_v33 = vld [vmem:[%s12943_s18 + $0x80] sm:$0xf]  ;;  %v8155_v29 = vrot.slane %v7440_v16, 6 }
 0x54e   : > { %v11932_v59 = vrot.slane %v12683_v33, 10  ;;  %v7447_v33 = vld [vmem:[%s12943_s18 + $0xa4] sm:$0x3] }
 0x54f   : > { %v7168_v63 = vmul.f32 %v15845_v32, %v7135_v41  ;;  %v7288_v55 = vpop.permute.xlu0 %7287  ;;  %v16242_v37 = vpop.f32.mrf.mxu3  ;;  %v8154_v41 = vrot.slane %v8152_v44, 4 }
 0x550   : > { %7379 = vst.msk [vmem:[%s13452_s19 + $0x28] sm:$0xff] %vm7373_vm13, %v7288_v55  ;;  %v17430_v55 = vld [vmem:[#allocation10_spill] sm:$0xff]  ;;  %v8153_v31 = vsel %vm12962_vm6, %v11932_v59, %v8152_v44 }
 0x551   : > { %v7201_v20 = vadd.f32 %v15850_v52, %v7168_v63  ;;  %v8156_v27 = vsel %vm12962_vm6, %v8154_v41, %v8155_v29 }
 0x552   : > { %v6374_v21 = vpop.f32.mrf.mxu0 }
 0x553   : > { %v7233_v53 = vmax.f32 %v7201_v20, 0.0  ;;  %v6421_v11 = vadd.f32 %v6374_v21, %v15655_v13 }
 0x554   : > { %v7087_v36 = vpop.f32.mrf.mxu2  ;;  %v6740_v50 = vpop.f32.mrf.mxu1 }
 0x555   : > { %v7136_v3 = vadd.f32 %v7087_v36, %v6786_v14  ;;  %7317 = vrot.lane.b32.xlu0 %v7233_v53, %s12811_s20  ;;  %11915 = vmatmul.msk.bf16.gmra.mxu0 %vm658_vm3, %v12423_v47  ;;  %v6787_v30 = vadd.f32 %v6740_v50, %v6421_v11  ;;  %v8244_v14 = vunpack.c.l.b16 %v8153_v31  ;;  %v8245_v53 = vunpack.c.l.b16 %v8156_v27  ;;  %v7446_v50 = vld [vmem:[%s12943_s18 + $0xa0] sm:$0xf] }
 0x557   : > { %v7169_v23 = vmul.f32 %v15845_v32, %v7136_v3  ;;  %v7290_v49 = vpop.permute.xlu1 %7289  ;;  %11948 = vmatmul.msk.bf16.gmra.mxu1 %vm658_vm3, %v8271_v51  ;;  %v16256_v24 = vpop.f32.mrf.mxu3  ;;  %v12424_v51 = vld [vmem:[%s12943_s18 + $0x70] sm:$0xff] }
 0x558   : > { %7380 = vst.msk [vmem:[%s13452_s19 + $0x30] sm:$0xff] %vm7373_vm13, %v7290_v49  ;;  %12029 = vmatmul.msk.bf16.gmra.mxu2 %vm658_vm3, %v12362_v6  ;;  %v12364_v49 = vld [vmem:[%s12943_s18 + $0x268] sm:$0xff] }
 0x559   : > { %v7202_v7 = vadd.f32 %v15850_v52, %v7169_v23  ;;  %v8272_v23 = vpack.c.b16 %v8245_v53, %v8244_v14 }
 0x55a   : > { %v6376_v5 = vpop.f32.mrf.mxu0 }
 0x55b   : > { %v7234_v40 = vmax.f32 %v7202_v7, 0.0  ;;  %v6422_v47 = vadd.f32 %v6376_v5, %v15677_v38  ;;  %v8159_v7 = vrot.slane %v7446_v50, 6 }
 0x55c   : > { %v7090_v13 = vpop.f32.mrf.mxu2  ;;  %v6742_v56 = vpop.f32.mrf.mxu1  ;;  %12047 = vmatmul.msk.bf16.gmra.mxu3 %vm658_vm3, %v17430_v55 }
 0x55d   : > { %v7137_v63 = vadd.f32 %v7090_v13, %v6787_v30  ;;  %7319 = vrot.lane.b32.xlu1 %v7234_v40, %s12811_s20  ;;  %v6788_v6 = vadd.f32 %v6742_v56, %v6422_v47  ;;  %v12684_v40 = vld [vmem:[%s12943_s18 + $0x9c] sm:$0xf]  ;;  %v8162_v56 = vrot.slane %v7447_v33, 6 }
 0x55e   : > { %v11933_v13 = vrot.slane %v12684_v40, 10  ;;  %v7454_v40 = vld [vmem:[%s12943_s18 + $0xc0] sm:$0x3] }
 0x55f   : > { %v7170_v20 = vmul.f32 %v15845_v32, %v7137_v63  ;;  %v7298_v21 = vpop.permute.xlu2 %7297  ;;  %v16272_v8 = vpop.f32.mrf.mxu3  ;;  %v8161_v63 = vrot.slane %v8159_v7, 4 }
 0x560   : > { %7384 = vst.msk [vmem:[%s13452_s19 + $0x50] sm:$0xff] %vm7373_vm13, %v7298_v21  ;;  %v17431_v21 = vld [vmem:[#allocation11_spill] sm:$0xff]  ;;  %v8160_v14 = vsel %vm12962_vm6, %v11933_v13, %v8159_v7 }
 0x561   : > { %v7203_v36 = vadd.f32 %v15850_v52, %v7170_v20  ;;  %v8163_v53 = vsel %vm12962_vm6, %v8161_v63, %v8162_v56 }
 0x562   : > { %v6379_v3 = vpop.f32.mrf.mxu0 }
 0x563   : > { %v7235_v44 = vmax.f32 %v7203_v36, 0.0  ;;  %v6423_v41 = vadd.f32 %v6379_v3, %v15696_v61 }
 0x564   : > { %v7092_v16 = vpop.f32.mrf.mxu2  ;;  %v6745_v11 = vpop.f32.mrf.mxu1 }
 0x565   : > { %v7138_v38 = vadd.f32 %v7092_v16, %v6788_v6  ;;  %7321 = vrot.lane.b32.xlu2 %v7235_v44, %s12811_s20  ;;  %11916 = vmatmul.msk.bf16.gmra.mxu0 %vm658_vm3, %v12424_v51  ;;  %v6789_v31 = vadd.f32 %v6745_v11, %v6423_v41  ;;  %v8246_v6 = vunpack.c.l.b16 %v8160_v14  ;;  %v8247_v44 = vunpack.c.l.b16 %v8163_v53  ;;  %v7453_v11 = vld [vmem:[%s12943_s18 + $0xbc] sm:$0xf] }
 0x567   : > { %v7171_v59 = vmul.f32 %v15845_v32, %v7138_v38  ;;  %v7294_v29 = vpop.permute.xlu0 %7293  ;;  %11949 = vmatmul.msk.bf16.gmra.mxu1 %vm658_vm3, %v8272_v23  ;;  %v16286_v5 = vpop.f32.mrf.mxu3  ;;  %v12425_v23 = vld [vmem:[%s12943_s18 + $0x8c] sm:$0xff] }
 0x568   : > { %7382 = vst.msk [vmem:[%s13452_s19 + $0x40] sm:$0xff] %vm7373_vm13, %v7294_v29  ;;  %12030 = vmatmul.msk.bf16.gmra.mxu2 %vm658_vm3, %v12364_v49  ;;  %v12366_v29 = vld [vmem:[%s12943_s18 + $0x284] sm:$0xff] }
 0x569   : > { %v7204_v30 = vadd.f32 %v15850_v52, %v7171_v59  ;;  %v8273_v59 = vpack.c.b16 %v8247_v44, %v8246_v6 }
 0x56a   : > { %v6381_v55 = vpop.f32.mrf.mxu0 }
 0x56b   : > { %v7236_v27 = vmax.f32 %v7204_v30, 0.0  ;;  %v6424_v51 = vadd.f32 %v6381_v55, %v15714_v48  ;;  %v8166_v30 = vrot.slane %v7453_v11, 6 }
 0x56c   : > { %v7095_v61 = vpop.f32.mrf.mxu2  ;;  %v6747_v47 = vpop.f32.mrf.mxu1  ;;  %12048 = vmatmul.msk.bf16.gmra.mxu3 %vm658_vm3, %v17431_v21 }
 0x56d   : > { %v7139_v20 = vadd.f32 %v7095_v61, %v6789_v31  ;;  %7323 = vrot.lane.b32.xlu0 %v7236_v27, %s12811_s20  ;;  %v6790_v49 = vadd.f32 %v6747_v47, %v6424_v51  ;;  %v12685_v27 = vld [vmem:[%s12943_s18 + $0xb8] sm:$0xf]  ;;  %v8169_v47 = vrot.slane %v7454_v40, 6 }
 0x56e   : > { %v11934_v61 = vrot.slane %v12685_v27, 10  ;;  %v7461_v27 = vld [vmem:[%s12943_s18 + $0xdc] sm:$0x3] }
 0x56f   : > { %v7172_v36 = vmul.f32 %v15845_v32, %v7139_v20  ;;  %v7296_v3 = vpop.permute.xlu1 %7295  ;;  %v16302_v50 = vpop.f32.mrf.mxu3  ;;  %v8168_v20 = vrot.slane %v8166_v30, 4 }
 0x570   : > { %7383 = vst.msk [vmem:[%s13452_s19 + $0x48] sm:$0xff] %vm7373_vm13, %v7296_v3  ;;  %v17432_v3 = vld [vmem:[#allocation12_spill] sm:$0xff]  ;;  %v8167_v6 = vsel %vm12962_vm6, %v11934_v61, %v8166_v30 }
 0x571   : > { %v7205_v16 = vadd.f32 %v15850_v52, %v7172_v36  ;;  %v8170_v44 = vsel %vm12962_vm6, %v8168_v20, %v8169_v47 }
 0x572   : > { %v6384_v38 = vpop.f32.mrf.mxu0 }
 0x573   : > { %v7237_v7 = vmax.f32 %v7205_v16, 0.0  ;;  %v6425_v63 = vadd.f32 %v6384_v38, %v15734_v54 }
 0x574   : > { %v7097_v33 = vpop.f32.mrf.mxu2  ;;  %v6750_v41 = vpop.f32.mrf.mxu1 }
 0x575   : > { %v7140_v48 = vadd.f32 %v7097_v33, %v6790_v49  ;;  %7325 = vrot.lane.b32.xlu1 %v7237_v7, %s12811_s20  ;;  %11917 = vmatmul.msk.bf16.gmra.mxu0 %vm658_vm3, %v12425_v23  ;;  %v6791_v14 = vadd.f32 %v6750_v41, %v6425_v63  ;;  %v8248_v49 = vunpack.c.l.b16 %v8167_v6  ;;  %v8249_v7 = vunpack.c.l.b16 %v8170_v44  ;;  %v7460_v41 = vld [vmem:[%s12943_s18 + $0xd8] sm:$0xf] }
 0x577   : > { %v7173_v13 = vmul.f32 %v15845_v32, %v7140_v48  ;;  %v7304_v56 = vpop.permute.xlu2 %7303  ;;  %11950 = vmatmul.msk.bf16.gmra.mxu1 %vm658_vm3, %v8273_v59  ;;  %v16316_v55 = vpop.f32.mrf.mxu3  ;;  %v12426_v59 = vld [vmem:[%s12943_s18 + $0xa8] sm:$0xff] }
 0x578   : > { %7387 = vst.msk [vmem:[%s13452_s19 + $0x68] sm:$0xff] %vm7373_vm13, %v7304_v56  ;;  %12031 = vmatmul.msk.bf16.gmra.mxu2 %vm658_vm3, %v12366_v29  ;;  %v12368_v56 = vld [vmem:[%s12943_s18 + $0x2a0] sm:$0xff] }
 0x579   : > { %v7206_v31 = vadd.f32 %v15850_v52, %v7173_v13  ;;  %v8274_v13 = vpack.c.b16 %v8249_v7, %v8248_v49 }
 0x57a   : > { %v6386_v21 = vpop.f32.mrf.mxu0 }
 0x57b   : > { %v7238_v53 = vmax.f32 %v7206_v31, 0.0  ;;  %v6426_v23 = vadd.f32 %v6386_v21, %v15756_v1  ;;  %v8173_v31 = vrot.slane %v7460_v41, 6 }
 0x57c   : > { %v7100_v54 = vpop.f32.mrf.mxu2  ;;  %v6752_v51 = vpop.f32.mrf.mxu1  ;;  %12049 = vmatmul.msk.bf16.gmra.mxu3 %vm658_vm3, %v17432_v3 }
 0x57d   : > { %v7141_v36 = vadd.f32 %v7100_v54, %v6791_v14  ;;  %7327 = vrot.lane.b32.xlu2 %v7238_v53, %s12811_s20  ;;  %v6792_v29 = vadd.f32 %v6752_v51, %v6426_v23  ;;  %v12686_v53 = vld [vmem:[%s12943_s18 + $0xd4] sm:$0xf]  ;;  %v8176_v51 = vrot.slane %v7461_v27, 6 }
 0x57e   : > { %v11935_v54 = vrot.slane %v12686_v53, 10  ;;  %v7468_v53 = vld [vmem:[%s12943_s18 + $0xf8] sm:$0x3] }
 0x57f   : > { %v7174_v16 = vmul.f32 %v15845_v32, %v7141_v36  ;;  %v7300_v38 = vpop.permute.xlu0 %7299  ;;  %v16332_v11 = vpop.f32.mrf.mxu3  ;;  %v8175_v36 = vrot.slane %v8173_v31, 4 }
 0x580   : > { %7385 = vst.msk [vmem:[%s13452_s19 + $0x58] sm:$0xff] %vm7373_vm13, %v7300_v38  ;;  %v17433_v38 = vld [vmem:[#allocation13_spill] sm:$0xff]  ;;  %v8174_v49 = vsel %vm12962_vm6, %v11935_v54, %v8173_v31 }
 0x581   : > { %v7207_v33 = vadd.f32 %v15850_v52, %v7174_v16  ;;  %v8177_v7 = vsel %vm12962_vm6, %v8175_v36, %v8176_v51 }
 0x582   : > { %v6389_v48 = vpop.f32.mrf.mxu0 }
 0x583   : > { %v7239_v30 = vmax.f32 %v7207_v33, 0.0  ;;  %v6427_v20 = vadd.f32 %v6389_v48, %v15775_v46 }
 0x584   : > { %v7102_v40 = vpop.f32.mrf.mxu2  ;;  %v6755_v63 = vpop.f32.mrf.mxu1 }
 0x585   : > { %v7142_v1 = vadd.f32 %v7102_v40, %v6792_v29  ;;  %7329 = vrot.lane.b32.xlu0 %v7239_v30, %s12811_s20  ;;  %11918 = vmatmul.msk.bf16.gmra.mxu0 %vm658_vm3, %v12426_v59  ;;  %v6793_v6 = vadd.f32 %v6755_v63, %v6427_v20  ;;  %v8250_v29 = vunpack.c.l.b16 %v8174_v49  ;;  %v8251_v30 = vunpack.c.l.b16 %v8177_v7  ;;  %v7467_v63 = vld [vmem:[%s12943_s18 + $0xf4] sm:$0xf] }
 0x587   : > { %v7175_v61 = vmul.f32 %v15845_v32, %v7142_v1  ;;  %v7302_v47 = vpop.permute.xlu1 %7301  ;;  %11951 = vmatmul.msk.bf16.gmra.mxu1 %vm658_vm3, %v8274_v13  ;;  %v16346_v21 = vpop.f32.mrf.mxu3  ;;  %v12427_v13 = vld [vmem:[%s12943_s18 + $0xc4] sm:$0xff] }
 0x588   : > { %7386 = vst.msk [vmem:[%s13452_s19 + $0x60] sm:$0xff] %vm7373_vm13, %v7302_v47  ;;  %12032 = vmatmul.msk.bf16.gmra.mxu2 %vm658_vm3, %v12368_v56  ;;  %v12370_v47 = vld [vmem:[%s12943_s18 + $0x2bc] sm:$0xff] }
 0x589   : > { %v7208_v14 = vadd.f32 %v15850_v52, %v7175_v61  ;;  %v8275_v61 = vpack.c.b16 %v8251_v30, %v8250_v29 }
 0x58a   : > { %v6391_v3 = vpop.f32.mrf.mxu0 }
 0x58b   : > { %v7240_v44 = vmax.f32 %v7208_v14, 0.0  ;;  %v6428_v59 = vadd.f32 %v6391_v3, %v15798_v10  ;;  %v8180_v14 = vrot.slane %v7467_v63, 6 }
 0x58c   : > { %v7105_v46 = vpop.f32.mrf.mxu2  ;;  %v6757_v23 = vpop.f32.mrf.mxu1  ;;  %12050 = vmatmul.msk.bf16.gmra.mxu3 %vm658_vm3, %v17433_v38 }
 0x58d   : > { %v7143_v16 = vadd.f32 %v7105_v46, %v6793_v6  ;;  %7331 = vrot.lane.b32.xlu1 %v7240_v44, %s12811_s20  ;;  %v6794_v56 = vadd.f32 %v6757_v23, %v6428_v59  ;;  %v12687_v44 = vld [vmem:[%s12943_s18 + $0xf0] sm:$0xf]  ;;  %v8183_v23 = vrot.slane %v7468_v53, 6 }
 0x58e   : > { %v11936_v46 = vrot.slane %v12687_v44, 10 }
 0x58f   : > { %v7176_v33 = vmul.f32 %v15845_v32, %v7143_v16  ;;  %v7310_v48 = vpop.permute.xlu2 %7309  ;;  %v16362_v41 = vpop.f32.mrf.mxu3  ;;  %v8182_v16 = vrot.slane %v8180_v14, 4 }
 0x590   : > { %7390 = vst.msk [vmem:[%s13452_s19 + $0x80] sm:$0xff] %vm7373_vm13, %v7310_v48  ;;  %v17434_v48 = vld [vmem:[#allocation14_spill] sm:$0xff]  ;;  %v8181_v29 = vsel %vm12962_vm6, %v11936_v46, %v8180_v14 }
 0x591   : > { %v7209_v40 = vadd.f32 %v15850_v52, %v7176_v33  ;;  %v8184_v30 = vsel %vm12962_vm6, %v8182_v16, %v8183_v23  ;;  %v7475_v16 = vld [vmem:[%s12943_s18 + $0x114] sm:$0x3] }
 0x592   : > { %v6394_v1 = vpop.f32.mrf.mxu0 }
 0x593   : > { %v7241_v31 = vmax.f32 %v7209_v40, 0.0  ;;  %v6429_v36 = vadd.f32 %v6394_v1, %v15813_v19 }
 0x594   : > { %v7107_v27 = vpop.f32.mrf.mxu2  ;;  %v6760_v20 = vpop.f32.mrf.mxu1 }
 0x595   : > { %v7144_v10 = vadd.f32 %v7107_v27, %v6794_v56  ;;  %7333 = vrot.lane.b32.xlu2 %v7241_v31, %s12811_s20  ;;  %11919 = vmatmul.msk.bf16.gmra.mxu0 %vm658_vm3, %v12427_v13  ;;  %v6795_v49 = vadd.f32 %v6760_v20, %v6429_v36  ;;  %v8252_v56 = vunpack.c.l.b16 %v8181_v29  ;;  %v8253_v31 = vunpack.c.l.b16 %v8184_v30  ;;  %v7474_v20 = vld [vmem:[%s12943_s18 + $0x110] sm:$0xf]  ;;  %v17435_v30 = vld [vmem:[#allocation24_spill] sm:$0xff] }
 0x596   : > { %v8187_v44 = vrot.slane %v7474_v20, 6 }
 0x597   : > { %v7177_v54 = vmul.f32 %v15845_v32, %v7144_v10  ;;  %v7306_v51 = vpop.permute.xlu0 %7305  ;;  %11952 = vmatmul.msk.bf16.gmra.mxu1 %vm658_vm3, %v8275_v61  ;;  %v16376_v3 = vpop.f32.mrf.mxu3  ;;  %v12428_v61 = vld [vmem:[%s12943_s18 + $0xe0] sm:$0xff] }
 0x598   : > { %7388 = vst.msk [vmem:[%s13452_s19 + $0x70] sm:$0xff] %vm7373_vm13, %v7306_v51  ;;  %12033 = vmatmul.msk.bf16.gmra.mxu2 %vm658_vm3, %v12370_v47 }
 0x599   : > { %v7210_v6 = vadd.f32 %v15850_v52, %v7177_v54 }
 0x59a   : > { %v6396_v38 = vpop.f32.mrf.mxu0 }
 0x59b   : > { %v7242_v7 = vmax.f32 %v7210_v6, 0.0  ;;  %v6430_v13 = vadd.f32 %v6396_v38, %v15835_v9  ;;  %v8276_v9 = vpack.c.b16 %v8253_v31, %v8252_v56  ;;  %v12372_v6 = vld [vmem:[%s12943_s18 + $0x2d8] sm:$0xff]  ;;  %v17436_v56 = vld [vmem:[#allocation15_spill] sm:$0xff] }
 0x59c   : > { %v7110_v19 = vpop.f32.mrf.mxu2  ;;  %v6762_v59 = vpop.f32.mrf.mxu1  ;;  %12051 = vmatmul.msk.bf16.gmra.mxu3 %vm658_vm3, %v17434_v48 }
 0x59d   : > { %v7145_v33 = vadd.f32 %v7110_v19, %v6795_v49  ;;  %7335 = vrot.lane.b32.xlu0 %v7242_v7, %s12811_s20  ;;  %v6796_v47 = vadd.f32 %v6762_v59, %v6430_v13  ;;  %v12688_v7 = vld [vmem:[%s12943_s18 + $0x10c] sm:$0xf]  ;;  %v8190_v59 = vrot.slane %v7475_v16, 6 }
 0x59e   : > { %v11937_v19 = vrot.slane %v12688_v7, 10 }
 0x59f   : > { %v7178_v40 = vmul.f32 %v15845_v32, %v7145_v33  ;;  %v7308_v1 = vpop.permute.xlu1 %7307  ;;  %v8692_v63 = vpop.f32.mrf.mxu3  ;;  %v8189_v33 = vrot.slane %v8187_v44, 4 }
 0x5a0   : > { %7389 = vst.msk [vmem:[%s13452_s19 + $0x78] sm:$0xff] %vm7373_vm13, %v7308_v1 }
 0x5a1   : > { %v7211_v27 = vadd.f32 %v15850_v52, %v7178_v40  ;;  %v8191_v31 = vsel %vm12962_vm6, %v8189_v33, %v8190_v59  ;;  %v12689_v59 = vld [vmem:[%s12943_s18 + $0x128] sm:$0xf] }
 0x5a2   : > { %v8010_v10 = vpop.f32.mrf.mxu0 }
 0x5a3   : > { %v7243_v14 = vmax.f32 %v7211_v27, 0.0  ;;  %v8011_v53 = vadd.f32 %v8010_v10, %v15815_v25 }
 0x5a4   : > { %v7112_v54 = vpop.f32.mrf.mxu2  ;;  %v8344_v51 = vpop.f32.mrf.mxu1 }
 0x5a5   : > { %v7146_v36 = vadd.f32 %v7112_v54, %v6796_v47  ;;  %7337 = vrot.lane.b32.xlu1 %v7243_v14, %s12811_s20  ;;  %11920 = vmatmul.msk.bf16.gmra.mxu0 %vm658_vm3, %v12428_v61  ;;  %v8424_v46 = vadd.f32 %v8344_v51, %v8011_v53  ;;  %v8255_v14 = vunpack.c.l.b16 %v8191_v31  ;;  %v12429_v53 = vld [vmem:[%s12943_s18 + $0xfc] sm:$0xff] }
 0x5a7   : > { %v7179_v23 = vmul.f32 %v15845_v32, %v7146_v36  ;;  %v7316_v38 = vpop.permute.xlu2 %7315  ;;  %11953 = vmatmul.msk.bf16.gmra.mxu1 %vm658_vm3, %v8276_v9  ;;  %v8694_v25 = vpop.f32.mrf.mxu3  ;;  %v7481_v9 = vld [vmem:[%s12943_s18 + $0x12c] sm:$0xf]  ;;  %v17437_v36 = vld [vmem:[#allocation25_spill] sm:$0xff] }
 0x5a8   : > { %7393 = vst.msk [vmem:[%s13452_s19 + $0x98] sm:$0xff] %vm7373_vm13, %v7316_v38  ;;  %12034 = vmatmul.msk.bf16.gmra.mxu2 %vm658_vm3, %v12372_v6 }
 0x5a9   : > { %v7212_v49 = vadd.f32 %v15850_v52, %v7179_v23  ;;  %v8188_v52 = vsel %vm12962_vm6, %v11937_v19, %v8187_v44  ;;  %v8194_v23 = vrot.slane %v7481_v9, 6 }
 0x5aa   : > { %v8012_v48 = vpop.f32.mrf.mxu0  ;;  %v8254_v47 = vunpack.c.l.b16 %v8188_v52  ;;  %v17439_v52 = vld [vmem:[#allocation16_spill] sm:$0xff] }
 0x5ab   : > { %v7244_v29 = vmax.f32 %v7212_v49, 0.0  ;;  %v8013_v32 = vadd.f32 %v8012_v48, %v17435_v30  ;;  %v7482_v49 = vld [vmem:[%s12943_s18 + $0x130] sm:$0x3]  ;;  %v11938_v48 = vrot.slane %v12689_v59, 10 }
 0x5ac   : > { %v8566_v40 = vpop.f32.mrf.mxu2  ;;  %v8346_v1 = vpop.f32.mrf.mxu1  ;;  %12052 = vmatmul.msk.bf16.gmra.mxu3 %vm658_vm3, %v17436_v56  ;;  %v8277_v44 = vpack.c.b16 %v8255_v14, %v8254_v47  ;;  %v8197_v30 = vrot.slane %v7482_v49, 6 }
 0x5ad   : > { %v8646_v13 = vadd.f32 %v8566_v40, %v8424_v46  ;;  %7339 = vrot.lane.b32.xlu2 %v7244_v29, %s12811_s20  ;;  %v8425_v27 = vadd.f32 %v8346_v1, %v8013_v32  ;;  %v8196_v29 = vrot.slane %v8194_v23, 4  ;;  %v17438_v40 = vld [vmem:[#allocation26_spill] sm:$0xff]  ;;  %v8195_v31 = vsel %vm12962_vm6, %v11938_v48, %v8194_v23 }
 0x5af   : > { %v7312_v61 = vpop.permute.xlu0 %7311  ;;  %v16415_v10 = vadd.f32 %v8692_v63, %v8646_v13  ;;  %v8697_v20 = vpop.f32.mrf.mxu3  ;;  %v12374_v63 = vld [vmem:[%s12943_s18 + $0x2f4] sm:$0xff] }
 0x5b0   : > { %7391 = vst.msk [vmem:[%s13452_s19 + $0x88] sm:$0xff] %vm7373_vm13, %v7312_v61 }
 0x5b2   : > { %v8015_v54 = vpop.f32.mrf.mxu0 }
 0x5b3   : > { %v8016_v51 = vadd.f32 %v8015_v54, %v17437_v36  ;;  %v8256_v54 = vunpack.c.l.b16 %v8195_v31  ;;  %v12430_v36 = vld [vmem:[%s12943_s18 + $0x118] sm:$0xff] }
 0x5b4   : > { %v8568_v6 = vpop.f32.mrf.mxu2  ;;  %v8349_v16 = vpop.f32.mrf.mxu1 }
 0x5b5   : > { %v8647_v46 = vadd.f32 %v8568_v6, %v8425_v27  ;;  %11921 = vmatmul.msk.bf16.gmra.mxu0 %vm658_vm3, %v12429_v53  ;;  %v8426_v38 = vadd.f32 %v8349_v16, %v8016_v51  ;;  %v8198_v27 = vsel %vm12962_vm6, %v8196_v29, %v8197_v30  ;;  %v7488_v6 = vld [vmem:[%s12943_s18 + $0x148] sm:$0xf] }
 0x5b6   : > { %v8257_v9 = vunpack.c.l.b16 %v8198_v27 }
 0x5b7   : > { %v7314_v7 = vpop.permute.xlu1 %7313  ;;  %v16425_v19 = vadd.f32 %v8694_v25, %v8647_v46  ;;  %11954 = vmatmul.msk.bf16.gmra.mxu1 %vm658_vm3, %v8277_v44  ;;  %v8699_v33 = vpop.f32.mrf.mxu3 }
 0x5b8   : > { %7392 = vst.msk [vmem:[%s13452_s19 + $0x90] sm:$0xff] %vm7373_vm13, %v7314_v7  ;;  %12035 = vmatmul.msk.bf16.gmra.mxu2 %vm658_vm3, %v12374_v63  ;;  %v8278_v16 = vpack.c.b16 %v8257_v9, %v8256_v54  ;;  %v7489_v7 = vld [vmem:[%s12943_s18 + $0x14c] sm:$0x3] }
 0x5ba   : > { %v8017_v32 = vpop.f32.mrf.mxu0 }
 0x5bb   : > { %v8018_v13 = vadd.f32 %v8017_v32, %v17438_v40  ;;  %v8204_v40 = vrot.slane %v7489_v7, 6  ;;  %v7496_v7 = vld [vmem:[%s12943_s18 + $0x168] sm:$0x3] }
 0x5bc   : > { %v8571_v1 = vpop.f32.mrf.mxu2  ;;  %v8351_v56 = vpop.f32.mrf.mxu1  ;;  %12053 = vmatmul.msk.bf16.gmra.mxu3 %vm658_vm3, %v17439_v52  ;;  %v17440_v52 = vld [vmem:[#allocation17_spill] sm:$0xff] }
 0x5bd   : > { %v8648_v25 = vadd.f32 %v8571_v1, %v8426_v38  ;;  %v8427_v61 = vadd.f32 %v8351_v56, %v8018_v13  ;;  %v8201_v38 = vrot.slane %v7488_v6, 6 }
 0x5bf   : > { %v7322_v47 = vpop.permute.xlu2 %7321  ;;  %v16439_v14 = vadd.f32 %v8697_v20, %v8648_v25  ;;  %v8702_v53 = vpop.f32.mrf.mxu3  ;;  %v12376_v20 = vld [vmem:[%s12943_s18 + $0x310] sm:$0xff]  ;;  %v8203_v32 = vrot.slane %v8201_v38, 4 }
 0x5c0   : > { %7396 = vst.msk [vmem:[%s13452_s19 + $0xb0] sm:$0xff] %vm7373_vm13, %v7322_v47 }
 0x5c1   : > { %v8205_v27 = vsel %vm12962_vm6, %v8203_v32, %v8204_v40 }
 0x5c2   : > { %v8020_v51 = vpop.f32.mrf.mxu0 }
 0x5c3   : > { %v8021_v44 = vadd.f32 %v8020_v51, %v15905_v18  ;;  %v12690_v18 = vld [vmem:[%s12943_s18 + $0x144] sm:$0xf]  ;;  %v12431_v51 = vld [vmem:[%s12943_s18 + $0x134] sm:$0xff] }
 0x5c4   : > { %v8573_v46 = vpop.f32.mrf.mxu2  ;;  %v8354_v23 = vpop.f32.mrf.mxu1  ;;  %v11939_v30 = vrot.slane %v12690_v18, 10 }
 0x5c5   : > { %v8649_v63 = vadd.f32 %v8573_v46, %v8427_v61  ;;  %11922 = vmatmul.msk.bf16.gmra.mxu0 %vm658_vm3, %v12430_v36  ;;  %v8428_v49 = vadd.f32 %v8354_v23, %v8021_v44  ;;  %v8259_v36 = vunpack.c.l.b16 %v8205_v27  ;;  %v7495_v44 = vld [vmem:[%s12943_s18 + $0x164] sm:$0xf] }
 0x5c6   : > { %v8202_v31 = vsel %vm12962_vm6, %v11939_v30, %v8201_v38  ;;  %v8208_v38 = vrot.slane %v7495_v44, 6 }
 0x5c7   : > { %v7318_v59 = vpop.permute.xlu0 %7317  ;;  %v16449_v48 = vadd.f32 %v8699_v33, %v8649_v63  ;;  %11955 = vmatmul.msk.bf16.gmra.mxu1 %vm658_vm3, %v8278_v16  ;;  %v8704_v29 = vpop.f32.mrf.mxu3  ;;  %v8258_v9 = vunpack.c.l.b16 %v8202_v31 }
 0x5c8   : > { %7394 = vst.msk [vmem:[%s13452_s19 + $0xa0] sm:$0xff] %vm7373_vm13, %v7318_v59  ;;  %12036 = vmatmul.msk.bf16.gmra.mxu2 %vm658_vm3, %v12376_v20  ;;  %v8210_v40 = vrot.slane %v8208_v38, 4 }
 0x5c9   : > { %v8279_v63 = vpack.c.b16 %v8259_v36, %v8258_v9 }
 0x5ca   : > { %v8022_v13 = vpop.f32.mrf.mxu0 }
 0x5cb   : > { %v8023_v1 = vadd.f32 %v8022_v13, %v15923_v0  ;;  %v8211_v13 = vrot.slane %v7496_v7, 6  ;;  %v7503_v7 = vld [vmem:[%s12943_s18 + $0x184] sm:$0x3] }
 0x5cc   : > { %v8576_v25 = vpop.f32.mrf.mxu2  ;;  %v8356_v56 = vpop.f32.mrf.mxu1  ;;  %12054 = vmatmul.msk.bf16.gmra.mxu3 %vm658_vm3, %v17440_v52  ;;  %v17441_v52 = vld [vmem:[#allocation18_spill] sm:$0xff] }
 0x5cd   : > { %v8650_v33 = vadd.f32 %v8576_v25, %v8428_v49  ;;  %v8429_v61 = vadd.f32 %v8356_v56, %v8023_v1  ;;  %v8212_v27 = vsel %vm12962_vm6, %v8210_v40, %v8211_v13 }
 0x5cf   : > { %v7320_v47 = vpop.permute.xlu1 %7319  ;;  %v16463_v54 = vadd.f32 %v8702_v53, %v8650_v33  ;;  %v8707_v0 = vpop.f32.mrf.mxu3  ;;  %v12378_v53 = vld [vmem:[%s12943_s18 + $0x32c] sm:$0xff] }
 0x5d0   : > { %7395 = vst.msk [vmem:[%s13452_s19 + $0xa8] sm:$0xff] %vm7373_vm13, %v7320_v47 }
 0x5d2   : > { %v8025_v6 = vpop.f32.mrf.mxu0 }
 0x5d3   : > { %v8026_v46 = vadd.f32 %v8025_v6, %v15946_v57  ;;  %v12691_v57 = vld [vmem:[%s12943_s18 + $0x160] sm:$0xf]  ;;  %v12432_v6 = vld [vmem:[%s12943_s18 + $0x150] sm:$0xff] }
 0x5d4   : > { %v8578_v16 = vpop.f32.mrf.mxu2  ;;  %v8359_v20 = vpop.f32.mrf.mxu1  ;;  %v11940_v32 = vrot.slane %v12691_v57, 10 }
 0x5d5   : > { %v8651_v23 = vadd.f32 %v8578_v16, %v8429_v61  ;;  %11923 = vmatmul.msk.bf16.gmra.mxu0 %vm658_vm3, %v12431_v51  ;;  %v8430_v49 = vadd.f32 %v8359_v20, %v8026_v46  ;;  %v8261_v51 = vunpack.c.l.b16 %v8212_v27  ;;  %v7502_v46 = vld [vmem:[%s12943_s18 + $0x180] sm:$0xf] }
 0x5d6   : > { %v8209_v31 = vsel %vm12962_vm6, %v11940_v32, %v8208_v38  ;;  %v8215_v38 = vrot.slane %v7502_v46, 6 }
 0x5d7   : > { %v7328_v59 = vpop.permute.xlu2 %7327  ;;  %v16473_v18 = vadd.f32 %v8704_v29, %v8651_v23  ;;  %11956 = vmatmul.msk.bf16.gmra.mxu1 %vm658_vm3, %v8279_v63  ;;  %v8709_v30 = vpop.f32.mrf.mxu3  ;;  %v8260_v36 = vunpack.c.l.b16 %v8209_v31 }
 0x5d8   : > { %7399 = vst.msk [vmem:[%s13452_s19 + $0xc8] sm:$0xff] %vm7373_vm13, %v7328_v59  ;;  %12037 = vmatmul.msk.bf16.gmra.mxu2 %vm658_vm3, %v12378_v53  ;;  %v8217_v13 = vrot.slane %v8215_v38, 4 }
 0x5d9   : > { %v8280_v23 = vpack.c.b16 %v8261_v51, %v8260_v36 }
 0x5da   : > { %v8027_v1 = vpop.f32.mrf.mxu0 }
 0x5db   : > { %v8028_v25 = vadd.f32 %v8027_v1, %v15967_v4  ;;  %v8218_v1 = vrot.slane %v7503_v7, 6  ;;  %v7510_v7 = vld [vmem:[%s12943_s18 + $0x1a0] sm:$0x3] }
 0x5dc   : > { %v8581_v33 = vpop.f32.mrf.mxu2  ;;  %v8361_v56 = vpop.f32.mrf.mxu1  ;;  %12055 = vmatmul.msk.bf16.gmra.mxu3 %vm658_vm3, %v17441_v52  ;;  %v17442_v52 = vld [vmem:[#allocation19_spill] sm:$0xff] }
 0x5dd   : > { %v8652_v29 = vadd.f32 %v8581_v33, %v8430_v49  ;;  %v8431_v61 = vadd.f32 %v8361_v56, %v8028_v25  ;;  %v8219_v27 = vsel %vm12962_vm6, %v8217_v13, %v8218_v1 }
 0x5df   : > { %v7324_v47 = vpop.permute.xlu0 %7323  ;;  %v16487_v9 = vadd.f32 %v8707_v0, %v8652_v29  ;;  %v8712_v4 = vpop.f32.mrf.mxu3  ;;  %v12380_v0 = vld [vmem:[%s12943_s18 + $0x348] sm:$0xff] }
 0x5e0   : > { %7397 = vst.msk [vmem:[%s13452_s19 + $0xb8] sm:$0xff] %vm7373_vm13, %v7324_v47 }
 0x5e2   : > { %v8030_v44 = vpop.f32.mrf.mxu0 }
 0x5e3   : > { %v8031_v16 = vadd.f32 %v8030_v44, %v15991_v28  ;;  %v12692_v28 = vld [vmem:[%s12943_s18 + $0x17c] sm:$0xf]  ;;  %v12433_v44 = vld [vmem:[%s12943_s18 + $0x16c] sm:$0xff] }
 0x5e4   : > { %v8583_v63 = vpop.f32.mrf.mxu2  ;;  %v8364_v53 = vpop.f32.mrf.mxu1  ;;  %v11941_v40 = vrot.slane %v12692_v28, 10 }
 0x5e5   : > { %v8653_v20 = vadd.f32 %v8583_v63, %v8431_v61  ;;  %11924 = vmatmul.msk.bf16.gmra.mxu0 %vm658_vm3, %v12432_v6  ;;  %v8432_v49 = vadd.f32 %v8364_v53, %v8031_v16  ;;  %v8263_v6 = vunpack.c.l.b16 %v8219_v27  ;;  %v7509_v16 = vld [vmem:[%s12943_s18 + $0x19c] sm:$0xf] }
 0x5e6   : > { %v8216_v31 = vsel %vm12962_vm6, %v11941_v40, %v8215_v38  ;;  %v8222_v38 = vrot.slane %v7509_v16, 6 }
 0x5e7   : > { %v7326_v59 = vpop.permute.xlu1 %7325  ;;  %v16497_v57 = vadd.f32 %v8709_v30, %v8653_v20  ;;  %11957 = vmatmul.msk.bf16.gmra.mxu1 %vm658_vm3, %v8280_v23  ;;  %v8714_v32 = vpop.f32.mrf.mxu3  ;;  %v8262_v51 = vunpack.c.l.b16 %v8216_v31 }
 0x5e8   : > { %7398 = vst.msk [vmem:[%s13452_s19 + $0xc0] sm:$0xff] %vm7373_vm13, %v7326_v59  ;;  %12038 = vmatmul.msk.bf16.gmra.mxu2 %vm658_vm3, %v12380_v0  ;;  %v8224_v1 = vrot.slane %v8222_v38, 4 }
 0x5e9   : > { %v8281_v20 = vpack.c.b16 %v8263_v6, %v8262_v51 }
 0x5ea   : > { %v8032_v25 = vpop.f32.mrf.mxu0 }
 0x5eb   : > { %v8033_v33 = vadd.f32 %v8032_v25, %v16009_v17  ;;  %v8225_v25 = vrot.slane %v7510_v7, 6  ;;  %v7517_v7 = vld [vmem:[%s12943_s18 + $0x1bc] sm:$0x3] }
 0x5ec   : > { %v8586_v29 = vpop.f32.mrf.mxu2  ;;  %v8366_v56 = vpop.f32.mrf.mxu1  ;;  %12056 = vmatmul.msk.bf16.gmra.mxu3 %vm658_vm3, %v17442_v52  ;;  %v17443_v52 = vld [vmem:[#allocation20_spill] sm:$0xff] }
 0x5ed   : > { %v8654_v30 = vadd.f32 %v8586_v29, %v8432_v49  ;;  %v8433_v61 = vadd.f32 %v8366_v56, %v8033_v33  ;;  %v8226_v27 = vsel %vm12962_vm6, %v8224_v1, %v8225_v25  ;;  %v12694_v1 = vld [vmem:[%s12943_s18 + $0x1b4] sm:$0xf] }
 0x5ee   : > { %v11943_v25 = vrot.slane %v12694_v1, 10 }
 0x5ef   : > { %v7334_v47 = vpop.permute.xlu2 %7333  ;;  %v16511_v36 = vadd.f32 %v8712_v4, %v8654_v30  ;;  %v8717_v17 = vpop.f32.mrf.mxu3  ;;  %v12382_v4 = vld [vmem:[%s12943_s18 + $0x364] sm:$0xff] }
 0x5f0   : > { %7402 = vst.msk [vmem:[%s13452_s19 + $0xe0] sm:$0xff] %vm7373_vm13, %v7334_v47 }
 0x5f2   : > { %v8035_v46 = vpop.f32.mrf.mxu0 }
 0x5f3   : > { %v8036_v63 = vadd.f32 %v8035_v46, %v16032_v39  ;;  %v12693_v39 = vld [vmem:[%s12943_s18 + $0x198] sm:$0xf]  ;;  %v12434_v46 = vld [vmem:[%s12943_s18 + $0x188] sm:$0xff] }
 0x5f4   : > { %v8588_v23 = vpop.f32.mrf.mxu2  ;;  %v8369_v0 = vpop.f32.mrf.mxu1  ;;  %v11942_v13 = vrot.slane %v12693_v39, 10  ;;  %v12097_v39 = vld [vmem:[%s12943_s18 + $0x404] sm:$0xf] }
 0x5f5   : > { %v8655_v53 = vadd.f32 %v8588_v23, %v8433_v61  ;;  %11925 = vmatmul.msk.bf16.gmra.mxu0 %vm658_vm3, %v12433_v44  ;;  %v8434_v49 = vadd.f32 %v8369_v0, %v8036_v63  ;;  %v8265_v44 = vunpack.c.l.b16 %v8226_v27  ;;  %v7516_v63 = vld [vmem:[%s12943_s18 + $0x1b8] sm:$0xf] }
 0x5f6   : > { %v8223_v31 = vsel %vm12962_vm6, %v11942_v13, %v8222_v38  ;;  %v8229_v38 = vrot.slane %v7516_v63, 6 }
 0x5f7   : > { %v7330_v59 = vpop.permute.xlu0 %7329  ;;  %v16521_v28 = vadd.f32 %v8714_v32, %v8655_v53  ;;  %11958 = vmatmul.msk.bf16.gmra.mxu1 %vm658_vm3, %v8281_v20  ;;  %v8719_v40 = vpop.f32.mrf.mxu3  ;;  %v8264_v6 = vunpack.c.l.b16 %v8223_v31  ;;  %v12098_v31 = vld [vmem:[%s12943_s18 + $0x408] sm:$0x3] }
 0x5f8   : > { %7400 = vst.msk [vmem:[%s13452_s19 + $0xd0] sm:$0xff] %vm7373_vm13, %v7330_v59  ;;  %12039 = vmatmul.msk.bf16.gmra.mxu2 %vm658_vm3, %v12382_v4  ;;  %v9940_v63 = vrot.slane %v12098_v31, 6 }
 0x5f9   : > { %v8282_v53 = vpack.c.b16 %v8265_v44, %v8264_v6  ;;  %v8230_v6 = vsel %vm12962_vm6, %v11943_v25, %v8229_v38 }
 0x5fa   : > { %v8037_v33 = vpop.f32.mrf.mxu0 }
 0x5fb   : > { %v8038_v29 = vadd.f32 %v8037_v33, %v16052_v43  ;;  %v8231_v33 = vrot.slane %v8229_v38, 4 }
 0x5fc   : > { %v8591_v30 = vpop.f32.mrf.mxu2  ;;  %v8371_v56 = vpop.f32.mrf.mxu1  ;;  %12057 = vmatmul.msk.bf16.gmra.mxu3 %vm658_vm3, %v17443_v52 }
 0x5fd   : > { %v8656_v32 = vadd.f32 %v8591_v30, %v8434_v49  ;;  %v8435_v61 = vadd.f32 %v8371_v56, %v8038_v29  ;;  %v8232_v29 = vrot.slane %v7517_v7, 6  ;;  %v9937_v56 = vrot.slane %v12097_v39, 6 }
 0x5ff   : > { %v7332_v47 = vpop.permute.xlu1 %7331  ;;  %v16535_v51 = vadd.f32 %v8717_v17, %v8656_v32  ;;  %v8722_v43 = vpop.f32.mrf.mxu3  ;;  %v12384_v17 = vld [vmem:[%s12943_s18 + $0x380] sm:$0xff]  ;;  %v8233_v44 = vsel %vm12962_vm6, %v8231_v33, %v8232_v29  ;;  %v12696_v33 = vld [vmem:[%s12943_s18 + $0x208] sm:$0xf] }
 0x600   : > { %7401 = vst.msk [vmem:[%s13452_s19 + $0xd8] sm:$0xff] %vm7373_vm13, %v7332_v47  ;;  %v16554_v32 = vld [vmem:[%s12943_s18 + $0x400] sm:$0xf]  ;;  %v12059_v29 = vrot.slane %v12696_v33, 10 }
 0x602   : > { %v8040_v16 = vpop.f32.mrf.mxu0 }
 0x603   : > { %v8041_v23 = vadd.f32 %v8040_v16, %v16073_v2 }
 0x604   : > { %v8593_v20 = vpop.f32.mrf.mxu2  ;;  %v8374_v4 = vpop.f32.mrf.mxu1 }
 0x605   : > { %v8657_v0 = vadd.f32 %v8593_v20, %v8435_v61  ;;  %11926 = vmatmul.msk.bf16.gmra.mxu0 %vm658_vm3, %v12434_v46  ;;  %v8436_v49 = vadd.f32 %v8374_v4, %v8041_v23  ;;  %v12318_v46 = vrot.slane %v16554_v32, 10  ;;  %v8267_v4 = vunpack.c.l.b16 %v8233_v44 }
 0x607   : > { %v7340_v59 = vpop.permute.xlu2 %7339  ;;  %11959 = vmatmul.msk.bf16.gmra.mxu1 %vm658_vm3, %v8282_v53  ;;  %v8724_v2 = vpop.f32.mrf.mxu3  ;;  %v16549_v13 = vadd.f32 %v8719_v40, %v8657_v0  ;;  %v17444_v40 = vld [vmem:[#allocation21_spill] sm:$0xff]  ;;  %v8266_v0 = vunpack.c.l.b16 %v8230_v6  ;;  %v9938_v38 = vsel %vm12962_vm6, %v12318_v46, %v9937_v56  ;;  %v12094_v46 = vld [vmem:[%s12943_s18 + $0x3f8] sm:$0xf] }
 0x608   : > { %7405 = vst.msk [vmem:[%s13452_s19 + $0xf8] sm:$0xff] %vm7373_vm13, %v7340_v59  ;;  %12040 = vmatmul.msk.bf16.gmra.mxu2 %vm658_vm3, %v12384_v17  ;;  %v12435_v17 = vld [vmem:[%s12943_s18 + $0x1a4] sm:$0xff]  ;;  %v12095_v59 = vld [vmem:[%s12943_s18 + $0x3fc] sm:$0xf]  ;;  %v10049_v31 = vunpack.c.l.b16 %v9938_v38 }
 0x60a   : > { %v8042_v30 = vpop.f32.mrf.mxu0 }
 0x60b   : > { %v8043_v52 = vadd.f32 %v8042_v30, %v16090_v60  ;;  %v9939_v60 = vrot.slane %v9937_v56, 4  ;;  %v9571_v56 = vrot.slane %v12095_v59, 5 }
 0x60c   : > { %v8596_v27 = vpop.f32.mrf.mxu2  ;;  %v8376_v47 = vpop.f32.mrf.mxu1  ;;  %12058 = vmatmul.msk.bf16.gmra.mxu3 %vm658_vm3, %v17444_v40 }
 0x60d   : > { %v8658_v61 = vadd.f32 %v8596_v27, %v8436_v49  ;;  %v8437_v16 = vadd.f32 %v8376_v47, %v8043_v52  ;;  %v12695_v49 = vld [vmem:[%s12943_s18 + $0x20c] sm:$0xf]  ;;  %v9941_v1 = vsel %vm12962_vm6, %v9939_v60, %v9940_v63  ;;  %v8283_v52 = vpack.c.b16 %v8267_v4, %v8266_v0  ;;  %v12386_v47 = vld [vmem:[%s12943_s18 + $0x39c] sm:$0xff] }
 0x60e   : > { %v8822_v7 = vrot.slane %v12695_v49, 6  ;;  %v10050_v40 = vunpack.c.l.b16 %v9941_v1  ;;  %v12285_v0 = vrot.slane %v12094_v46, 9  ;;  %v9574_v4 = vrot.slane %v16554_v32, 5 }
 0x60f   : > { %v7336_v23 = vpop.permute.xlu0 %7335  ;;  %v16565_v20 = vadd.f32 %v8722_v43, %v8658_v61  ;;  %v8727_v53 = vpop.f32.mrf.mxu3  ;;  %v10651_v43 = vld [vmem:[%s12943_s18 + $0x210] sm:$0x3] }
 0x610   : > { %7403 = vst.msk [vmem:[%s13452_s19 + $0xe8] sm:$0xff] %vm7373_vm13, %v7336_v23  ;;  %v8824_v6 = vrot.slane %v8822_v7, 4  ;;  %v8825_v44 = vrot.slane %v10651_v43, 6  ;;  %v10081_v38 = vpack.c.b16 %v10050_v40, %v10049_v31  ;;  %v8823_v49 = vsel %vm12962_vm6, %v12059_v29, %v8822_v7  ;;  %v16595_v43 = vld [vmem:[%s12943_s18 + $0x41c] sm:$0xf] }
 0x611   : > { %v8934_v32 = vunpack.c.l.b16 %v8823_v49 }
 0x612   : > { %v8045_v39 = vpop.f32.mrf.mxu0  ;;  %v8826_v59 = vsel %vm12962_vm6, %v8824_v6, %v8825_v44 }
 0x613   : > { %v8046_v25 = vadd.f32 %v8045_v39, %v16125_v42  ;;  %v12104_v42 = vld [vmem:[%s12943_s18 + $0x420] sm:$0xf] }
 0x614   : > { %v8598_v30 = vpop.f32.mrf.mxu2  ;;  %v8379_v61 = vpop.f32.mrf.mxu1  ;;  %v9944_v39 = vrot.slane %v12104_v42, 6 }
 0x615   : > { %v8659_v27 = vadd.f32 %v8598_v30, %v8437_v16  ;;  %11927 = vmatmul.msk.bf16.gmra.mxu0 %vm658_vm3, %v12435_v17  ;;  %v8438_v60 = vadd.f32 %v8379_v61, %v8046_v25  ;;  %v9573_v16 = vrot.slane %v9571_v56, 4  ;;  %v12105_v25 = vld [vmem:[%s12943_s18 + $0x424] sm:$0x3] }
 0x616   : > { %v9946_v61 = vrot.slane %v9944_v39, 4 }
 0x617   : > { %v7338_v63 = vpop.permute.xlu1 %7337  ;;  %11960 = vmatmul.msk.bf16.gmra.mxu1 %vm658_vm3, %v8283_v52  ;;  %v8729_v23 = vpop.f32.mrf.mxu3  ;;  %v16587_v17 = vadd.f32 %v8724_v2, %v8659_v27  ;;  %v8935_v2 = vunpack.c.l.b16 %v8826_v59  ;;  %v9572_v52 = vsel %vm12946_vm4, %v12285_v0, %v9571_v56  ;;  %v9575_v7 = vsel %vm12946_vm4, %v9573_v16, %v9574_v4  ;;  %v12102_v16 = vld [vmem:[%s12943_s18 + $0x418] sm:$0xf]  ;;  %v12436_v59 = vld [vmem:[%s12943_s18 + $0x3f0] sm:$0xff] }
 0x618   : > { %7404 = vst.msk [vmem:[%s13452_s19 + $0xf0] sm:$0xff] %vm7373_vm13, %v7338_v63  ;;  %12041 = vmatmul.msk.bf16.gmra.mxu2 %vm658_vm3, %v12386_v47  ;;  %v12319_v27 = vrot.slane %v16595_v43, 10  ;;  %v9683_v56 = vunpack.c.l.b16 %v9572_v52  ;;  %v9684_v44 = vunpack.c.l.b16 %v9575_v7  ;;  %v12697_v63 = vld [vmem:[%s12943_s18 + $0x228] sm:$0xf] }
 0x619   : > { %v8966_v46 = vpack.c.b16 %v8935_v2, %v8934_v32  ;;  %v8829_v0 = vrot.slane %v12697_v63, 6  ;;  %v12698_v2 = vld [vmem:[%s12943_s18 + $0x224] sm:$0xf] }
 0x61a   : > { %v8047_v1 = vpop.f32.mrf.mxu0  ;;  %v12060_v52 = vrot.slane %v12698_v2, 10 }
 0x61b   : > { %v8048_v33 = vadd.f32 %v8047_v1, %v16138_v62  ;;  %v9947_v62 = vrot.slane %v12105_v25, 6  ;;  %v9715_v1 = vpack.c.b16 %v9684_v44, %v9683_v56  ;;  %v8831_v7 = vrot.slane %v8829_v0, 4 }
 0x61c   : > { %v8601_v30 = vpop.f32.mrf.mxu2  ;;  %v8381_v31 = vpop.f32.mrf.mxu1  ;;  %12335 = vmatmul.msk.bf16.vlgmr.msra.gmra.mxu3 %vm658_vm3, %v10081_v38  ;;  %v10658_v38 = vld [vmem:[%s12943_s18 + $0x22c] sm:$0x3]  ;;  %v9581_v44 = vrot.slane %v16595_v43, 5 }
 0x61d   : > { %v8660_v29 = vadd.f32 %v8601_v30, %v8438_v60  ;;  %v8439_v47 = vadd.f32 %v8381_v31, %v8048_v33  ;;  %v9945_v60 = vsel %vm12962_vm6, %v12319_v27, %v9944_v39  ;;  %v9948_v42 = vsel %vm12962_vm6, %v9946_v61, %v9947_v62  ;;  %v12101_v31 = vld [vmem:[%s12943_s18 + $0x414] sm:$0xf] }
 0x61e   : > { %v10051_v25 = vunpack.c.l.b16 %v9945_v60  ;;  %v10052_v33 = vunpack.c.l.b16 %v9948_v42  ;;  %v9578_v30 = vrot.slane %v12102_v16, 5  ;;  %v12286_v62 = vrot.slane %v12101_v31, 9 }
 0x61f   : > { %v16605_v40 = vadd.f32 %v8727_v53, %v8660_v29  ;;  %v8732_v6 = vpop.f32.mrf.mxu3  ;;  %v8832_v29 = vrot.slane %v10658_v38, 6  ;;  %v8830_v60 = vsel %vm12962_vm6, %v12060_v52, %v8829_v0  ;;  %v12112_v38 = vld [vmem:[%s12943_s18 + $0x440] sm:$0x3] }
 0x620   : > { %v9580_v56 = vrot.slane %v9578_v30, 4  ;;  %v8936_v43 = vunpack.c.l.b16 %v8830_v60 }
 0x621   : > { %v8833_v42 = vsel %vm12962_vm6, %v8831_v7, %v8832_v29 }
 0x622   : > { %v8050_v4 = vpop.f32.mrf.mxu0  ;;  %v9582_v0 = vsel %vm12946_vm4, %v9580_v56, %v9581_v44  ;;  %v12109_v56 = vld [vmem:[%s12943_s18 + $0x434] sm:$0xf] }
 0x623   : > { %v8051_v53 = vadd.f32 %v8050_v4, %v16152_v34  ;;  %v12111_v34 = vld [vmem:[%s12943_s18 + $0x43c] sm:$0xf]  ;;  %v16630_v4 = vld [vmem:[%s12943_s18 + $0x438] sm:$0xf]  ;;  %v9686_v7 = vunpack.c.l.b16 %v9582_v0 }
 0x624   : > { %v8603_v49 = vpop.f32.mrf.mxu2  ;;  %v8384_v32 = vpop.f32.mrf.mxu1  ;;  %v9951_v63 = vrot.slane %v12111_v34, 6  ;;  %v12699_v34 = vld [vmem:[%s12943_s18 + $0x244] sm:$0xf] }
 0x625   : > { %v8661_v39 = vadd.f32 %v8603_v49, %v8439_v47  ;;  %12076 = vmatmul.msk.bf16.vlgmr.msra.gmra.mxu0 %vm658_vm3, %v8966_v46  ;;  %v8440_v27 = vadd.f32 %v8384_v32, %v8051_v53  ;;  %v10082_v46 = vpack.c.b16 %v10052_v33, %v10051_v25  ;;  %v12320_v33 = vrot.slane %v16630_v4, 10 }
 0x627   : > { %12269 = vmatmul.msk.bf16.vlgmr.msra.gmra.mxu1 %vm658_vm3, %v12436_v59  ;;  %v8734_v61 = vpop.f32.mrf.mxu3  ;;  %v16622_v47 = vadd.f32 %v8729_v23, %v8661_v39  ;;  %v8937_v23 = vunpack.c.l.b16 %v8833_v42  ;;  %v9579_v59 = vsel %vm12946_vm4, %v12286_v62, %v9578_v30  ;;  %v9953_v39 = vrot.slane %v9951_v63, 4  ;;  %v12437_v42 = vld [vmem:[%s12943_s18 + $0x40c] sm:$0xff] }
 0x628   : > { %12302 = vmatmul.msk.bf16.vlgmr.msra.gmra.mxu2 %vm658_vm3, %v9715_v1  ;;  %v9685_v30 = vunpack.c.l.b16 %v9579_v59  ;;  %v9952_v31 = vsel %vm12962_vm6, %v12320_v33, %v9951_v63  ;;  %v8836_v62 = vrot.slane %v12699_v34, 6 }
 0x629   : > { %v8967_v29 = vpack.c.b16 %v8937_v23, %v8936_v43  ;;  %v12700_v23 = vld [vmem:[%s12943_s18 + $0x240] sm:$0xf] }
 0x62a   : > { %v8052_v16 = vpop.f32.mrf.mxu0  ;;  %v12061_v59 = vrot.slane %v12700_v23, 10  ;;  %v8838_v0 = vrot.slane %v8836_v62, 4 }
 0x62b   : > { %v8053_v53 = vadd.f32 %v8052_v16, %v16166_v35  ;;  %v9954_v35 = vrot.slane %v12112_v38, 6  ;;  %v9716_v16 = vpack.c.b16 %v9686_v7, %v9685_v30  ;;  %v10053_v38 = vunpack.c.l.b16 %v9952_v31 }
 0x62c   : > { %v8606_v49 = vpop.f32.mrf.mxu2  ;;  %v8386_v25 = vpop.f32.mrf.mxu1  ;;  %12336 = vmatmul.msk.bf16.gmra.mxu3 %vm658_vm3, %v10082_v46  ;;  %v10665_v46 = vld [vmem:[%s12943_s18 + $0x248] sm:$0x3]  ;;  %v9588_v7 = vrot.slane %v16630_v4, 5  ;;  %v8837_v31 = vsel %vm12962_vm6, %v12061_v59, %v8836_v62 }
 0x62d   : > { %v8662_v1 = vadd.f32 %v8606_v49, %v8440_v27  ;;  %v8441_v32 = vadd.f32 %v8386_v25, %v8053_v53  ;;  %v9955_v27 = vsel %vm12962_vm6, %v9953_v39, %v9954_v35  ;;  %v9585_v49 = vrot.slane %v12109_v56, 5  ;;  %v12108_v25 = vld [vmem:[%s12943_s18 + $0x430] sm:$0xf] }
 0x62e   : > { %v10054_v53 = vunpack.c.l.b16 %v9955_v27  ;;  %v12287_v35 = vrot.slane %v12108_v25, 9  ;;  %v8938_v4 = vunpack.c.l.b16 %v8837_v31 }
 0x62f   : > { %v16640_v2 = vadd.f32 %v8732_v6, %v8662_v1  ;;  %v8737_v52 = vpop.f32.mrf.mxu3  ;;  %v8839_v1 = vrot.slane %v10665_v46, 6  ;;  %v9587_v30 = vrot.slane %v9585_v49, 4  ;;  %v12119_v46 = vld [vmem:[%s12943_s18 + $0x45c] sm:$0x3] }
 0x631   : > { %v8840_v27 = vsel %vm12962_vm6, %v8838_v0, %v8839_v1  ;;  %v9589_v62 = vsel %vm12946_vm4, %v9587_v30, %v9588_v7  ;;  %v12116_v30 = vld [vmem:[%s12943_s18 + $0x450] sm:$0xf] }
 0x632   : > { %v8055_v44 = vpop.f32.mrf.mxu0  ;;  %v9688_v0 = vunpack.c.l.b16 %v9589_v62 }
 0x633   : > { %v8056_v6 = vadd.f32 %v8055_v44, %v16182_v45  ;;  %v12118_v45 = vld [vmem:[%s12943_s18 + $0x458] sm:$0xf]  ;;  %v16665_v44 = vld [vmem:[%s12943_s18 + $0x454] sm:$0xf] }
 0x634   : > { %v8608_v60 = vpop.f32.mrf.mxu2  ;;  %v8389_v43 = vpop.f32.mrf.mxu1  ;;  %v9958_v34 = vrot.slane %v12118_v45, 6  ;;  %v12701_v45 = vld [vmem:[%s12943_s18 + $0x260] sm:$0xf] }
 0x635   : > { %v8663_v63 = vadd.f32 %v8608_v60, %v8441_v32  ;;  %12077 = vmatmul.msk.bf16.gmra.mxu0 %vm658_vm3, %v8967_v29  ;;  %v8442_v33 = vadd.f32 %v8389_v43, %v8056_v6  ;;  %v10083_v29 = vpack.c.b16 %v10054_v53, %v10053_v38  ;;  %v12321_v53 = vrot.slane %v16665_v44, 10 }
 0x637   : > { %12270 = vmatmul.msk.bf16.gmra.mxu1 %vm658_vm3, %v12437_v42  ;;  %v8739_v39 = vpop.f32.mrf.mxu3  ;;  %v16657_v32 = vadd.f32 %v8734_v61, %v8663_v63  ;;  %v8939_v61 = vunpack.c.l.b16 %v8840_v27  ;;  %v9586_v42 = vsel %vm12946_vm4, %v12287_v35, %v9585_v49  ;;  %v9960_v63 = vrot.slane %v9958_v34, 4  ;;  %v12438_v27 = vld [vmem:[%s12943_s18 + $0x428] sm:$0xff] }
 0x638   : > { %12303 = vmatmul.msk.bf16.gmra.mxu2 %vm658_vm3, %v9716_v16  ;;  %v9687_v49 = vunpack.c.l.b16 %v9586_v42  ;;  %v9959_v25 = vsel %vm12962_vm6, %v12321_v53, %v9958_v34  ;;  %v8843_v35 = vrot.slane %v12701_v45, 6 }
 0x639   : > { %v8968_v1 = vpack.c.b16 %v8939_v61, %v8938_v4  ;;  %v12702_v61 = vld [vmem:[%s12943_s18 + $0x25c] sm:$0xf] }
 0x63a   : > { %v8057_v56 = vpop.f32.mrf.mxu0  ;;  %v12062_v42 = vrot.slane %v12702_v61, 10  ;;  %v8845_v62 = vrot.slane %v8843_v35, 4 }
 0x63b   : > { %v8058_v6 = vadd.f32 %v8057_v56, %v16196_v58  ;;  %v9961_v58 = vrot.slane %v12119_v46, 6  ;;  %v9717_v56 = vpack.c.b16 %v9688_v0, %v9687_v49  ;;  %v10055_v46 = vunpack.c.l.b16 %v9959_v25 }
 0x63c   : > { %v8611_v60 = vpop.f32.mrf.mxu2  ;;  %v8391_v38 = vpop.f32.mrf.mxu1  ;;  %12337 = vmatmul.msk.bf16.gmra.mxu3 %vm658_vm3, %v10083_v29  ;;  %v10672_v29 = vld [vmem:[%s12943_s18 + $0x264] sm:$0x3]  ;;  %v9595_v0 = vrot.slane %v16665_v44, 5  ;;  %v8844_v25 = vsel %vm12962_vm6, %v12062_v42, %v8843_v35 }
 0x63d   : > { %v8664_v16 = vadd.f32 %v8611_v60, %v8442_v33  ;;  %v8443_v43 = vadd.f32 %v8391_v38, %v8058_v6  ;;  %v9962_v33 = vsel %vm12962_vm6, %v9960_v63, %v9961_v58  ;;  %v9592_v60 = vrot.slane %v12116_v30, 5  ;;  %v12115_v38 = vld [vmem:[%s12943_s18 + $0x44c] sm:$0xf] }
 0x63e   : > { %v10056_v6 = vunpack.c.l.b16 %v9962_v33  ;;  %v12288_v58 = vrot.slane %v12115_v38, 9  ;;  %v8940_v44 = vunpack.c.l.b16 %v8844_v25 }
 0x63f   : > { %v16675_v23 = vadd.f32 %v8737_v52, %v8664_v16  ;;  %v8742_v59 = vpop.f32.mrf.mxu3  ;;  %v8846_v16 = vrot.slane %v10672_v29, 6  ;;  %v9594_v49 = vrot.slane %v9592_v60, 4  ;;  %v12126_v29 = vld [vmem:[%s12943_s18 + $0x478] sm:$0x3] }
 0x641   : > { %v8847_v33 = vsel %vm12962_vm6, %v8845_v62, %v8846_v16  ;;  %v9596_v35 = vsel %vm12946_vm4, %v9594_v49, %v9595_v0  ;;  %v12123_v49 = vld [vmem:[%s12943_s18 + $0x46c] sm:$0xf] }
 0x642   : > { %v8060_v7 = vpop.f32.mrf.mxu0  ;;  %v9690_v62 = vunpack.c.l.b16 %v9596_v35 }
 0x643   : > { %v8061_v52 = vadd.f32 %v8060_v7, %v16212_v26  ;;  %v12125_v26 = vld [vmem:[%s12943_s18 + $0x474] sm:$0xf]  ;;  %v16700_v7 = vld [vmem:[%s12943_s18 + $0x470] sm:$0xf] }
 0x644   : > { %v8613_v31 = vpop.f32.mrf.mxu2  ;;  %v8394_v4 = vpop.f32.mrf.mxu1  ;;  %v9965_v45 = vrot.slane %v12125_v26, 6  ;;  %v12703_v26 = vld [vmem:[%s12943_s18 + $0x27c] sm:$0xf] }
 0x645   : > { %v8665_v34 = vadd.f32 %v8613_v31, %v8443_v43  ;;  %12078 = vmatmul.msk.bf16.gmra.mxu0 %vm658_vm3, %v8968_v1  ;;  %v8444_v53 = vadd.f32 %v8394_v4, %v8061_v52  ;;  %v10084_v1 = vpack.c.b16 %v10056_v6, %v10055_v46  ;;  %v12322_v6 = vrot.slane %v16700_v7, 10 }
 0x647   : > { %12271 = vmatmul.msk.bf16.gmra.mxu1 %vm658_vm3, %v12438_v27  ;;  %v8744_v63 = vpop.f32.mrf.mxu3  ;;  %v16692_v43 = vadd.f32 %v8739_v39, %v8665_v34  ;;  %v8941_v39 = vunpack.c.l.b16 %v8847_v33  ;;  %v9593_v27 = vsel %vm12946_vm4, %v12288_v58, %v9592_v60  ;;  %v9967_v34 = vrot.slane %v9965_v45, 4  ;;  %v12439_v33 = vld [vmem:[%s12943_s18 + $0x444] sm:$0xff] }
 0x648   : > { %12304 = vmatmul.msk.bf16.gmra.mxu2 %vm658_vm3, %v9717_v56  ;;  %v9689_v60 = vunpack.c.l.b16 %v9593_v27  ;;  %v9966_v38 = vsel %vm12962_vm6, %v12322_v6, %v9965_v45  ;;  %v8850_v58 = vrot.slane %v12703_v26, 6 }
 0x649   : > { %v8969_v16 = vpack.c.b16 %v8941_v39, %v8940_v44  ;;  %v12704_v39 = vld [vmem:[%s12943_s18 + $0x278] sm:$0xf] }
 0x64a   : > { %v8062_v30 = vpop.f32.mrf.mxu0  ;;  %v12063_v27 = vrot.slane %v12704_v39, 10  ;;  %v8852_v35 = vrot.slane %v8850_v58, 4 }
 0x64b   : > { %v8063_v52 = vadd.f32 %v8062_v30, %v16226_v22  ;;  %v9968_v22 = vrot.slane %v12126_v29, 6  ;;  %v9718_v30 = vpack.c.b16 %v9690_v62, %v9689_v60  ;;  %v10057_v29 = vunpack.c.l.b16 %v9966_v38 }
 0x64c   : > { %v8616_v31 = vpop.f32.mrf.mxu2  ;;  %v8396_v46 = vpop.f32.mrf.mxu1  ;;  %12338 = vmatmul.msk.bf16.gmra.mxu3 %vm658_vm3, %v10084_v1  ;;  %v10679_v1 = vld [vmem:[%s12943_s18 + $0x280] sm:$0x3]  ;;  %v9602_v62 = vrot.slane %v16700_v7, 5  ;;  %v8851_v38 = vsel %vm12962_vm6, %v12063_v27, %v8850_v58 }
 0x64d   : > { %v8666_v56 = vadd.f32 %v8616_v31, %v8444_v53  ;;  %v8445_v4 = vadd.f32 %v8396_v46, %v8063_v52  ;;  %v9969_v53 = vsel %vm12962_vm6, %v9967_v34, %v9968_v22  ;;  %v9599_v31 = vrot.slane %v12123_v49, 5  ;;  %v12122_v46 = vld [vmem:[%s12943_s18 + $0x468] sm:$0xf] }
 0x64e   : > { %v10058_v52 = vunpack.c.l.b16 %v9969_v53  ;;  %v12289_v22 = vrot.slane %v12122_v46, 9  ;;  %v8942_v7 = vunpack.c.l.b16 %v8851_v38 }
 0x64f   : > { %v16710_v61 = vadd.f32 %v8742_v59, %v8666_v56  ;;  %v8747_v42 = vpop.f32.mrf.mxu3  ;;  %v8853_v56 = vrot.slane %v10679_v1, 6  ;;  %v9601_v60 = vrot.slane %v9599_v31, 4  ;;  %v12133_v1 = vld [vmem:[%s12943_s18 + $0x494] sm:$0x3] }
 0x651   : > { %v8854_v53 = vsel %vm12962_vm6, %v8852_v35, %v8853_v56  ;;  %v9603_v58 = vsel %vm12946_vm4, %v9601_v60, %v9602_v62  ;;  %v12130_v60 = vld [vmem:[%s12943_s18 + $0x488] sm:$0xf] }
 0x652   : > { %v8065_v0 = vpop.f32.mrf.mxu0  ;;  %v9692_v35 = vunpack.c.l.b16 %v9603_v58 }
 0x653   : > { %v8066_v59 = vadd.f32 %v8065_v0, %v16242_v37  ;;  %v12132_v37 = vld [vmem:[%s12943_s18 + $0x490] sm:$0xf]  ;;  %v16735_v0 = vld [vmem:[%s12943_s18 + $0x48c] sm:$0xf] }
 0x654   : > { %v8618_v25 = vpop.f32.mrf.mxu2  ;;  %v8399_v44 = vpop.f32.mrf.mxu1  ;;  %v9972_v26 = vrot.slane %v12132_v37, 6  ;;  %v12705_v37 = vld [vmem:[%s12943_s18 + $0x298] sm:$0xf] }
 0x655   : > { %v8667_v45 = vadd.f32 %v8618_v25, %v8445_v4  ;;  %12079 = vmatmul.msk.bf16.gmra.mxu0 %vm658_vm3, %v8969_v16  ;;  %v8446_v6 = vadd.f32 %v8399_v44, %v8066_v59  ;;  %v10085_v16 = vpack.c.b16 %v10058_v52, %v10057_v29  ;;  %v12323_v52 = vrot.slane %v16735_v0, 10 }
 0x657   : > { %12272 = vmatmul.msk.bf16.gmra.mxu1 %vm658_vm3, %v12439_v33  ;;  %v8749_v34 = vpop.f32.mrf.mxu3  ;;  %v16727_v4 = vadd.f32 %v8744_v63, %v8667_v45  ;;  %v8943_v63 = vunpack.c.l.b16 %v8854_v53  ;;  %v9600_v33 = vsel %vm12946_vm4, %v12289_v22, %v9599_v31  ;;  %v9974_v45 = vrot.slane %v9972_v26, 4  ;;  %v12440_v53 = vld [vmem:[%s12943_s18 + $0x460] sm:$0xff] }
 0x658   : > { %12305 = vmatmul.msk.bf16.gmra.mxu2 %vm658_vm3, %v9718_v30  ;;  %v9691_v31 = vunpack.c.l.b16 %v9600_v33  ;;  %v9973_v46 = vsel %vm12962_vm6, %v12323_v52, %v9972_v26  ;;  %v8857_v22 = vrot.slane %v12705_v37, 6 }
 0x659   : > { %v8970_v56 = vpack.c.b16 %v8943_v63, %v8942_v7  ;;  %v12706_v63 = vld [vmem:[%s12943_s18 + $0x294] sm:$0xf] }
 0x65a   : > { %v8067_v49 = vpop.f32.mrf.mxu0  ;;  %v12064_v33 = vrot.slane %v12706_v63, 10  ;;  %v8859_v58 = vrot.slane %v8857_v22, 4 }
 0x65b   : > { %v8068_v59 = vadd.f32 %v8067_v49, %v16256_v24  ;;  %v9975_v24 = vrot.slane %v12133_v1, 6  ;;  %v9719_v49 = vpack.c.b16 %v9692_v35, %v9691_v31  ;;  %v10059_v1 = vunpack.c.l.b16 %v9973_v46 }
 0x65c   : > { %v8621_v25 = vpop.f32.mrf.mxu2  ;;  %v8401_v29 = vpop.f32.mrf.mxu1  ;;  %12339 = vmatmul.msk.bf16.gmra.mxu3 %vm658_vm3, %v10085_v16  ;;  %v10686_v16 = vld [vmem:[%s12943_s18 + $0x29c] sm:$0x3]  ;;  %v9609_v35 = vrot.slane %v16735_v0, 5  ;;  %v8858_v46 = vsel %vm12962_vm6, %v12064_v33, %v8857_v22 }
 0x65d   : > { %v8668_v30 = vadd.f32 %v8621_v25, %v8446_v6  ;;  %v8447_v44 = vadd.f32 %v8401_v29, %v8068_v59  ;;  %v9976_v6 = vsel %vm12962_vm6, %v9974_v45, %v9975_v24  ;;  %v9606_v25 = vrot.slane %v12130_v60, 5  ;;  %v12129_v29 = vld [vmem:[%s12943_s18 + $0x484] sm:$0xf] }
 0x65e   : > { %v10060_v59 = vunpack.c.l.b16 %v9976_v6  ;;  %v12290_v24 = vrot.slane %v12129_v29, 9  ;;  %v8944_v0 = vunpack.c.l.b16 %v8858_v46 }
 0x65f   : > { %v16745_v39 = vadd.f32 %v8747_v42, %v8668_v30  ;;  %v8752_v27 = vpop.f32.mrf.mxu3  ;;  %v8860_v30 = vrot.slane %v10686_v16, 6  ;;  %v9608_v31 = vrot.slane %v9606_v25, 4  ;;  %v12140_v16 = vld [vmem:[%s12943_s18 + $0x4b0] sm:$0x3] }
 0x661   : > { %v8861_v6 = vsel %vm12962_vm6, %v8859_v58, %v8860_v30  ;;  %v9610_v22 = vsel %vm12946_vm4, %v9608_v31, %v9609_v35  ;;  %v12137_v31 = vld [vmem:[%s12943_s18 + $0x4a4] sm:$0xf] }
 0x662   : > { %v8070_v62 = vpop.f32.mrf.mxu0  ;;  %v9694_v58 = vunpack.c.l.b16 %v9610_v22 }
 0x663   : > { %v8071_v42 = vadd.f32 %v8070_v62, %v16272_v8  ;;  %v12139_v8 = vld [vmem:[%s12943_s18 + $0x4ac] sm:$0xf]  ;;  %v16770_v62 = vld [vmem:[%s12943_s18 + $0x4a8] sm:$0xf] }
 0x664   : > { %v8623_v38 = vpop.f32.mrf.mxu2  ;;  %v8404_v7 = vpop.f32.mrf.mxu1  ;;  %v9979_v37 = vrot.slane %v12139_v8, 6  ;;  %v12707_v8 = vld [vmem:[%s12943_s18 + $0x2b4] sm:$0xf] }
 0x665   : > { %v8669_v26 = vadd.f32 %v8623_v38, %v8447_v44  ;;  %12080 = vmatmul.msk.bf16.gmra.mxu0 %vm658_vm3, %v8970_v56  ;;  %v8448_v52 = vadd.f32 %v8404_v7, %v8071_v42  ;;  %v10086_v56 = vpack.c.b16 %v10060_v59, %v10059_v1  ;;  %v12324_v59 = vrot.slane %v16770_v62, 10 }
 0x667   : > { %12273 = vmatmul.msk.bf16.gmra.mxu1 %vm658_vm3, %v12440_v53  ;;  %v8754_v45 = vpop.f32.mrf.mxu3  ;;  %v16762_v44 = vadd.f32 %v8749_v34, %v8669_v26  ;;  %v8945_v34 = vunpack.c.l.b16 %v8861_v6  ;;  %v9607_v53 = vsel %vm12946_vm4, %v12290_v24, %v9606_v25  ;;  %v9981_v26 = vrot.slane %v9979_v37, 4  ;;  %v12441_v6 = vld [vmem:[%s12943_s18 + $0x47c] sm:$0xff] }
 0x668   : > { %12306 = vmatmul.msk.bf16.gmra.mxu2 %vm658_vm3, %v9719_v49  ;;  %v9693_v25 = vunpack.c.l.b16 %v9607_v53  ;;  %v9980_v29 = vsel %vm12962_vm6, %v12324_v59, %v9979_v37  ;;  %v8864_v24 = vrot.slane %v12707_v8, 6 }
 0x669   : > { %v8971_v30 = vpack.c.b16 %v8945_v34, %v8944_v0  ;;  %v12708_v34 = vld [vmem:[%s12943_s18 + $0x2b0] sm:$0xf] }
 0x66a   : > { %v8072_v60 = vpop.f32.mrf.mxu0  ;;  %v12065_v53 = vrot.slane %v12708_v34, 10  ;;  %v8866_v22 = vrot.slane %v8864_v24, 4 }
 0x66b   : > { %v8073_v42 = vadd.f32 %v8072_v60, %v16286_v5  ;;  %v9982_v5 = vrot.slane %v12140_v16, 6  ;;  %v9720_v60 = vpack.c.b16 %v9694_v58, %v9693_v25  ;;  %v10061_v16 = vunpack.c.l.b16 %v9980_v29 }
 0x66c   : > { %v8626_v38 = vpop.f32.mrf.mxu2  ;;  %v8406_v1 = vpop.f32.mrf.mxu1  ;;  %12340 = vmatmul.msk.bf16.gmra.mxu3 %vm658_vm3, %v10086_v56  ;;  %v10693_v56 = vld [vmem:[%s12943_s18 + $0x2b8] sm:$0x3]  ;;  %v9616_v58 = vrot.slane %v16770_v62, 5  ;;  %v8865_v29 = vsel %vm12962_vm6, %v12065_v53, %v8864_v24 }
 0x66d   : > { %v8670_v49 = vadd.f32 %v8626_v38, %v8448_v52  ;;  %v8449_v7 = vadd.f32 %v8406_v1, %v8073_v42  ;;  %v9983_v52 = vsel %vm12962_vm6, %v9981_v26, %v9982_v5  ;;  %v9613_v38 = vrot.slane %v12137_v31, 5  ;;  %v12136_v1 = vld [vmem:[%s12943_s18 + $0x4a0] sm:$0xf] }
 0x66e   : > { %v10062_v42 = vunpack.c.l.b16 %v9983_v52  ;;  %v12291_v5 = vrot.slane %v12136_v1, 9  ;;  %v8946_v62 = vunpack.c.l.b16 %v8865_v29 }
 0x66f   : > { %v16780_v63 = vadd.f32 %v8752_v27, %v8670_v49  ;;  %v8757_v33 = vpop.f32.mrf.mxu3  ;;  %v8867_v49 = vrot.slane %v10693_v56, 6  ;;  %v9615_v25 = vrot.slane %v9613_v38, 4  ;;  %v12147_v56 = vld [vmem:[%s12943_s18 + $0x4cc] sm:$0x3] }
 0x671   : > { %v8868_v52 = vsel %vm12962_vm6, %v8866_v22, %v8867_v49  ;;  %v9617_v24 = vsel %vm12946_vm4, %v9615_v25, %v9616_v58  ;;  %v12144_v25 = vld [vmem:[%s12943_s18 + $0x4c0] sm:$0xf] }
 0x672   : > { %v8075_v35 = vpop.f32.mrf.mxu0  ;;  %v9696_v22 = vunpack.c.l.b16 %v9617_v24 }
 0x673   : > { %v8076_v27 = vadd.f32 %v8075_v35, %v16302_v50  ;;  %v12146_v50 = vld [vmem:[%s12943_s18 + $0x4c8] sm:$0xf]  ;;  %v16805_v35 = vld [vmem:[%s12943_s18 + $0x4c4] sm:$0xf] }
 0x674   : > { %v8628_v46 = vpop.f32.mrf.mxu2  ;;  %v8409_v0 = vpop.f32.mrf.mxu1  ;;  %v9986_v8 = vrot.slane %v12146_v50, 6  ;;  %v12709_v50 = vld [vmem:[%s12943_s18 + $0x2d0] sm:$0xf] }
 0x675   : > { %v8671_v37 = vadd.f32 %v8628_v46, %v8449_v7  ;;  %12081 = vmatmul.msk.bf16.gmra.mxu0 %vm658_vm3, %v8971_v30  ;;  %v8450_v59 = vadd.f32 %v8409_v0, %v8076_v27  ;;  %v10087_v30 = vpack.c.b16 %v10062_v42, %v10061_v16  ;;  %v12325_v42 = vrot.slane %v16805_v35, 10 }
 0x677   : > { %12274 = vmatmul.msk.bf16.gmra.mxu1 %vm658_vm3, %v12441_v6  ;;  %v8759_v26 = vpop.f32.mrf.mxu3  ;;  %v16797_v7 = vadd.f32 %v8754_v45, %v8671_v37  ;;  %v8947_v45 = vunpack.c.l.b16 %v8868_v52  ;;  %v9614_v6 = vsel %vm12946_vm4, %v12291_v5, %v9613_v38  ;;  %v9988_v37 = vrot.slane %v9986_v8, 4  ;;  %v12442_v52 = vld [vmem:[%s12943_s18 + $0x498] sm:$0xff] }
 0x678   : > { %12307 = vmatmul.msk.bf16.gmra.mxu2 %vm658_vm3, %v9720_v60  ;;  %v9695_v38 = vunpack.c.l.b16 %v9614_v6  ;;  %v9987_v1 = vsel %vm12962_vm6, %v12325_v42, %v9986_v8  ;;  %v8871_v5 = vrot.slane %v12709_v50, 6 }
 0x679   : > { %v8972_v49 = vpack.c.b16 %v8947_v45, %v8946_v62  ;;  %v12710_v45 = vld [vmem:[%s12943_s18 + $0x2cc] sm:$0xf] }
 0x67a   : > { %v8077_v31 = vpop.f32.mrf.mxu0  ;;  %v12066_v6 = vrot.slane %v12710_v45, 10  ;;  %v8873_v24 = vrot.slane %v8871_v5, 4 }
 0x67b   : > { %v8078_v27 = vadd.f32 %v8077_v31, %v16316_v55  ;;  %v9989_v55 = vrot.slane %v12147_v56, 6  ;;  %v9721_v31 = vpack.c.b16 %v9696_v22, %v9695_v38  ;;  %v10063_v56 = vunpack.c.l.b16 %v9987_v1 }
 0x67c   : > { %v8631_v46 = vpop.f32.mrf.mxu2  ;;  %v8411_v16 = vpop.f32.mrf.mxu1  ;;  %12341 = vmatmul.msk.bf16.gmra.mxu3 %vm658_vm3, %v10087_v30  ;;  %v10700_v30 = vld [vmem:[%s12943_s18 + $0x2d4] sm:$0x3]  ;;  %v9623_v22 = vrot.slane %v16805_v35, 5  ;;  %v8872_v1 = vsel %vm12962_vm6, %v12066_v6, %v8871_v5 }
 0x67d   : > { %v8672_v60 = vadd.f32 %v8631_v46, %v8450_v59  ;;  %v8451_v0 = vadd.f32 %v8411_v16, %v8078_v27  ;;  %v9990_v59 = vsel %vm12962_vm6, %v9988_v37, %v9989_v55  ;;  %v9620_v46 = vrot.slane %v12144_v25, 5  ;;  %v12143_v16 = vld [vmem:[%s12943_s18 + $0x4bc] sm:$0xf] }
 0x67e   : > { %v10064_v27 = vunpack.c.l.b16 %v9990_v59  ;;  %v12292_v55 = vrot.slane %v12143_v16, 9  ;;  %v8948_v35 = vunpack.c.l.b16 %v8872_v1 }
 0x67f   : > { %v16815_v34 = vadd.f32 %v8757_v33, %v8672_v60  ;;  %v8762_v53 = vpop.f32.mrf.mxu3  ;;  %v8874_v60 = vrot.slane %v10700_v30, 6  ;;  %v9622_v38 = vrot.slane %v9620_v46, 4  ;;  %v12154_v30 = vld [vmem:[%s12943_s18 + $0x4e8] sm:$0x3] }
 0x681   : > { %v8875_v59 = vsel %vm12962_vm6, %v8873_v24, %v8874_v60  ;;  %v9624_v5 = vsel %vm12946_vm4, %v9622_v38, %v9623_v22  ;;  %v12151_v38 = vld [vmem:[%s12943_s18 + $0x4dc] sm:$0xf] }
 0x682   : > { %v8080_v58 = vpop.f32.mrf.mxu0  ;;  %v9698_v24 = vunpack.c.l.b16 %v9624_v5 }
 0x683   : > { %v8081_v33 = vadd.f32 %v8080_v58, %v16332_v11  ;;  %v12153_v11 = vld [vmem:[%s12943_s18 + $0x4e4] sm:$0xf]  ;;  %v16840_v58 = vld [vmem:[%s12943_s18 + $0x4e0] sm:$0xf] }
 0x684   : > { %v8633_v29 = vpop.f32.mrf.mxu2  ;;  %v8414_v62 = vpop.f32.mrf.mxu1  ;;  %v9993_v50 = vrot.slane %v12153_v11, 6  ;;  %v12711_v11 = vld [vmem:[%s12943_s18 + $0x2ec] sm:$0xf] }
 0x685   : > { %v8673_v8 = vadd.f32 %v8633_v29, %v8451_v0  ;;  %12082 = vmatmul.msk.bf16.gmra.mxu0 %vm658_vm3, %v8972_v49  ;;  %v8452_v42 = vadd.f32 %v8414_v62, %v8081_v33  ;;  %v10088_v49 = vpack.c.b16 %v10064_v27, %v10063_v56  ;;  %v12326_v27 = vrot.slane %v16840_v58, 10 }
 0x687   : > { %12275 = vmatmul.msk.bf16.gmra.mxu1 %vm658_vm3, %v12442_v52  ;;  %v8764_v37 = vpop.f32.mrf.mxu3  ;;  %v16832_v0 = vadd.f32 %v8759_v26, %v8673_v8  ;;  %v8949_v26 = vunpack.c.l.b16 %v8875_v59  ;;  %v9621_v52 = vsel %vm12946_vm4, %v12292_v55, %v9620_v46  ;;  %v9995_v8 = vrot.slane %v9993_v50, 4  ;;  %v12443_v59 = vld [vmem:[%s12943_s18 + $0x4b4] sm:$0xff] }
 0x688   : > { %12308 = vmatmul.msk.bf16.gmra.mxu2 %vm658_vm3, %v9721_v31  ;;  %v9697_v46 = vunpack.c.l.b16 %v9621_v52  ;;  %v9994_v16 = vsel %vm12962_vm6, %v12326_v27, %v9993_v50  ;;  %v8878_v55 = vrot.slane %v12711_v11, 6 }
 0x689   : > { %v8973_v60 = vpack.c.b16 %v8949_v26, %v8948_v35  ;;  %v12712_v26 = vld [vmem:[%s12943_s18 + $0x2e8] sm:$0xf] }
 0x68a   : > { %v8082_v25 = vpop.f32.mrf.mxu0  ;;  %v12067_v52 = vrot.slane %v12712_v26, 10  ;;  %v8880_v5 = vrot.slane %v8878_v55, 4 }
 0x68b   : > { %v8083_v33 = vadd.f32 %v8082_v25, %v16346_v21  ;;  %v9996_v21 = vrot.slane %v12154_v30, 6  ;;  %v9722_v25 = vpack.c.b16 %v9698_v24, %v9697_v46  ;;  %v10065_v30 = vunpack.c.l.b16 %v9994_v16 }
 0x68c   : > { %v8636_v29 = vpop.f32.mrf.mxu2  ;;  %v8416_v56 = vpop.f32.mrf.mxu1  ;;  %12342 = vmatmul.msk.bf16.gmra.mxu3 %vm658_vm3, %v10088_v49  ;;  %v10707_v49 = vld [vmem:[%s12943_s18 + $0x2f0] sm:$0x3]  ;;  %v9630_v24 = vrot.slane %v16840_v58, 5  ;;  %v8879_v16 = vsel %vm12962_vm6, %v12067_v52, %v8878_v55 }
 0x68d   : > { %v8674_v31 = vadd.f32 %v8636_v29, %v8452_v42  ;;  %v8453_v62 = vadd.f32 %v8416_v56, %v8083_v33  ;;  %v9997_v42 = vsel %vm12962_vm6, %v9995_v8, %v9996_v21  ;;  %v9627_v29 = vrot.slane %v12151_v38, 5  ;;  %v12150_v56 = vld [vmem:[%s12943_s18 + $0x4d8] sm:$0xf] }
 0x68e   : > { %v10066_v33 = vunpack.c.l.b16 %v9997_v42  ;;  %v12293_v21 = vrot.slane %v12150_v56, 9  ;;  %v8950_v58 = vunpack.c.l.b16 %v8879_v16  ;;  %v12444_v16 = vld [vmem:[%s12943_s18 + $0x4d0] sm:$0xff] }
 0x68f   : > { %v16850_v45 = vadd.f32 %v8762_v53, %v8674_v31  ;;  %v8767_v6 = vpop.f32.mrf.mxu3  ;;  %v8881_v31 = vrot.slane %v10707_v49, 6  ;;  %v9629_v46 = vrot.slane %v9627_v29, 4  ;;  %v12161_v49 = vld [vmem:[%s12943_s18 + $0x504] sm:$0x3] }
 0x691   : > { %v8882_v42 = vsel %vm12962_vm6, %v8880_v5, %v8881_v31  ;;  %v9631_v55 = vsel %vm12946_vm4, %v9629_v46, %v9630_v24  ;;  %v12158_v46 = vld [vmem:[%s12943_s18 + $0x4f8] sm:$0xf] }
 0x692   : > { %v8085_v22 = vpop.f32.mrf.mxu0  ;;  %v9700_v5 = vunpack.c.l.b16 %v9631_v55 }
 0x693   : > { %v8086_v53 = vadd.f32 %v8085_v22, %v16362_v41  ;;  %v12160_v41 = vld [vmem:[%s12943_s18 + $0x500] sm:$0xf]  ;;  %v16875_v22 = vld [vmem:[%s12943_s18 + $0x4fc] sm:$0xf] }
 0x694   : > { %v8638_v1 = vpop.f32.mrf.mxu2  ;;  %v8419_v35 = vpop.f32.mrf.mxu1  ;;  %v10000_v11 = vrot.slane %v12160_v41, 6  ;;  %v12713_v41 = vld [vmem:[%s12943_s18 + $0x308] sm:$0xf] }
 0x695   : > { %v8675_v50 = vadd.f32 %v8638_v1, %v8453_v62  ;;  %12083 = vmatmul.msk.bf16.gmra.mxu0 %vm658_vm3, %v8973_v60  ;;  %v8454_v27 = vadd.f32 %v8419_v35, %v8086_v53  ;;  %v10089_v60 = vpack.c.b16 %v10066_v33, %v10065_v30  ;;  %v12327_v33 = vrot.slane %v16875_v22, 10 }
 0x697   : > { %12276 = vmatmul.msk.bf16.gmra.mxu1 %vm658_vm3, %v12443_v59  ;;  %v8769_v8 = vpop.f32.mrf.mxu3  ;;  %v16867_v62 = vadd.f32 %v8764_v37, %v8675_v50  ;;  %v8951_v37 = vunpack.c.l.b16 %v8882_v42  ;;  %v9628_v59 = vsel %vm12946_vm4, %v12293_v21, %v9627_v29  ;;  %v10002_v50 = vrot.slane %v10000_v11, 4 }
 0x698   : > { %12309 = vmatmul.msk.bf16.gmra.mxu2 %vm658_vm3, %v9722_v25  ;;  %v9699_v29 = vunpack.c.l.b16 %v9628_v59  ;;  %v10001_v56 = vsel %vm12962_vm6, %v12327_v33, %v10000_v11  ;;  %v8885_v21 = vrot.slane %v12713_v41, 6  ;;  %v12714_v11 = vld [vmem:[%s12943_s18 + $0x304] sm:$0xf] }
 0x699   : > { %v8974_v31 = vpack.c.b16 %v8951_v37, %v8950_v58  ;;  %v12068_v37 = vrot.slane %v12714_v11, 10 }
 0x69a   : > { %v8087_v38 = vpop.f32.mrf.mxu0  ;;  %v9723_v42 = vpack.c.b16 %v9700_v5, %v9699_v29  ;;  %v8887_v59 = vrot.slane %v8885_v21, 4 }
 0x69b   : > { %v8088_v53 = vadd.f32 %v8087_v38, %v16376_v3  ;;  %v10003_v3 = vrot.slane %v12161_v49, 6  ;;  %v10067_v38 = vunpack.c.l.b16 %v10001_v56  ;;  %v8886_v56 = vsel %vm12962_vm6, %v12068_v37, %v8885_v21 }
 0x69c   : > { %v8641_v1 = vpop.f32.mrf.mxu2  ;;  %v8421_v30 = vpop.f32.mrf.mxu1  ;;  %12343 = vmatmul.msk.bf16.gmra.mxu3 %vm658_vm3, %v10089_v60  ;;  %v10714_v60 = vld [vmem:[%s12943_s18 + $0x30c] sm:$0x3] }
 0x69d   : > { %v8676_v25 = vadd.f32 %v8641_v1, %v8454_v27  ;;  %v8455_v35 = vadd.f32 %v8421_v30, %v8088_v53  ;;  %v10004_v27 = vsel %vm12962_vm6, %v10002_v50, %v10003_v3  ;;  %v9634_v53 = vrot.slane %v12158_v46, 5  ;;  %v12167_v30 = vld [vmem:[%s12943_s18 + $0x51c] sm:$0xf]  ;;  %v16910_v46 = vld [vmem:[%s12943_s18 + $0x518] sm:$0xf] }
 0x69e   : > { %v10068_v49 = vunpack.c.l.b16 %v10004_v27  ;;  %v8888_v55 = vrot.slane %v10714_v60, 6  ;;  %v10007_v41 = vrot.slane %v12167_v30, 6 }
 0x69f   : > { %v16885_v26 = vadd.f32 %v8767_v6, %v8676_v25  ;;  %v10157_v52 = vpop.f32.mrf.mxu3  ;;  %v12157_v25 = vld [vmem:[%s12943_s18 + $0x4f4] sm:$0xf]  ;;  %v9636_v29 = vrot.slane %v9634_v53, 4 }
 0x6a0   : > { %v12294_v3 = vrot.slane %v12157_v25, 9  ;;  %v8889_v27 = vsel %vm12962_vm6, %v8887_v59, %v8888_v55  ;;  %v10009_v11 = vrot.slane %v10007_v41, 4  ;;  %v12716_v59 = vld [vmem:[%s17337_s5] sm:$0xf] }
 0x6a1   : > { %v16927_v55 = vperm.slane %v12716_v59, 3 }
 0x6a2   : > { %v9042_v24 = vpop.f32.mrf.mxu0  ;;  %v9635_v21 = vsel %vm12946_vm4, %v12294_v3, %v9634_v53 }
 0x6a3   : > { %v9122_v33 = vadd.f32 %v9042_v24, %v16415_v10  ;;  %v12168_v24 = vld [vmem:[%s12943_s18 + $0x520] sm:$0x3]  ;;  %v9701_v30 = vunpack.c.l.b16 %v9635_v21 }
 0x6a4   : > { %v8643_v6 = vpop.f32.mrf.mxu2  ;;  %v9409_v58 = vpop.f32.mrf.mxu1  ;;  %v10010_v37 = vrot.slane %v12168_v24, 6 }
 0x6a5   : > { %v8677_v1 = vadd.f32 %v8643_v6, %v8455_v35  ;;  %12084 = vmatmul.msk.bf16.gmra.mxu0 %vm658_vm3, %v8974_v31  ;;  %v9637_v35 = vrot.slane %v16875_v22, 5  ;;  %v10090_v31 = vpack.c.b16 %v10068_v49, %v10067_v38  ;;  %v9489_v60 = vadd.f32 %v9409_v58, %v9122_v33 }
 0x6a6   : > { %v12328_v58 = vrot.slane %v16910_v46, 10 }
 0x6a7   : > { %12277 = vmatmul.msk.bf16.gmra.mxu1 %vm658_vm3, %v12444_v16  ;;  %v10159_v50 = vpop.f32.mrf.mxu3  ;;  %v16902_v5 = vadd.f32 %v8769_v8, %v8677_v1  ;;  %v12715_v8 = vld [vmem:[%s17336_s4] sm:$0xf]  ;;  %v8952_v16 = vunpack.c.l.b16 %v8886_v56  ;;  %v9638_v38 = vsel %vm12946_vm4, %v9636_v29, %v9637_v35  ;;  %v10011_v56 = vsel %vm12962_vm6, %v10009_v11, %v10010_v37 }
 0x6a8   : > { %12310 = vmatmul.msk.bf16.gmra.mxu2 %vm658_vm3, %v9723_v42  ;;  %v16916_v22 = vperm.slane %v12715_v8, 3  ;;  %v8953_v42 = vunpack.c.l.b16 %v8889_v27  ;;  %v9702_v33 = vunpack.c.l.b16 %v9638_v38  ;;  %v12717_v27 = vld [vmem:[%s12943_s18 + $0x324] sm:$0xf]  ;;  %v10070_v38 = vunpack.c.l.b16 %v10011_v56 }
 0x6a9   : > { %17445 = vst [vmem:[#allocation23_spill] sm:$0xff] %v16902_v5  ;;  %v8892_v24 = vrot.slane %v12717_v27, 6 }
 0x6aa   : > { %v9044_v10 = vpop.f32.mrf.mxu0  ;;  %v8975_v29 = vpack.c.b16 %v8953_v42, %v8952_v16  ;;  %v12445_v42 = vld [vmem:[%s12943_s18 + $0x4ec] sm:$0xff] }
 0x6ab   : > { %v9123_v25 = vadd.f32 %v9044_v10, %v16425_v19  ;;  %v10721_v19 = vld [vmem:[%s12943_s18 + $0x328] sm:$0x3]  ;;  %v8894_v27 = vrot.slane %v8892_v24, 4 }
 0x6ac   : > { %v9791_v6 = vpop.f32.mrf.mxu2  ;;  %v9411_v1 = vpop.f32.mrf.mxu1  ;;  %12344 = vmatmul.msk.bf16.gmra.mxu3 %vm658_vm3, %v10090_v31  ;;  %v10008_v31 = vsel %vm12962_vm6, %v12328_v58, %v10007_v41  ;;  %v12164_v58 = vld [vmem:[%s12943_s18 + $0x510] sm:$0xf]  ;;  %v8895_v5 = vrot.slane %v10721_v19, 6 }
 0x6ad   : > { %v9871_v49 = vadd.f32 %v9791_v6, %v9489_v60  ;;  %v9490_v10 = vadd.f32 %v9411_v1, %v9123_v25  ;;  %v9724_v6 = vpack.c.b16 %v9702_v33, %v9701_v30  ;;  %v10069_v21 = vunpack.c.l.b16 %v10008_v31  ;;  %v12174_v1 = vld [vmem:[%s12943_s18 + $0x538] sm:$0xf] }
 0x6ae   : > { %v12295_v33 = vrot.slane %v12164_v58, 9  ;;  %v10014_v19 = vrot.slane %v12174_v1, 6 }
 0x6af   : > { %v10237_v53 = vadd.f32 %v10157_v52, %v9871_v49  ;;  %v10162_v3 = vpop.f32.mrf.mxu3  ;;  %v12165_v52 = vld [vmem:[%s12943_s18 + $0x514] sm:$0xf]  ;;  %v12718_v49 = vld [vmem:[%s12943_s18 + $0x320] sm:$0xf]  ;;  %v10091_v31 = vpack.c.b16 %v10070_v38, %v10069_v21 }
 0x6b0   : > { %v12069_v41 = vrot.slane %v12718_v49, 10  ;;  %v9641_v59 = vrot.slane %v12165_v52, 5  ;;  %v9644_v52 = vrot.slane %v16910_v46, 5 }
 0x6b1   : > { %v10270_v35 = vmul.f32 %v16916_v22, %v10237_v53 }
 0x6b2   : > { %v9047_v60 = vpop.f32.mrf.mxu0  ;;  %v9643_v56 = vrot.slane %v9641_v59, 4  ;;  %v9642_v46 = vsel %vm12946_vm4, %v12295_v33, %v9641_v59 }
 0x6b3   : > { %v10303_v8 = vadd.f32 %v16927_v55, %v10270_v35  ;;  %v9124_v30 = vadd.f32 %v9047_v60, %v16439_v14  ;;  %v8896_v14 = vsel %vm12962_vm6, %v8894_v27, %v8895_v5  ;;  %v16955_v60 = vld [vmem:[%s12943_s18 + $0x534] sm:$0xf]  ;;  %v9703_v27 = vunpack.c.l.b16 %v9642_v46 }
 0x6b4   : > { %v9793_v16 = vpop.f32.mrf.mxu2  ;;  %v9414_v11 = vpop.f32.mrf.mxu1  ;;  %v12329_v49 = vrot.slane %v16955_v60, 10 }
 0x6b5   : > { %v9872_v53 = vadd.f32 %v9793_v16, %v9490_v10  ;;  %v10335_v37 = vmax.f32 %v10303_v8, 0.0  ;;  %12085 = vmatmul.msk.bf16.gmra.mxu0 %vm658_vm3, %v8975_v29  ;;  %v12175_v8 = vld [vmem:[%s12943_s18 + $0x53c] sm:$0x3]  ;;  %v9491_v16 = vadd.f32 %v9414_v11, %v9124_v30 }
 0x6b6   : > { %v10017_v11 = vrot.slane %v12175_v8, 6 }
 0x6b7   : > { %v10238_v25 = vadd.f32 %v10159_v50, %v9872_v53  ;;  %10399 = vrot.lane.b32.xlu0 %v10335_v37, %s12812_s30  ;;  %12278 = vmatmul.msk.bf16.gmra.mxu1 %vm658_vm3, %v12445_v42  ;;  %v10164_v35 = vpop.f32.mrf.mxu3  ;;  %v8893_v50 = vsel %vm12962_vm6, %v12069_v41, %v8892_v24  ;;  %v9645_v24 = vsel %vm12946_vm4, %v9643_v56, %v9644_v52  ;;  %v10016_v53 = vrot.slane %v10014_v19, 4 }
 0x6b8   : > { %12311 = vmatmul.msk.bf16.gmra.mxu2 %vm658_vm3, %v9724_v6  ;;  %v8954_v38 = vunpack.c.l.b16 %v8893_v50  ;;  %v8955_v6 = vunpack.c.l.b16 %v8896_v14  ;;  %v9704_v1 = vunpack.c.l.b16 %v9645_v24  ;;  %v10015_v56 = vsel %vm12962_vm6, %v12329_v49, %v10014_v19  ;;  %v10728_v50 = vld [vmem:[%s12943_s18 + $0x344] sm:$0x3] }
 0x6b9   : > { %v10271_v29 = vmul.f32 %v16916_v22, %v10238_v25  ;;  %v10071_v46 = vunpack.c.l.b16 %v10015_v56 }
 0x6ba   : > { %v9049_v10 = vpop.f32.mrf.mxu0  ;;  %v8976_v30 = vpack.c.b16 %v8955_v6, %v8954_v38  ;;  %v9725_v8 = vpack.c.b16 %v9704_v1, %v9703_v27  ;;  %v12720_v38 = vld [vmem:[%s12943_s18 + $0x33c] sm:$0xf]  ;;  %v12171_v6 = vld [vmem:[%s12943_s18 + $0x52c] sm:$0xf] }
 0x6bb   : > { %v10304_v42 = vadd.f32 %v16927_v55, %v10271_v29  ;;  %v9125_v59 = vadd.f32 %v9049_v10, %v16449_v48  ;;  %v12172_v48 = vld [vmem:[%s12943_s18 + $0x530] sm:$0xf]  ;;  %v12070_v19 = vrot.slane %v12720_v38, 10  ;;  %v12296_v27 = vrot.slane %v12171_v6, 9 }
 0x6bc   : > { %v9796_v21 = vpop.f32.mrf.mxu2  ;;  %v9416_v41 = vpop.f32.mrf.mxu1  ;;  %12345 = vmatmul.msk.bf16.gmra.mxu3 %vm658_vm3, %v10091_v31  ;;  %v10018_v31 = vsel %vm12962_vm6, %v10016_v53, %v10017_v11  ;;  %v9648_v24 = vrot.slane %v12172_v48, 5  ;;  %v12181_v11 = vld [vmem:[%s12943_s18 + $0x554] sm:$0xf] }
 0x6bd   : > { %v9873_v5 = vadd.f32 %v9796_v21, %v9491_v16  ;;  %v10336_v58 = vmax.f32 %v10304_v42, 0.0  ;;  %v9492_v14 = vadd.f32 %v9416_v41, %v9125_v59  ;;  %v12446_v42 = vld [vmem:[%s12943_s18 + $0x508] sm:$0xff]  ;;  %v10072_v21 = vunpack.c.l.b16 %v10018_v31 }
 0x6be   : > { %v8902_v41 = vrot.slane %v10728_v50, 6  ;;  %v9650_v56 = vrot.slane %v9648_v24, 4  ;;  %v9651_v31 = vrot.slane %v16955_v60, 5  ;;  %v10021_v48 = vrot.slane %v12181_v11, 6  ;;  %v12182_v50 = vld [vmem:[%s12943_s18 + $0x558] sm:$0x3] }
 0x6bf   : > { %v10239_v37 = vadd.f32 %v10162_v3, %v9873_v5  ;;  %10401 = vrot.lane.b32.xlu1 %v10336_v58, %s12812_s30  ;;  %v10167_v25 = vpop.f32.mrf.mxu3  ;;  %v12719_v3 = vld [vmem:[%s12943_s18 + $0x340] sm:$0xf]  ;;  %v9649_v60 = vsel %vm12946_vm4, %v12296_v27, %v9648_v24 }
 0x6c0   : > { %v8899_v52 = vrot.slane %v12719_v3, 6  ;;  %v16992_v3 = vld [vmem:[%s12943_s18 + $0x550] sm:$0xf]  ;;  %v10023_v6 = vrot.slane %v10021_v48, 4 }
 0x6c1   : > { %v10272_v33 = vmul.f32 %v16916_v22, %v10239_v37 }
 0x6c2   : > { %v9052_v29 = vpop.f32.mrf.mxu0  ;;  %v8901_v53 = vrot.slane %v8899_v52, 4 }
 0x6c3   : > { %v10305_v10 = vadd.f32 %v16927_v55, %v10272_v33  ;;  %v9126_v59 = vadd.f32 %v9052_v29, %v16463_v54  ;;  %v10092_v33 = vpack.c.b16 %v10072_v21, %v10071_v46  ;;  %v12330_v46 = vrot.slane %v16992_v3, 10 }
 0x6c4   : > { %v9798_v16 = vpop.f32.mrf.mxu2  ;;  %v9419_v5 = vpop.f32.mrf.mxu1  ;;  %v8903_v54 = vsel %vm12962_vm6, %v8901_v53, %v8902_v41 }
 0x6c5   : > { %v9874_v49 = vadd.f32 %v9798_v16, %v9492_v14  ;;  %v10337_v58 = vmax.f32 %v10305_v10, 0.0  ;;  %12086 = vmatmul.msk.bf16.gmra.mxu0 %vm658_vm3, %v8976_v30  ;;  %v9493_v14 = vadd.f32 %v9419_v5, %v9126_v59  ;;  %v10022_v59 = vsel %vm12962_vm6, %v12330_v46, %v10021_v48 }
 0x6c7   : > { %v10240_v37 = vadd.f32 %v10164_v35, %v9874_v49  ;;  %10403 = vrot.lane.b32.xlu2 %v10337_v58, %s12812_s30  ;;  %12279 = vmatmul.msk.bf16.gmra.mxu1 %vm658_vm3, %v12446_v42  ;;  %v10169_v1 = vpop.f32.mrf.mxu3  ;;  %v8900_v35 = vsel %vm12962_vm6, %v12070_v19, %v8899_v52  ;;  %v9652_v52 = vsel %vm12946_vm4, %v9650_v56, %v9651_v31  ;;  %v10024_v49 = vrot.slane %v12182_v50, 6  ;;  %v10735_v31 = vld [vmem:[%s12943_s18 + $0x360] sm:$0x3]  ;;  %v12447_v50 = vld [vmem:[%s12943_s18 + $0x524] sm:$0xff] }
 0x6c8   : > { %12312 = vmatmul.msk.bf16.gmra.mxu2 %vm658_vm3, %v9725_v8  ;;  %v8956_v42 = vunpack.c.l.b16 %v8900_v35  ;;  %v8957_v8 = vunpack.c.l.b16 %v8903_v54  ;;  %v9705_v58 = vunpack.c.l.b16 %v9649_v60  ;;  %v9706_v53 = vunpack.c.l.b16 %v9652_v52  ;;  %v12722_v60 = vld [vmem:[%s12943_s18 + $0x358] sm:$0xf] }
 0x6c9   : > { %v10273_v30 = vmul.f32 %v16916_v22, %v10240_v37  ;;  %v10025_v27 = vsel %vm12962_vm6, %v10023_v6, %v10024_v49  ;;  %v12071_v48 = vrot.slane %v12722_v60, 10 }
 0x6ca   : > { %v9054_v29 = vpop.f32.mrf.mxu0  ;;  %v8977_v11 = vpack.c.b16 %v8957_v8, %v8956_v42  ;;  %v9726_v54 = vpack.c.b16 %v9706_v53, %v9705_v58 }
 0x6cb   : > { %v10306_v10 = vadd.f32 %v16927_v55, %v10273_v30  ;;  %v9127_v24 = vadd.f32 %v9054_v29, %v16473_v18  ;;  %v12179_v18 = vld [vmem:[%s12943_s18 + $0x54c] sm:$0xf] }
 0x6cc   : > { %v9801_v16 = vpop.f32.mrf.mxu2  ;;  %v9421_v38 = vpop.f32.mrf.mxu1  ;;  %12346 = vmatmul.msk.bf16.gmra.mxu3 %vm658_vm3, %v10092_v33  ;;  %v9655_v42 = vrot.slane %v12179_v18, 5  ;;  %v12189_v18 = vld [vmem:[%s12943_s18 + $0x574] sm:$0x3] }
 0x6cd   : > { %v9875_v21 = vadd.f32 %v9801_v16, %v9493_v14  ;;  %v10338_v19 = vmax.f32 %v10306_v10, 0.0  ;;  %v9494_v30 = vadd.f32 %v9421_v38, %v9127_v24  ;;  %v10073_v14 = vunpack.c.l.b16 %v10022_v59  ;;  %v12178_v16 = vld [vmem:[%s12943_s18 + $0x548] sm:$0xf]  ;;  %v17029_v59 = vld [vmem:[%s12943_s18 + $0x56c] sm:$0xf] }
 0x6ce   : > { %v10074_v10 = vunpack.c.l.b16 %v10025_v27  ;;  %v8909_v38 = vrot.slane %v10735_v31, 6  ;;  %v9657_v53 = vrot.slane %v9655_v42, 4 }
 0x6cf   : > { %v10241_v5 = vadd.f32 %v10167_v25, %v9875_v21  ;;  %10405 = vrot.lane.b32.xlu0 %v10338_v19, %s12812_s30  ;;  %v10172_v41 = vpop.f32.mrf.mxu3  ;;  %v12721_v25 = vld [vmem:[%s12943_s18 + $0x35c] sm:$0xf]  ;;  %v12188_v19 = vld [vmem:[%s12943_s18 + $0x570] sm:$0xf] }
 0x6d0   : > { %v8906_v33 = vrot.slane %v12721_v25, 6  ;;  %v10093_v58 = vpack.c.b16 %v10074_v10, %v10073_v14  ;;  %v10028_v27 = vrot.slane %v12188_v19, 6 }
 0x6d1   : > { %v10274_v37 = vmul.f32 %v16916_v22, %v10241_v5  ;;  %v12297_v5 = vrot.slane %v12178_v16, 9 }
 0x6d2   : > { %v9057_v56 = vpop.f32.mrf.mxu0  ;;  %v8908_v21 = vrot.slane %v8906_v33, 4  ;;  %v10030_v60 = vrot.slane %v10028_v27, 4 }
 0x6d3   : > { %v10307_v35 = vadd.f32 %v16927_v55, %v10274_v37  ;;  %v9128_v49 = vadd.f32 %v9057_v56, %v16487_v9  ;;  %v9658_v37 = vrot.slane %v16992_v3, 5  ;;  %v9656_v3 = vsel %vm12946_vm4, %v12297_v5, %v9655_v42 }
 0x6d4   : > { %v9803_v29 = vpop.f32.mrf.mxu2  ;;  %v9424_v52 = vpop.f32.mrf.mxu1  ;;  %v8910_v9 = vsel %vm12962_vm6, %v8908_v21, %v8909_v38 }
 0x6d5   : > { %v9876_v8 = vadd.f32 %v9803_v29, %v9494_v30  ;;  %v10339_v46 = vmax.f32 %v10307_v35, 0.0  ;;  %12087 = vmatmul.msk.bf16.gmra.mxu0 %vm658_vm3, %v8977_v11  ;;  %v9495_v56 = vadd.f32 %v9424_v52, %v9128_v49  ;;  %v12331_v29 = vrot.slane %v17029_v59, 10 }
 0x6d7   : > { %v10242_v6 = vadd.f32 %v10169_v1, %v9876_v8  ;;  %10407 = vrot.lane.b32.xlu1 %v10339_v46, %s12812_s30  ;;  %12280 = vmatmul.msk.bf16.gmra.mxu1 %vm658_vm3, %v12447_v50  ;;  %v10174_v24 = vpop.f32.mrf.mxu3  ;;  %v8907_v1 = vsel %vm12962_vm6, %v12071_v48, %v8906_v33  ;;  %v9659_v33 = vsel %vm12946_vm4, %v9657_v53, %v9658_v37  ;;  %v10031_v48 = vrot.slane %v12189_v18, 6 }
 0x6d8   : > { %12313 = vmatmul.msk.bf16.gmra.mxu2 %vm658_vm3, %v9726_v54  ;;  %v8958_v35 = vunpack.c.l.b16 %v8907_v1  ;;  %v8959_v54 = vunpack.c.l.b16 %v8910_v9  ;;  %v9707_v8 = vunpack.c.l.b16 %v9656_v3  ;;  %v9708_v52 = vunpack.c.l.b16 %v9659_v33  ;;  %v12448_v9 = vld [vmem:[%s12943_s18 + $0x540] sm:$0xff] }
 0x6d9   : > { %v10275_v11 = vmul.f32 %v16916_v22, %v10242_v6  ;;  %v10029_v19 = vsel %vm12962_vm6, %v12331_v29, %v10028_v27  ;;  %v10032_v6 = vsel %vm12962_vm6, %v10030_v60, %v10031_v48 }
 0x6da   : > { %v9059_v25 = vpop.f32.mrf.mxu0  ;;  %v8978_v21 = vpack.c.b16 %v8959_v54, %v8958_v35  ;;  %v10076_v18 = vunpack.c.l.b16 %v10032_v6  ;;  %v12196_v6 = vld [vmem:[%s12943_s18 + $0x590] sm:$0x3] }
 0x6db   : > { %v10308_v31 = vadd.f32 %v16927_v55, %v10275_v11  ;;  %v9129_v42 = vadd.f32 %v9059_v25, %v16497_v57  ;;  %v12186_v57 = vld [vmem:[%s12943_s18 + $0x568] sm:$0xf]  ;;  %v9727_v11 = vpack.c.b16 %v9708_v52, %v9707_v8  ;;  %v10075_v25 = vunpack.c.l.b16 %v10029_v19 }
 0x6dc   : > { %v9806_v30 = vpop.f32.mrf.mxu2  ;;  %v9426_v14 = vpop.f32.mrf.mxu1  ;;  %12347 = vmatmul.msk.bf16.gmra.mxu3 %vm658_vm3, %v10093_v58  ;;  %v10742_v58 = vld [vmem:[%s12943_s18 + $0x37c] sm:$0x3]  ;;  %v9662_v3 = vrot.slane %v12186_v57, 5  ;;  %v9665_v8 = vrot.slane %v17029_v59, 5 }
 0x6dd   : > { %v9877_v50 = vadd.f32 %v9806_v30, %v9495_v56  ;;  %v10340_v10 = vmax.f32 %v10308_v31, 0.0  ;;  %v9496_v53 = vadd.f32 %v9426_v14, %v9129_v42  ;;  %v12724_v56 = vld [vmem:[%s12943_s18 + $0x374] sm:$0xf]  ;;  %v12185_v31 = vld [vmem:[%s12943_s18 + $0x564] sm:$0xf]  ;;  %v8916_v29 = vrot.slane %v10742_v58, 6 }
 0x6de   : > { %v12072_v27 = vrot.slane %v12724_v56, 10  ;;  %v12298_v60 = vrot.slane %v12185_v31, 9  ;;  %v9664_v42 = vrot.slane %v9662_v3, 4 }
 0x6df   : > { %v10243_v16 = vadd.f32 %v10172_v41, %v9877_v50  ;;  %10409 = vrot.lane.b32.xlu2 %v10340_v10, %s12812_s30  ;;  %v10177_v46 = vpop.f32.mrf.mxu3  ;;  %v12723_v41 = vld [vmem:[%s12943_s18 + $0x378] sm:$0xf]  ;;  %v12195_v50 = vld [vmem:[%s12943_s18 + $0x58c] sm:$0xf] }
 0x6e0   : > { %v8913_v49 = vrot.slane %v12723_v41, 6  ;;  %v9663_v59 = vsel %vm12946_vm4, %v12298_v60, %v9662_v3 }
 0x6e1   : > { %v10276_v38 = vmul.f32 %v16916_v22, %v10243_v16  ;;  %v10094_v16 = vpack.c.b16 %v10076_v18, %v10075_v25  ;;  %v10038_v18 = vrot.slane %v12196_v6, 6  ;;  %v9709_v3 = vunpack.c.l.b16 %v9663_v59  ;;  %v12192_v59 = vld [vmem:[%s12943_s18 + $0x580] sm:$0xf] }
 0x6e2   : > { %v9062_v5 = vpop.f32.mrf.mxu0  ;;  %v8915_v33 = vrot.slane %v8913_v49, 4 }
 0x6e3   : > { %v10309_v37 = vadd.f32 %v16927_v55, %v10276_v38  ;;  %v9130_v10 = vadd.f32 %v9062_v5, %v16511_v36  ;;  %v10035_v38 = vrot.slane %v12195_v50, 6 }
 0x6e4   : > { %v9808_v1 = vpop.f32.mrf.mxu2  ;;  %v9429_v35 = vpop.f32.mrf.mxu1  ;;  %v8917_v36 = vsel %vm12962_vm6, %v8915_v33, %v8916_v29 }
 0x6e5   : > { %v9878_v30 = vadd.f32 %v9808_v1, %v9496_v53  ;;  %v10341_v54 = vmax.f32 %v10309_v37, 0.0  ;;  %12088 = vmatmul.msk.bf16.gmra.mxu0 %vm658_vm3, %v8978_v21  ;;  %v17066_v21 = vld [vmem:[%s12943_s18 + $0x588] sm:$0xf]  ;;  %v9497_v41 = vadd.f32 %v9429_v35, %v9130_v10  ;;  %v8961_v53 = vunpack.c.l.b16 %v8917_v36 }
 0x6e6   : > { %v12332_v37 = vrot.slane %v17066_v21, 10  ;;  %v10037_v25 = vrot.slane %v10035_v38, 4 }
 0x6e7   : > { %v10244_v14 = vadd.f32 %v10174_v24, %v9878_v30  ;;  %10411 = vrot.lane.b32.xlu0 %v10341_v54, %s12812_s30  ;;  %12281 = vmatmul.msk.bf16.gmra.mxu1 %vm658_vm3, %v12448_v9  ;;  %v10179_v48 = vpop.f32.mrf.mxu3  ;;  %v8914_v24 = vsel %vm12962_vm6, %v12072_v27, %v8913_v49  ;;  %v9666_v49 = vsel %vm12946_vm4, %v9664_v42, %v9665_v8  ;;  %v12449_v8 = vld [vmem:[%s12943_s18 + $0x55c] sm:$0xff] }
 0x6e8   : > { %12314 = vmatmul.msk.bf16.gmra.mxu2 %vm658_vm3, %v9727_v11  ;;  %v8960_v58 = vunpack.c.l.b16 %v8914_v24  ;;  %v9710_v30 = vunpack.c.l.b16 %v9666_v49  ;;  %v10036_v33 = vsel %vm12962_vm6, %v12332_v37, %v10035_v38  ;;  %v10039_v29 = vsel %vm12962_vm6, %v10037_v25, %v10038_v18 }
 0x6e9   : > { %v10277_v52 = vmul.f32 %v16916_v22, %v10244_v14  ;;  %v10077_v24 = vunpack.c.l.b16 %v10036_v33  ;;  %v10078_v36 = vunpack.c.l.b16 %v10039_v29  ;;  %v12299_v25 = vrot.slane %v12192_v59, 9  ;;  %v17104_v33 = vld [vmem:[%s12943_s18 + $0x5a4] sm:$0xf]  ;;  %v12203_v29 = vld [vmem:[%s12943_s18 + $0x5ac] sm:$0x3] }
 0x6ea   : > { %v9064_v19 = vpop.f32.mrf.mxu0  ;;  %v8979_v54 = vpack.c.b16 %v8961_v53, %v8960_v58 }
 0x6eb   : > { %v10310_v57 = vadd.f32 %v16927_v55, %v10277_v52  ;;  %v9131_v27 = vadd.f32 %v9064_v19, %v16521_v28  ;;  %v12193_v28 = vld [vmem:[%s12943_s18 + $0x584] sm:$0xf]  ;;  %v9728_v52 = vpack.c.b16 %v9710_v30, %v9709_v3 }
 0x6ec   : > { %v9811_v5 = vpop.f32.mrf.mxu2  ;;  %v9431_v1 = vpop.f32.mrf.mxu1  ;;  %12348 = vmatmul.msk.bf16.gmra.mxu3 %vm658_vm3, %v10094_v16  ;;  %v10749_v16 = vld [vmem:[%s12943_s18 + $0x398] sm:$0x3] }
 0x6ed   : > { %v9879_v11 = vadd.f32 %v9811_v5, %v9497_v41  ;;  %v10342_v9 = vmax.f32 %v10310_v57, 0.0  ;;  %v9498_v10 = vadd.f32 %v9431_v1, %v9131_v27  ;;  %v12726_v41 = vld [vmem:[%s12943_s18 + $0x390] sm:$0xf]  ;;  %v9669_v5 = vrot.slane %v12193_v28, 5 }
 0x6ee   : > { %v12073_v57 = vrot.slane %v12726_v41, 10  ;;  %v8923_v53 = vrot.slane %v10749_v16, 6 }
 0x6ef   : > { %v10245_v56 = vadd.f32 %v10177_v46, %v9879_v11  ;;  %10413 = vrot.lane.b32.xlu1 %v10342_v9, %s12812_s30  ;;  %v10182_v31 = vpop.f32.mrf.mxu3  ;;  %v12725_v46 = vld [vmem:[%s12943_s18 + $0x394] sm:$0xf]  ;;  %v12202_v11 = vld [vmem:[%s12943_s18 + $0x5a8] sm:$0xf]  ;;  %v10095_v9 = vpack.c.b16 %v10078_v36, %v10077_v24  ;;  %v9670_v28 = vsel %vm12946_vm4, %v12299_v25, %v9669_v5  ;;  %v12450_v25 = vld [vmem:[%s12943_s18 + $0x578] sm:$0xff] }
 0x6f0   : > { %v8920_v14 = vrot.slane %v12725_v46, 6  ;;  %v10042_v30 = vrot.slane %v12202_v11, 6  ;;  %v12200_v11 = vld [vmem:[%s12943_s18 + $0x5a0] sm:$0xf] }
 0x6f1   : > { %v10278_v35 = vmul.f32 %v16916_v22, %v10245_v56 }
 0x6f2   : > { %v9067_v50 = vpop.f32.mrf.mxu0  ;;  %v8922_v58 = vrot.slane %v8920_v14, 4  ;;  %v8921_v56 = vsel %vm12962_vm6, %v12073_v57, %v8920_v14 }
 0x6f3   : > { %v10311_v60 = vadd.f32 %v16927_v55, %v10278_v35  ;;  %v9132_v37 = vadd.f32 %v9067_v50, %v16535_v51  ;;  %v9672_v51 = vrot.slane %v17066_v21, 5  ;;  %v8962_v46 = vunpack.c.l.b16 %v8921_v56 }
 0x6f4   : > { %v9813_v42 = vpop.f32.mrf.mxu2  ;;  %v9434_v19 = vpop.f32.mrf.mxu1  ;;  %v8924_v3 = vsel %vm12962_vm6, %v8922_v58, %v8923_v53 }
 0x6f5   : > { %v9880_v38 = vadd.f32 %v9813_v42, %v9498_v10  ;;  %v10343_v6 = vmax.f32 %v10311_v60, 0.0  ;;  %12089 = vmatmul.msk.bf16.gmra.mxu0 %vm658_vm3, %v8979_v54  ;;  %v9499_v35 = vadd.f32 %v9434_v19, %v9132_v37  ;;  %v8963_v21 = vunpack.c.l.b16 %v8924_v3  ;;  %v10756_v37 = vld [vmem:[%s12943_s18 + $0x3b4] sm:$0x3] }
 0x6f6   : > { %v12333_v42 = vrot.slane %v17104_v33, 10  ;;  %v9711_v19 = vunpack.c.l.b16 %v9670_v28 }
 0x6f7   : > { %v10246_v49 = vadd.f32 %v10179_v48, %v9880_v38  ;;  %10415 = vrot.lane.b32.xlu2 %v10343_v6, %s12812_s30  ;;  %12282 = vmatmul.msk.bf16.gmra.mxu1 %vm658_vm3, %v12449_v8  ;;  %v10184_v1 = vpop.f32.mrf.mxu3  ;;  %v9671_v48 = vrot.slane %v9669_v5, 4  ;;  %v10044_v8 = vrot.slane %v10042_v30, 4  ;;  %v8980_v57 = vpack.c.b16 %v8963_v21, %v8962_v46 }
 0x6f8   : > { %12315 = vmatmul.msk.bf16.gmra.mxu2 %vm658_vm3, %v9728_v52  ;;  %v10045_v52 = vrot.slane %v12203_v29, 6  ;;  %v10043_v5 = vsel %vm12962_vm6, %v12333_v42, %v10042_v30  ;;  %v12728_v30 = vld [vmem:[%s12943_s18 + $0x3ac] sm:$0xf]  ;;  %v8930_v29 = vrot.slane %v10756_v37, 6  ;;  %v9676_v46 = vrot.slane %v12200_v11, 5 }
 0x6f9   : > { %v10279_v18 = vmul.f32 %v16916_v22, %v10246_v49  ;;  %v9673_v16 = vsel %vm12946_vm4, %v9671_v48, %v9672_v51 }
 0x6fa   : > { %v9069_v27 = vpop.f32.mrf.mxu0  ;;  %v9712_v6 = vunpack.c.l.b16 %v9673_v16  ;;  %v10046_v58 = vsel %vm12962_vm6, %v10044_v8, %v10045_v52  ;;  %v9678_v52 = vrot.slane %v9676_v46, 4 }
 0x6fb   : > { %v10312_v54 = vadd.f32 %v16927_v55, %v10279_v18  ;;  %v9133_v36 = vadd.f32 %v9069_v27, %v16549_v13  ;;  %v10079_v27 = vunpack.c.l.b16 %v10043_v5  ;;  %v10080_v3 = vunpack.c.l.b16 %v10046_v58 }
 0x6fc   : > { %v9816_v50 = vpop.f32.mrf.mxu2  ;;  %v9436_v10 = vpop.f32.mrf.mxu1  ;;  %12349 = vmatmul.msk.bf16.gmra.mxu3 %vm658_vm3, %v10095_v9  ;;  %v9729_v18 = vpack.c.b16 %v9712_v6, %v9711_v19 }
 0x6fd   : > { %v9881_v14 = vadd.f32 %v9816_v50, %v9499_v35  ;;  %v10344_v60 = vmax.f32 %v10312_v54, 0.0  ;;  %v9500_v13 = vadd.f32 %v9436_v10, %v9133_v36  ;;  %v12074_v35 = vrot.slane %v12728_v30, 10  ;;  %v12199_v50 = vld [vmem:[%s12943_s18 + $0x59c] sm:$0xf] }
 0x6fe   : > { %v10096_v21 = vpack.c.b16 %v10080_v3, %v10079_v27  ;;  %v12300_v16 = vrot.slane %v12199_v50, 9 }
 0x6ff   : > { %v10247_v24 = vadd.f32 %v10182_v31, %v9881_v14  ;;  %10417 = vrot.lane.b32.xlu0 %v10344_v60, %s12812_s30  ;;  %v10187_v38 = vpop.f32.mrf.mxu3  ;;  %v12727_v31 = vld [vmem:[%s12943_s18 + $0x3b0] sm:$0xf] }
 0x700   : > { %v8927_v53 = vrot.slane %v12727_v31, 6  ;;  %v9677_v58 = vsel %vm12946_vm4, %v12300_v16, %v9676_v46 }
 0x701   : > { %v10280_v41 = vmul.f32 %v16916_v22, %v10247_v24  ;;  %v9713_v37 = vunpack.c.l.b16 %v9677_v58 }
 0x702   : > { %v9072_v59 = vpop.f32.mrf.mxu0  ;;  %v8929_v54 = vrot.slane %v8927_v53, 4  ;;  %v8928_v8 = vsel %vm12962_vm6, %v12074_v35, %v8927_v53 }
 0x703   : > { %v10313_v49 = vadd.f32 %v16927_v55, %v10280_v41  ;;  %v9134_v14 = vadd.f32 %v9072_v59, %v16565_v20  ;;  %v9679_v20 = vrot.slane %v17104_v33, 5  ;;  %v8964_v59 = vunpack.c.l.b16 %v8928_v8 }
 0x704   : > { %v9818_v9 = vpop.f32.mrf.mxu2  ;;  %v9439_v48 = vpop.f32.mrf.mxu1 }
 0x705   : > { %v9882_v56 = vadd.f32 %v9818_v9, %v9500_v13  ;;  %v10345_v51 = vmax.f32 %v10313_v49, 0.0  ;;  %12090 = vmatmul.msk.bf16.gmra.mxu0 %vm658_vm3, %v8980_v57  ;;  %v9501_v24 = vadd.f32 %v9439_v48, %v9134_v14  ;;  %v9680_v12 = vsel %vm12946_vm4, %v9678_v52, %v9679_v20  ;;  %v12451_v48 = vld [vmem:[%s12943_s18 + $0x594] sm:$0xff]  ;;  %s12452_s18 = sshll.u32 %s12799_s24, 8 }
 0x706   : > { %v9714_v11 = vunpack.c.l.b16 %v9680_v12  ;;  %s10543_s14 = scalar_lea.hbm %s17338_s6, %s12452_s18 }
 0x707   : > { %v10248_v28 = vadd.f32 %v10184_v1, %v9882_v56  ;;  %10419 = vrot.lane.b32.xlu1 %v10345_v51, %s12812_s30  ;;  %12283 = vmatmul.msk.bf16.gmra.mxu1 %vm658_vm3, %v12450_v25  ;;  %v10189_v10 = vpop.f32.mrf.mxu3  ;;  %v8931_v1 = vsel %vm12962_vm6, %v8929_v54, %v8930_v29  ;;  %s10546_s16 = sshll.u32 %s10543_s14, 4  ;;  %s10547_s16 = int_to_ptr.hbm [resolvable:$true] %s10546_s16 }
 0x708   : > { %12316 = vmatmul.msk.bf16.gmra.mxu2 %vm658_vm3, %v9729_v18  ;;  %v8965_v5 = vunpack.c.l.b16 %v8931_v1  ;;  %s12743_s20 = sshra.s32 %s10547_s16, 4  ;;  %s12744_s20 = int_to_ptr.hbm [resolvable:$true] %s12743_s20 }
 0x709   : > { %v10281_v60 = vmul.f32 %v16916_v22, %v10248_v28  ;;  %s12745_s27 = scalar_lea.hbm %s12744_s20, 256  ;;  %p12750_p1 = scmp.lt.s32.totalorder %s12744_s20, %s17338_s6 }
 0x70a   : > { %v9074_v42 = vpop.f32.mrf.mxu0  ;;  %v8981_v49 = vpack.c.b16 %v8965_v5, %v8964_v59  ;;  %p12746_p12 = scmp.ne.s32.totalorder %s12744_s20, %s12745_s27 }
 0x70b   : > { %v10314_v36 = vadd.f32 %v16927_v55, %v10281_v60  ;;  %v9135_v33 = vadd.f32 %v9074_v42, %v16587_v17  ;;  %v9730_v17 = vpack.c.b16 %v9714_v11, %v9713_v37 }
 0x70c   : > { %v9821_v19 = vpop.f32.mrf.mxu2  ;;  %v9441_v41 = vpop.f32.mrf.mxu1  ;;  %12350 = vmatmul.msk.bf16.gmra.mxu3 %vm658_vm3, %v10096_v21  ;;  %p12747_p13 = pnand %p12746_p12, %p12889_p4 }
 0x70d   : > { %v9883_v6 = vadd.f32 %v9821_v19, %v9501_v24  ;;  %v10346_v57 = vmax.f32 %v10314_v36, 0.0  ;;  %v9502_v25 = vadd.f32 %v9441_v41, %v9135_v33 }
 0x70e   : > { %p12748_p0 = pneg %p12747_p13 }
 0x70f   : > { %v10249_v31 = vadd.f32 %v10187_v38, %v9883_v6  ;;  %10421 = vrot.lane.b32.xlu2 %v10346_v57, %s12812_s30  ;;  %v10192_v53 = vpop.f32.mrf.mxu3 }
 0x711   : > { %v10282_v13 = vmul.f32 %v16916_v22, %v10249_v31 }
 0x712   : > { %v9077_v9 = vpop.f32.mrf.mxu0 }
 0x713   : > { %v10315_v18 = vadd.f32 %v16927_v55, %v10282_v13  ;;  %v9136_v3 = vadd.f32 %v9077_v9, %v16605_v40 }
 0x714   : > { %v9823_v56 = vpop.f32.mrf.mxu2  ;;  %v9444_v15 = vpop.f32.mrf.mxu1 }
 0x715   : > { %v9884_v51 = vadd.f32 %v9823_v56, %v9502_v25  ;;  %v10347_v27 = vmax.f32 %v10315_v18, 0.0  ;;  %12091 = vmatmul.msk.bf16.gmra.mxu0 %vm658_vm3, %v8981_v49  ;;  %v9503_v29 = vadd.f32 %v9444_v15, %v9136_v3 }
 0x717   : > { %v10250_v38 = vadd.f32 %v10189_v10, %v9884_v51  ;;  %10423 = vrot.lane.b32.xlu0 %v10347_v27, %s12812_s30  ;;  %12284 = vmatmul.msk.bf16.gmra.mxu1 %vm658_vm3, %v12451_v48  ;;  %v10194_v30 = vpop.f32.mrf.mxu3 }
 0x718   : > { %12317 = vmatmul.msk.bf16.gmra.mxu2 %vm658_vm3, %v9730_v17 }
 0x719   : > { %v10283_v35 = vmul.f32 %v16916_v22, %v10250_v38 }
 0x71a   : > { %v9079_v54 = vpop.f32.mrf.mxu0 }
 0x71b   : > { %v10316_v50 = vadd.f32 %v16927_v55, %v10283_v35  ;;  %v9137_v40 = vadd.f32 %v9079_v54, %v16622_v47 }
 0x71c   : > { %v9826_v46 = vpop.f32.mrf.mxu2  ;;  %v9446_v14 = vpop.f32.mrf.mxu1 }
 0x71d   : > { %v9885_v28 = vadd.f32 %v9826_v46, %v9503_v29  ;;  %v10348_v10 = vmax.f32 %v10316_v50, 0.0  ;;  %v9504_v1 = vadd.f32 %v9446_v14, %v9137_v40 }
 0x71f   : > { %v10251_v60 = vadd.f32 %v10192_v53, %v9885_v28  ;;  %10425 = vrot.lane.b32.xlu1 %v10348_v10, %s12812_s30  ;;  %v10197_v21 = vpop.f32.mrf.mxu3 }
 0x721   : > { %v10284_v16 = vmul.f32 %v16916_v22, %v10251_v60  ;;  %v10404_v42 = vpop.permute.xlu2 %10403 }
 0x722   : > { %10498 = vst.msk [vmem:[%s13452_s19 + $0x10] sm:$0xff] %vm10495_vm14, %v10404_v42  ;;  %v9082_v8 = vpop.f32.mrf.mxu0 }
 0x723   : > { %v10317_v52 = vadd.f32 %v16927_v55, %v10284_v16  ;;  %v9138_v47 = vadd.f32 %v9082_v8, %v16640_v2 }
 0x724   : > { %v9828_v20 = vpop.f32.mrf.mxu2  ;;  %v9449_v36 = vpop.f32.mrf.mxu1 }
 0x725   : > { %v9886_v24 = vadd.f32 %v9828_v20, %v9504_v1  ;;  %v10349_v19 = vmax.f32 %v10317_v52, 0.0  ;;  %v9505_v58 = vadd.f32 %v9449_v36, %v9138_v47 }
 0x727   : > { %v10252_v6 = vadd.f32 %v10194_v30, %v9886_v24  ;;  %10427 = vrot.lane.b32.xlu2 %v10349_v19, %s12812_s30  ;;  %v10199_v41 = vpop.f32.mrf.mxu3 }
 0x729   : > { %v10285_v57 = vmul.f32 %v16916_v22, %v10252_v6  ;;  %v10400_v59 = vpop.permute.xlu0 %10399 }
 0x72a   : > { %10496 = vst.msk [vmem:[%s13452_s19] sm:$0xff] %vm10495_vm14, %v10400_v59  ;;  %v9084_v5 = vpop.f32.mrf.mxu0 }
 0x72b   : > { %v10318_v12 = vadd.f32 %v16927_v55, %v10285_v57  ;;  %v9139_v2 = vadd.f32 %v9084_v5, %v16657_v32 }
 0x72c   : > { %v9831_v31 = vpop.f32.mrf.mxu2  ;;  %v9451_v53 = vpop.f32.mrf.mxu1 }
 0x72d   : > { %v9887_v33 = vadd.f32 %v9831_v31, %v9505_v58  ;;  %v10350_v13 = vmax.f32 %v10318_v12, 0.0  ;;  %v9506_v18 = vadd.f32 %v9451_v53, %v9139_v2 }
 0x72f   : > { %v10253_v49 = vadd.f32 %v10197_v21, %v9887_v33  ;;  %10429 = vrot.lane.b32.xlu0 %v10350_v13, %s12812_s30  ;;  %v10202_v37 = vpop.f32.mrf.mxu3 }
 0x731   : > { %v10286_v11 = vmul.f32 %v16916_v22, %v10253_v49  ;;  %v10402_v9 = vpop.permute.xlu1 %10401 }
 0x732   : > { %10497 = vst.msk [vmem:[%s13452_s19 + $0x8] sm:$0xff] %vm10495_vm14, %v10402_v9  ;;  %v9087_v25 = vpop.f32.mrf.mxu0 }
 0x733   : > { %v10319_v56 = vadd.f32 %v16927_v55, %v10286_v11  ;;  %v9140_v32 = vadd.f32 %v9087_v25, %v16675_v23 }
 0x734   : > { %v9833_v48 = vpop.f32.mrf.mxu2  ;;  %v9454_v15 = vpop.f32.mrf.mxu1 }
 0x735   : > { %v9888_v51 = vadd.f32 %v9833_v48, %v9506_v18  ;;  %v10351_v27 = vmax.f32 %v10319_v56, 0.0  ;;  %v9507_v54 = vadd.f32 %v9454_v15, %v9140_v32 }
 0x737   : > { %v10254_v17 = vadd.f32 %v10199_v41, %v9888_v51  ;;  %10431 = vrot.lane.b32.xlu1 %v10351_v27, %s12812_s30  ;;  %v10204_v38 = vpop.f32.mrf.mxu3 }
 0x739   : > { %v10287_v3 = vmul.f32 %v16916_v22, %v10254_v17  ;;  %v10410_v30 = vpop.permute.xlu2 %10409 }
 0x73a   : > { %10501 = vst.msk [vmem:[%s13452_s19 + $0x28] sm:$0xff] %vm10495_vm14, %v10410_v30  ;;  %v9089_v35 = vpop.f32.mrf.mxu0 }
 0x73b   : > { %v10320_v29 = vadd.f32 %v16927_v55, %v10287_v3  ;;  %v9141_v23 = vadd.f32 %v9089_v35, %v16692_v43 }
 0x73c   : > { %v9836_v50 = vpop.f32.mrf.mxu2  ;;  %v9456_v28 = vpop.f32.mrf.mxu1 }
 0x73d   : > { %v9889_v46 = vadd.f32 %v9836_v50, %v9507_v54  ;;  %v10352_v14 = vmax.f32 %v10320_v29, 0.0  ;;  %v9508_v42 = vadd.f32 %v9456_v28, %v9141_v23 }
 0x73f   : > { %v10255_v10 = vadd.f32 %v10202_v37, %v9889_v46  ;;  %10433 = vrot.lane.b32.xlu2 %v10352_v14, %s12812_s30  ;;  %v10207_v60 = vpop.f32.mrf.mxu3 }
 0x741   : > { %v10288_v40 = vmul.f32 %v16916_v22, %v10255_v10  ;;  %v10406_v21 = vpop.permute.xlu0 %10405 }
 0x742   : > { %10499 = vst.msk [vmem:[%s13452_s19 + $0x18] sm:$0xff] %vm10495_vm14, %v10406_v21  ;;  %v9092_v16 = vpop.f32.mrf.mxu0 }
 0x743   : > { %v10321_v8 = vadd.f32 %v16927_v55, %v10288_v40  ;;  %v9142_v43 = vadd.f32 %v9092_v16, %v16710_v61 }
 0x744   : > { %v9838_v1 = vpop.f32.mrf.mxu2  ;;  %v9459_v20 = vpop.f32.mrf.mxu1 }
 0x745   : > { %v9890_v52 = vadd.f32 %v9838_v1, %v9508_v42  ;;  %v10353_v24 = vmax.f32 %v10321_v8, 0.0  ;;  %v9509_v57 = vadd.f32 %v9459_v20, %v9142_v43 }
 0x747   : > { %v10256_v36 = vadd.f32 %v10204_v38, %v9890_v52  ;;  %10435 = vrot.lane.b32.xlu0 %v10353_v24, %s12812_s30  ;;  %v10209_v19 = vpop.f32.mrf.mxu3 }
 0x749   : > { %v10289_v6 = vmul.f32 %v16916_v22, %v10256_v36  ;;  %v10408_v47 = vpop.permute.xlu1 %10407 }
 0x74a   : > { %10500 = vst.msk [vmem:[%s13452_s19 + $0x20] sm:$0xff] %vm10495_vm14, %v10408_v47  ;;  %v9094_v41 = vpop.f32.mrf.mxu0 }
 0x74b   : > { %v10322_v59 = vadd.f32 %v16927_v55, %v10289_v6  ;;  %v9143_v61 = vadd.f32 %v9094_v41, %v16727_v4 }
 0x74c   : > { %v9841_v5 = vpop.f32.mrf.mxu2  ;;  %v9461_v12 = vpop.f32.mrf.mxu1 }
 0x74d   : > { %v9891_v58 = vadd.f32 %v9841_v5, %v9509_v57  ;;  %v10354_v31 = vmax.f32 %v10322_v59, 0.0  ;;  %v9510_v37 = vadd.f32 %v9461_v12, %v9143_v61 }
 0x74f   : > { %v10257_v33 = vadd.f32 %v10207_v60, %v9891_v58  ;;  %10437 = vrot.lane.b32.xlu1 %v10354_v31, %s12812_s30  ;;  %v10212_v53 = vpop.f32.mrf.mxu3 }
 0x751   : > { %v10290_v13 = vmul.f32 %v16916_v22, %v10257_v33  ;;  %v10416_v49 = vpop.permute.xlu2 %10415 }
 0x752   : > { %10504 = vst.msk [vmem:[%s13452_s19 + $0x40] sm:$0xff] %vm10495_vm14, %v10416_v49  ;;  %v9097_v2 = vpop.f32.mrf.mxu0 }
 0x753   : > { %v10323_v11 = vadd.f32 %v16927_v55, %v10290_v13  ;;  %v9144_v4 = vadd.f32 %v9097_v2, %v16745_v39 }
 0x754   : > { %v9843_v9 = vpop.f32.mrf.mxu2  ;;  %v9464_v18 = vpop.f32.mrf.mxu1 }
 0x755   : > { %v9892_v25 = vadd.f32 %v9843_v9, %v9510_v37  ;;  %v10355_v56 = vmax.f32 %v10323_v11, 0.0  ;;  %v9511_v32 = vadd.f32 %v9464_v18, %v9144_v4 }
 0x757   : > { %v10258_v48 = vadd.f32 %v10209_v19, %v9892_v25  ;;  %10439 = vrot.lane.b32.xlu2 %v10355_v56, %s12812_s30  ;;  %v10214_v51 = vpop.f32.mrf.mxu3 }
 0x759   : > { %v10291_v15 = vmul.f32 %v16916_v22, %v10258_v48  ;;  %v10412_v27 = vpop.permute.xlu0 %10411 }
 0x75a   : > { %10502 = vst.msk [vmem:[%s13452_s19 + $0x30] sm:$0xff] %vm10495_vm14, %v10412_v27  ;;  %v9099_v17 = vpop.f32.mrf.mxu0 }
 0x75b   : > { %v10324_v38 = vadd.f32 %v16927_v55, %v10291_v15  ;;  %v9145_v39 = vadd.f32 %v9099_v17, %v16762_v44 }
 0x75c   : > { %v9846_v3 = vpop.f32.mrf.mxu2  ;;  %v9466_v35 = vpop.f32.mrf.mxu1 }
 0x75d   : > { %v9893_v30 = vadd.f32 %v9846_v3, %v9511_v32  ;;  %v10356_v54 = vmax.f32 %v10324_v38, 0.0  ;;  %v9512_v10 = vadd.f32 %v9466_v35, %v9145_v39 }
 0x75f   : > { %v10259_v29 = vadd.f32 %v10212_v53, %v9893_v30  ;;  %10441 = vrot.lane.b32.xlu0 %v10356_v54, %s12812_s30  ;;  %v10217_v50 = vpop.f32.mrf.mxu3 }
 0x761   : > { %v10292_v46 = vmul.f32 %v16916_v22, %v10259_v29  ;;  %v10414_v28 = vpop.permute.xlu1 %10413 }
 0x762   : > { %10503 = vst.msk [vmem:[%s13452_s19 + $0x38] sm:$0xff] %vm10495_vm14, %v10414_v28  ;;  %v9102_v14 = vpop.f32.mrf.mxu0 }
 0x763   : > { %v10325_v23 = vadd.f32 %v16927_v55, %v10292_v46  ;;  %v9146_v44 = vadd.f32 %v9102_v14, %v16780_v63 }
 0x764   : > { %v9848_v60 = vpop.f32.mrf.mxu2  ;;  %v9469_v21 = vpop.f32.mrf.mxu1 }
 0x765   : > { %v9894_v40 = vadd.f32 %v9848_v60, %v9512_v10  ;;  %v10357_v16 = vmax.f32 %v10325_v23, 0.0  ;;  %v9513_v24 = vadd.f32 %v9469_v21, %v9146_v44 }
 0x767   : > { %v10260_v42 = vadd.f32 %v10214_v51, %v9894_v40  ;;  %10443 = vrot.lane.b32.xlu1 %v10357_v16, %s12812_s30  ;;  %v10219_v52 = vpop.f32.mrf.mxu3 }
 0x769   : > { %v10293_v8 = vmul.f32 %v16916_v22, %v10260_v42  ;;  %v10422_v1 = vpop.permute.xlu2 %10421 }
 0x76a   : > { %10507 = vst.msk [vmem:[%s13452_s19 + $0x58] sm:$0xff] %vm10495_vm14, %v10422_v1  ;;  %v9104_v20 = vpop.f32.mrf.mxu0 }
 0x76b   : > { %v10326_v36 = vadd.f32 %v16927_v55, %v10293_v8  ;;  %v9147_v63 = vadd.f32 %v9104_v20, %v16797_v7 }
 0x76c   : > { %v9851_v43 = vpop.f32.mrf.mxu2  ;;  %v9471_v6 = vpop.f32.mrf.mxu1 }
 0x76d   : > { %v9895_v19 = vadd.f32 %v9851_v43, %v9513_v24  ;;  %v10358_v47 = vmax.f32 %v10326_v36, 0.0  ;;  %v9514_v58 = vadd.f32 %v9471_v6, %v9147_v63 }
 0x76f   : > { %v10261_v41 = vadd.f32 %v10217_v50, %v9895_v19  ;;  %10445 = vrot.lane.b32.xlu2 %v10358_v47, %s12812_s30  ;;  %v10222_v12 = vpop.f32.mrf.mxu3 }
 0x771   : > { %v10294_v57 = vmul.f32 %v16916_v22, %v10261_v41  ;;  %v10418_v59 = vpop.permute.xlu0 %10417 }
 0x772   : > { %10505 = vst.msk [vmem:[%s13452_s19 + $0x48] sm:$0xff] %vm10495_vm14, %v10418_v59  ;;  %v9107_v5 = vpop.f32.mrf.mxu0 }
 0x773   : > { %v10327_v31 = vadd.f32 %v16927_v55, %v10294_v57  ;;  %v9148_v7 = vadd.f32 %v9107_v5, %v16815_v34 }
 0x774   : > { %v9853_v33 = vpop.f32.mrf.mxu2  ;;  %v9474_v53 = vpop.f32.mrf.mxu1 }
 0x775   : > { %v9896_v61 = vadd.f32 %v9853_v33, %v9514_v58  ;;  %v10359_v13 = vmax.f32 %v10327_v31, 0.0  ;;  %v9515_v9 = vadd.f32 %v9474_v53, %v9148_v7  ;;  %v17446_v53 = vld [vmem:[#allocation23_spill] sm:$0xff] }
 0x777   : > { %v10262_v49 = vadd.f32 %v10219_v52, %v9896_v61  ;;  %10447 = vrot.lane.b32.xlu0 %v10359_v13, %s12812_s30  ;;  %v10224_v4 = vpop.f32.mrf.mxu3 }
 0x779   : > { %v10295_v2 = vmul.f32 %v16916_v22, %v10262_v49  ;;  %v10420_v37 = vpop.permute.xlu1 %10419 }
 0x77a   : > { %10506 = vst.msk [vmem:[%s13452_s19 + $0x50] sm:$0xff] %vm10495_vm14, %v10420_v37  ;;  %v9109_v11 = vpop.f32.mrf.mxu0 }
 0x77b   : > { %v10328_v25 = vadd.f32 %v16927_v55, %v10295_v2  ;;  %v9149_v34 = vadd.f32 %v9109_v11, %v16832_v0 }
 0x77c   : > { %v9856_v18 = vpop.f32.mrf.mxu2  ;;  %v9476_v48 = vpop.f32.mrf.mxu1 }
 0x77d   : > { %v9897_v56 = vadd.f32 %v9856_v18, %v9515_v9  ;;  %v10360_v51 = vmax.f32 %v10328_v25, 0.0  ;;  %v9516_v38 = vadd.f32 %v9476_v48, %v9149_v34 }
 0x77f   : > { %v10263_v15 = vadd.f32 %v10222_v12, %v9897_v56  ;;  %10449 = vrot.lane.b32.xlu1 %v10360_v51, %s12812_s30  ;;  %v10227_v0 = vpop.f32.mrf.mxu3 }
 0x781   : > { %v10296_v27 = vmul.f32 %v16916_v22, %v10263_v15  ;;  %v10428_v17 = vpop.permute.xlu2 %10427 }
 0x782   : > { %10510 = vst.msk [vmem:[%s13452_s19 + $0x70] sm:$0xff] %vm10495_vm14, %v10428_v17  ;;  %v9112_v32 = vpop.f32.mrf.mxu0 }
 0x783   : > { %v10329_v3 = vadd.f32 %v16927_v55, %v10296_v27  ;;  %v9150_v50 = vadd.f32 %v9112_v32, %v16850_v45 }
 0x784   : > { %v9858_v30 = vpop.f32.mrf.mxu2  ;;  %v9479_v54 = vpop.f32.mrf.mxu1 }
 0x785   : > { %v9898_v35 = vadd.f32 %v9858_v30, %v9516_v38  ;;  %v10361_v29 = vmax.f32 %v10329_v3, 0.0  ;;  %v9517_v10 = vadd.f32 %v9479_v54, %v9150_v50 }
 0x787   : > { %v10264_v39 = vadd.f32 %v10224_v4, %v9898_v35  ;;  %10451 = vrot.lane.b32.xlu2 %v10361_v29, %s12812_s30  ;;  %v10229_v8 = vpop.f32.mrf.mxu3 }
 0x789   : > { %v10297_v46 = vmul.f32 %v16916_v22, %v10264_v39  ;;  %v10424_v28 = vpop.permute.xlu0 %10423 }
 0x78a   : > { %10508 = vst.msk [vmem:[%s13452_s19 + $0x60] sm:$0xff] %vm10495_vm14, %v10424_v28  ;;  %v9114_v14 = vpop.f32.mrf.mxu0 }
 0x78b   : > { %v10330_v23 = vadd.f32 %v16927_v55, %v10297_v46  ;;  %v9151_v45 = vadd.f32 %v9114_v14, %v16867_v62 }
 0x78c   : > { %v9861_v60 = vpop.f32.mrf.mxu2  ;;  %v9481_v16 = vpop.f32.mrf.mxu1 }
 0x78d   : > { %v9899_v40 = vadd.f32 %v9861_v60, %v9517_v10  ;;  %v10362_v21 = vmax.f32 %v10330_v23, 0.0  ;;  %v9518_v20 = vadd.f32 %v9481_v16, %v9151_v45 }
 0x78f   : > { %v10265_v42 = vadd.f32 %v10227_v0, %v9899_v40  ;;  %10453 = vrot.lane.b32.xlu0 %v10362_v21, %s12812_s30  ;;  %v10232_v59 = vpop.f32.mrf.mxu3 }
 0x791   : > { %v10298_v44 = vmul.f32 %v16916_v22, %v10265_v42  ;;  %v10426_v1 = vpop.permute.xlu1 %10425 }
 0x792   : > { %10509 = vst.msk [vmem:[%s13452_s19 + $0x68] sm:$0xff] %vm10495_vm14, %v10426_v1  ;;  %v9117_v52 = vpop.f32.mrf.mxu0 }
 0x793   : > { %v10331_v24 = vadd.f32 %v16927_v55, %v10298_v44  ;;  %v9152_v47 = vadd.f32 %v9117_v52, %v16885_v26 }
 0x794   : > { %v9863_v36 = vpop.f32.mrf.mxu2  ;;  %v9484_v62 = vpop.f32.mrf.mxu1 }
 0x795   : > { %v9900_v43 = vadd.f32 %v9863_v36, %v9518_v20  ;;  %v10363_v19 = vmax.f32 %v10331_v24, 0.0  ;;  %v9519_v57 = vadd.f32 %v9484_v62, %v9152_v47 }
 0x797   : > { %v10266_v6 = vadd.f32 %v10229_v8, %v9900_v43  ;;  %10455 = vrot.lane.b32.xlu1 %v10363_v19, %s12812_s30  ;;  %v10234_v18 = vpop.f32.mrf.mxu3 }
 0x799   : > { %v10299_v41 = vmul.f32 %v16916_v22, %v10266_v6  ;;  %v10434_v63 = vpop.permute.xlu2 %10433 }
 0x79a   : > { %10513 = vst.msk [vmem:[%s13452_s19 + $0x88] sm:$0xff] %vm10495_vm14, %v10434_v63  ;;  %v9119_v12 = vpop.f32.mrf.mxu0 }
 0x79b   : > { %v10332_v5 = vadd.f32 %v16927_v55, %v10299_v41  ;;  %v9153_v26 = vadd.f32 %v9119_v12, %v17446_v53 }
 0x79c   : > { %v9866_v58 = vpop.f32.mrf.mxu2  ;;  %v9486_v7 = vpop.f32.mrf.mxu1 }
 0x79d   : > { %v9901_v31 = vadd.f32 %v9866_v58, %v9519_v57  ;;  %v10364_v33 = vmax.f32 %v10332_v5, 0.0  ;;  %v9520_v2 = vadd.f32 %v9486_v7, %v9153_v26 }
 0x79f   : > { %v10267_v61 = vadd.f32 %v10232_v59, %v9901_v31  ;;  %10457 = vrot.lane.b32.xlu2 %v10364_v33, %s12812_s30 }
 0x7a1   : > { %v10300_v13 = vmul.f32 %v16916_v22, %v10267_v61  ;;  %v10430_v49 = vpop.permute.xlu0 %10429 }
 0x7a2   : > { %10511 = vst.msk [vmem:[%s13452_s19 + $0x78] sm:$0xff] %vm10495_vm14, %v10430_v49 }
 0x7a3   : > { %v10333_v37 = vadd.f32 %v16927_v55, %v10300_v13 }
 0x7a4   : > { %v9868_v11 = vpop.f32.mrf.mxu2 }
 0x7a5   : > { %v9902_v9 = vadd.f32 %v9868_v11, %v9520_v2  ;;  %v10365_v25 = vmax.f32 %v10333_v37, 0.0 }
 0x7a7   : > { %v10268_v56 = vadd.f32 %v10234_v18, %v9902_v9  ;;  %10459 = vrot.lane.b32.xlu0 %v10365_v25, %s12812_s30 }
 0x7a9   : > { %v10301_v48 = vmul.f32 %v16916_v22, %v10268_v56  ;;  %v10432_v4 = vpop.permute.xlu1 %10431 }
 0x7aa   : > { %10512 = vst.msk [vmem:[%s13452_s19 + $0x80] sm:$0xff] %vm10495_vm14, %v10432_v4 }
 0x7ab   : > { %v10334_v51 = vadd.f32 %v16927_v55, %v10301_v48 }
 0x7ad   : > { %v10366_v15 = vmax.f32 %v10334_v51, 0.0 }
 0x7af   : > { %10461 = vrot.lane.b32.xlu1 %v10366_v15, %s12812_s30  ;;  %s12749_s30 = scalar_lea.hbm %s17338_s6, 512 }
 0x7b0   : > { %p12751_p2 = scmp.lt.s32.totalorder %s12749_s30, %s12745_s27 }
 0x7b1   : > { %v10440_v34 = vpop.permute.xlu2 %10439 }
 0x7b2   : > { %10516 = vst.msk [vmem:[%s13452_s19 + $0xa0] sm:$0xff] %vm10495_vm14, %v10440_v34  ;;  %p12752_p3 = por %p12751_p2, %p12750_p1 }
 0x7b4   : > { %p12753_p5 = pnand %p12752_p3, %p12748_p0 }
 0x7b9   : > { %v10436_v27 = vpop.permute.xlu0 %10435 }
 0x7ba   : > { %10514 = vst.msk [vmem:[%s13452_s19 + $0x90] sm:$0xff] %vm10495_vm14, %v10436_v27 }
 0x7c1   : > { %v10438_v22 = vpop.permute.xlu1 %10437 }
 0x7c2   : > { %10515 = vst.msk [vmem:[%s13452_s19 + $0x98] sm:$0xff] %vm10495_vm14, %v10438_v22 }
 0x7c9   : > { %v10446_v17 = vpop.permute.xlu2 %10445 }
 0x7ca   : > { %10519 = vst.msk [vmem:[%s13452_s19 + $0xb8] sm:$0xff] %vm10495_vm14, %v10446_v17 }
 0x7d1   : > { %v10442_v55 = vpop.permute.xlu0 %10441 }
 0x7d2   : > { %10517 = vst.msk [vmem:[%s13452_s19 + $0xa8] sm:$0xff] %vm10495_vm14, %v10442_v55 }
 0x7d9   : > { %v10444_v32 = vpop.permute.xlu1 %10443 }
 0x7da   : > { %10518 = vst.msk [vmem:[%s13452_s19 + $0xb0] sm:$0xff] %vm10495_vm14, %v10444_v32 }
 0x7e1   : > { %v10452_v38 = vpop.permute.xlu2 %10451 }
 0x7e2   : > { %10522 = vst.msk [vmem:[%s13452_s19 + $0xd0] sm:$0xff] %vm10495_vm14, %v10452_v38 }
 0x7e9   : > { %v10448_v3 = vpop.permute.xlu0 %10447 }
 0x7ea   : > { %10520 = vst.msk [vmem:[%s13452_s19 + $0xc0] sm:$0xff] %vm10495_vm14, %v10448_v3 }
 0x7f1   : > { %v10450_v30 = vpop.permute.xlu1 %10449 }
 0x7f2   : > { %10521 = vst.msk [vmem:[%s13452_s19 + $0xc8] sm:$0xff] %vm10495_vm14, %v10450_v30 }
 0x7f9   : > { %v10458_v35 = vpop.permute.xlu2 %10457 }
 0x7fa   : > { %10525 = vst.msk [vmem:[%s13452_s19 + $0xe8] sm:$0xff] %vm10495_vm14, %v10458_v35 }
 0x801   : > { %v10454_v54 = vpop.permute.xlu0 %10453 }
 0x802   : > { %10523 = vst.msk [vmem:[%s13452_s19 + $0xd8] sm:$0xff] %vm10495_vm14, %v10454_v54 }
 0x809   : > { %v10456_v29 = vpop.permute.xlu1 %10455 }
 0x80a   : > { %10524 = vst.msk [vmem:[%s13452_s19 + $0xe0] sm:$0xff] %vm10495_vm14, %v10456_v29 }
 0x819   : > { %v10460_v39 = vpop.permute.xlu0 %10459 }
 0x81a   : > { %10526 = vst.msk [vmem:[%s13452_s19 + $0xf0] sm:$0xff] %vm10495_vm14, %v10460_v39 }
 0x821   : > { %v10462_v50 = vpop.permute.xlu1 %10461 }
 0x822   : > { %10527 = vst.msk [vmem:[%s13452_s19 + $0xf8] sm:$0xff] %vm10495_vm14, %v10462_v50 }
 0x823   : > { %12756 = shalt.err (!%p12753_p5)
}
 0x824   : > { %s12813_s13 = smov 128  }
 0x825   : > { %12454 = dma.vmem_to_hbm [thread:$0]  (%p12889_p4), %s10545_s15, 4096, %s10547_s16, %s10529_s17, %s12813_s13, %s12813_s13, %s12809_s12  }
 0x826 PF: > { %p12460_p6 = scmp.ge.s32.totalorder %s12807_s26, 2  ;;  %s10561_s19 = sand.u32 1, %s12787_s21  }
 0x827   : > { %s10562_s11 = scalar_lea.sflag [#allocation3], %s10561_s19 }
 0x828   : > { %p12457_p7 = pnand %p12460_p6, %p12896_p8 }
 0x82a   : > { %p12458_p9 = pneg %p12457_p7 }
 0x82c   : > { %12782 = dma.done.wait (%p12458_p9), %s10562_s11, 4096  }
 0x82d   : > { %12784 = vsyncadd (%p12458_p9), %s10562_s11, 4294963200  ;;  %s19_s26 = sadd.s32 1, %s12807_s26   ;;  %s17447_s21 = smov %s12791_s22 }
 0x82e   : > { %p16_p10 = scmp.ge.s32.totalorder %s19_s26, 4   ;;  %s17448_s22 = smov %s12795_s23 }
 0x82f   : > { %s17449_s23 = smov %s12902_s10  ;;  %s17450_s24 = smov %s12803_s25 }
 0x830   : > { %s17451_s25 = smov %s17453_s29  ;;  %18 = sbr.rel (!%p16_p10) target bundleno = 4 (0x4), region = 114 }
 0x835   :  { %10568 = vsyncpa [#allocation3], 1 }
 0x836   :  { %10570 = vsyncpa [#allocation3 + $0x1], 1 }

</bundles_post_ra>
